<compile_context>
chip_gen: v7x
topology: tpu7x:2x2x1
jax: 0.10.0
libtpu: 0.0.40
codegen_flags: <defaults>
</compile_context>

<pallas_src>
import functools

import jax
import jax.numpy as jnp
from jax.experimental import pallas as pl
from jax.experimental.pallas import tpu as pltpu


def _vmem_limit_bytes():
    # Generation-aware scoped-VMEM limit (v5e/v6e: 128 MiB phys, v7x: 64 MiB).
    try:
        cap = pltpu.get_tpu_info().vmem_capacity_bytes
    except Exception:
        cap = 64 * 1024 * 1024
    return int(min(cap * 3 // 4, 96 * 1024 * 1024))


VMEM_LIMIT = _vmem_limit_bytes()


# --------------------------------------------------------------------------
# Conv3x3 (pad=1) + folded BatchNorm + ReLU — single deep-K MXU matmul.
# --------------------------------------------------------------------------
def _conv_bn_relu_kernel(xp_ref, w_ref, scale_ref, bias_ref, o_ref,
                         *, th, width, cin):
    # xp_ref : (1, 1, th+2, width+2, cin)  bf16 padded row-slab (with halo)
    # w_ref  : (9*cin, cout)               bf16, tap-major / cin-minor along K
    # scale/bias : (1, cout)               f32 (conv bias + eval-BN folded)
    # o_ref  : (1, th, width, cout)        bf16
    xs = xp_ref[0, 0]                                    # (th+2, width+2, cin)
    taps = []
    for dy in range(3):
        for dx in range(3):
            taps.append(xs[dy:dy + th, dx:dx + width, :])   # (th, width, cin)
    patches = jnp.concatenate(taps, axis=-1)             # (th, width, 9*cin)
    patches = patches.reshape(th * width, 9 * cin)       # (M, K)
    acc = jnp.dot(patches, w_ref[...],
                  preferred_element_type=jnp.float32)    # (M, cout) f32
    y = acc * scale_ref[...] + bias_ref[...]
    y = jnp.maximum(y, 0.0)
    o_ref[0] = y.reshape(th, width, o_ref.shape[-1]).astype(o_ref.dtype)


def _pick_row_tile(h, w, target_rows=4096):
    """Largest divisor of h keeping the matmul M-dim (th*w) near target."""
    if h * w <= target_rows:
        return h
    cap = max(1, target_rows // max(w, 1))
    th = 1
    for d in range(1, h + 1):
        if h % d == 0 and d <= cap:
            th = d
    return th


def conv3x3_bn_relu(x_nhwc, w_hwio, scale, bias):
    n, h, w, cin = x_nhwc.shape
    cout = w_hwio.shape[-1]
    xp = jnp.pad(x_nhwc, ((0, 0), (1, 1), (1, 1), (0, 0))).astype(jnp.bfloat16)

    th = _pick_row_tile(h, w)
    nrt = h // th
    if nrt == 1:
        xt = xp[:, None]                                  # (n, 1, h+2, w+2, cin)
    else:
        # Overlapping row slabs: duplicates only the 2 halo rows per tile.
        xt = jnp.stack([xp[:, r * th:r * th + th + 2] for r in range(nrt)],
                       axis=1)                            # (n, nrt, th+2, w+2, cin)

    # Tap-major weight layout matches the in-kernel channel concat.
    # NOTE: first layer has cin=3 (poor lane fill) but K=27 after the merge;
    # it is a tiny layer and deliberately shares this generic path.
    w2 = w_hwio.reshape(9 * cin, cout).astype(jnp.bfloat16)
    scale2 = scale.reshape(1, cout).astype(jnp.float32)
    bias2 = bias.reshape(1, cout).astype(jnp.float32)

    kern = functools.partial(_conv_bn_relu_kernel, th=th, width=w, cin=cin)
    out = pl.pallas_call(
        kern,
        out_shape=jax.ShapeDtypeStruct((n, h, w, cout), jnp.bfloat16),
        grid=(n, nrt),
        in_specs=[
            pl.BlockSpec((1, 1, th + 2, w + 2, cin),
                         lambda b, r: (b, r, 0, 0, 0)),
            pl.BlockSpec((9 * cin, cout), lambda b, r: (0, 0)),
            pl.BlockSpec((1, cout), lambda b, r: (0, 0)),
            pl.BlockSpec((1, cout), lambda b, r: (0, 0)),
        ],
        out_specs=pl.BlockSpec((1, th, w, cout), lambda b, r: (b, r, 0, 0)),
        compiler_params=pltpu.CompilerParams(
            dimension_semantics=("parallel", "parallel"),
            vmem_limit_bytes=VMEM_LIMIT),
    )(xt, w2, scale2, bias2)
    return out


# --------------------------------------------------------------------------
# MaxPool 2x2 stride 2 — single pallas_call, input read exactly once.
# The wrapper reshape (n,h,w,c)->(n,h/2,2,w/2,2,c) is a free row-major relabel.
# --------------------------------------------------------------------------
def _maxpool_kernel(x_ref, o_ref):
    # x_ref: (1, oh, 2, ow, 2, c) ; o_ref: (1, oh, ow, c)
    x = x_ref[0]                                   # (oh, 2, ow, 2, c)
    a = jnp.maximum(x[:, 0], x[:, 1])              # (oh, ow, 2, c)
    o_ref[0] = jnp.maximum(a[:, :, 0, :], a[:, :, 1, :])


def maxpool2x2(x_nhwc):
    n, h, w, c = x_nhwc.shape
    oh, ow = h // 2, w // 2
    xr = x_nhwc.reshape(n, oh, 2, ow, 2, c)
    return pl.pallas_call(
        _maxpool_kernel,
        out_shape=jax.ShapeDtypeStruct((n, oh, ow, c), x_nhwc.dtype),
        grid=(n,),
        in_specs=[pl.BlockSpec((1, oh, 2, ow, 2, c),
                               lambda b: (b, 0, 0, 0, 0, 0))],
        out_specs=pl.BlockSpec((1, oh, ow, c), lambda b: (b, 0, 0, 0)),
        compiler_params=pltpu.CompilerParams(
            dimension_semantics=("parallel",),
            vmem_limit_bytes=VMEM_LIMIT),
    )(xr)


# --------------------------------------------------------------------------
# Linear (+ optional ReLU): K/N-tiled bf16 matmul with f32 VMEM accumulator.
# --------------------------------------------------------------------------
def _linear_kernel(x_ref, w_ref, b_ref, o_ref, acc_ref, *, relu):
    k = pl.program_id(1)

    @pl.when(k == 0)
    def _():
        acc_ref[...] = jnp.zeros_like(acc_ref)

    acc_ref[...] += jnp.dot(x_ref[...], w_ref[...],
                            preferred_element_type=jnp.float32)

    @pl.when(k == pl.num_programs(1) - 1)
    def _():
        y = acc_ref[...] + b_ref[...]
        if relu:
            y = jnp.maximum(y, 0.0)
        o_ref[...] = y.astype(o_ref.dtype)


def _pick_tile(dim, candidates):
    for c in candidates:
        if dim % c == 0:
            return c
    return dim


def linear(x, w, b, *, relu, out_dtype=jnp.bfloat16):
    bsz, kdim = x.shape
    ndim = w.shape[1]
    # Large tiles (grid-overhead reduction) but bf16-sized so double-buffered
    # weight tiles stay well under the v7x 64 MiB VMEM budget.
    tk = _pick_tile(kdim, (3584, 2048, 1024, 512, 256, 128))
    tn = _pick_tile(ndim, (1024, 512, 256, 128))
    xb = x.astype(jnp.bfloat16)
    wb = w.astype(jnp.bfloat16)
    b2 = b.reshape(1, ndim).astype(jnp.float32)
    grid = (ndim // tn, kdim // tk)
    return pl.pallas_call(
        functools.partial(_linear_kernel, relu=relu),
        out_shape=jax.ShapeDtypeStruct((bsz, ndim), out_dtype),
        grid=grid,
        in_specs=[
            pl.BlockSpec((bsz, tk), lambda j, k: (0, k)),
            pl.BlockSpec((tk, tn), lambda j, k: (k, j)),
            pl.BlockSpec((1, tn), lambda j, k: (0, j)),
        ],
        out_specs=pl.BlockSpec((bsz, tn), lambda j, k: (0, j)),
        scratch_shapes=[pltpu.VMEM((bsz, tn), jnp.float32)],
        compiler_params=pltpu.CompilerParams(
            dimension_semantics=("parallel", "arbitrary"),
            vmem_limit_bytes=VMEM_LIMIT),
    )(xb, wb, b2)


# --------------------------------------------------------------------------
# AdaptiveAvgPool2d((7,7)) — for the 1x1 feature map this is a broadcast.
# --------------------------------------------------------------------------
def adaptive_avg_pool_nhwc(x, out_hw=(7, 7)):
    n, h, w, c = x.shape
    oh, ow = out_hw
    if (h, w) == (oh, ow):
        return x
    if h == 1 and w == 1:
        return jnp.broadcast_to(x, (n, oh, ow, c))
    # General fallback (rare path at toy resolutions): exact adaptive bins.
    rows = []
    for i in range(oh):
        h0 = (i * h) // oh
        h1 = -((-((i + 1) * h)) // oh)
        cols = []
        for j in range(ow):
            w0 = (j * w) // ow
            w1 = -((-((j + 1) * w)) // ow)
            cols.append(jnp.mean(x[:, h0:h1, w0:w1, :], axis=(1, 2)))
        rows.append(jnp.stack(cols, axis=1))
    return jnp.stack(rows, axis=1)


# --------------------------------------------------------------------------
# Parameter init (deterministic, synthetic) for VGG13_bn + Linear(4096, 6).
# --------------------------------------------------------------------------
VGG13_CFG = [64, 64, "M", 128, 128, "M", 256, 256, "M", 512, 512, "M",
             512, 512, "M"]


def init_vgg13_bn_params(key):
    convs = []
    cin = 3
    for v in VGG13_CFG:
        if v == "M":
            convs.append("M")
            continue
        key, k1, k2, k3, k4, k5, k6 = jax.random.split(key, 7)
        fan_in = 3 * 3 * cin
        w = jax.random.normal(k1, (3, 3, cin, v), jnp.float32) * (2.0 / fan_in) ** 0.5
        b = 0.01 * jax.random.normal(k2, (v,), jnp.float32)
        gamma = 1.0 + 0.1 * jax.random.normal(k3, (v,), jnp.float32)
        beta = 0.1 * jax.random.normal(k4, (v,), jnp.float32)
        run_mean = 0.1 * jax.random.normal(k5, (v,), jnp.float32)
        run_var = 1.0 + 0.1 * jnp.abs(jax.random.normal(k6, (v,), jnp.float32))
        # eval-mode BN folding: y = gamma*(conv + b - mean)/sqrt(var+eps) + beta
        scale = gamma / jnp.sqrt(run_var + 1e-5)
        bias = beta + scale * (b - run_mean)
        convs.append((w, scale, bias))
        cin = v

    key, k1, k2, k3, k4, k5, k6 = jax.random.split(key, 7)
    fc1_w = jax.random.normal(k1, (512 * 7 * 7, 4096), jnp.float32) * (2.0 / (512 * 7 * 7)) ** 0.5
    fc1_b = 0.01 * jax.random.normal(k2, (4096,), jnp.float32)
    fc2_w = jax.random.normal(k3, (4096, 4096), jnp.float32) * (2.0 / 4096) ** 0.5
    fc2_b = 0.01 * jax.random.normal(k4, (4096,), jnp.float32)
    fc3_w = jax.random.normal(k5, (4096, 6), jnp.float32) * (2.0 / 4096) ** 0.5
    fc3_b = 0.01 * jax.random.normal(k6, (6,), jnp.float32)
    return convs, (fc1_w, fc1_b, fc2_w, fc2_b, fc3_w, fc3_b)


# --------------------------------------------------------------------------
# Forward pass (matches VGG.forward: features -> avgpool -> classifier).
# --------------------------------------------------------------------------
def vgg13_bn_forward(x_nchw, convs, fcs):
    x = jnp.transpose(x_nchw, (0, 2, 3, 1)).astype(jnp.bfloat16)  # NCHW -> NHWC
    for layer in convs:
        if isinstance(layer, str):            # "M" -> MaxPool2d(2, 2)
            x = maxpool2x2(x)
        else:
            w, scale, bias = layer
            x = conv3x3_bn_relu(x, w, scale, bias)
    x = adaptive_avg_pool_nhwc(x, (7, 7))                          # (N,7,7,512)
    x = jnp.transpose(x, (0, 3, 1, 2)).reshape(x.shape[0], -1)     # NCHW flatten

    fc1_w, fc1_b, fc2_w, fc2_b, fc3_w, fc3_b = fcs
    x = linear(x, fc1_w, fc1_b, relu=True)    # Linear(25088,4096)+ReLU; Dropout=id
    x = linear(x, fc2_w, fc2_b, relu=True)    # Linear(4096,4096)+ReLU; Dropout=id

    # Replaced head Linear(4096, 6): pad N 6 -> 128 for lane-dense stores.
    n_out = fc3_w.shape[1]
    pad_n = 128 - n_out
    fc3_wp = jnp.pad(fc3_w, ((0, 0), (0, pad_n)))
    fc3_bp = jnp.pad(fc3_b, ((0, pad_n),))
    y = linear(x, fc3_wp, fc3_bp, relu=False, out_dtype=jnp.float32)
    return y[:, :n_out]


if __name__ == "__main__":
    key = jax.random.PRNGKey(0)
    pkey, xkey = jax.random.split(key)
    convs, fcs = init_vgg13_bn_params(pkey)
    # Small NCHW input consistent with the module (3 input channels).
    x = jax.random.normal(xkey, (2, 3, 32, 32), jnp.float32)
    out = vgg13_bn_forward(x, convs, fcs)
    out = jax.block_until_ready(out)
    assert out.shape == (2, 6) and out.dtype == jnp.float32
    print("KERNEL_OK")
</pallas_src>

<mosaic_0001>
module attributes {stable_mosaic.version = 11 : i64} {
  func.func @_conv_bn_relu_kernel(%arg0: i32, %arg1: i32, %arg2: memref<1x1x34x34x3xbf16, #tpu.memory_space<vmem>>, %arg3: memref<27x64xbf16, #tpu.memory_space<vmem>>, %arg4: memref<1x64xf32, #tpu.memory_space<vmem>>, %arg5: memref<1x64xf32, #tpu.memory_space<vmem>>, %arg6: memref<1x32x32x64xbf16, #tpu.memory_space<vmem>>) attributes {dimension_semantics = [#tpu.dimension_semantics<parallel>, #tpu.dimension_semantics<parallel>], iteration_bounds = array<i64: 2, 1>, scalar_prefetch = 0 : i64, scratch_operands = 0 : i64, tpu.core_type = #tpu.core_type<tc>, window_params = [{transform_indices = @transform_0, window_bounds = array<i64: 1, 1, 34, 34, 3>}, {pipeline_mode = #tpu.pipeline_mode<synchronous>, transform_indices = @transform_1, window_bounds = array<i64: 27, 64>}, {pipeline_mode = #tpu.pipeline_mode<synchronous>, transform_indices = @transform_2, window_bounds = array<i64: 1, 64>}, {pipeline_mode = #tpu.pipeline_mode<synchronous>, transform_indices = @transform_3, window_bounds = array<i64: 1, 64>}, {transform_indices = @transform_4, window_bounds = array<i64: 1, 32, 32, 64>}]} {
    %c0 = arith.constant 0 : index
    %c0_0 = arith.constant 0 : index
    %c0_1 = arith.constant 0 : index
    %c0_2 = arith.constant 0 : index
    %c0_3 = arith.constant 0 : index
    %0 = vector.load %arg2[%c0, %c0_0, %c0_1, %c0_2, %c0_3] : memref<1x1x34x34x3xbf16, #tpu.memory_space<vmem>>, vector<1x1x34x34x3xbf16>
    %1 = vector.shape_cast %0 : vector<1x1x34x34x3xbf16> to vector<34x34x3xbf16>
    %2 = vector.extract_strided_slice %1 {offsets = [0, 0, 0], sizes = [32, 32, 3], strides = [1, 1, 1]} : vector<34x34x3xbf16> to vector<32x32x3xbf16>
    %3 = vector.extract_strided_slice %1 {offsets = [0, 1, 0], sizes = [32, 32, 3], strides = [1, 1, 1]} : vector<34x34x3xbf16> to vector<32x32x3xbf16>
    %4 = vector.extract_strided_slice %1 {offsets = [0, 2, 0], sizes = [32, 32, 3], strides = [1, 1, 1]} : vector<34x34x3xbf16> to vector<32x32x3xbf16>
    %5 = vector.extract_strided_slice %1 {offsets = [1, 0, 0], sizes = [32, 32, 3], strides = [1, 1, 1]} : vector<34x34x3xbf16> to vector<32x32x3xbf16>
    %6 = vector.extract_strided_slice %1 {offsets = [1, 1, 0], sizes = [32, 32, 3], strides = [1, 1, 1]} : vector<34x34x3xbf16> to vector<32x32x3xbf16>
    %7 = vector.extract_strided_slice %1 {offsets = [1, 2, 0], sizes = [32, 32, 3], strides = [1, 1, 1]} : vector<34x34x3xbf16> to vector<32x32x3xbf16>
    %8 = vector.extract_strided_slice %1 {offsets = [2, 0, 0], sizes = [32, 32, 3], strides = [1, 1, 1]} : vector<34x34x3xbf16> to vector<32x32x3xbf16>
    %9 = vector.extract_strided_slice %1 {offsets = [2, 1, 0], sizes = [32, 32, 3], strides = [1, 1, 1]} : vector<34x34x3xbf16> to vector<32x32x3xbf16>
    %10 = vector.extract_strided_slice %1 {offsets = [2, 2, 0], sizes = [32, 32, 3], strides = [1, 1, 1]} : vector<34x34x3xbf16> to vector<32x32x3xbf16>
    %11 = tpu.concatenate %2, %3, %4, %5, %6, %7, %8, %9, %10 in 2 : vector<32x32x3xbf16>, vector<32x32x3xbf16>, vector<32x32x3xbf16>, vector<32x32x3xbf16>, vector<32x32x3xbf16>, vector<32x32x3xbf16>, vector<32x32x3xbf16>, vector<32x32x3xbf16>, vector<32x32x3xbf16> -> vector<32x32x27xbf16>
    %12 = vector.shape_cast %11 : vector<32x32x27xbf16> to vector<1024x27xbf16>
    %c0_4 = arith.constant 0 : index
    %c0_5 = arith.constant 0 : index
    %13 = vector.load %arg3[%c0_4, %c0_5] : memref<27x64xbf16, #tpu.memory_space<vmem>>, vector<27x64xbf16>
    %cst = arith.constant dense<0.000000e+00> : vector<1024x64xf32>
    %14 = tpu.matmul %12, %13, %cst {dimension_numbers = #tpu.dot_dimension_numbers<[1], [0], [0], [1], [0, 0, 1, 1], [], []>} : vector<1024x27xbf16>, vector<27x64xbf16>, vector<1024x64xf32> -> vector<1024x64xf32>
    %c0_6 = arith.constant 0 : index
    %c0_7 = arith.constant 0 : index
    %15 = vector.load %arg4[%c0_6, %c0_7] : memref<1x64xf32, #tpu.memory_space<vmem>>, vector<1x64xf32>
    %16 = vector.broadcast %15 : vector<1x64xf32> to vector<1024x64xf32>
    %17 = arith.mulf %14, %16 : vector<1024x64xf32>
    %c0_8 = arith.constant 0 : index
    %c0_9 = arith.constant 0 : index
    %18 = vector.load %arg5[%c0_8, %c0_9] : memref<1x64xf32, #tpu.memory_space<vmem>>, vector<1x64xf32>
    %19 = vector.broadcast %18 : vector<1x64xf32> to vector<1024x64xf32>
    %20 = arith.addf %17, %19 : vector<1024x64xf32>
    %cst_10 = arith.constant 0.000000e+00 : f32
    %21 = vector.broadcast %cst_10 : f32 to vector<1024x64xf32>
    %22 = arith.maximumf %20, %21 : vector<1024x64xf32>
    %23 = vector.shape_cast %22 : vector<1024x64xf32> to vector<32x32x64xf32>
    %24 = arith.truncf %23 : vector<32x32x64xf32> to vector<32x32x64xbf16>
    %c0_11 = arith.constant 0 : index
    %c0_12 = arith.constant 0 : index
    %c0_13 = arith.constant 0 : index
    %c0_14 = arith.constant 0 : index
    %25 = vector.load %arg6[%c0_11, %c0_12, %c0_13, %c0_14] : memref<1x32x32x64xbf16, #tpu.memory_space<vmem>>, vector<1x32x32x64xbf16>
    %26 = vector.shape_cast %25 : vector<1x32x32x64xbf16> to vector<32x32x64xbf16>
    %27 = vector.shape_cast %24 : vector<32x32x64xbf16> to vector<1x32x32x64xbf16>
    tpu.vector_store %arg6[%c0_11, %c0_12, %c0_13, %c0_14], %27 {strides = array<i32>} : memref<1x32x32x64xbf16, #tpu.memory_space<vmem>>, vector<1x32x32x64xbf16>,
    return
  }
  func.func @transform_0(%arg0: i32, %arg1: i32) -> (i32, i32, i32, i32, i32) {
    %c0_i32 = arith.constant 0 : i32
    %c0_i32_0 = arith.constant 0 : i32
    %c0_i32_1 = arith.constant 0 : i32
    %c0_i32_2 = arith.constant 0 : i32
    return %arg0, %arg1, %c0_i32, %c0_i32_0, %c0_i32_1 : i32, i32, i32, i32, i32
  }
  func.func @transform_1(%arg0: i32, %arg1: i32) -> (i32, i32) {
    %c0_i32 = arith.constant 0 : i32
    %c0_i32_0 = arith.constant 0 : i32
    %c0_i32_1 = arith.constant 0 : i32
    return %c0_i32, %c0_i32_0 : i32, i32
  }
  func.func @transform_2(%arg0: i32, %arg1: i32) -> (i32, i32) {
    %c0_i32 = arith.constant 0 : i32
    %c0_i32_0 = arith.constant 0 : i32
    %c0_i32_1 = arith.constant 0 : i32
    return %c0_i32, %c0_i32_0 : i32, i32
  }
  func.func @transform_3(%arg0: i32, %arg1: i32) -> (i32, i32) {
    %c0_i32 = arith.constant 0 : i32
    %c0_i32_0 = arith.constant 0 : i32
    %c0_i32_1 = arith.constant 0 : i32
    return %c0_i32, %c0_i32_0 : i32, i32
  }
  func.func @transform_4(%arg0: i32, %arg1: i32) -> (i32, i32, i32, i32) {
    %c0_i32 = arith.constant 0 : i32
    %c0_i32_0 = arith.constant 0 : i32
    %c0_i32_1 = arith.constant 0 : i32
    return %arg0, %arg1, %c0_i32, %c0_i32_0 : i32, i32, i32, i32
  }
}

</mosaic_0001>

<bundles_post_ra>
// kernel: tpu_custom_call.1
= control target key start
LH: loop header
LB: loop body
LE: loop exit
PB: predicated region body
PF: predicated region fallthrough
CT: control target
= control target key end

     0   :  { %9 = vsyncpa [#allocation3], 0  ;;  %s10986_s0 = inlined_call_operand.vmem [shape: bf16[2,1,34,34,3], index: 0, kind: input, shape index: {}]   ;;  %s10987_s1 = inlined_call_operand.vmem [shape: bf16[27,64], index: 1, kind: input, shape index: {}]   ;;  %s10988_s2 = inlined_call_operand.vmem [shape: f32[1,64], index: 2, kind: input, shape index: {}]   ;;  %s10989_s3 = inlined_call_operand.vmem [shape: f32[1,64], index: 3, kind: input, shape index: {}]   ;;  %s10990_s4 = inlined_call_operand.hbm [shape: bf16[2,32,32,64], index: 4, kind: output, shape index: {}]  }
   0x1   :  { %11 = vsyncpa [#allocation3 + $0x1], 0  ;;  %s6679_s15 = smov 0   ;;  %s6681_s16 = smov 0  }
   0x2   :  { %s6683_s17 = smov 0   ;;  %s6685_s18 = smov 0  }
   0x3   :  { %s6687_s19 = smov 0   ;;  %s6689_s20 = smov 0  }
   0x4 LB: > { %s5580_s21 = sadd.s32 4294967295, %s6640_s20   ;;  %s5581_s22 = sadd.s32 4294967294, %s6640_s20   ;;  %s6640_s20 = sphi %s6689_s20, %s17_s20   ;;  %s6636_s19 = sphi %s6687_s19, %s12150_s19   ;;  %s6632_s18 = sphi %s6685_s18, %s12149_s18   ;;  %s6628_s17 = sphi %s6683_s17, %s12148_s17   ;;  %s6624_s16 = sphi %s6681_s16, %s12147_s16   ;;  %s6620_s15 = sphi %s6679_s15, %s12146_s15  }
   0x5   : > { %s29_s23 = sadd.s32 1, %s6636_s19  ;;  %s129_s24 = sadd.s32 1, %s6628_s17 }
   0x6   : > { %p31_p0 = scmp.ge.s32.totalorder %s29_s23, 2  ;;  %p139_p1 = scmp.ne.s32.totalorder %s6628_s17, %s6624_s16 }
   0x7   : > { %p140_p2 = scmp.eq.s32.totalorder %s5580_s21, 1  ;;  %p145_p3 = scmp.ne.s32.totalorder %s6624_s16, %s6620_s15 }
   0x8   : > { %s12152_s23 = smov (%p31_p0, %s29_s23), 0  ;;  %p146_p5 = scmp.eq.s32.totalorder %s5581_s22, 1 }
   0x9   : > { %p6719_p4 = por %p140_p2, %p139_p1  ;;  %s124_s26 = ssub.s32 %s6636_s19, %s12152_s23 }
   0xa   : > { %p5584_p6 = scmp.ge.s32.totalorder %s6640_s20, 1  ;;  %p127_p7 = scmp.eq.s32.totalorder %s124_s26, 0 }
   0xb   : > { %p6726_p8 = por %p146_p5, %p145_p3  ;;  %p185_p9 = scmp.lt.s32.totalorder %s6640_s20, 3 }
   0xc   : > { %s6732_s28 = scalar_select %p127_p7, %s6628_s17, %s129_s24  }
   0xd   : > { %p186_p10 = pnand %p5584_p6, %p185_p9 }
   0xf   : > { %189 = sbr.rel (%p186_p10) target bundleno = 1413 (0x585), region = 36 }
  0x16   : > { %p215_p11 = scmp.lt.s32.totalorder %s6632_s18, 1  ;;  %vm812_vm0 = vsmask.f32 7424  ;;  %s6642_s8 = smov 3   ;;  %vm1581_vm1 = vcmask 1046528   ;;  %vm3890_vm2 = vcmask 1044480  }
  0x17   : > { %s6643_s9 = smov 6   ;;  %s6644_s10 = smov 9   ;;  %vm3891_vm3 = vcmask 1045504   ;;  %vm2714_vm4 = vcmask 23552   ;;  %vm2843_vm5 = vcmask 48128   ;;  %vm2972_vm6 = vcmask 72704  }
  0x18   : > { %s216_s29 = scalar_select %p215_p11, %s6632_s18, 1  ;;  %vm3101_vm7 = vcmask 97280   ;;  %vm3230_vm8 = vcmask 121856   ;;  %vm3359_vm9 = vcmask 146432   ;;  %vm3488_vm10 = vcmask 171008  }
  0x19   : > { %s6645_s11 = smov 12   ;;  %s6646_s12 = smov 15   ;;  %vm3617_vm11 = vcmask 195584   ;;  %vm3761_vm12 = vcmask 220160   ;;  %vm5352_vm13 = vcmask 519168  }
  0x1a   : > { %s6221_s30 = smul.u32 680, %s216_s29  ;;  %s6647_s13 = smov 18  }
  0x1b   : > { %s6649_s26 = smov 21   ;;  %s6650_s29 = smov 24  }
  0x1c   : > { %s6739_s7 = scalar_lea.vmem %s10986_s0, %s6221_s30  ;;  %s212_s6 = sand.u32 1, %s6624_s16  }
  0x1d   : > { %v6288_v0 = vld [vmem:[%s6739_s7 + $0x14] sm:$0xff]   ;;  %v6289_v1 = vld [vmem:[%s6739_s7 + $0x1c] sm:$0xff]   ;;  %v6291_v6 = vld [vmem:[%s6739_s7 + $0x8] sm:$0xff]  }
  0x1e   : > { %v834_v2 = vshrl.u32 %v6288_v0, 16  ;;  %v836_v3 = vshll.u32 %v6288_v0, 16  ;;  %v841_v4 = vshll.u32 %v6289_v1, 16  ;;  %v6290_v5 = vld [vmem:[%s6739_s7] sm:$0xff]   ;;  %v821_v12 = vshll.u32 %v6291_v6, 16  ;;  %v6294_v23 = vld [vmem:[%s6739_s7 + $0x30] sm:$0xff]  }
  0x1f   : > { %v6292_v7 = vld [vmem:[%s6739_s7 + $0x24] ss:$0 sps:$4 sm:$0x11]   ;;  %v814_v10 = vshrl.u32 %v6290_v5, 16  ;;  %v816_v11 = vshll.u32 %v6290_v5, 16  ;;  %v845_v13 = vshrl.u32 %v6289_v1, 16 }
  0x20   : > { %v838_v8 = vrot.slane %v836_v3, 1  ;;  %v843_v9 = vrot.slane %v841_v4, 1  ;;  %v849_v14 = vshll.u32 %v6292_v7, 16  ;;  %v6293_v15 = vld [vmem:[%s6739_s7 + $0x10] ss:$0 sps:$4 sm:$0x11]  }
  0x21   : > { %v818_v17 = vrot.slane %v816_v11, 1  ;;  %v825_v18 = vshrl.u32 %v6291_v6, 16  ;;  %v823_v19 = vrot.slane %v821_v12, 1  ;;  %v829_v22 = vshll.u32 %v6293_v15, 16  ;;  %v6296_v27 = vld [vmem:[%s6739_s7 + $0x28] sm:$0xff]   ;;  %v6299_v46 = vld [vmem:[%s6739_s7 + $0x3c] sm:$0xff]  }
  0x22   : > { %v839_v16 = vor.u32 %v838_v8, %v834_v2  ;;  %v847_v20 = vor.u32 %v845_v13, %v843_v9  ;;  %v851_v21 = vrot.slane %v849_v14, 1  ;;  %v6295_v26 = vld [vmem:[%s6739_s7 + $0x38] ss:$0 sps:$4 sm:$0x11]   ;;  %v861_v31 = vshll.u32 %v6294_v23, 16  ;;  %v6297_v36 = vld [vmem:[%s6739_s7 + $0x44] sm:$0xff]  }
  0x23   : > { %v819_v25 = vor.u32 %v818_v17, %v814_v10  ;;  %v827_v29 = vor.u32 %v825_v18, %v823_v19  ;;  %v831_v30 = vrot.slane %v829_v22, 1  ;;  %v865_v33 = vshrl.u32 %v6294_v23, 16  ;;  %v6298_v41 = vld [vmem:[%s6739_s7 + $0x4c] ss:$0 sps:$4 sm:$0x11]   ;;  %v6300_v53 = vld [vmem:[%s6739_s7 + $0x58] sm:$0xff]  }
  0x24   : > { %v6749_v24 = vsel %vm812_vm0, %v839_v16, %v843_v9  ;;  %v6756_v28 = vsel %vm812_vm0, %v847_v20, %v851_v21  ;;  %v869_v34 = vshll.u32 %v6295_v26, 16  ;;  %v854_v35 = vshrl.u32 %v6296_v27, 16  ;;  %v6301_v54 = vld [vmem:[%s6739_s7 + $0x60] ss:$0 sps:$4 sm:$0x11]   ;;  %v6302_v57 = vld [vmem:[%s6739_s7 + $0x50] sm:$0xff]  }
  0x25   : > { %11234 = vst [vmem:[#allocation5_spill] sm:$0xff] %v6749_v24  ;;  %1457 = vrot.lane.b32.xlu1 %v6749_v24, %s6642_s8  ;;  %11235 = vst [vmem:[#allocation6_spill] sm:$0xff] %v6756_v28  ;;  %v824_v32 = vsel %vm812_vm0, %v819_v25, %v823_v19  ;;  %v863_v37 = vrot.slane %v861_v31, 1  ;;  %v856_v38 = vshll.u32 %v6296_v27, 16  ;;  %v832_v39 = vsel %vm812_vm0, %v827_v29, %v831_v30  ;;  %v6303_v62 = vld [vmem:[%s6739_s7 + $0x6c] sm:$0xff]   ;;  %v6305_v3 = vld [vmem:[%s6739_s7 + $0x64] sm:$0xff]  }
  0x26   : > { %1453 = vrot.lane.b32.xlu0 %v824_v32, %s6642_s8  ;;  %v871_v40 = vrot.slane %v869_v34, 1  ;;  %v881_v42 = vshll.u32 %v6297_v36, 16  ;;  %v885_v43 = vshrl.u32 %v6297_v36, 16  ;;  %v889_v48 = vshll.u32 %v6298_v41, 16  ;;  %v6306_v20 = vld [vmem:[%s6739_s7 + $0x80] sm:$0xff]   ;;  %v6308_v22 = vld [vmem:[%s6739_s7 + $0x78] sm:$0xff]  }
  0x27   : > { %v867_v44 = vor.u32 %v865_v33, %v863_v37  ;;  %v858_v45 = vrot.slane %v856_v38, 1  ;;  %v874_v51 = vshrl.u32 %v6299_v46, 16  ;;  %v876_v52 = vshll.u32 %v6299_v46, 16  ;;  %v6304_v6 = vld [vmem:[%s6739_s7 + $0x74] ss:$0 sps:$4 sm:$0x11]  }
  0x28   : > { %v883_v47 = vrot.slane %v881_v42, 1  ;;  %v891_v56 = vrot.slane %v889_v48, 1  ;;  %v901_v60 = vshll.u32 %v6300_v53, 16  ;;  %v905_v61 = vshrl.u32 %v6300_v53, 16  ;;  %v6309_v27 = vld [vmem:[%s6739_s7 + $0x94] sm:$0xff]   ;;  %v6311_v46 = vld [vmem:[%s6739_s7 + $0x8c] sm:$0xff]  }
  0x29   : > { %1459 = vrot.lane.b32.xlu1 %v6756_v28, %s6642_s8  ;;  %v6768_v49 = vsel %vm812_vm0, %v867_v44, %v871_v40  ;;  %v859_v50 = vor.u32 %v858_v45, %v854_v35  ;;  %v878_v59 = vrot.slane %v876_v52, 1  ;;  %v909_v0 = vshll.u32 %v6301_v54, 16  ;;  %v6307_v21 = vld [vmem:[%s6739_s7 + $0x88] ss:$0 sps:$4 sm:$0x11]  }
  0x2a   : > { %1455 = vrot.lane.b32.xlu0 %v832_v39, %s6642_s8  ;;  %11236 = vst [vmem:[#allocation7_spill] sm:$0xff] %v6768_v49  ;;  %v887_v55 = vor.u32 %v885_v43, %v883_v47  ;;  %v894_v1 = vshrl.u32 %v6302_v57, 16  ;;  %v896_v2 = vshll.u32 %v6302_v57, 16  ;;  %v903_v5 = vrot.slane %v901_v60, 1 }
  0x2b   : > { %v6776_v58 = vsel %vm812_vm0, %v859_v50, %v863_v37  ;;  %v879_v4 = vor.u32 %v878_v59, %v874_v51  ;;  %v911_v7 = vrot.slane %v909_v0, 1  ;;  %v921_v9 = vshll.u32 %v6303_v62, 16  ;;  %v6310_v39 = vld [vmem:[%s6739_s7 + $0x9c] ss:$0 sps:$4 sm:$0x11]   ;;  %v6312_v50 = vld [vmem:[%s6739_s7 + $0xa8] sm:$0xff]  }
  0x2c   : > { %11237 = vst [vmem:[#allocation8_spill] sm:$0xff] %v6776_v58  ;;  %v6780_v63 = vsel %vm812_vm0, %v887_v55, %v891_v56  ;;  %v898_v8 = vrot.slane %v896_v2, 1  ;;  %v925_v10 = vshrl.u32 %v6303_v62, 16  ;;  %v907_v12 = vor.u32 %v905_v61, %v903_v5  ;;  %v6313_v51 = vld [vmem:[%s6739_s7 + $0xb0] ss:$0 sps:$4 sm:$0x11]  }
  0x2d   : > { %1463 = vrot.lane.b32.xlu1 %v6768_v49, %s6642_s8  ;;  %11238 = vst [vmem:[#allocation9_spill] sm:$0xff] %v6780_v63  ;;  %v6789_v11 = vsel %vm812_vm0, %v879_v4, %v883_v47  ;;  %v929_v13 = vshll.u32 %v6304_v6, 16  ;;  %v914_v14 = vshrl.u32 %v6305_v3, 16  ;;  %v923_v16 = vrot.slane %v921_v9, 1  ;;  %v6314_v56 = vld [vmem:[%s6739_s7 + $0xa0] sm:$0xff]   ;;  %v7253_v49 = vld [vmem:[%s6739_s7 + $0x258] sm:$0xff]  }
  0x2e   : > { %1461 = vrot.lane.b32.xlu0 %v6776_v58, %s6642_s8  ;;  %11239 = vst [vmem:[#allocation10_spill] sm:$0xff] %v6789_v11  ;;  %v899_v15 = vor.u32 %v898_v8, %v894_v1  ;;  %v916_v17 = vshll.u32 %v6305_v3, 16  ;;  %v6794_v18 = vsel %vm812_vm0, %v907_v12, %v911_v7  ;;  %v941_v29 = vshll.u32 %v6306_v20, 16  ;;  %v6315_v62 = vld [vmem:[%s6739_s7 + $0xbc] sm:$0xff]   ;;  %v6317_v3 = vld [vmem:[%s6739_s7 + $0xb4] sm:$0xff]  }
  0x2f   : > { %11240 = vst [vmem:[#allocation11_spill] sm:$0xff] %v6794_v18  ;;  %v931_v19 = vrot.slane %v929_v13, 1  ;;  %v927_v25 = vor.u32 %v925_v10, %v923_v16  ;;  %v945_v30 = vshrl.u32 %v6306_v20, 16  ;;  %v949_v31 = vshll.u32 %v6307_v21, 16 }
  0x30   : > { %v6800_v23 = vsel %vm812_vm0, %v899_v15, %v903_v5  ;;  %v918_v26 = vrot.slane %v916_v17, 1  ;;  %v934_v32 = vshrl.u32 %v6308_v22, 16  ;;  %v936_v35 = vshll.u32 %v6308_v22, 16  ;;  %v6316_v9 = vld [vmem:[%s6739_s7 + $0xc4] ss:$0 sps:$4 sm:$0x11]  }
  0x31   : > { %1467 = vrot.lane.b32.xlu1 %v6780_v63, %s6642_s8  ;;  %11241 = vst [vmem:[#allocation12_spill] sm:$0xff] %v6800_v23  ;;  %v6806_v33 = vsel %vm812_vm0, %v927_v25, %v931_v19  ;;  %v961_v36 = vshll.u32 %v6309_v27, 16  ;;  %v943_v37 = vrot.slane %v941_v29, 1  ;;  %v951_v38 = vrot.slane %v949_v31, 1  ;;  %v6318_v25 = vld [vmem:[%s6739_s7 + $0xd0] sm:$0xff]  }
  0x32   : > { %1465 = vrot.lane.b32.xlu0 %v6789_v11, %s6642_s8  ;;  %11242 = vst [vmem:[#allocation13_spill] sm:$0xff] %v6806_v33  ;;  %v919_v34 = vor.u32 %v918_v26, %v914_v14  ;;  %v965_v40 = vshrl.u32 %v6309_v27, 16  ;;  %v938_v42 = vrot.slane %v936_v35, 1  ;;  %v969_v45 = vshll.u32 %v6310_v39, 16  ;;  %v6320_v35 = vld [vmem:[%s6739_s7 + $0xc8] sm:$0xff]   ;;  %v6323_v39 = vld [vmem:[%s6739_s7 + $0xdc] sm:$0xff]  }
  0x33   : > { %v963_v43 = vrot.slane %v961_v36, 1  ;;  %v947_v44 = vor.u32 %v945_v30, %v943_v37  ;;  %v954_v54 = vshrl.u32 %v6311_v46, 16  ;;  %v956_v55 = vshll.u32 %v6311_v46, 16  ;;  %v6319_v29 = vld [vmem:[%s6739_s7 + $0xd8] ss:$0 sps:$4 sm:$0x11]  }
  0x34   : > { %v6812_v41 = vsel %vm812_vm0, %v919_v34, %v923_v16  ;;  %v939_v47 = vor.u32 %v938_v42, %v934_v32  ;;  %v971_v53 = vrot.slane %v969_v45, 1  ;;  %v981_v59 = vshll.u32 %v6312_v50, 16  ;;  %v6321_v36 = vld [vmem:[%s6739_s7 + $0xe4] sm:$0xff]   ;;  %v6322_v45 = vld [vmem:[%s6739_s7 + $0xec] ss:$0 sps:$4 sm:$0x11]  }
  0x35   : > { %1471 = vrot.lane.b32.xlu1 %v6794_v18, %s6642_s8  ;;  %11243 = vst [vmem:[#allocation14_spill] sm:$0xff] %v6812_v41  ;;  %v967_v48 = vor.u32 %v965_v40, %v963_v43  ;;  %v6822_v52 = vsel %vm812_vm0, %v947_v44, %v951_v38  ;;  %v985_v60 = vshrl.u32 %v6312_v50, 16  ;;  %v989_v61 = vshll.u32 %v6313_v51, 16  ;;  %v7231_v11 = vld [vmem:[%s6739_s7 + $0x244] sm:$0xff]  }
  0x36   : > { %1469 = vrot.lane.b32.xlu0 %v6800_v23, %s6642_s8  ;;  %11244 = vst [vmem:[#allocation15_spill] sm:$0xff] %v6822_v52  ;;  %v6826_v57 = vsel %vm812_vm0, %v939_v47, %v943_v37  ;;  %v958_v0 = vrot.slane %v956_v55, 1  ;;  %v974_v1 = vshrl.u32 %v6314_v56, 16  ;;  %v976_v2 = vshll.u32 %v6314_v56, 16  ;;  %v6324_v56 = vld [vmem:[%s6739_s7 + $0xf8] sm:$0xff]   ;;  %11286 = vst [vmem:[#allocation57_spill] sm:$0xff] %v7231_v11 }
  0x37   : > { %11245 = vst [vmem:[#allocation16_spill] sm:$0xff] %v6826_v57  ;;  %v6833_v4 = vsel %vm812_vm0, %v967_v48, %v971_v53  ;;  %v983_v5 = vrot.slane %v981_v59, 1  ;;  %v991_v6 = vrot.slane %v989_v61, 1  ;;  %v1001_v10 = vshll.u32 %v6315_v62, 16 }
  0x38   : > { %11246 = vst [vmem:[#allocation17_spill] sm:$0xff] %v6833_v4  ;;  %v959_v7 = vor.u32 %v958_v0, %v954_v54  ;;  %v978_v8 = vrot.slane %v976_v2, 1  ;;  %v1005_v12 = vshrl.u32 %v6315_v62, 16  ;;  %v994_v14 = vshrl.u32 %v6317_v3, 16 }
  0x39   : > { %1475 = vrot.lane.b32.xlu1 %v6806_v33, %s6642_s8  ;;  %v987_v13 = vor.u32 %v985_v60, %v983_v5  ;;  %v996_v15 = vshll.u32 %v6317_v3, 16  ;;  %v1003_v19 = vrot.slane %v1001_v10, 1  ;;  %v1009_v20 = vshll.u32 %v6316_v9, 16  ;;  %v6326_v60 = vld [vmem:[%s6739_s7 + $0xf0] sm:$0xff]  }
  0x3a   : > { %1473 = vrot.lane.b32.xlu0 %v6812_v41, %s6642_s8  ;;  %v6841_v16 = vsel %vm812_vm0, %v959_v7, %v963_v43  ;;  %v979_v17 = vor.u32 %v978_v8, %v974_v1  ;;  %v1021_v32 = vshll.u32 %v6318_v25, 16  ;;  %v1025_v34 = vshrl.u32 %v6318_v25, 16  ;;  %v6325_v3 = vld [vmem:[%s6739_s7 + $0x100] ss:$0 sps:$4 sm:$0x11]  }
  0x3b   : > { %11247 = vst [vmem:[#allocation18_spill] sm:$0xff] %v6841_v16  ;;  %v6844_v21 = vsel %vm812_vm0, %v987_v13, %v991_v6  ;;  %v998_v22 = vrot.slane %v996_v15, 1  ;;  %v1007_v26 = vor.u32 %v1005_v12, %v1003_v19  ;;  %v1011_v27 = vrot.slane %v1009_v20, 1  ;;  %v6327_v12 = vld [vmem:[%s6739_s7 + $0x10c] sm:$0xff]  }
  0x3c   : > { %11248 = vst [vmem:[#allocation19_spill] sm:$0xff] %v6844_v21  ;;  %v6851_v30 = vsel %vm812_vm0, %v979_v17, %v983_v5  ;;  %v1029_v38 = vshll.u32 %v6319_v29, 16  ;;  %v1023_v42 = vrot.slane %v1021_v32, 1  ;;  %v1014_v43 = vshrl.u32 %v6320_v35, 16 }
  0x3d   : > { %1479 = vrot.lane.b32.xlu1 %v6822_v52, %s6642_s8  ;;  %11249 = vst [vmem:[#allocation20_spill] sm:$0xff] %v6851_v30  ;;  %v999_v31 = vor.u32 %v998_v22, %v994_v14  ;;  %v6858_v37 = vsel %vm812_vm0, %v1007_v26, %v1011_v27  ;;  %v1016_v44 = vshll.u32 %v6320_v35, 16  ;;  %v1041_v47 = vshll.u32 %v6321_v36, 16  ;;  %v6329_v27 = vld [vmem:[%s6739_s7 + $0x104] sm:$0xff]   ;;  %v7193_v52 = vld [vmem:[%s6739_s7 + $0x230] sm:$0xff]  }
  0x3e   : > { %1477 = vrot.lane.b32.xlu0 %v6826_v57, %s6642_s8  ;;  %11250 = vst [vmem:[#allocation21_spill] sm:$0xff] %v6858_v37  ;;  %v1031_v46 = vrot.slane %v1029_v38, 1  ;;  %v1045_v48 = vshrl.u32 %v6321_v36, 16  ;;  %v1034_v50 = vshrl.u32 %v6323_v39, 16  ;;  %v1027_v51 = vor.u32 %v1025_v34, %v1023_v42  ;;  %v6330_v38 = vld [vmem:[%s6739_s7 + $0x120] sm:$0xff]  }
  0x3f   : > { %v6862_v40 = vsel %vm812_vm0, %v999_v31, %v1003_v19  ;;  %v1018_v53 = vrot.slane %v1016_v44, 1  ;;  %v1049_v54 = vshll.u32 %v6322_v45, 16  ;;  %v1036_v55 = vshll.u32 %v6323_v39, 16  ;;  %v6328_v19 = vld [vmem:[%s6739_s7 + $0x114] ss:$0 sps:$4 sm:$0x11]  }
  0x40   : > { %11251 = vst [vmem:[#allocation22_spill] sm:$0xff] %v6862_v40  ;;  %v1043_v59 = vrot.slane %v1041_v47, 1  ;;  %v6872_v61 = vsel %vm812_vm0, %v1027_v51, %v1031_v46  ;;  %v1061_v5 = vshll.u32 %v6324_v56, 16  ;;  %v1065_v6 = vshrl.u32 %v6324_v56, 16  ;;  %v6332_v39 = vld [vmem:[%s6739_s7 + $0x118] sm:$0xff]  }
  0x41   : > { %1483 = vrot.lane.b32.xlu1 %v6833_v4, %s6642_s8  ;;  %11252 = vst [vmem:[#allocation23_spill] sm:$0xff] %v6872_v61  ;;  %v1019_v62 = vor.u32 %v1018_v53, %v1014_v43  ;;  %v1051_v0 = vrot.slane %v1049_v54, 1  ;;  %v1038_v1 = vrot.slane %v1036_v55, 1  ;;  %v1054_v7 = vshrl.u32 %v6326_v60, 16 }
  0x42   : > { %1481 = vrot.lane.b32.xlu0 %v6841_v16, %s6642_s8  ;;  %v1047_v2 = vor.u32 %v1045_v48, %v1043_v59  ;;  %v1056_v10 = vshll.u32 %v6326_v60, 16  ;;  %v1063_v13 = vrot.slane %v1061_v5, 1  ;;  %v1069_v14 = vshll.u32 %v6325_v3, 16  ;;  %v6331_v45 = vld [vmem:[%s6739_s7 + $0x128] ss:$0 sps:$4 sm:$0x11]  }
  0x43   : > { %v6878_v8 = vsel %vm812_vm0, %v1019_v62, %v1023_v42  ;;  %v1039_v9 = vor.u32 %v1038_v1, %v1034_v50  ;;  %v1081_v20 = vshll.u32 %v6327_v12, 16  ;;  %v1085_v22 = vshrl.u32 %v6327_v12, 16  ;;  %v6334_v1 = vld [vmem:[%s6739_s7 + $0x13c] ss:$0 sps:$4 sm:$0x11]  }
  0x44   : > { %11253 = vst [vmem:[#allocation24_spill] sm:$0xff] %v6878_v8  ;;  %v6884_v15 = vsel %vm812_vm0, %v1047_v2, %v1051_v0  ;;  %v1058_v17 = vrot.slane %v1056_v10, 1  ;;  %v1067_v25 = vor.u32 %v1065_v6, %v1063_v13  ;;  %v1071_v26 = vrot.slane %v1069_v14, 1  ;;  %v6335_v2 = vld [vmem:[%s6739_s7 + $0x12c] sm:$0xff]  }
  0x45   : > { %1487 = vrot.lane.b32.xlu1 %v6844_v21, %s6642_s8  ;;  %11254 = vst [vmem:[#allocation25_spill] sm:$0xff] %v6884_v15  ;;  %v6891_v29 = vsel %vm812_vm0, %v1039_v9, %v1043_v59  ;;  %v1083_v32 = vrot.slane %v1081_v20, 1  ;;  %v1089_v34 = vshll.u32 %v6328_v19, 16  ;;  %v1074_v35 = vshrl.u32 %v6329_v27, 16  ;;  %v6333_v59 = vld [vmem:[%s6739_s7 + $0x134] sm:$0xff]   ;;  %v6336_v14 = vld [vmem:[%s6739_s7 + $0x148] sm:$0xff]  }
  0x46   : > { %1485 = vrot.lane.b32.xlu0 %v6851_v30, %s6642_s8  ;;  %11255 = vst [vmem:[#allocation26_spill] sm:$0xff] %v6891_v29  ;;  %v1059_v31 = vor.u32 %v1058_v17, %v1054_v7  ;;  %v1076_v36 = vshll.u32 %v6329_v27, 16  ;;  %v6898_v42 = vsel %vm812_vm0, %v1067_v25, %v1071_v26  ;;  %v1101_v47 = vshll.u32 %v6330_v38, 16  ;;  %v6337_v19 = vld [vmem:[%s6739_s7 + $0x150] ss:$0 sps:$4 sm:$0x11]  }
  0x47   : > { %11256 = vst [vmem:[#allocation27_spill] sm:$0xff] %v6898_v42  ;;  %v1087_v43 = vor.u32 %v1085_v22, %v1083_v32  ;;  %v1091_v44 = vrot.slane %v1089_v34, 1  ;;  %v1105_v48 = vshrl.u32 %v6330_v38, 16  ;;  %v1094_v50 = vshrl.u32 %v6332_v39, 16  ;;  %v6338_v27 = vld [vmem:[%s6739_s7 + $0x140] sm:$0xff]  }
  0x48   : > { %v1078_v46 = vrot.slane %v1076_v36, 1  ;;  %v6904_v51 = vsel %vm812_vm0, %v1059_v31, %v1063_v13  ;;  %v1109_v53 = vshll.u32 %v6331_v45, 16  ;;  %v1096_v54 = vshll.u32 %v6332_v39, 16  ;;  %v7268_v24 = vld [vmem:[%s6739_s7 + $0x27c] ss:$0 sps:$4 sm:$0x11]  }
  0x49   : > { %1491 = vrot.lane.b32.xlu1 %v6858_v37, %s6642_s8  ;;  %11257 = vst [vmem:[#allocation28_spill] sm:$0xff] %v6904_v51  ;;  %v1103_v56 = vrot.slane %v1101_v47, 1  ;;  %v6910_v60 = vsel %vm812_vm0, %v1087_v43, %v1091_v44  ;;  %v1121_v6 = vshll.u32 %v6333_v59, 16  ;;  %v1125_v7 = vshrl.u32 %v6333_v59, 16  ;;  %v6933_v44 = vld [vmem:[%s6739_s7 + $0x15c] sm:$0xff]   ;;  %v6952_v59 = vld [vmem:[%s6739_s7 + $0x170] sm:$0xff]  }
  0x4a   : > { %1489 = vrot.lane.b32.xlu0 %v6862_v40, %s6642_s8  ;;  %v1079_v55 = vor.u32 %v1078_v46, %v1074_v35  ;;  %11258 = vst [vmem:[#allocation29_spill] sm:$0xff] %v6910_v60  ;;  %v1111_v62 = vrot.slane %v1109_v53, 1  ;;  %v1098_v0 = vrot.slane %v1096_v54, 1  ;;  %v1129_v10 = vshll.u32 %v6334_v1, 16 }
  0x4b   : > { %v1107_v5 = vor.u32 %v1105_v48, %v1103_v56  ;;  %v1114_v12 = vshrl.u32 %v6335_v2, 16  ;;  %v1116_v13 = vshll.u32 %v6335_v2, 16  ;;  %v1123_v17 = vrot.slane %v1121_v6, 1  ;;  %v6938_v46 = vld [vmem:[%s6739_s7 + $0x164] ss:$0 sps:$4 sm:$0x11]  }
  0x4c   : > { %v6917_v3 = vsel %vm812_vm0, %v1079_v55, %v1083_v32  ;;  %v1099_v9 = vor.u32 %v1098_v0, %v1094_v50  ;;  %v1131_v22 = vrot.slane %v1129_v10, 1  ;;  %v1141_v26 = vshll.u32 %v6336_v14, 16  ;;  %v6958_v2 = vld [vmem:[%s6739_s7 + $0x168] sm:$0xff]  }
  0x4d   : > { %1495 = vrot.lane.b32.xlu1 %v6872_v61, %s6642_s8  ;;  %11259 = vst [vmem:[#allocation30_spill] sm:$0xff] %v6917_v3  ;;  %v6924_v20 = vsel %vm812_vm0, %v1107_v5, %v1111_v62  ;;  %v1118_v25 = vrot.slane %v1116_v13, 1  ;;  %v1127_v32 = vor.u32 %v1125_v7, %v1123_v17  ;;  %v1145_v34 = vshrl.u32 %v6336_v14, 16  ;;  %v7136_v61 = vld [vmem:[%s6739_s7 + $0x210] sm:$0xff]  }
  0x4e   : > { %1493 = vrot.lane.b32.xlu0 %v6878_v8, %s6642_s8  ;;  %11260 = vst [vmem:[#allocation31_spill] sm:$0xff] %v6924_v20  ;;  %v6930_v31 = vsel %vm812_vm0, %v1099_v9, %v1103_v56  ;;  %v1149_v35 = vshll.u32 %v6337_v19, 16  ;;  %v1143_v38 = vrot.slane %v1141_v26, 1  ;;  %v1134_v39 = vshrl.u32 %v6338_v27, 16  ;;  %v6949_v56 = vld [vmem:[%s6739_s7 + $0x154] sm:$0xff]  }
  0x4f   : > { %11261 = vst [vmem:[#allocation32_spill] sm:$0xff] %v6930_v31  ;;  %v1119_v36 = vor.u32 %v1118_v25, %v1114_v12  ;;  %v1136_v43 = vshll.u32 %v6338_v27, 16  ;;  %v6941_v47 = vsel %vm812_vm0, %v1127_v32, %v1131_v22  ;;  %v1161_v53 = vshll.u32 %v6933_v44, 16  ;;  %v6965_v9 = vld [vmem:[%s6739_s7 + $0x178] ss:$0 sps:$4 sm:$0x11]  }
  0x50   : > { %v1151_v45 = vrot.slane %v1149_v35, 1  ;;  %11262 = vst [vmem:[#allocation33_spill] sm:$0xff] %v6941_v47  ;;  %v1147_v48 = vor.u32 %v1145_v34, %v1143_v38  ;;  %v1165_v54 = vshrl.u32 %v6933_v44, 16  ;;  %v1169_v55 = vshll.u32 %v6938_v46, 16  ;;  %v6981_v32 = vld [vmem:[%s6739_s7 + $0x184] sm:$0xff]  }
  0x51   : > { %1499 = vrot.lane.b32.xlu1 %v6884_v15, %s6642_s8  ;;  %v1138_v50 = vrot.slane %v1136_v43, 1  ;;  %v6955_v62 = vsel %vm812_vm0, %v1119_v36, %v1123_v17  ;;  %v1163_v1 = vrot.slane %v1161_v53, 1  ;;  %v1154_v6 = vshrl.u32 %v6949_v56, 16  ;;  %v6989_v43 = vld [vmem:[%s6739_s7 + $0x17c] sm:$0xff]  }
  0x52   : > { %1497 = vrot.lane.b32.xlu0 %v6891_v29, %s6642_s8  ;;  %11263 = vst [vmem:[#allocation34_spill] sm:$0xff] %v6955_v62  ;;  %v1171_v5 = vrot.slane %v1169_v55, 1  ;;  %v1156_v7 = vshll.u32 %v6949_v56, 16  ;;  %v6968_v10 = vsel %vm812_vm0, %v1147_v48, %v1151_v45  ;;  %v1181_v13 = vshll.u32 %v6952_v59, 16  ;;  %v7111_v29 = vld [vmem:[%s6739_s7 + $0x1e0] sm:$0xff]  }
  0x53   : > { %v1139_v0 = vor.u32 %v1138_v50, %v1134_v39  ;;  %11264 = vst [vmem:[#allocation35_spill] sm:$0xff] %v6968_v10  ;;  %v1167_v12 = vor.u32 %v1165_v54, %v1163_v1  ;;  %v1185_v14 = vshrl.u32 %v6952_v59, 16  ;;  %v1189_v19 = vshll.u32 %v6965_v9, 16  ;;  %v6986_v39 = vld [vmem:[%s6739_s7 + $0x18c] ss:$0 sps:$4 sm:$0x11]  }
  0x54   : > { %v1158_v17 = vrot.slane %v1156_v7, 1  ;;  %v1174_v22 = vshrl.u32 %v6958_v2, 16  ;;  %v1176_v25 = vshll.u32 %v6958_v2, 16  ;;  %v1183_v27 = vrot.slane %v1181_v13, 1  ;;  %v7005_v7 = vld [vmem:[%s6739_s7 + $0x198] sm:$0xff]  }
  0x55   : > { %1503 = vrot.lane.b32.xlu1 %v6898_v42, %s6642_s8  ;;  %v6978_v26 = vsel %vm812_vm0, %v1139_v0, %v1143_v38  ;;  %v1191_v35 = vrot.slane %v1189_v19, 1  ;;  %v6992_v45 = vsel %vm812_vm0, %v1167_v12, %v1171_v5  ;;  %v1201_v48 = vshll.u32 %v6981_v32, 16  ;;  %v7008_v12 = vld [vmem:[%s6739_s7 + $0x190] sm:$0xff]  }
  0x56   : > { %1501 = vrot.lane.b32.xlu0 %v6904_v51, %s6642_s8  ;;  %11265 = vst [vmem:[#allocation36_spill] sm:$0xff] %v6978_v26  ;;  %v1159_v34 = vor.u32 %v1158_v17, %v1154_v6  ;;  %v1178_v36 = vrot.slane %v1176_v25, 1  ;;  %11266 = vst [vmem:[#allocation37_spill] sm:$0xff] %v6992_v45  ;;  %v1187_v38 = vor.u32 %v1185_v14, %v1183_v27  ;;  %v1205_v50 = vshrl.u32 %v6981_v32, 16 }
  0x57   : > { %v1209_v53 = vshll.u32 %v6986_v39, 16  ;;  %v1194_v54 = vshrl.u32 %v6989_v43, 16  ;;  %v1203_v5 = vrot.slane %v1201_v48, 1  ;;  %v1196_v6 = vshll.u32 %v6989_v43, 16  ;;  %v7029_v48 = vld [vmem:[%s6739_s7 + $0x1a4] sm:$0xff]  }
  0x58   : > { %v7001_v55 = vsel %vm812_vm0, %v1159_v34, %v1163_v1  ;;  %v1179_v0 = vor.u32 %v1178_v36, %v1174_v22  ;;  %v7013_v13 = vsel %vm812_vm0, %v1187_v38, %v1191_v35  ;;  %v7016_v17 = vld [vmem:[%s6739_s7 + $0x1a0] ss:$0 sps:$4 sm:$0x11]   ;;  %v1221_v22 = vshll.u32 %v7005_v7, 16  ;;  %v7021_v34 = vld [vmem:[%s6739_s7 + $0x1ac] sm:$0xff]  }
  0x59   : > { %1507 = vrot.lane.b32.xlu1 %v6910_v60, %s6642_s8  ;;  %11267 = vst [vmem:[#allocation38_spill] sm:$0xff] %v7001_v55  ;;  %11268 = vst [vmem:[#allocation39_spill] sm:$0xff] %v7013_v13  ;;  %v1211_v14 = vrot.slane %v1209_v53, 1  ;;  %v1207_v1 = vor.u32 %v1205_v50, %v1203_v5  ;;  %v1198_v19 = vrot.slane %v1196_v6, 1  ;;  %v1225_v25 = vshrl.u32 %v7005_v7, 16 }
  0x5a   : > { %1505 = vrot.lane.b32.xlu0 %v6917_v3, %s6642_s8  ;;  %v1229_v36 = vshll.u32 %v7016_v17, 16  ;;  %v1214_v35 = vshrl.u32 %v7008_v12, 16  ;;  %v1216_v38 = vshll.u32 %v7008_v12, 16  ;;  %v7032_v50 = vsel %vm812_vm0, %v1179_v0, %v1183_v27 }
  0x5b   : > { %11269 = vst [vmem:[#allocation40_spill] sm:$0xff] %v7032_v50  ;;  %v1199_v53 = vor.u32 %v1198_v19, %v1194_v54  ;;  %v1223_v6 = vrot.slane %v1221_v22, 1  ;;  %v1234_v54 = vshrl.u32 %v7029_v48, 16  ;;  %v1341_v37 = vshll.u32 %v7136_v61, 16 }
  0x5d   : > { %1511 = vrot.lane.b32.xlu1 %v6924_v20, %s6642_s8  ;;  %v1227_v27 = vor.u32 %v1225_v25, %v1223_v6  ;;  %v7082_v20 = vld [vmem:[%s6739_s7 + $0x1dc] ss:$0 sps:$4 sm:$0x11]  }
  0x5e   : > { %1509 = vrot.lane.b32.xlu0 %v6930_v31, %s6642_s8  ;;  %v1289_v3 = vshll.u32 %v7082_v20, 16 }
  0x61   : > { %1515 = vrot.lane.b32.xlu1 %v6941_v47, %s6642_s8  ;;  %v7042_v47 = vsel %vm812_vm0, %v1207_v1, %v1211_v14  ;;  %v7056_v14 = vld [vmem:[%s6739_s7 + $0x1c8] ss:$0 sps:$4 sm:$0x11]  }
  0x62   : > { %1513 = vrot.lane.b32.xlu0 %v6955_v62, %s6642_s8  ;;  %v1245_v62 = vshrl.u32 %v7021_v34, 16  ;;  %11270 = vst [vmem:[#allocation41_spill] sm:$0xff] %v7042_v47 }
  0x65   : > { %1519 = vrot.lane.b32.xlu1 %v6968_v10, %s6642_s8  ;;  %v7038_v10 = vld [vmem:[%s6739_s7 + $0x1b4] ss:$0 sps:$4 sm:$0x11]  }
  0x66   : > { %1517 = vrot.lane.b32.xlu0 %v6978_v26, %s6642_s8  ;;  %v1218_v26 = vrot.slane %v1216_v38, 1  ;;  %v1249_v22 = vshll.u32 %v7038_v10, 16  ;;  %v7050_v38 = vsel %vm812_vm0, %v1199_v53, %v1203_v5  ;;  %v1269_v53 = vshll.u32 %v7056_v14, 16 }
  0x67   : > { %11271 = vst [vmem:[#allocation42_spill] sm:$0xff] %v7050_v38 }
  0x68   : > { %v1219_v19 = vor.u32 %v1218_v26, %v1214_v35  ;;  %v1251_v1 = vrot.slane %v1249_v22, 1  ;;  %v7075_v22 = vld [vmem:[%s6739_s7 + $0x1d4] sm:$0xff]  }
  0x69   : > { %1523 = vrot.lane.b32.xlu1 %v6992_v45, %s6642_s8  ;;  %v1241_v45 = vshll.u32 %v7021_v34, 16 }
  0x6a   : > { %1521 = vrot.lane.b32.xlu0 %v7001_v55, %s6642_s8  ;;  %v1231_v55 = vrot.slane %v1229_v36, 1  ;;  %v1236_v36 = vshll.u32 %v7029_v48, 16 }
  0x6b   : > { %v1243_v0 = vrot.slane %v1241_v45, 1 }
  0x6c   : > { %v7061_v45 = vsel %vm812_vm0, %v1227_v27, %v1231_v55  ;;  %v1238_v26 = vrot.slane %v1236_v36, 1  ;;  %v7072_v55 = vsel %vm812_vm0, %v1219_v19, %v1223_v6  ;;  %v1271_v36 = vrot.slane %v1269_v53, 1  ;;  %v7087_v19 = vld [vmem:[%s6739_s7 + $0x1cc] sm:$0xff]  }
  0x6d   : > { %1527 = vrot.lane.b32.xlu1 %v7013_v13, %s6642_s8  ;;  %v7053_v13 = vld [vmem:[%s6739_s7 + $0x1c0] sm:$0xff]   ;;  %11272 = vst [vmem:[#allocation43_spill] sm:$0xff] %v7061_v45  ;;  %v1247_v25 = vor.u32 %v1245_v62, %v1243_v0  ;;  %11273 = vst [vmem:[#allocation44_spill] sm:$0xff] %v7072_v55  ;;  %v1285_v6 = vshrl.u32 %v7075_v22, 16  ;;  %v7093_v53 = vld [vmem:[%s6739_s7 + $0x1e8] sm:$0xff]   ;;  %v1274_v60 = vshrl.u32 %v7087_v19, 16 }
  0x6e   : > { %1525 = vrot.lane.b32.xlu0 %v7032_v50, %s6642_s8  ;;  %v1261_v35 = vshll.u32 %v7053_v13, 16  ;;  %v1265_v5 = vshrl.u32 %v7053_v13, 16  ;;  %v7067_v50 = vld [vmem:[%s6739_s7 + $0x1b8] sm:$0xff]   ;;  %v1239_v27 = vor.u32 %v1238_v26, %v1234_v54  ;;  %v1276_v51 = vshll.u32 %v7087_v19, 16 }
  0x6f   : > { %v1256_v31 = vshll.u32 %v7067_v50, 16  ;;  %v7090_v54 = vsel %vm812_vm0, %v1247_v25, %v1251_v1  ;;  %v7104_v25 = vld [vmem:[%s6739_s7 + $0x1f0] ss:$0 sps:$4 sm:$0x11]  }
  0x70   : > { %v1263_v62 = vrot.slane %v1261_v35, 1  ;;  %11274 = vst [vmem:[#allocation45_spill] sm:$0xff] %v7090_v54  ;;  %v7101_v42 = vsel %vm812_vm0, %v1239_v27, %v1243_v0 }
  0x71   : > { %1531 = vrot.lane.b32.xlu1 %v7042_v47, %s6642_s8  ;;  %v1254_v47 = vshrl.u32 %v7067_v50, 16  ;;  %v1258_v35 = vrot.slane %v1256_v31, 1  ;;  %11275 = vst [vmem:[#allocation46_spill] sm:$0xff] %v7101_v42  ;;  %v1301_v31 = vshll.u32 %v7093_v53, 16 }
  0x72   : > { %1529 = vrot.lane.b32.xlu0 %v7050_v38, %s6642_s8  ;;  %v1281_v38 = vshll.u32 %v7075_v22, 16  ;;  %v1267_v26 = vor.u32 %v1265_v5, %v1263_v62  ;;  %v1278_v5 = vrot.slane %v1276_v51, 1  ;;  %v1296_v51 = vshll.u32 %v7111_v29, 16 }
  0x73   : > { %v1259_v1 = vor.u32 %v1258_v35, %v1254_v47  ;;  %v1303_v27 = vrot.slane %v1301_v31, 1  ;;  %v1309_v35 = vshll.u32 %v7104_v25, 16 }
  0x74   : > { %v7114_v0 = vsel %vm812_vm0, %v1267_v26, %v1271_v36  ;;  %v1279_v15 = vor.u32 %v1278_v5, %v1274_v60  ;;  %v7125_v36 = vld [vmem:[%s6739_s7 + $0x1fc] sm:$0xff]   ;;  %v7128_v26 = vld [vmem:[%s6739_s7 + $0x204] ss:$0 sps:$4 sm:$0x11]   ;;  %v7145_v5 = vld [vmem:[%s6739_s7 + $0x208] sm:$0xff]  }
  0x75   : > { %1535 = vrot.lane.b32.xlu1 %v7061_v45, %s6642_s8  ;;  %v1283_v45 = vrot.slane %v1281_v38, 1  ;;  %v1291_v38 = vrot.slane %v1289_v3, 1  ;;  %11276 = vst [vmem:[#allocation47_spill] sm:$0xff] %v7114_v0  ;;  %v7122_v3 = vsel %vm812_vm0, %v1259_v1, %v1263_v62  ;;  %v1311_v8 = vrot.slane %v1309_v35, 1 }
  0x76   : > { %1533 = vrot.lane.b32.xlu0 %v7072_v55, %s6642_s8  ;;  %v1305_v55 = vshrl.u32 %v7093_v53, 16  ;;  %11277 = vst [vmem:[#allocation48_spill] sm:$0xff] %v7122_v3  ;;  %v1321_v60 = vshll.u32 %v7125_v36, 16  ;;  %v1325_v62 = vshrl.u32 %v7125_v36, 16  ;;  %v1329_v1 = vshll.u32 %v7128_v26, 16 }
  0x77   : > { %v1287_v47 = vor.u32 %v1285_v6, %v1283_v45  ;;  %v7131_v6 = vld [vmem:[%s6739_s7 + $0x1f4] sm:$0xff]  }
  0x78   : > { %v1307_v31 = vor.u32 %v1305_v55, %v1303_v27  ;;  %v1314_v55 = vshrl.u32 %v7131_v6, 16  ;;  %v1316_v35 = vshll.u32 %v7131_v6, 16  ;;  %v1331_v30 = vrot.slane %v1329_v1, 1 }
  0x79   : > { %1539 = vrot.lane.b32.xlu1 %v7090_v54, %s6642_s8  ;;  %v1294_v54 = vshrl.u32 %v7111_v29, 16  ;;  %v7139_v40 = vsel %vm812_vm0, %v1287_v47, %v1291_v38  ;;  %v1323_v47 = vrot.slane %v1321_v60, 1 }
  0x7a   : > { %1537 = vrot.lane.b32.xlu0 %v7101_v42, %s6642_s8  ;;  %v1298_v42 = vrot.slane %v1296_v51, 1  ;;  %11278 = vst [vmem:[#allocation49_spill] sm:$0xff] %v7139_v40  ;;  %v7152_v51 = vsel %vm812_vm0, %v1279_v15, %v1283_v45  ;;  %v1318_v21 = vrot.slane %v1316_v35, 1  ;;  %v1343_v15 = vrot.slane %v1341_v37, 1  ;;  %v7183_v35 = vld [vmem:[%s6739_s7 + $0x238] sm:$0xff]  }
  0x7b   : > { %11279 = vst [vmem:[#allocation50_spill] sm:$0xff] %v7152_v51  ;;  %v1327_v16 = vor.u32 %v1325_v62, %v1323_v47  ;;  %v1334_v37 = vshrl.u32 %v7145_v5, 16  ;;  %v7179_v62 = vld [vmem:[%s6739_s7 + $0x22c] ss:$0 sps:$4 sm:$0x11]  }
  0x7c   : > { %v1299_v38 = vor.u32 %v1298_v42, %v1294_v54  ;;  %v1345_v42 = vshrl.u32 %v7136_v61, 16  ;;  %v7166_v54 = vld [vmem:[%s6739_s7 + $0x224] sm:$0xff]   ;;  %v1319_v60 = vor.u32 %v1318_v21, %v1314_v55  ;;  %v1369_v57 = vshll.u32 %v7179_v62, 16 }
  0x7d   : > { %1543 = vrot.lane.b32.xlu1 %v7114_v0, %s6642_s8  ;;  %v7155_v0 = vld [vmem:[%s6739_s7 + $0x218] ss:$0 sps:$4 sm:$0x11]   ;;  %v1361_v1 = vshll.u32 %v7166_v54, 16  ;;  %v7188_v21 = vsel %vm812_vm0, %v1327_v16, %v1331_v30  ;;  %v1381_v30 = vshll.u32 %v7183_v35, 16 }
  0x7e   : > { %1541 = vrot.lane.b32.xlu0 %v7122_v3, %s6642_s8  ;;  %v7161_v3 = vsel %vm812_vm0, %v1307_v31, %v1311_v8  ;;  %v1349_v45 = vshll.u32 %v7155_v0, 16  ;;  %v7172_v8 = vld [vmem:[%s6739_s7 + $0x21c] sm:$0xff]   ;;  %v7175_v31 = vsel %vm812_vm0, %v1299_v38, %v1303_v27  ;;  %11282 = vst [vmem:[#allocation53_spill] sm:$0xff] %v7188_v21  ;;  %v1347_v4 = vor.u32 %v1345_v42, %v1343_v15 }
  0x7f   : > { %11280 = vst [vmem:[#allocation51_spill] sm:$0xff] %v7161_v3  ;;  %11281 = vst [vmem:[#allocation52_spill] sm:$0xff] %v7175_v31  ;;  %v1363_v27 = vrot.slane %v1361_v1, 1  ;;  %v1365_v38 = vshrl.u32 %v7166_v54, 16  ;;  %v7198_v41 = vsel %vm812_vm0, %v1319_v60, %v1323_v47  ;;  %v1356_v16 = vshll.u32 %v7172_v8, 16 }
  0x80   : > { %v1351_v55 = vrot.slane %v1349_v45, 1  ;;  %11283 = vst [vmem:[#allocation54_spill] sm:$0xff] %v7198_v41  ;;  %v1371_v42 = vrot.slane %v1369_v57, 1  ;;  %v1354_v45 = vshrl.u32 %v7172_v8, 16  ;;  %v1383_v47 = vrot.slane %v1381_v30, 1 }
  0x81   : > { %1547 = vrot.lane.b32.xlu1 %v7139_v40, %s6642_s8  ;;  %v1336_v40 = vshll.u32 %v7145_v5, 16  ;;  %v7204_v1 = vld [vmem:[%s6739_s7 + $0x240] ss:$0 sps:$4 sm:$0x11]   ;;  %v1367_v33 = vor.u32 %v1365_v38, %v1363_v27  ;;  %v1376_v57 = vshll.u32 %v7193_v52, 16 }
  0x82   : > { %1545 = vrot.lane.b32.xlu0 %v7152_v51, %s6642_s8  ;;  %v7210_v60 = vsel %vm812_vm0, %v1347_v4, %v1351_v55  ;;  %v1389_v23 = vshll.u32 %v7204_v1, 16  ;;  %v1374_v4 = vshrl.u32 %v7193_v52, 16 }
  0x83   : > { %v1338_v51 = vrot.slane %v1336_v40, 1  ;;  %11284 = vst [vmem:[#allocation55_spill] sm:$0xff] %v7210_v60  ;;  %v1378_v55 = vrot.slane %v1376_v57, 1  ;;  %v1396_v57 = vshll.u32 %v7231_v11, 16 }
  0x85   : > { %1551 = vrot.lane.b32.xlu1 %v7161_v3, %s6642_s8  ;;  %v1339_v40 = vor.u32 %v1338_v51, %v1334_v37  ;;  %v1385_v3 = vshrl.u32 %v7183_v35, 16  ;;  %v7217_v51 = vld [vmem:[%s6739_s7 + $0x24c] sm:$0xff]   ;;  %v7220_v37 = vld [vmem:[%s6739_s7 + $0x254] ss:$0 sps:$4 sm:$0x11]  }
  0x86   : > { %1549 = vrot.lane.b32.xlu0 %v7175_v31, %s6642_s8  ;;  %v1358_v31 = vrot.slane %v1356_v16, 1  ;;  %v1401_v18 = vshll.u32 %v7217_v51, 16 }
  0x87   : > { %v7223_v16 = vsel %vm812_vm0, %v1339_v40, %v1343_v15  ;;  %v1387_v38 = vor.u32 %v1385_v3, %v1383_v47  ;;  %v7234_v15 = vsel %vm812_vm0, %v1367_v33, %v1371_v42  ;;  %v7238_v40 = vld [vmem:[%s6739_s7 + $0x260] sm:$0xff]   ;;  %v1379_v33 = vor.u32 %v1378_v55, %v1374_v4  ;;  %v7248_v42 = vld [vmem:[%s6739_s7 + $0x268] ss:$0 sps:$4 sm:$0x11]  }
  0x88   : > { %11285 = vst [vmem:[#allocation56_spill] sm:$0xff] %v7223_v16  ;;  %v1359_v30 = vor.u32 %v1358_v31, %v1354_v45  ;;  %11287 = vst [vmem:[#allocation58_spill] sm:$0xff] %v7234_v15  ;;  %v1405_v31 = vshrl.u32 %v7217_v51, 16  ;;  %v1403_v3 = vrot.slane %v1401_v18, 1  ;;  %v1394_v45 = vshrl.u32 %v7231_v11, 16 }
  0x89   : > { %1555 = vrot.lane.b32.xlu1 %v7188_v21, %s6642_s8  ;;  %v1391_v21 = vrot.slane %v1389_v23, 1  ;;  %11288 = vst [vmem:[#allocation59_spill] sm:$0xff] %v7238_v40  ;;  %11290 = vst [vmem:[#allocation61_spill] sm:$0xff] %v7248_v42  ;;  %v1421_v63 = vshll.u32 %v7238_v40, 16  ;;  %v1425_v58 = vshrl.u32 %v7238_v40, 16  ;;  %v1429_v4 = vshll.u32 %v7248_v42, 16 }
  0x8a   : > { %1553 = vrot.lane.b32.xlu0 %v7198_v41, %s6642_s8  ;;  %v1409_v41 = vshll.u32 %v7220_v37, 16  ;;  %v1416_v55 = vshll.u32 %v7253_v49, 16 }
  0x8b   : > { %v7258_v18 = vsel %vm812_vm0, %v1387_v38, %v1391_v21  ;;  %v1414_v38 = vshrl.u32 %v7253_v49, 16 }
  0x8c   : > { %v1411_v23 = vrot.slane %v1409_v41, 1  ;;  %11291 = vst [vmem:[#allocation62_spill] sm:$0xff] %v7258_v18  ;;  %v1398_v41 = vrot.slane %v1396_v57, 1  ;;  %v1418_v57 = vrot.slane %v1416_v55, 1 }
  0x8d   : > { %1559 = vrot.lane.b32.xlu1 %v7210_v60, %s6642_s8  ;;  %v7245_v60 = vsel %vm812_vm0, %v1359_v30, %v1363_v27  ;;  %v1407_v27 = vor.u32 %v1405_v31, %v1403_v3  ;;  %v1423_v30 = vrot.slane %v1421_v63, 1  ;;  %v7276_v31 = vld [vmem:[%s6739_s7 + $0x26c] sm:$0xff]   ;;  %v1431_v63 = vrot.slane %v1429_v4, 1 }
  0x8e   : > { %1557 = vrot.lane.b32.xlu0 %v7223_v16, %s6642_s8  ;;  %11289 = vst [vmem:[#allocation60_spill] sm:$0xff] %v7245_v60  ;;  %v7261_v16 = vld [vmem:[%s6739_s7 + $0x274] sm:$0xff]   ;;  %v1399_v21 = vor.u32 %v1398_v41, %v1394_v45  ;;  %v1436_v45 = vshll.u32 %v7276_v31, 16  ;;  %v1434_v4 = vshrl.u32 %v7276_v31, 16 }
  0x8f   : > { %v1441_v28 = vshll.u32 %v7261_v16, 16  ;;  %v7282_v40 = vsel %vm812_vm0, %v1407_v27, %v1411_v23  ;;  %v1427_v11 = vor.u32 %v1425_v58, %v1423_v30 }
  0x90   : > { %11293 = vst [vmem:[#allocation64_spill] sm:$0xff] %v7282_v40  ;;  %v7291_v41 = vsel %vm812_vm0, %v1399_v21, %v1403_v3  ;;  %v1438_v23 = vrot.slane %v1436_v45, 1 }
  0x91   : > { %1563 = vrot.lane.b32.xlu1 %v7234_v15, %s6642_s8  ;;  %v7272_v15 = vsel %vm812_vm0, %v1379_v33, %v1383_v47  ;;  %v1443_v42 = vrot.slane %v1441_v28, 1  ;;  %v1449_v47 = vshll.u32 %v7268_v24, 16  ;;  %11295 = vst [vmem:[#allocation66_spill] sm:$0xff] %v7291_v41  ;;  %v1419_v28 = vor.u32 %v1418_v57, %v1414_v38 }
  0x92   : > { %1561 = vrot.lane.b32.xlu0 %v7245_v60, %s6642_s8  ;;  %11292 = vst [vmem:[#allocation63_spill] sm:$0xff] %v7272_v15  ;;  %v1445_v60 = vshrl.u32 %v7261_v16, 16  ;;  %v7299_v58 = vsel %vm812_vm0, %v1427_v11, %v1431_v63  ;;  %v1439_v38 = vor.u32 %v1438_v23, %v1434_v4  ;;  %v6394_v4 = vld [vmem:[%s6739_s7] sm:$0xff]  }
  0x93   : > { %11297 = vst [vmem:[#allocation68_spill] sm:$0xff] %v7299_v58  ;;  %v7306_v21 = vsel %vm812_vm0, %v1419_v28, %v1423_v30  ;;  %v1582_v23 = vrot.slane %v6394_v4, 1  ;;  %v7341_v4 = vld [vmem:[%s6739_s7 + $0x14] sm:$0xff]  }
  0x94   : > { %v1447_v55 = vor.u32 %v1445_v60, %v1443_v42  ;;  %11299 = vst [vmem:[#allocation70_spill] sm:$0xff] %v7306_v21  ;;  %v6392_v60 = vld [vmem:[%s6739_s7 + $0x8] sm:$0xff]   ;;  %v7322_v28 = vsel %vm812_vm0, %v1439_v38, %v1443_v42 }
  0x95   : > { %1567 = vrot.lane.b32.xlu1 %v7258_v18, %s6642_s8  ;;  %v1583_v63 = vrot.slane %v6392_v60, 1  ;;  %11303 = vst [vmem:[#allocation74_spill] sm:$0xff] %v7322_v28 }
  0x96   : > { %1565 = vrot.lane.b32.xlu0 %v7272_v15, %s6642_s8  ;;  %v1451_v15 = vrot.slane %v1449_v47, 1  ;;  %v6393_v47 = vld [vmem:[%s6739_s7 + $0x10] ss:$0 sps:$4 sm:$0x11]  }
  0x97   : > { %v7288_v33 = vpop.permute.xlu1 %1457  ;;  %v1585_v45 = vrot.slane %v6393_v47, 1  ;;  %v6396_v47 = vld [vmem:[%s6739_s7 + $0x24] ss:$0 sps:$4 sm:$0x11]   ;;  %v1584_v38 = vsel %vm1581_vm1, %v1582_v23, %v1583_v63 }
  0x98   : > { %11294 = vst [vmem:[#allocation65_spill] sm:$0xff] %v7288_v33  ;;  %v7294_v27 = vpop.permute.xlu0 %1453  ;;  %v7313_v11 = vsel %vm812_vm0, %v1447_v55, %v1451_v15  ;;  %v7331_v55 = vld [vmem:[%s6739_s7 + $0x1c] sm:$0xff]   ;;  %v7351_v33 = vld [vmem:[%s6739_s7 + $0x30] sm:$0xff]  }
  0x99   : > { %11296 = vst [vmem:[#allocation67_spill] sm:$0xff] %v7294_v27  ;;  %1571 = vrot.lane.b32.xlu1 %v7282_v40, %s6642_s8  ;;  %11301 = vst [vmem:[#allocation72_spill] sm:$0xff] %v7313_v11  ;;  %v1586_v15 = vsel %vm1581_vm1, %v1583_v63, %v1585_v45  ;;  %v1588_v60 = vrot.slane %v7331_v55, 1  ;;  %v7362_v27 = vld [vmem:[%s6739_s7 + $0x28] sm:$0xff]  }
  0x9a   : > { %1569 = vrot.lane.b32.xlu0 %v7291_v41, %s6642_s8 }
  0x9b   : > { %v7303_v3 = vpop.permute.xlu1 %1459 }
  0x9c   : > { %11298 = vst [vmem:[#allocation69_spill] sm:$0xff] %v7303_v3  ;;  %v7308_v57 = vpop.permute.xlu0 %1455 }
  0x9d   : > { %11300 = vst [vmem:[#allocation71_spill] sm:$0xff] %v7308_v57  ;;  %1575 = vrot.lane.b32.xlu1 %v7299_v58, %s6642_s8  ;;  %v6399_v57 = vld [vmem:[%s6739_s7 + $0x38] ss:$0 sps:$4 sm:$0x11]  }
  0x9e   : > { %1573 = vrot.lane.b32.xlu0 %v7306_v21, %s6642_s8  ;;  %v1595_v63 = vrot.slane %v6399_v57, 1 }
  0x9f   : > { %v7319_v30 = vpop.permute.xlu1 %1463 }
  0xa0   : > { %11302 = vst [vmem:[#allocation73_spill] sm:$0xff] %v7319_v30  ;;  %v7325_v3 = vpop.permute.xlu0 %1461  ;;  %v1590_v30 = vrot.slane %v6396_v47, 1 }
  0xa1   : > { %11304 = vst [vmem:[#allocation75_spill] sm:$0xff] %v7325_v3  ;;  %1579 = vrot.lane.b32.xlu1 %v7313_v11, %s6642_s8  ;;  %v1587_v3 = vrot.slane %v7341_v4, 1 }
  0xa2   : > { %1577 = vrot.lane.b32.xlu0 %v7322_v28, %s6642_s8  ;;  %v7348_v47 = vsel %vm1581_vm1, %v1588_v60, %v1590_v30 }
  0xa3   : > { %v7337_v42 = vpop.permute.xlu1 %1467  ;;  %11307 = vst [vmem:[#allocation78_spill] sm:$0xff] %v7348_v47 }
  0xa4   : > { %11305 = vst [vmem:[#allocation76_spill] sm:$0xff] %v7337_v42  ;;  %v7344_v45 = vpop.permute.xlu0 %1465  ;;  %v1593_v42 = vrot.slane %v7351_v33, 1 }
  0xa5   : > { %11306 = vst [vmem:[#allocation77_spill] sm:$0xff] %v7344_v45  ;;  %1744 = vrot.lane.b32.xlu1 %v1586_v15, %s6643_s9  ;;  %v7359_v45 = vsel %vm1581_vm1, %v1587_v3, %v1588_v60  ;;  %v1592_v15 = vrot.slane %v7362_v27, 1  ;;  %v6402_v3 = vld [vmem:[%s6739_s7 + $0x4c] ss:$0 sps:$4 sm:$0x11]  }
  0xa6   : > { %1742 = vrot.lane.b32.xlu0 %v1584_v38, %s6643_s9  ;;  %11309 = vst [vmem:[#allocation80_spill] sm:$0xff] %v7359_v45  ;;  %v7370_v57 = vsel %vm1581_vm1, %v1593_v42, %v1595_v63  ;;  %v7373_v38 = vld [vmem:[%s6739_s7 + $0x44] sm:$0xff]   ;;  %v1600_v60 = vrot.slane %v6402_v3, 1 }
  0xa7   : > { %v7356_v23 = vpop.permute.xlu1 %1471  ;;  %11311 = vst [vmem:[#allocation82_spill] sm:$0xff] %v7370_v57 }
  0xa8   : > { %11308 = vst [vmem:[#allocation79_spill] sm:$0xff] %v7356_v23  ;;  %v7365_v30 = vpop.permute.xlu0 %1469  ;;  %v1598_v23 = vrot.slane %v7373_v38, 1 }
  0xa9   : > { %11310 = vst [vmem:[#allocation81_spill] sm:$0xff] %v7365_v30  ;;  %1748 = vrot.lane.b32.xlu1 %v7348_v47, %s6643_s9  ;;  %v7382_v30 = vsel %vm1581_vm1, %v1592_v15, %v1593_v42  ;;  %v7385_v47 = vld [vmem:[%s6739_s7 + $0x3c] sm:$0xff]  }
  0xaa   : > { %1746 = vrot.lane.b32.xlu0 %v7359_v45, %s6643_s9  ;;  %11313 = vst [vmem:[#allocation84_spill] sm:$0xff] %v7382_v30  ;;  %v1597_v63 = vrot.slane %v7385_v47, 1  ;;  %v7393_v3 = vsel %vm1581_vm1, %v1598_v23, %v1600_v60  ;;  %v7396_v45 = vld [vmem:[%s6739_s7 + $0x58] sm:$0xff]   ;;  %v6405_v42 = vld [vmem:[%s6739_s7 + $0x60] ss:$0 sps:$4 sm:$0x11]  }
  0xab   : > { %v7379_v28 = vpop.permute.xlu1 %1475  ;;  %11315 = vst [vmem:[#allocation86_spill] sm:$0xff] %v7393_v3  ;;  %v1605_v15 = vrot.slane %v6405_v42, 1 }
  0xac   : > { %11312 = vst [vmem:[#allocation83_spill] sm:$0xff] %v7379_v28  ;;  %v7388_v11 = vpop.permute.xlu0 %1473  ;;  %v1603_v28 = vrot.slane %v7396_v45, 1 }
  0xad   : > { %11314 = vst [vmem:[#allocation85_spill] sm:$0xff] %v7388_v11  ;;  %1752 = vrot.lane.b32.xlu1 %v7370_v57, %s6643_s9  ;;  %v7405_v11 = vsel %vm1581_vm1, %v1597_v63, %v1598_v23  ;;  %v7408_v57 = vld [vmem:[%s6739_s7 + $0x50] sm:$0xff]  }
  0xae   : > { %1750 = vrot.lane.b32.xlu0 %v7382_v30, %s6643_s9  ;;  %11317 = vst [vmem:[#allocation88_spill] sm:$0xff] %v7405_v11  ;;  %v1602_v60 = vrot.slane %v7408_v57, 1  ;;  %v7416_v42 = vsel %vm1581_vm1, %v1603_v28, %v1605_v15  ;;  %v7419_v30 = vld [vmem:[%s6739_s7 + $0x6c] sm:$0xff]   ;;  %v6408_v23 = vld [vmem:[%s6739_s7 + $0x74] ss:$0 sps:$4 sm:$0x11]  }
  0xaf   : > { %v7402_v21 = vpop.permute.xlu1 %1479  ;;  %11319 = vst [vmem:[#allocation90_spill] sm:$0xff] %v7416_v42  ;;  %11320 = vst [vmem:[#allocation91_spill] sm:$0xff] %v7419_v30  ;;  %v1610_v63 = vrot.slane %v6408_v23, 1 }
  0xb0   : > { %11316 = vst [vmem:[#allocation87_spill] sm:$0xff] %v7402_v21  ;;  %v7411_v58 = vpop.permute.xlu0 %1477  ;;  %v1608_v21 = vrot.slane %v7419_v30, 1 }
  0xb1   : > { %11318 = vst [vmem:[#allocation89_spill] sm:$0xff] %v7411_v58  ;;  %1756 = vrot.lane.b32.xlu1 %v7393_v3, %s6643_s9  ;;  %v7428_v58 = vsel %vm1581_vm1, %v1602_v60, %v1603_v28  ;;  %v7431_v3 = vld [vmem:[%s6739_s7 + $0x64] sm:$0xff]  }
  0xb2   : > { %1754 = vrot.lane.b32.xlu0 %v7405_v11, %s6643_s9  ;;  %11322 = vst [vmem:[#allocation93_spill] sm:$0xff] %v7428_v58  ;;  %11323 = vst [vmem:[#allocation94_spill] sm:$0xff] %v7431_v3  ;;  %v1607_v15 = vrot.slane %v7431_v3, 1  ;;  %v7439_v23 = vsel %vm1581_vm1, %v1608_v21, %v1610_v63  ;;  %v7442_v11 = vld [vmem:[%s6739_s7 + $0x80] sm:$0xff]  }
  0xb3   : > { %v7425_v41 = vpop.permute.xlu1 %1483  ;;  %11325 = vst [vmem:[#allocation96_spill] sm:$0xff] %v7439_v23  ;;  %11326 = vst [vmem:[#allocation97_spill] sm:$0xff] %v7442_v11  ;;  %v6411_v28 = vld [vmem:[%s6739_s7 + $0x88] ss:$0 sps:$4 sm:$0x11]  }
  0xb4   : > { %11321 = vst [vmem:[#allocation92_spill] sm:$0xff] %v7425_v41  ;;  %v7434_v40 = vpop.permute.xlu0 %1481  ;;  %v1613_v41 = vrot.slane %v7442_v11, 1  ;;  %v1615_v60 = vrot.slane %v6411_v28, 1 }
  0xb5   : > { %11324 = vst [vmem:[#allocation95_spill] sm:$0xff] %v7434_v40  ;;  %1760 = vrot.lane.b32.xlu1 %v7416_v42, %s6643_s9  ;;  %v7451_v40 = vsel %vm1581_vm1, %v1607_v15, %v1608_v21  ;;  %v7454_v42 = vld [vmem:[%s6739_s7 + $0x78] sm:$0xff]  }
  0xb6   : > { %1758 = vrot.lane.b32.xlu0 %v7428_v58, %s6643_s9  ;;  %11328 = vst [vmem:[#allocation99_spill] sm:$0xff] %v7451_v40  ;;  %11329 = vst [vmem:[#allocation100_spill] sm:$0xff] %v7454_v42  ;;  %v1612_v63 = vrot.slane %v7454_v42, 1  ;;  %v7462_v28 = vsel %vm1581_vm1, %v1613_v41, %v1615_v60  ;;  %v7465_v58 = vld [vmem:[%s6739_s7 + $0x94] sm:$0xff]  }
  0xb7   : > { %v7448_v18 = vpop.permute.xlu1 %1487  ;;  %11331 = vst [vmem:[#allocation102_spill] sm:$0xff] %v7462_v28  ;;  %11332 = vst [vmem:[#allocation103_spill] sm:$0xff] %v7465_v58  ;;  %v6414_v21 = vld [vmem:[%s6739_s7 + $0x9c] ss:$0 sps:$4 sm:$0x11]  }
  0xb8   : > { %11327 = vst [vmem:[#allocation98_spill] sm:$0xff] %v7448_v18  ;;  %v7457_v3 = vpop.permute.xlu0 %1485  ;;  %v1618_v18 = vrot.slane %v7465_v58, 1  ;;  %v1620_v15 = vrot.slane %v6414_v21, 1 }
  0xb9   : > { %11330 = vst [vmem:[#allocation101_spill] sm:$0xff] %v7457_v3  ;;  %1764 = vrot.lane.b32.xlu1 %v7439_v23, %s6643_s9  ;;  %v7474_v3 = vsel %vm1581_vm1, %v1612_v63, %v1613_v41  ;;  %v7477_v23 = vld [vmem:[%s6739_s7 + $0x8c] sm:$0xff]  }
  0xba   : > { %1762 = vrot.lane.b32.xlu0 %v7451_v40, %s6643_s9  ;;  %11334 = vst [vmem:[#allocation105_spill] sm:$0xff] %v7474_v3  ;;  %11335 = vst [vmem:[#allocation106_spill] sm:$0xff] %v7477_v23  ;;  %v1617_v60 = vrot.slane %v7477_v23, 1  ;;  %v7485_v21 = vsel %vm1581_vm1, %v1618_v18, %v1620_v15  ;;  %v7488_v40 = vld [vmem:[%s6739_s7 + $0xa8] sm:$0xff]  }
  0xbb   : > { %v7471_v42 = vpop.permute.xlu1 %1491  ;;  %11337 = vst [vmem:[#allocation108_spill] sm:$0xff] %v7485_v21  ;;  %11338 = vst [vmem:[#allocation109_spill] sm:$0xff] %v7488_v40  ;;  %v6417_v41 = vld [vmem:[%s6739_s7 + $0xb0] ss:$0 sps:$4 sm:$0x11]  }
  0xbc   : > { %11333 = vst [vmem:[#allocation104_spill] sm:$0xff] %v7471_v42  ;;  %v7480_v11 = vpop.permute.xlu0 %1489  ;;  %v1623_v42 = vrot.slane %v7488_v40, 1  ;;  %v1625_v63 = vrot.slane %v6417_v41, 1 }
  0xbd   : > { %11336 = vst [vmem:[#allocation107_spill] sm:$0xff] %v7480_v11  ;;  %1768 = vrot.lane.b32.xlu1 %v7462_v28, %s6643_s9  ;;  %v7497_v11 = vsel %vm1581_vm1, %v1617_v60, %v1618_v18  ;;  %v7500_v28 = vld [vmem:[%s6739_s7 + $0xa0] sm:$0xff]  }
  0xbe   : > { %1766 = vrot.lane.b32.xlu0 %v7474_v3, %s6643_s9  ;;  %11340 = vst [vmem:[#allocation111_spill] sm:$0xff] %v7497_v11  ;;  %11341 = vst [vmem:[#allocation112_spill] sm:$0xff] %v7500_v28  ;;  %v1622_v15 = vrot.slane %v7500_v28, 1  ;;  %v7508_v41 = vsel %vm1581_vm1, %v1623_v42, %v1625_v63  ;;  %v7511_v3 = vld [vmem:[%s6739_s7 + $0xbc] sm:$0xff]  }
  0xbf   : > { %v7494_v23 = vpop.permute.xlu1 %1495  ;;  %11343 = vst [vmem:[#allocation114_spill] sm:$0xff] %v7508_v41  ;;  %11344 = vst [vmem:[#allocation115_spill] sm:$0xff] %v7511_v3  ;;  %v6420_v18 = vld [vmem:[%s6739_s7 + $0xc4] ss:$0 sps:$4 sm:$0x11]  }
  0xc0   : > { %11339 = vst [vmem:[#allocation110_spill] sm:$0xff] %v7494_v23  ;;  %v7503_v58 = vpop.permute.xlu0 %1493  ;;  %v1628_v23 = vrot.slane %v7511_v3, 1  ;;  %v1630_v60 = vrot.slane %v6420_v18, 1 }
  0xc1   : > { %11342 = vst [vmem:[#allocation113_spill] sm:$0xff] %v7503_v58  ;;  %1772 = vrot.lane.b32.xlu1 %v7485_v21, %s6643_s9  ;;  %v7520_v58 = vsel %vm1581_vm1, %v1622_v15, %v1623_v42  ;;  %v7523_v21 = vld [vmem:[%s6739_s7 + $0xb4] sm:$0xff]  }
  0xc2   : > { %1770 = vrot.lane.b32.xlu0 %v7497_v11, %s6643_s9  ;;  %11346 = vst [vmem:[#allocation117_spill] sm:$0xff] %v7520_v58  ;;  %11347 = vst [vmem:[#allocation118_spill] sm:$0xff] %v7523_v21  ;;  %v1627_v63 = vrot.slane %v7523_v21, 1  ;;  %v7531_v18 = vsel %vm1581_vm1, %v1628_v23, %v1630_v60  ;;  %v7534_v11 = vld [vmem:[%s6739_s7 + $0xd0] sm:$0xff]  }
  0xc3   : > { %v7517_v28 = vpop.permute.xlu1 %1499  ;;  %11349 = vst [vmem:[#allocation120_spill] sm:$0xff] %v7531_v18  ;;  %11350 = vst [vmem:[#allocation121_spill] sm:$0xff] %v7534_v11  ;;  %v6423_v42 = vld [vmem:[%s6739_s7 + $0xd8] ss:$0 sps:$4 sm:$0x11]  }
  0xc4   : > { %11345 = vst [vmem:[#allocation116_spill] sm:$0xff] %v7517_v28  ;;  %v7526_v40 = vpop.permute.xlu0 %1497  ;;  %v1633_v28 = vrot.slane %v7534_v11, 1  ;;  %v1635_v15 = vrot.slane %v6423_v42, 1 }
  0xc5   : > { %11348 = vst [vmem:[#allocation119_spill] sm:$0xff] %v7526_v40  ;;  %1776 = vrot.lane.b32.xlu1 %v7508_v41, %s6643_s9  ;;  %v7543_v40 = vsel %vm1581_vm1, %v1627_v63, %v1628_v23  ;;  %v7546_v41 = vld [vmem:[%s6739_s7 + $0xc8] sm:$0xff]  }
  0xc6   : > { %1774 = vrot.lane.b32.xlu0 %v7520_v58, %s6643_s9  ;;  %11352 = vst [vmem:[#allocation123_spill] sm:$0xff] %v7543_v40  ;;  %11353 = vst [vmem:[#allocation124_spill] sm:$0xff] %v7546_v41  ;;  %v1632_v60 = vrot.slane %v7546_v41, 1  ;;  %v7554_v42 = vsel %vm1581_vm1, %v1633_v28, %v1635_v15  ;;  %v7557_v58 = vld [vmem:[%s6739_s7 + $0xe4] sm:$0xff]  }
  0xc7   : > { %v7540_v21 = vpop.permute.xlu1 %1503  ;;  %11355 = vst [vmem:[#allocation126_spill] sm:$0xff] %v7554_v42  ;;  %11356 = vst [vmem:[#allocation127_spill] sm:$0xff] %v7557_v58  ;;  %v6426_v23 = vld [vmem:[%s6739_s7 + $0xec] ss:$0 sps:$4 sm:$0x11]  }
  0xc8   : > { %11351 = vst [vmem:[#allocation122_spill] sm:$0xff] %v7540_v21  ;;  %v7549_v3 = vpop.permute.xlu0 %1501  ;;  %v1638_v21 = vrot.slane %v7557_v58, 1  ;;  %v1640_v63 = vrot.slane %v6426_v23, 1 }
  0xc9   : > { %11354 = vst [vmem:[#allocation125_spill] sm:$0xff] %v7549_v3  ;;  %1780 = vrot.lane.b32.xlu1 %v7531_v18, %s6643_s9  ;;  %v7566_v3 = vsel %vm1581_vm1, %v1632_v60, %v1633_v28  ;;  %v7569_v18 = vld [vmem:[%s6739_s7 + $0xdc] sm:$0xff]  }
  0xca   : > { %1778 = vrot.lane.b32.xlu0 %v7543_v40, %s6643_s9  ;;  %11358 = vst [vmem:[#allocation129_spill] sm:$0xff] %v7566_v3  ;;  %11359 = vst [vmem:[#allocation130_spill] sm:$0xff] %v7569_v18  ;;  %v1637_v15 = vrot.slane %v7569_v18, 1  ;;  %v7577_v23 = vsel %vm1581_vm1, %v1638_v21, %v1640_v63  ;;  %v7580_v40 = vld [vmem:[%s6739_s7 + $0xf8] sm:$0xff]  }
  0xcb   : > { %v7563_v41 = vpop.permute.xlu1 %1507  ;;  %11361 = vst [vmem:[#allocation132_spill] sm:$0xff] %v7577_v23  ;;  %11362 = vst [vmem:[#allocation133_spill] sm:$0xff] %v7580_v40  ;;  %v6429_v28 = vld [vmem:[%s6739_s7 + $0x100] ss:$0 sps:$4 sm:$0x11]  }
  0xcc   : > { %11357 = vst [vmem:[#allocation128_spill] sm:$0xff] %v7563_v41  ;;  %v7572_v11 = vpop.permute.xlu0 %1505  ;;  %v1643_v41 = vrot.slane %v7580_v40, 1  ;;  %v1645_v60 = vrot.slane %v6429_v28, 1 }
  0xcd   : > { %11360 = vst [vmem:[#allocation131_spill] sm:$0xff] %v7572_v11  ;;  %1784 = vrot.lane.b32.xlu1 %v7554_v42, %s6643_s9  ;;  %v7589_v11 = vsel %vm1581_vm1, %v1637_v15, %v1638_v21  ;;  %v7592_v42 = vld [vmem:[%s6739_s7 + $0xf0] sm:$0xff]  }
  0xce   : > { %1782 = vrot.lane.b32.xlu0 %v7566_v3, %s6643_s9  ;;  %11364 = vst [vmem:[#allocation135_spill] sm:$0xff] %v7589_v11  ;;  %11365 = vst [vmem:[#allocation136_spill] sm:$0xff] %v7592_v42  ;;  %v1642_v63 = vrot.slane %v7592_v42, 1  ;;  %v7600_v28 = vsel %vm1581_vm1, %v1643_v41, %v1645_v60  ;;  %v7603_v3 = vld [vmem:[%s6739_s7 + $0x10c] sm:$0xff]  }
  0xcf   : > { %v7586_v18 = vpop.permute.xlu1 %1511  ;;  %11367 = vst [vmem:[#allocation138_spill] sm:$0xff] %v7600_v28  ;;  %11368 = vst [vmem:[#allocation139_spill] sm:$0xff] %v7603_v3  ;;  %v6432_v21 = vld [vmem:[%s6739_s7 + $0x114] ss:$0 sps:$4 sm:$0x11]  }
  0xd0   : > { %11363 = vst [vmem:[#allocation134_spill] sm:$0xff] %v7586_v18  ;;  %v7595_v58 = vpop.permute.xlu0 %1509  ;;  %v1648_v18 = vrot.slane %v7603_v3, 1  ;;  %v1650_v15 = vrot.slane %v6432_v21, 1 }
  0xd1   : > { %11366 = vst [vmem:[#allocation137_spill] sm:$0xff] %v7595_v58  ;;  %1788 = vrot.lane.b32.xlu1 %v7577_v23, %s6643_s9  ;;  %v7612_v58 = vsel %vm1581_vm1, %v1642_v63, %v1643_v41  ;;  %v7615_v23 = vld [vmem:[%s6739_s7 + $0x104] sm:$0xff]  }
  0xd2   : > { %1786 = vrot.lane.b32.xlu0 %v7589_v11, %s6643_s9  ;;  %11370 = vst [vmem:[#allocation141_spill] sm:$0xff] %v7612_v58  ;;  %11371 = vst [vmem:[#allocation142_spill] sm:$0xff] %v7615_v23  ;;  %v1647_v60 = vrot.slane %v7615_v23, 1  ;;  %v7623_v21 = vsel %vm1581_vm1, %v1648_v18, %v1650_v15  ;;  %v7626_v11 = vld [vmem:[%s6739_s7 + $0x120] sm:$0xff]  }
  0xd3   : > { %v7609_v42 = vpop.permute.xlu1 %1515  ;;  %11373 = vst [vmem:[#allocation144_spill] sm:$0xff] %v7623_v21  ;;  %11374 = vst [vmem:[#allocation145_spill] sm:$0xff] %v7626_v11  ;;  %v6435_v41 = vld [vmem:[%s6739_s7 + $0x128] ss:$0 sps:$4 sm:$0x11]  }
  0xd4   : > { %11369 = vst [vmem:[#allocation140_spill] sm:$0xff] %v7609_v42  ;;  %v7618_v40 = vpop.permute.xlu0 %1513  ;;  %v1653_v42 = vrot.slane %v7626_v11, 1  ;;  %v1655_v63 = vrot.slane %v6435_v41, 1 }
  0xd5   : > { %11372 = vst [vmem:[#allocation143_spill] sm:$0xff] %v7618_v40  ;;  %1792 = vrot.lane.b32.xlu1 %v7600_v28, %s6643_s9  ;;  %v7635_v40 = vsel %vm1581_vm1, %v1647_v60, %v1648_v18  ;;  %v7638_v28 = vld [vmem:[%s6739_s7 + $0x118] sm:$0xff]  }
  0xd6   : > { %1790 = vrot.lane.b32.xlu0 %v7612_v58, %s6643_s9  ;;  %11376 = vst [vmem:[#allocation147_spill] sm:$0xff] %v7635_v40  ;;  %11377 = vst [vmem:[#allocation148_spill] sm:$0xff] %v7638_v28  ;;  %v1652_v15 = vrot.slane %v7638_v28, 1  ;;  %v7646_v41 = vsel %vm1581_vm1, %v1653_v42, %v1655_v63  ;;  %v7649_v58 = vld [vmem:[%s6739_s7 + $0x134] sm:$0xff]  }
  0xd7   : > { %v7632_v23 = vpop.permute.xlu1 %1519  ;;  %11379 = vst [vmem:[#allocation150_spill] sm:$0xff] %v7646_v41  ;;  %11380 = vst [vmem:[#allocation151_spill] sm:$0xff] %v7649_v58  ;;  %v6438_v18 = vld [vmem:[%s6739_s7 + $0x13c] ss:$0 sps:$4 sm:$0x11]  }
  0xd8   : > { %11375 = vst [vmem:[#allocation146_spill] sm:$0xff] %v7632_v23  ;;  %v7641_v3 = vpop.permute.xlu0 %1517  ;;  %v1658_v23 = vrot.slane %v7649_v58, 1  ;;  %v1660_v60 = vrot.slane %v6438_v18, 1  ;;  %v7672_v58 = vld [vmem:[%s6739_s7 + $0x148] sm:$0xff]  }
  0xd9   : > { %11378 = vst [vmem:[#allocation149_spill] sm:$0xff] %v7641_v3  ;;  %1796 = vrot.lane.b32.xlu1 %v7623_v21, %s6643_s9  ;;  %v7658_v3 = vsel %vm1581_vm1, %v1652_v15, %v1653_v42  ;;  %v7661_v21 = vld [vmem:[%s6739_s7 + $0x12c] sm:$0xff]   ;;  %11385 = vst [vmem:[#allocation156_spill] sm:$0xff] %v7672_v58 }
  0xda   : > { %1794 = vrot.lane.b32.xlu0 %v7635_v40, %s6643_s9  ;;  %11382 = vst [vmem:[#allocation153_spill] sm:$0xff] %v7658_v3  ;;  %v1657_v63 = vrot.slane %v7661_v21, 1  ;;  %v7669_v18 = vsel %vm1581_vm1, %v1658_v23, %v1660_v60  ;;  %v1663_v40 = vrot.slane %v7672_v58, 1 }
  0xdb   : > { %v7655_v28 = vpop.permute.xlu1 %1523  ;;  %11384 = vst [vmem:[#allocation155_spill] sm:$0xff] %v7669_v18 }
  0xdc   : > { %11381 = vst [vmem:[#allocation152_spill] sm:$0xff] %v7655_v28  ;;  %v7664_v11 = vpop.permute.xlu0 %1521  ;;  %v6441_v28 = vld [vmem:[%s6739_s7 + $0x150] ss:$0 sps:$4 sm:$0x11]   ;;  %v7681_v15 = vsel %vm1581_vm1, %v1657_v63, %v1658_v23 }
  0xdd   : > { %11383 = vst [vmem:[#allocation154_spill] sm:$0xff] %v7664_v11  ;;  %1800 = vrot.lane.b32.xlu1 %v7646_v41, %s6643_s9  ;;  %v1665_v30 = vrot.slane %v6441_v28, 1  ;;  %11387 = vst [vmem:[#allocation158_spill] sm:$0xff] %v7681_v15  ;;  %v7684_v11 = vld [vmem:[%s6739_s7 + $0x140] sm:$0xff]   ;;  %v1668_v28 = vrot.slane %v6933_v44, 1  ;;  %v1673_v44 = vrot.slane %v6952_v59, 1 }
  0xde   : > { %1798 = vrot.lane.b32.xlu0 %v7658_v3, %s6643_s9  ;;  %v1662_v41 = vrot.slane %v7684_v11, 1  ;;  %v1670_v3 = vrot.slane %v6938_v46, 1  ;;  %v1675_v46 = vrot.slane %v6965_v9, 1  ;;  %v1678_v59 = vrot.slane %v6981_v32, 1 }
  0xdf   : > { %v7678_v42 = vpop.permute.xlu1 %1527  ;;  %v7692_v58 = vsel %vm1581_vm1, %v1663_v40, %v1665_v30  ;;  %v1680_v9 = vrot.slane %v6986_v39, 1  ;;  %v1683_v32 = vrot.slane %v7005_v7, 1  ;;  %v1685_v39 = vrot.slane %v7016_v17, 1 }
  0xe0   : > { %11386 = vst [vmem:[#allocation157_spill] sm:$0xff] %v7678_v42  ;;  %v7687_v60 = vpop.permute.xlu0 %1525  ;;  %11389 = vst [vmem:[#allocation160_spill] sm:$0xff] %v7692_v58  ;;  %v7701_v63 = vsel %vm1581_vm1, %v1662_v41, %v1663_v40  ;;  %v1667_v42 = vrot.slane %v6949_v56, 1  ;;  %v7709_v30 = vsel %vm1581_vm1, %v1668_v28, %v1670_v3  ;;  %v1672_v56 = vrot.slane %v6958_v2, 1 }
  0xe1   : > { %11388 = vst [vmem:[#allocation159_spill] sm:$0xff] %v7687_v60  ;;  %1804 = vrot.lane.b32.xlu1 %v7669_v18, %s6643_s9  ;;  %11391 = vst [vmem:[#allocation162_spill] sm:$0xff] %v7701_v63  ;;  %v7726_v3 = vsel %vm1581_vm1, %v1673_v44, %v1675_v46  ;;  %v1677_v2 = vrot.slane %v6989_v43, 1  ;;  %v7743_v46 = vsel %vm1581_vm1, %v1678_v59, %v1680_v9  ;;  %v1682_v43 = vrot.slane %v7008_v12, 1 }
  0xe2   : > { %1802 = vrot.lane.b32.xlu0 %v7681_v15, %s6643_s9  ;;  %11393 = vst [vmem:[#allocation164_spill] sm:$0xff] %v7709_v30  ;;  %v7718_v40 = vsel %vm1581_vm1, %v1667_v42, %v1668_v28  ;;  %v7735_v42 = vsel %vm1581_vm1, %v1672_v56, %v1673_v44  ;;  %v7760_v9 = vsel %vm1581_vm1, %v1683_v32, %v1685_v39  ;;  %v1688_v7 = vrot.slane %v7021_v34, 1 }
  0xe3   : > { %v7698_v23 = vpop.permute.xlu1 %1531  ;;  %11395 = vst [vmem:[#allocation166_spill] sm:$0xff] %v7718_v40  ;;  %v7752_v44 = vsel %vm1581_vm1, %v1677_v2, %v1678_v59  ;;  %v1690_v17 = vrot.slane %v7038_v10, 1  ;;  %v7769_v59 = vsel %vm1581_vm1, %v1682_v43, %v1683_v32  ;;  %v1687_v12 = vrot.slane %v7029_v48, 1 }
  0xe4   : > { %11390 = vst [vmem:[#allocation161_spill] sm:$0xff] %v7698_v23  ;;  %v7704_v60 = vpop.permute.xlu0 %1529  ;;  %v1693_v10 = vrot.slane %v7053_v13, 1  ;;  %v1695_v34 = vrot.slane %v7056_v14, 1  ;;  %v1692_v48 = vrot.slane %v7067_v50, 1  ;;  %v1698_v13 = vrot.slane %v7075_v22, 1 }
  0xe5   : > { %11392 = vst [vmem:[#allocation163_spill] sm:$0xff] %v7704_v60  ;;  %1808 = vrot.lane.b32.xlu1 %v7692_v58, %s6643_s9  ;;  %v7777_v39 = vsel %vm1581_vm1, %v1688_v7, %v1690_v17  ;;  %v7786_v32 = vsel %vm1581_vm1, %v1687_v12, %v1688_v7  ;;  %v1700_v14 = vrot.slane %v7082_v20, 1  ;;  %v1697_v50 = vrot.slane %v7087_v19, 1  ;;  %v6459_v60 = vld [vmem:[%s6739_s7 + $0x1fc] sm:$0xff]  }
  0xe6   : > { %1806 = vrot.lane.b32.xlu0 %v7701_v63, %s6643_s9  ;;  %v7794_v17 = vsel %vm1581_vm1, %v1693_v10, %v1695_v34  ;;  %v7803_v7 = vsel %vm1581_vm1, %v1692_v48, %v1693_v10  ;;  %v1703_v20 = vrot.slane %v7093_v53, 1  ;;  %v1705_v22 = vrot.slane %v7104_v25, 1 }
  0xe7   : > { %v7715_v23 = vpop.permute.xlu1 %1535  ;;  %v7811_v34 = vsel %vm1581_vm1, %v1698_v13, %v1700_v14  ;;  %v7820_v10 = vsel %vm1581_vm1, %v1697_v50, %v1698_v13  ;;  %v1702_v19 = vrot.slane %v7111_v29, 1  ;;  %v1708_v53 = vrot.slane %v7125_v36, 1 }
  0xe8   : > { %11394 = vst [vmem:[#allocation165_spill] sm:$0xff] %v7715_v23  ;;  %v7721_v41 = vpop.permute.xlu0 %1533  ;;  %v7828_v14 = vsel %vm1581_vm1, %v1703_v20, %v1705_v22  ;;  %v1710_v25 = vrot.slane %v7128_v26, 1  ;;  %v1707_v29 = vrot.slane %v7131_v6, 1  ;;  %v1713_v36 = vrot.slane %v7136_v61, 1 }
  0xe9   : > { %11396 = vst [vmem:[#allocation167_spill] sm:$0xff] %v7721_v41  ;;  %1812 = vrot.lane.b32.xlu1 %v7709_v30, %s6643_s9  ;;  %v7837_v13 = vsel %vm1581_vm1, %v1702_v19, %v1703_v20  ;;  %v1715_v26 = vrot.slane %v7155_v0, 1  ;;  %v1712_v6 = vrot.slane %v7145_v5, 1  ;;  %v1718_v61 = vrot.slane %v7166_v54, 1 }
  0xea   : > { %1810 = vrot.lane.b32.xlu0 %v7718_v40, %s6643_s9  ;;  %v7845_v22 = vsel %vm1581_vm1, %v1708_v53, %v1710_v25  ;;  %v7854_v20 = vsel %vm1581_vm1, %v1707_v29, %v1708_v53  ;;  %v1720_v0 = vrot.slane %v7179_v62, 1  ;;  %v1717_v5 = vrot.slane %v7172_v8, 1 }
  0xeb   : > { %v7732_v23 = vpop.permute.xlu1 %1539  ;;  %v7862_v25 = vsel %vm1581_vm1, %v1713_v36, %v1715_v26  ;;  %v7871_v53 = vsel %vm1581_vm1, %v1712_v6, %v1713_v36  ;;  %v1723_v54 = vrot.slane %v7183_v35, 1  ;;  %v1725_v62 = vrot.slane %v7204_v1, 1 }
  0xec   : > { %11397 = vst [vmem:[#allocation168_spill] sm:$0xff] %v7732_v23  ;;  %v7738_v28 = vpop.permute.xlu0 %1537  ;;  %11413 = vst [vmem:[#allocation184_spill] sm:$0xff] %v7862_v25  ;;  %v7879_v26 = vsel %vm1581_vm1, %v1718_v61, %v1720_v0  ;;  %v7888_v36 = vsel %vm1581_vm1, %v1717_v5, %v1718_v61  ;;  %v1722_v8 = vrot.slane %v7193_v52, 1  ;;  %v1728_v35 = vrot.slane %v7217_v51, 1  ;;  %v11424_v52 = vld [vmem:[#allocation57_spill] sm:$0xff] }
  0xed   : > { %11398 = vst [vmem:[#allocation169_spill] sm:$0xff] %v7738_v28  ;;  %1816 = vrot.lane.b32.xlu1 %v7726_v3, %s6643_s9  ;;  %11415 = vst [vmem:[#allocation186_spill] sm:$0xff] %v7871_v53  ;;  %v7896_v0 = vsel %vm1581_vm1, %v1723_v54, %v1725_v62  ;;  %v1730_v1 = vrot.slane %v7220_v37, 1  ;;  %v1727_v5 = vrot.slane %v11424_v52, 1 }
  0xee   : > { %1814 = vrot.lane.b32.xlu0 %v7735_v42, %s6643_s9  ;;  %11417 = vst [vmem:[#allocation188_spill] sm:$0xff] %v7879_v26  ;;  %11419 = vst [vmem:[#allocation190_spill] sm:$0xff] %v7888_v36  ;;  %v7905_v61 = vsel %vm1581_vm1, %v1722_v8, %v1723_v54  ;;  %v1732_v8 = vrot.slane %v7253_v49, 1 }
  0xef   : > { %v7749_v23 = vpop.permute.xlu1 %1543  ;;  %11421 = vst [vmem:[#allocation192_spill] sm:$0xff] %v7896_v0  ;;  %11423 = vst [vmem:[#allocation194_spill] sm:$0xff] %v7905_v61  ;;  %v7913_v62 = vsel %vm1581_vm1, %v1728_v35, %v1730_v1  ;;  %v7922_v54 = vsel %vm1581_vm1, %v1727_v5, %v1728_v35  ;;  %v1737_v5 = vrot.slane %v7276_v31, 1 }
  0xf0   : > { %11399 = vst [vmem:[#allocation170_spill] sm:$0xff] %v7749_v23  ;;  %v7755_v56 = vpop.permute.xlu0 %1541  ;;  %11426 = vst [vmem:[#allocation195_spill] sm:$0xff] %v7913_v62 }
  0xf1   : > { %11400 = vst [vmem:[#allocation171_spill] sm:$0xff] %v7755_v56  ;;  %1820 = vrot.lane.b32.xlu1 %v7743_v46, %s6643_s9 }
  0xf2   : > { %1818 = vrot.lane.b32.xlu0 %v7752_v44, %s6643_s9 }
  0xf3   : > { %v7766_v23 = vpop.permute.xlu1 %1547 }
  0xf4   : > { %11401 = vst [vmem:[#allocation172_spill] sm:$0xff] %v7766_v23  ;;  %v7772_v2 = vpop.permute.xlu0 %1545 }
  0xf5   : > { %11402 = vst [vmem:[#allocation173_spill] sm:$0xff] %v7772_v2  ;;  %1824 = vrot.lane.b32.xlu1 %v7760_v9, %s6643_s9 }
  0xf6   : > { %1822 = vrot.lane.b32.xlu0 %v7769_v59, %s6643_s9 }
  0xf7   : > { %v7783_v23 = vpop.permute.xlu1 %1551 }
  0xf8   : > { %11403 = vst [vmem:[#allocation174_spill] sm:$0xff] %v7783_v23  ;;  %v7789_v43 = vpop.permute.xlu0 %1549 }
  0xf9   : > { %11404 = vst [vmem:[#allocation175_spill] sm:$0xff] %v7789_v43  ;;  %1828 = vrot.lane.b32.xlu1 %v7777_v39, %s6643_s9 }
  0xfa   : > { %1826 = vrot.lane.b32.xlu0 %v7786_v32, %s6643_s9 }
  0xfb   : > { %v7800_v23 = vpop.permute.xlu1 %1555 }
  0xfc   : > { %11405 = vst [vmem:[#allocation176_spill] sm:$0xff] %v7800_v23  ;;  %v7806_v12 = vpop.permute.xlu0 %1553 }
  0xfd   : > { %11406 = vst [vmem:[#allocation177_spill] sm:$0xff] %v7806_v12  ;;  %1832 = vrot.lane.b32.xlu1 %v7794_v17, %s6643_s9 }
  0xfe   : > { %1830 = vrot.lane.b32.xlu0 %v7803_v7, %s6643_s9 }
  0xff   : > { %v7817_v23 = vpop.permute.xlu1 %1559 }
 0x100   : > { %11407 = vst [vmem:[#allocation178_spill] sm:$0xff] %v7817_v23  ;;  %v7823_v48 = vpop.permute.xlu0 %1557 }
 0x101   : > { %11408 = vst [vmem:[#allocation179_spill] sm:$0xff] %v7823_v48  ;;  %1836 = vrot.lane.b32.xlu1 %v7811_v34, %s6643_s9  ;;  %v1740_v48 = vrot.slane %v7268_v24, 1 }
 0x102   : > { %1834 = vrot.lane.b32.xlu0 %v7820_v10, %s6643_s9 }
 0x103   : > { %v7834_v23 = vpop.permute.xlu1 %1563 }
 0x104   : > { %11409 = vst [vmem:[#allocation180_spill] sm:$0xff] %v7834_v23  ;;  %v7840_v50 = vpop.permute.xlu0 %1561 }
 0x105   : > { %11410 = vst [vmem:[#allocation181_spill] sm:$0xff] %v7840_v50  ;;  %1840 = vrot.lane.b32.xlu1 %v7828_v14, %s6643_s9 }
 0x106   : > { %1838 = vrot.lane.b32.xlu0 %v7837_v13, %s6643_s9 }
 0x107   : > { %v7851_v23 = vpop.permute.xlu1 %1567 }
 0x108   : > { %11411 = vst [vmem:[#allocation182_spill] sm:$0xff] %v7851_v23  ;;  %v7857_v19 = vpop.permute.xlu0 %1565 }
 0x109   : > { %11412 = vst [vmem:[#allocation183_spill] sm:$0xff] %v7857_v19  ;;  %1844 = vrot.lane.b32.xlu1 %v7845_v22, %s6643_s9  ;;  %v11428_v19 = vld [vmem:[#allocation61_spill] sm:$0xff] }
 0x10a   : > { %1842 = vrot.lane.b32.xlu0 %v7854_v20, %s6643_s9  ;;  %v1735_v50 = vrot.slane %v11428_v19, 1  ;;  %11430 = vst [vmem:[#allocation61_spill] sm:$0xff] %v7922_v54  ;;  %v1738_v19 = vrot.slane %v7261_v16, 1 }
 0x10b   : > { %v7868_v23 = vpop.permute.xlu1 %1571 }
 0x10c   : > { %11414 = vst [vmem:[#allocation185_spill] sm:$0xff] %v7868_v23  ;;  %v7874_v29 = vpop.permute.xlu0 %1569  ;;  %v7954_v2 = vsel %vm1581_vm1, %v1737_v5, %v1738_v19 }
 0x10d   : > { %11416 = vst [vmem:[#allocation187_spill] sm:$0xff] %v7874_v29  ;;  %1848 = vrot.lane.b32.xlu1 %v7862_v25, %s6643_s9  ;;  %v11427_v29 = vld [vmem:[#allocation59_spill] sm:$0xff]  ;;  %11438 = vst [vmem:[#allocation203_spill] sm:$0xff] %v7954_v2 }
 0x10e   : > { %1846 = vrot.lane.b32.xlu0 %v7871_v53, %s6643_s9  ;;  %v1733_v37 = vrot.slane %v11427_v29, 1 }
 0x10f   : > { %v7885_v23 = vpop.permute.xlu1 %1575 }
 0x110   : > { %11418 = vst [vmem:[#allocation189_spill] sm:$0xff] %v7885_v23  ;;  %v7891_v6 = vpop.permute.xlu0 %1573  ;;  %v7930_v1 = vsel %vm1581_vm1, %v1733_v37, %v1735_v50  ;;  %v7939_v35 = vsel %vm1581_vm1, %v1732_v8, %v1733_v37  ;;  %v7947_v50 = vsel %vm1581_vm1, %v1738_v19, %v1740_v48 }
 0x111   : > { %11420 = vst [vmem:[#allocation191_spill] sm:$0xff] %v7891_v6  ;;  %1852 = vrot.lane.b32.xlu1 %v7879_v26, %s6643_s9  ;;  %11432 = vst [vmem:[#allocation197_spill] sm:$0xff] %v7930_v1 }
 0x112   : > { %1850 = vrot.lane.b32.xlu0 %v7888_v36, %s6643_s9  ;;  %11434 = vst [vmem:[#allocation199_spill] sm:$0xff] %v7939_v35  ;;  %11436 = vst [vmem:[#allocation201_spill] sm:$0xff] %v7947_v50 }
 0x113   : > { %v7902_v23 = vpop.permute.xlu1 %1579 }
 0x114   : > { %11422 = vst [vmem:[#allocation193_spill] sm:$0xff] %v7902_v23  ;;  %v7908_v6 = vpop.permute.xlu0 %1577 }
 0x115   : > { %11425 = vst [vmem:[#allocation57_spill] sm:$0xff] %v7908_v6  ;;  %1856 = vrot.lane.b32.xlu1 %v7896_v0, %s6643_s9  ;;  %v8122_v0 = vld [vmem:[%s6739_s7 + $0x17c] sm:$0xff]  }
 0x116   : > { %1854 = vrot.lane.b32.xlu0 %v7905_v61, %s6643_s9 }
 0x117   : > { %v7919_v23 = vpop.permute.xlu1 %1744 }
 0x118   : > { %11429 = vst [vmem:[#allocation59_spill] sm:$0xff] %v7919_v23  ;;  %v7925_v6 = vpop.permute.xlu0 %1742 }
 0x119   : > { %11431 = vst [vmem:[#allocation196_spill] sm:$0xff] %v7925_v6  ;;  %1860 = vrot.lane.b32.xlu1 %v7913_v62, %s6643_s9  ;;  %v11454_v62 = vld [vmem:[#allocation97_spill] sm:$0xff] }
 0x11a   : > { %1858 = vrot.lane.b32.xlu0 %v7922_v54, %s6643_s9 }
 0x11b   : > { %v7936_v12 = vpop.permute.xlu1 %1748 }
 0x11c   : > { %11433 = vst [vmem:[#allocation198_spill] sm:$0xff] %v7936_v12  ;;  %v7942_v43 = vpop.permute.xlu0 %1746  ;;  %v11558_v12 = vld [vmem:[#allocation18_spill] sm:$0xff] }
 0x11d   : > { %11435 = vst [vmem:[#allocation200_spill] sm:$0xff] %v7942_v43  ;;  %1864 = vrot.lane.b32.xlu1 %v7930_v1, %s6643_s9  ;;  %v11450_v1 = vld [vmem:[#allocation91_spill] sm:$0xff] }
 0x11e   : > { %1862 = vrot.lane.b32.xlu0 %v7939_v35, %s6643_s9 }
 0x11f   : > { %v7951_v24 = vpop.permute.xlu1 %1752 }
 0x120   : > { %11437 = vst [vmem:[#allocation202_spill] sm:$0xff] %v7951_v24  ;;  %v7956_v37 = vpop.permute.xlu0 %1750  ;;  %v11546_v24 = vld [vmem:[#allocation12_spill] sm:$0xff] }
 0x121   : > { %11439 = vst [vmem:[#allocation204_spill] sm:$0xff] %v7956_v37  ;;  %1868 = vrot.lane.b32.xlu1 %v7947_v50, %s6643_s9  ;;  %v11550_v37 = vld [vmem:[#allocation14_spill] sm:$0xff] }
 0x122   : > { %1866 = vrot.lane.b32.xlu0 %v7954_v2, %s6643_s9  ;;  %s10940_s9 = scalar_lea.sflag [#allocation3], %s212_s6 }
 0x123   : > { %v7962_v8 = vpop.permute.xlu1 %1756 }
 0x124   : > { %11440 = vst [vmem:[#allocation205_spill] sm:$0xff] %v7962_v8  ;;  %v7964_v48 = vpop.permute.xlu0 %1754  ;;  %v6461_v8 = vld [vmem:[%s6739_s7 + $0x210] sm:$0xff]  }
 0x125   : > { %11441 = vst [vmem:[#allocation206_spill] sm:$0xff] %v7964_v48  ;;  %1882 = vrot.lane.b32.xlu1 %v7331_v55, %s6644_s10  ;;  %v6462_v48 = vld [vmem:[%s6739_s7 + $0x208] sm:$0xff]  }
 0x126   : > { %1880 = vrot.lane.b32.xlu0 %v7341_v4, %s6644_s10 }
 0x127   : > { %v7970_v19 = vpop.permute.xlu1 %1760 }
 0x128   : > { %11442 = vst [vmem:[#allocation207_spill] sm:$0xff] %v7970_v19  ;;  %v7972_v5 = vpop.permute.xlu0 %1758 }
 0x129   : > { %11443 = vst [vmem:[#allocation208_spill] sm:$0xff] %v7972_v5  ;;  %1886 = vrot.lane.b32.xlu1 %v7351_v33, %s6644_s10 }
 0x12a   : > { %1884 = vrot.lane.b32.xlu0 %v7362_v27, %s6644_s10 }
 0x12b   : > { %v7978_v50 = vpop.permute.xlu1 %1764 }
 0x12c   : > { %11444 = vst [vmem:[#allocation209_spill] sm:$0xff] %v7978_v50  ;;  %v7980_v2 = vpop.permute.xlu0 %1762 }
 0x12d   : > { %11445 = vst [vmem:[#allocation210_spill] sm:$0xff] %v7980_v2  ;;  %1890 = vrot.lane.b32.xlu1 %v7373_v38, %s6644_s10  ;;  %v11451_v38 = vld [vmem:[#allocation94_spill] sm:$0xff] }
 0x12e   : > { %1888 = vrot.lane.b32.xlu0 %v7385_v47, %s6644_s10 }
 0x12f   : > { %v7986_v55 = vpop.permute.xlu1 %1768 }
 0x130   : > { %11446 = vst [vmem:[#allocation211_spill] sm:$0xff] %v7986_v55  ;;  %v7988_v4 = vpop.permute.xlu0 %1766  ;;  %v8103_v55 = vld [vmem:[%s6739_s7 + $0x170] sm:$0xff]  }
 0x131   : > { %11447 = vst [vmem:[#allocation212_spill] sm:$0xff] %v7988_v4  ;;  %1894 = vrot.lane.b32.xlu1 %v7396_v45, %s6644_s10  ;;  %v11455_v45 = vld [vmem:[#allocation100_spill] sm:$0xff] }
 0x132   : > { %1892 = vrot.lane.b32.xlu0 %v7408_v57, %s6644_s10  ;;  %v8117_v4 = vld [vmem:[%s6739_s7 + $0x184] sm:$0xff]  }
 0x133   : > { %v7994_v33 = vpop.permute.xlu1 %1772 }
 0x134   : > { %11448 = vst [vmem:[#allocation213_spill] sm:$0xff] %v7994_v33  ;;  %v7996_v27 = vpop.permute.xlu0 %1770 }
 0x135   : > { %11449 = vst [vmem:[#allocation214_spill] sm:$0xff] %v7996_v27  ;;  %1898 = vrot.lane.b32.xlu1 %v11450_v1, %s6644_s10  ;;  %v11458_v27 = vld [vmem:[#allocation103_spill] sm:$0xff]  ;;  %v11459_v1 = vld [vmem:[#allocation106_spill] sm:$0xff] }
 0x136   : > { %1896 = vrot.lane.b32.xlu0 %v11451_v38, %s6644_s10 }
 0x137   : > { %v8002_v47 = vpop.permute.xlu1 %1776 }
 0x138   : > { %11452 = vst [vmem:[#allocation91_spill] sm:$0xff] %v8002_v47  ;;  %v8004_v35 = vpop.permute.xlu0 %1774 }
 0x139   : > { %11453 = vst [vmem:[#allocation94_spill] sm:$0xff] %v8004_v35  ;;  %1902 = vrot.lane.b32.xlu1 %v11454_v62, %s6644_s10  ;;  %v11462_v35 = vld [vmem:[#allocation109_spill] sm:$0xff]  ;;  %v11463_v62 = vld [vmem:[#allocation112_spill] sm:$0xff] }
 0x13a   : > { %1900 = vrot.lane.b32.xlu0 %v11455_v45, %s6644_s10 }
 0x13b   : > { %v8010_v57 = vpop.permute.xlu1 %1780 }
 0x13c   : > { %11456 = vst [vmem:[#allocation97_spill] sm:$0xff] %v8010_v57  ;;  %v8012_v33 = vpop.permute.xlu0 %1778 }
 0x13d   : > { %11457 = vst [vmem:[#allocation100_spill] sm:$0xff] %v8012_v33  ;;  %1906 = vrot.lane.b32.xlu1 %v11458_v27, %s6644_s10  ;;  %v11466_v33 = vld [vmem:[#allocation115_spill] sm:$0xff]  ;;  %v11467_v27 = vld [vmem:[#allocation118_spill] sm:$0xff] }
 0x13e   : > { %1904 = vrot.lane.b32.xlu0 %v11459_v1, %s6644_s10 }
 0x13f   : > { %v8018_v38 = vpop.permute.xlu1 %1784 }
 0x140   : > { %11460 = vst [vmem:[#allocation103_spill] sm:$0xff] %v8018_v38  ;;  %v8020_v47 = vpop.permute.xlu0 %1782 }
 0x141   : > { %11461 = vst [vmem:[#allocation106_spill] sm:$0xff] %v8020_v47  ;;  %1910 = vrot.lane.b32.xlu1 %v11462_v35, %s6644_s10  ;;  %v11470_v47 = vld [vmem:[#allocation121_spill] sm:$0xff]  ;;  %v11471_v35 = vld [vmem:[#allocation124_spill] sm:$0xff] }
 0x142   : > { %1908 = vrot.lane.b32.xlu0 %v11463_v62, %s6644_s10 }
 0x143   : > { %v8026_v45 = vpop.permute.xlu1 %1788 }
 0x144   : > { %11464 = vst [vmem:[#allocation109_spill] sm:$0xff] %v8026_v45  ;;  %v8028_v57 = vpop.permute.xlu0 %1786 }
 0x145   : > { %11465 = vst [vmem:[#allocation112_spill] sm:$0xff] %v8028_v57  ;;  %1914 = vrot.lane.b32.xlu1 %v11466_v33, %s6644_s10  ;;  %v11474_v57 = vld [vmem:[#allocation127_spill] sm:$0xff]  ;;  %v11475_v33 = vld [vmem:[#allocation130_spill] sm:$0xff] }
 0x146   : > { %1912 = vrot.lane.b32.xlu0 %v11467_v27, %s6644_s10 }
 0x147   : > { %v8034_v1 = vpop.permute.xlu1 %1792 }
 0x148   : > { %11468 = vst [vmem:[#allocation115_spill] sm:$0xff] %v8034_v1  ;;  %v8036_v38 = vpop.permute.xlu0 %1790 }
 0x149   : > { %11469 = vst [vmem:[#allocation118_spill] sm:$0xff] %v8036_v38  ;;  %1918 = vrot.lane.b32.xlu1 %v11470_v47, %s6644_s10  ;;  %v11478_v38 = vld [vmem:[#allocation133_spill] sm:$0xff]  ;;  %v11479_v47 = vld [vmem:[#allocation136_spill] sm:$0xff] }
 0x14a   : > { %1916 = vrot.lane.b32.xlu0 %v11471_v35, %s6644_s10 }
 0x14b   : > { %v8042_v62 = vpop.permute.xlu1 %1796 }
 0x14c   : > { %11472 = vst [vmem:[#allocation121_spill] sm:$0xff] %v8042_v62  ;;  %v8044_v45 = vpop.permute.xlu0 %1794 }
 0x14d   : > { %11473 = vst [vmem:[#allocation124_spill] sm:$0xff] %v8044_v45  ;;  %1922 = vrot.lane.b32.xlu1 %v11474_v57, %s6644_s10  ;;  %v11482_v45 = vld [vmem:[#allocation139_spill] sm:$0xff]  ;;  %v11483_v57 = vld [vmem:[#allocation142_spill] sm:$0xff] }
 0x14e   : > { %1920 = vrot.lane.b32.xlu0 %v11475_v33, %s6644_s10 }
 0x14f   : > { %v8050_v27 = vpop.permute.xlu1 %1800 }
 0x150   : > { %11476 = vst [vmem:[#allocation127_spill] sm:$0xff] %v8050_v27  ;;  %v8052_v1 = vpop.permute.xlu0 %1798 }
 0x151   : > { %11477 = vst [vmem:[#allocation130_spill] sm:$0xff] %v8052_v1  ;;  %1926 = vrot.lane.b32.xlu1 %v11478_v38, %s6644_s10  ;;  %v11486_v38 = vld [vmem:[#allocation145_spill] sm:$0xff] }
 0x152   : > { %1924 = vrot.lane.b32.xlu0 %v11479_v47, %s6644_s10  ;;  %v11487_v47 = vld [vmem:[#allocation148_spill] sm:$0xff] }
 0x153   : > { %v8058_v35 = vpop.permute.xlu1 %1804 }
 0x154   : > { %11480 = vst [vmem:[#allocation133_spill] sm:$0xff] %v8058_v35  ;;  %v8060_v62 = vpop.permute.xlu0 %1802 }
 0x155   : > { %11481 = vst [vmem:[#allocation136_spill] sm:$0xff] %v8060_v62  ;;  %1930 = vrot.lane.b32.xlu1 %v11482_v45, %s6644_s10  ;;  %v11490_v45 = vld [vmem:[#allocation151_spill] sm:$0xff] }
 0x156   : > { %1928 = vrot.lane.b32.xlu0 %v11483_v57, %s6644_s10 }
 0x157   : > { %v8066_v33 = vpop.permute.xlu1 %1808 }
 0x158   : > { %11484 = vst [vmem:[#allocation139_spill] sm:$0xff] %v8066_v33  ;;  %v8068_v27 = vpop.permute.xlu0 %1806  ;;  %v11566_v33 = vld [vmem:[#allocation22_spill] sm:$0xff] }
 0x159   : > { %11485 = vst [vmem:[#allocation142_spill] sm:$0xff] %v8068_v27  ;;  %1934 = vrot.lane.b32.xlu1 %v11486_v38, %s6644_s10  ;;  %v11493_v38 = vld [vmem:[#allocation156_spill] sm:$0xff] }
 0x15a   : > { %1932 = vrot.lane.b32.xlu0 %v11487_v47, %s6644_s10  ;;  %v11610_v27 = vld [vmem:[#allocation44_spill] sm:$0xff] }
 0x15b   : > { %v8074_v35 = vpop.permute.xlu1 %1812 }
 0x15c   : > { %11488 = vst [vmem:[#allocation145_spill] sm:$0xff] %v8074_v35  ;;  %v8076_v62 = vpop.permute.xlu0 %1810 }
 0x15d   : > { %11489 = vst [vmem:[#allocation148_spill] sm:$0xff] %v8076_v62  ;;  %1938 = vrot.lane.b32.xlu1 %v11490_v45, %s6644_s10  ;;  %v6443_v45 = vld [vmem:[%s6739_s7 + $0x15c] sm:$0xff]   ;;  %v11554_v62 = vld [vmem:[#allocation16_spill] sm:$0xff] }
 0x15e   : > { %1936 = vrot.lane.b32.xlu0 %v7661_v21, %s6644_s10  ;;  %v6444_v21 = vld [vmem:[%s6739_s7 + $0x154] sm:$0xff]  }
 0x15f   : > { %v8082_v57 = vpop.permute.xlu1 %1816 }
 0x160   : > { %11491 = vst [vmem:[#allocation151_spill] sm:$0xff] %v8082_v57  ;;  %v8084_v1 = vpop.permute.xlu0 %1814  ;;  %v6464_v57 = vld [vmem:[%s6739_s7 + $0x21c] sm:$0xff]  }
 0x161   : > { %11492 = vst [vmem:[#allocation215_spill] sm:$0xff] %v8084_v1  ;;  %1942 = vrot.lane.b32.xlu1 %v11493_v38, %s6644_s10  ;;  %v11538_v1 = vld [vmem:[#allocation8_spill] sm:$0xff] }
 0x162   : > { %1940 = vrot.lane.b32.xlu0 %v7684_v11, %s6644_s10  ;;  %v8108_v11 = vld [vmem:[%s6739_s7 + $0x168] sm:$0xff]  }
 0x163   : > { %v8090_v47 = vpop.permute.xlu1 %1820 }
 0x164   : > { %11494 = vst [vmem:[#allocation156_spill] sm:$0xff] %v8090_v47  ;;  %v8092_v54 = vpop.permute.xlu0 %1818 }
 0x165   : > { %11495 = vst [vmem:[#allocation216_spill] sm:$0xff] %v8092_v54  ;;  %1946 = vrot.lane.b32.xlu1 %v6443_v45, %s6644_s10 }
 0x166   : > { %1944 = vrot.lane.b32.xlu0 %v6444_v21, %s6644_s10 }
 0x167   : > { %v8098_v56 = vpop.permute.xlu1 %1824 }
 0x168   : > { %11496 = vst [vmem:[#allocation217_spill] sm:$0xff] %v8098_v56  ;;  %v8100_v38 = vpop.permute.xlu0 %1822 }
 0x169   : > { %11497 = vst [vmem:[#allocation218_spill] sm:$0xff] %v8100_v38  ;;  %1950 = vrot.lane.b32.xlu1 %v8103_v55, %s6644_s10 }
 0x16a   : > { %1948 = vrot.lane.b32.xlu0 %v8108_v11, %s6644_s10 }
 0x16b   : > { %v8112_v45 = vpop.permute.xlu1 %1828 }
 0x16c   : > { %11498 = vst [vmem:[#allocation219_spill] sm:$0xff] %v8112_v45  ;;  %v8114_v21 = vpop.permute.xlu0 %1826  ;;  %v8131_v45 = vld [vmem:[%s6739_s7 + $0x198] sm:$0xff]  }
 0x16d   : > { %11499 = vst [vmem:[#allocation220_spill] sm:$0xff] %v8114_v21  ;;  %1954 = vrot.lane.b32.xlu1 %v8117_v4, %s6644_s10  ;;  %v8136_v21 = vld [vmem:[%s6739_s7 + $0x190] sm:$0xff]  }
 0x16e   : > { %1952 = vrot.lane.b32.xlu0 %v8122_v0, %s6644_s10 }
 0x16f   : > { %v8126_v61 = vpop.permute.xlu1 %1832 }
 0x170   : > { %11500 = vst [vmem:[#allocation221_spill] sm:$0xff] %v8126_v61  ;;  %v8128_v28 = vpop.permute.xlu0 %1830  ;;  %v8145_v61 = vld [vmem:[%s6739_s7 + $0x1ac] sm:$0xff]  }
 0x171   : > { %11501 = vst [vmem:[#allocation222_spill] sm:$0xff] %v8128_v28  ;;  %1958 = vrot.lane.b32.xlu1 %v8131_v45, %s6644_s10  ;;  %v8150_v28 = vld [vmem:[%s6739_s7 + $0x1a4] sm:$0xff]  }
 0x172   : > { %1956 = vrot.lane.b32.xlu0 %v8136_v21, %s6644_s10 }
 0x173   : > { %v8140_v50 = vpop.permute.xlu1 %1836 }
 0x174   : > { %11502 = vst [vmem:[#allocation223_spill] sm:$0xff] %v8140_v50  ;;  %v8142_v2 = vpop.permute.xlu0 %1834  ;;  %v8159_v50 = vld [vmem:[%s6739_s7 + $0x1c0] sm:$0xff]  }
 0x175   : > { %11503 = vst [vmem:[#allocation224_spill] sm:$0xff] %v8142_v2  ;;  %1962 = vrot.lane.b32.xlu1 %v8145_v61, %s6644_s10  ;;  %11506 = vst [vmem:[#allocation227_spill] sm:$0xff] %v8159_v50  ;;  %v8164_v2 = vld [vmem:[%s6739_s7 + $0x1b8] sm:$0xff]  }
 0x176   : > { %1960 = vrot.lane.b32.xlu0 %v8150_v28, %s6644_s10  ;;  %11507 = vst [vmem:[#allocation228_spill] sm:$0xff] %v8164_v2 }
 0x177   : > { %v8154_v26 = vpop.permute.xlu1 %1840 }
 0x178   : > { %11504 = vst [vmem:[#allocation225_spill] sm:$0xff] %v8154_v26  ;;  %v8156_v56 = vpop.permute.xlu0 %1838  ;;  %v8173_v26 = vld [vmem:[%s6739_s7 + $0x1d4] sm:$0xff]  }
 0x179   : > { %11505 = vst [vmem:[#allocation226_spill] sm:$0xff] %v8156_v56  ;;  %1966 = vrot.lane.b32.xlu1 %v8159_v50, %s6644_s10  ;;  %11510 = vst [vmem:[#allocation231_spill] sm:$0xff] %v8173_v26  ;;  %v8178_v56 = vld [vmem:[%s6739_s7 + $0x1cc] sm:$0xff]  }
 0x17a   : > { %1964 = vrot.lane.b32.xlu0 %v8164_v2, %s6644_s10  ;;  %11511 = vst [vmem:[#allocation232_spill] sm:$0xff] %v8178_v56 }
 0x17b   : > { %v8168_v38 = vpop.permute.xlu1 %1844 }
 0x17c   : > { %11508 = vst [vmem:[#allocation229_spill] sm:$0xff] %v8168_v38  ;;  %v8170_v41 = vpop.permute.xlu0 %1842  ;;  %v6457_v38 = vld [vmem:[%s6739_s7 + $0x1e8] sm:$0xff]  }
 0x17d   : > { %11509 = vst [vmem:[#allocation230_spill] sm:$0xff] %v8170_v41  ;;  %1970 = vrot.lane.b32.xlu1 %v8173_v26, %s6644_s10  ;;  %v8189_v41 = vld [vmem:[%s6739_s7 + $0x1e0] sm:$0xff]  }
 0x17e   : > { %1968 = vrot.lane.b32.xlu0 %v8178_v56, %s6644_s10  ;;  %11514 = vst [vmem:[#allocation235_spill] sm:$0xff] %v8189_v41 }
 0x17f   : > { %v8182_v19 = vpop.permute.xlu1 %1848 }
 0x180   : > { %11512 = vst [vmem:[#allocation233_spill] sm:$0xff] %v8182_v19  ;;  %v8184_v5 = vpop.permute.xlu0 %1846  ;;  %v6460_v19 = vld [vmem:[%s6739_s7 + $0x1f4] sm:$0xff]  }
 0x181   : > { %11513 = vst [vmem:[#allocation234_spill] sm:$0xff] %v8184_v5  ;;  %1974 = vrot.lane.b32.xlu1 %v6457_v38, %s6644_s10 }
 0x182   : > { %1972 = vrot.lane.b32.xlu0 %v8189_v41, %s6644_s10 }
 0x183   : > { %v8193_v47 = vpop.permute.xlu1 %1852 }
 0x184   : > { %11515 = vst [vmem:[#allocation236_spill] sm:$0xff] %v8193_v47  ;;  %v8195_v54 = vpop.permute.xlu0 %1850 }
 0x185   : > { %11516 = vst [vmem:[#allocation237_spill] sm:$0xff] %v8195_v54  ;;  %1978 = vrot.lane.b32.xlu1 %v6459_v60, %s6644_s10  ;;  %v6463_v60 = vld [vmem:[%s6739_s7 + $0x224] sm:$0xff]  }
 0x186   : > { %1976 = vrot.lane.b32.xlu0 %v6460_v19, %s6644_s10 }
 0x187   : > { %v8201_v5 = vpop.permute.xlu1 %1856 }
 0x188   : > { %11517 = vst [vmem:[#allocation238_spill] sm:$0xff] %v8201_v5  ;;  %v8203_v38 = vpop.permute.xlu0 %1854 }
 0x189   : > { %11518 = vst [vmem:[#allocation239_spill] sm:$0xff] %v8203_v38  ;;  %1982 = vrot.lane.b32.xlu1 %v6461_v8, %s6644_s10  ;;  %v6465_v38 = vld [vmem:[%s6739_s7 + $0x238] sm:$0xff]   ;;  %v6466_v8 = vld [vmem:[%s6739_s7 + $0x230] sm:$0xff]  }
 0x18a   : > { %1980 = vrot.lane.b32.xlu0 %v6462_v48, %s6644_s10 }
 0x18b   : > { %v8209_v47 = vpop.permute.xlu1 %1860 }
 0x18c   : > { %11519 = vst [vmem:[#allocation240_spill] sm:$0xff] %v8209_v47  ;;  %v8211_v54 = vpop.permute.xlu0 %1858 }
 0x18d   : > { %11520 = vst [vmem:[#allocation241_spill] sm:$0xff] %v8211_v54  ;;  %1986 = vrot.lane.b32.xlu1 %v6463_v60, %s6644_s10  ;;  %v11537_v54 = vld [vmem:[#allocation7_spill] sm:$0xff] }
 0x18e   : > { %1984 = vrot.lane.b32.xlu0 %v6464_v57, %s6644_s10 }
 0x18f   : > { %v8217_v19 = vpop.permute.xlu1 %1864 }
 0x190   : > { %11521 = vst [vmem:[#allocation242_spill] sm:$0xff] %v8217_v19  ;;  %v8219_v5 = vpop.permute.xlu0 %1862 }
 0x191   : > { %11522 = vst [vmem:[#allocation243_spill] sm:$0xff] %v8219_v5  ;;  %1990 = vrot.lane.b32.xlu1 %v6465_v38, %s6644_s10 }
 0x192   : > { %1988 = vrot.lane.b32.xlu0 %v6466_v8, %s6644_s10 }
 0x193   : > { %v8225_v48 = vpop.permute.xlu1 %1868 }
 0x194   : > { %11523 = vst [vmem:[#allocation244_spill] sm:$0xff] %v8225_v48  ;;  %v8227_v47 = vpop.permute.xlu0 %1866  ;;  %v8255_v48 = vld [vmem:[%s6739_s7 + $0x280] sm:$0xff]  }
 0x195   : > { %11524 = vst [vmem:[#allocation245_spill] sm:$0xff] %v8227_v47  ;;  %1994 = vrot.lane.b32.xlu1 %v7217_v51, %s6644_s10  ;;  %v8248_v51 = vld [vmem:[%s6739_s7 + $0x288] sm:$0xff]   ;;  %v11533_v47 = vld [vmem:[#allocation6_spill] sm:$0xff] }
 0x196   : > { %1992 = vrot.lane.b32.xlu0 %v11424_v52, %s6644_s10 }
 0x197   : > { %v8233_v57 = vpop.permute.xlu1 %1882 }
 0x198   : > { %11525 = vst [vmem:[#allocation246_spill] sm:$0xff] %v8233_v57  ;;  %v8235_v60 = vpop.permute.xlu0 %1880  ;;  %v11614_v57 = vld [vmem:[#allocation46_spill] sm:$0xff] }
 0x199   : > { %11526 = vst [vmem:[#allocation247_spill] sm:$0xff] %v8235_v60  ;;  %1998 = vrot.lane.b32.xlu1 %v11427_v29, %s6644_s10  ;;  %v11622_v60 = vld [vmem:[#allocation50_spill] sm:$0xff] }
 0x19a   : > { %1996 = vrot.lane.b32.xlu0 %v7253_v49, %s6644_s10 }
 0x19b   : > { %v8241_v38 = vpop.permute.xlu1 %1886 }
 0x19c   : > { %11527 = vst [vmem:[#allocation248_spill] sm:$0xff] %v8241_v38  ;;  %v8243_v8 = vpop.permute.xlu0 %1884 }
 0x19d   : > { %11528 = vst [vmem:[#allocation249_spill] sm:$0xff] %v8243_v8  ;;  %2002 = vrot.lane.b32.xlu1 %v7261_v16, %s6644_s10  ;;  %v11562_v8 = vld [vmem:[#allocation20_spill] sm:$0xff] }
 0x19e   : > { %2000 = vrot.lane.b32.xlu0 %v7276_v31, %s6644_s10  ;;  %v11534_v31 = vld [vmem:[#allocation5_spill] sm:$0xff] }
 0x19f   : > { %v8252_v52 = vpop.permute.xlu1 %1890 }
 0x1a0   : > { %11529 = vst [vmem:[#allocation250_spill] sm:$0xff] %v8252_v52  ;;  %v8257_v29 = vpop.permute.xlu0 %1888  ;;  %v11541_v52 = vld [vmem:[#allocation9_spill] sm:$0xff] }
 0x1a1   : > { %11530 = vst [vmem:[#allocation251_spill] sm:$0xff] %v8257_v29  ;;  %2006 = vrot.lane.b32.xlu1 %v8248_v51, %s6644_s10 }
 0x1a2   : > { %2004 = vrot.lane.b32.xlu0 %v8255_v48, %s6644_s10  ;;  %s9884_s10 = sshll.u32 %s212_s6, 9 }
 0x1a3   : > { %v8263_v49 = vpop.permute.xlu1 %1894 }
 0x1a4   : > { %11531 = vst [vmem:[#allocation252_spill] sm:$0xff] %v8263_v49  ;;  %v8265_v16 = vpop.permute.xlu0 %1892 }
 0x1a5   : > { %11532 = vst [vmem:[#allocation253_spill] sm:$0xff] %v8265_v16  ;;  %2033 = vrot.lane.b32.xlu1 %v11533_v47, %s6645_s11  ;;  %v11542_v47 = vld [vmem:[#allocation10_spill] sm:$0xff] }
 0x1a6   : > { %2031 = vrot.lane.b32.xlu0 %v11534_v31, %s6645_s11 }
 0x1a7   : > { %v8271_v19 = vpop.permute.xlu1 %1898 }
 0x1a8   : > { %11535 = vst [vmem:[#allocation6_spill] sm:$0xff] %v8271_v19  ;;  %v8273_v5 = vpop.permute.xlu0 %1896 }
 0x1a9   : > { %11536 = vst [vmem:[#allocation5_spill] sm:$0xff] %v8273_v5  ;;  %2037 = vrot.lane.b32.xlu1 %v11537_v54, %s6645_s11  ;;  %v11545_v5 = vld [vmem:[#allocation11_spill] sm:$0xff] }
 0x1aa   : > { %2035 = vrot.lane.b32.xlu0 %v11538_v1, %s6645_s11 }
 0x1ab   : > { %v8279_v49 = vpop.permute.xlu1 %1902 }
 0x1ac   : > { %11539 = vst [vmem:[#allocation7_spill] sm:$0xff] %v8279_v49  ;;  %v8281_v16 = vpop.permute.xlu0 %1900 }
 0x1ad   : > { %11540 = vst [vmem:[#allocation8_spill] sm:$0xff] %v8281_v16  ;;  %2041 = vrot.lane.b32.xlu1 %v11541_v52, %s6645_s11  ;;  %v11549_v16 = vld [vmem:[#allocation13_spill] sm:$0xff] }
 0x1ae   : > { %2039 = vrot.lane.b32.xlu0 %v11542_v47, %s6645_s11 }
 0x1af   : > { %v8287_v31 = vpop.permute.xlu1 %1906 }
 0x1b0   : > { %11543 = vst [vmem:[#allocation9_spill] sm:$0xff] %v8287_v31  ;;  %v8289_v19 = vpop.permute.xlu0 %1904 }
 0x1b1   : > { %11544 = vst [vmem:[#allocation10_spill] sm:$0xff] %v8289_v19  ;;  %2045 = vrot.lane.b32.xlu1 %v11545_v5, %s6645_s11  ;;  %v11553_v19 = vld [vmem:[#allocation15_spill] sm:$0xff] }
 0x1b2   : > { %2043 = vrot.lane.b32.xlu0 %v11546_v24, %s6645_s11 }
 0x1b3   : > { %v8295_v29 = vpop.permute.xlu1 %1910 }
 0x1b4   : > { %11547 = vst [vmem:[#allocation11_spill] sm:$0xff] %v8295_v29  ;;  %v8297_v49 = vpop.permute.xlu0 %1908 }
 0x1b5   : > { %11548 = vst [vmem:[#allocation12_spill] sm:$0xff] %v8297_v49  ;;  %2049 = vrot.lane.b32.xlu1 %v11549_v16, %s6645_s11  ;;  %v11557_v49 = vld [vmem:[#allocation17_spill] sm:$0xff] }
 0x1b6   : > { %2047 = vrot.lane.b32.xlu0 %v11550_v37, %s6645_s11 }
 0x1b7   : > { %v8303_v35 = vpop.permute.xlu1 %1914 }
 0x1b8   : > { %11551 = vst [vmem:[#allocation13_spill] sm:$0xff] %v8303_v35  ;;  %v8305_v31 = vpop.permute.xlu0 %1912 }
 0x1b9   : > { %11552 = vst [vmem:[#allocation14_spill] sm:$0xff] %v8305_v31  ;;  %2053 = vrot.lane.b32.xlu1 %v11553_v19, %s6645_s11  ;;  %v11561_v31 = vld [vmem:[#allocation19_spill] sm:$0xff] }
 0x1ba   : > { %2051 = vrot.lane.b32.xlu0 %v11554_v62, %s6645_s11 }
 0x1bb   : > { %v8311_v38 = vpop.permute.xlu1 %1918 }
 0x1bc   : > { %11555 = vst [vmem:[#allocation254_spill] sm:$0xff] %v8311_v38  ;;  %v8313_v29 = vpop.permute.xlu0 %1916 }
 0x1bd   : > { %11556 = vst [vmem:[#allocation255_spill] sm:$0xff] %v8313_v29  ;;  %2057 = vrot.lane.b32.xlu1 %v11557_v49, %s6645_s11  ;;  %v11565_v29 = vld [vmem:[#allocation21_spill] sm:$0xff] }
 0x1be   : > { %2055 = vrot.lane.b32.xlu0 %v11558_v12, %s6645_s11  ;;  %v11618_v12 = vld [vmem:[#allocation48_spill] sm:$0xff] }
 0x1bf   : > { %v8319_v41 = vpop.permute.xlu1 %1922 }
 0x1c0   : > { %11559 = vst [vmem:[#allocation256_spill] sm:$0xff] %v8319_v41  ;;  %v8321_v35 = vpop.permute.xlu0 %1920 }
 0x1c1   : > { %11560 = vst [vmem:[#allocation257_spill] sm:$0xff] %v8321_v35  ;;  %2061 = vrot.lane.b32.xlu1 %v11561_v31, %s6645_s11  ;;  %v11569_v35 = vld [vmem:[#allocation23_spill] sm:$0xff]  ;;  %v11570_v31 = vld [vmem:[#allocation24_spill] sm:$0xff] }
 0x1c2   : > { %2059 = vrot.lane.b32.xlu0 %v11562_v8, %s6645_s11 }
 0x1c3   : > { %v8327_v43 = vpop.permute.xlu1 %1926 }
 0x1c4   : > { %11563 = vst [vmem:[#allocation258_spill] sm:$0xff] %v8327_v43  ;;  %v8329_v38 = vpop.permute.xlu0 %1924 }
 0x1c5   : > { %11564 = vst [vmem:[#allocation259_spill] sm:$0xff] %v8329_v38  ;;  %2065 = vrot.lane.b32.xlu1 %v11565_v29, %s6645_s11  ;;  %v11573_v38 = vld [vmem:[#allocation25_spill] sm:$0xff]  ;;  %v11574_v29 = vld [vmem:[#allocation26_spill] sm:$0xff] }
 0x1c6   : > { %2063 = vrot.lane.b32.xlu0 %v11566_v33, %s6645_s11 }
 0x1c7   : > { %v8335_v49 = vpop.permute.xlu1 %1930 }
 0x1c8   : > { %11567 = vst [vmem:[#allocation260_spill] sm:$0xff] %v8335_v49  ;;  %v8337_v41 = vpop.permute.xlu0 %1928 }
 0x1c9   : > { %11568 = vst [vmem:[#allocation261_spill] sm:$0xff] %v8337_v41  ;;  %2069 = vrot.lane.b32.xlu1 %v11569_v35, %s6645_s11  ;;  %v11577_v41 = vld [vmem:[#allocation27_spill] sm:$0xff]  ;;  %v11578_v35 = vld [vmem:[#allocation28_spill] sm:$0xff] }
 0x1ca   : > { %2067 = vrot.lane.b32.xlu0 %v11570_v31, %s6645_s11 }
 0x1cb   : > { %v8343_v8 = vpop.permute.xlu1 %1934 }
 0x1cc   : > { %11571 = vst [vmem:[#allocation262_spill] sm:$0xff] %v8343_v8  ;;  %v8345_v43 = vpop.permute.xlu0 %1932 }
 0x1cd   : > { %11572 = vst [vmem:[#allocation263_spill] sm:$0xff] %v8345_v43  ;;  %2073 = vrot.lane.b32.xlu1 %v11573_v38, %s6645_s11  ;;  %v11581_v43 = vld [vmem:[#allocation29_spill] sm:$0xff]  ;;  %v11582_v38 = vld [vmem:[#allocation30_spill] sm:$0xff] }
 0x1ce   : > { %2071 = vrot.lane.b32.xlu0 %v11574_v29, %s6645_s11 }
 0x1cf   : > { %v8351_v33 = vpop.permute.xlu1 %1938 }
 0x1d0   : > { %11575 = vst [vmem:[#allocation264_spill] sm:$0xff] %v8351_v33  ;;  %v8353_v49 = vpop.permute.xlu0 %1936 }
 0x1d1   : > { %11576 = vst [vmem:[#allocation265_spill] sm:$0xff] %v8353_v49  ;;  %2077 = vrot.lane.b32.xlu1 %v11577_v41, %s6645_s11  ;;  %v11585_v49 = vld [vmem:[#allocation31_spill] sm:$0xff]  ;;  %v11586_v41 = vld [vmem:[#allocation32_spill] sm:$0xff] }
 0x1d2   : > { %2075 = vrot.lane.b32.xlu0 %v11578_v35, %s6645_s11 }
 0x1d3   : > { %v8359_v31 = vpop.permute.xlu1 %1942 }
 0x1d4   : > { %11579 = vst [vmem:[#allocation266_spill] sm:$0xff] %v8359_v31  ;;  %v8361_v8 = vpop.permute.xlu0 %1940 }
 0x1d5   : > { %11580 = vst [vmem:[#allocation267_spill] sm:$0xff] %v8361_v8  ;;  %2081 = vrot.lane.b32.xlu1 %v11581_v43, %s6645_s11  ;;  %v11589_v8 = vld [vmem:[#allocation33_spill] sm:$0xff]  ;;  %v11590_v43 = vld [vmem:[#allocation34_spill] sm:$0xff] }
 0x1d6   : > { %2079 = vrot.lane.b32.xlu0 %v11582_v38, %s6645_s11 }
 0x1d7   : > { %v8367_v29 = vpop.permute.xlu1 %1946 }
 0x1d8   : > { %11583 = vst [vmem:[#allocation268_spill] sm:$0xff] %v8367_v29  ;;  %v8369_v33 = vpop.permute.xlu0 %1944 }
 0x1d9   : > { %11584 = vst [vmem:[#allocation269_spill] sm:$0xff] %v8369_v33  ;;  %2085 = vrot.lane.b32.xlu1 %v11585_v49, %s6645_s11  ;;  %v11593_v33 = vld [vmem:[#allocation35_spill] sm:$0xff]  ;;  %v11594_v49 = vld [vmem:[#allocation36_spill] sm:$0xff] }
 0x1da   : > { %2083 = vrot.lane.b32.xlu0 %v11586_v41, %s6645_s11 }
 0x1db   : > { %v8375_v35 = vpop.permute.xlu1 %1950 }
 0x1dc   : > { %11587 = vst [vmem:[#allocation270_spill] sm:$0xff] %v8375_v35  ;;  %v8377_v31 = vpop.permute.xlu0 %1948 }
 0x1dd   : > { %11588 = vst [vmem:[#allocation271_spill] sm:$0xff] %v8377_v31  ;;  %2089 = vrot.lane.b32.xlu1 %v11589_v8, %s6645_s11  ;;  %v11597_v31 = vld [vmem:[#allocation37_spill] sm:$0xff]  ;;  %v11598_v8 = vld [vmem:[#allocation38_spill] sm:$0xff] }
 0x1de   : > { %2087 = vrot.lane.b32.xlu0 %v11590_v43, %s6645_s11 }
 0x1df   : > { %v8383_v38 = vpop.permute.xlu1 %1954 }
 0x1e0   : > { %11591 = vst [vmem:[#allocation272_spill] sm:$0xff] %v8383_v38  ;;  %v8385_v29 = vpop.permute.xlu0 %1952 }
 0x1e1   : > { %11592 = vst [vmem:[#allocation273_spill] sm:$0xff] %v8385_v29  ;;  %2093 = vrot.lane.b32.xlu1 %v11593_v33, %s6645_s11  ;;  %v11601_v29 = vld [vmem:[#allocation39_spill] sm:$0xff]  ;;  %v11602_v33 = vld [vmem:[#allocation40_spill] sm:$0xff] }
 0x1e2   : > { %2091 = vrot.lane.b32.xlu0 %v11594_v49, %s6645_s11 }
 0x1e3   : > { %v8391_v41 = vpop.permute.xlu1 %1958 }
 0x1e4   : > { %11595 = vst [vmem:[#allocation274_spill] sm:$0xff] %v8391_v41  ;;  %v8393_v35 = vpop.permute.xlu0 %1956 }
 0x1e5   : > { %11596 = vst [vmem:[#allocation275_spill] sm:$0xff] %v8393_v35  ;;  %2097 = vrot.lane.b32.xlu1 %v11597_v31, %s6645_s11  ;;  %v11605_v35 = vld [vmem:[#allocation41_spill] sm:$0xff]  ;;  %v11606_v31 = vld [vmem:[#allocation42_spill] sm:$0xff] }
 0x1e6   : > { %2095 = vrot.lane.b32.xlu0 %v11598_v8, %s6645_s11 }
 0x1e7   : > { %v8399_v43 = vpop.permute.xlu1 %1962 }
 0x1e8   : > { %11599 = vst [vmem:[#allocation276_spill] sm:$0xff] %v8399_v43  ;;  %v8401_v38 = vpop.permute.xlu0 %1960 }
 0x1e9   : > { %11600 = vst [vmem:[#allocation277_spill] sm:$0xff] %v8401_v38  ;;  %2101 = vrot.lane.b32.xlu1 %v11601_v29, %s6645_s11  ;;  %v11609_v38 = vld [vmem:[#allocation43_spill] sm:$0xff] }
 0x1ea   : > { %2099 = vrot.lane.b32.xlu0 %v11602_v33, %s6645_s11 }
 0x1eb   : > { %v8407_v49 = vpop.permute.xlu1 %1966 }
 0x1ec   : > { %11603 = vst [vmem:[#allocation39_spill] sm:$0xff] %v8407_v49  ;;  %v8409_v41 = vpop.permute.xlu0 %1964 }
 0x1ed   : > { %11604 = vst [vmem:[#allocation40_spill] sm:$0xff] %v8409_v41  ;;  %2105 = vrot.lane.b32.xlu1 %v11605_v35, %s6645_s11  ;;  %v11613_v41 = vld [vmem:[#allocation45_spill] sm:$0xff] }
 0x1ee   : > { %2103 = vrot.lane.b32.xlu0 %v11606_v31, %s6645_s11 }
 0x1ef   : > { %v8415_v8 = vpop.permute.xlu1 %1970 }
 0x1f0   : > { %11607 = vst [vmem:[#allocation41_spill] sm:$0xff] %v8415_v8  ;;  %v8417_v43 = vpop.permute.xlu0 %1968 }
 0x1f1   : > { %11608 = vst [vmem:[#allocation42_spill] sm:$0xff] %v8417_v43  ;;  %2109 = vrot.lane.b32.xlu1 %v11609_v38, %s6645_s11  ;;  %v11617_v43 = vld [vmem:[#allocation47_spill] sm:$0xff] }
 0x1f2   : > { %2107 = vrot.lane.b32.xlu0 %v11610_v27, %s6645_s11 }
 0x1f3   : > { %v8423_v26 = vpop.permute.xlu1 %1974 }
 0x1f4   : > { %11611 = vst [vmem:[#allocation43_spill] sm:$0xff] %v8423_v26  ;;  %v8425_v49 = vpop.permute.xlu0 %1972 }
 0x1f5   : > { %11612 = vst [vmem:[#allocation44_spill] sm:$0xff] %v8425_v49  ;;  %2113 = vrot.lane.b32.xlu1 %v11613_v41, %s6645_s11  ;;  %v11621_v49 = vld [vmem:[#allocation49_spill] sm:$0xff]  ;;  %v11649_v41 = vld [vmem:[#allocation68_spill] sm:$0xff] }
 0x1f6   : > { %2111 = vrot.lane.b32.xlu0 %v11614_v57, %s6645_s11 }
 0x1f7   : > { %v8431_v23 = vpop.permute.xlu1 %1978 }
 0x1f8   : > { %11615 = vst [vmem:[#allocation278_spill] sm:$0xff] %v8431_v23  ;;  %v8433_v8 = vpop.permute.xlu0 %1976 }
 0x1f9   : > { %11616 = vst [vmem:[#allocation279_spill] sm:$0xff] %v8433_v8  ;;  %2117 = vrot.lane.b32.xlu1 %v11617_v43, %s6645_s11  ;;  %v11625_v8 = vld [vmem:[#allocation51_spill] sm:$0xff]  ;;  %v11626_v43 = vld [vmem:[#allocation52_spill] sm:$0xff] }
 0x1fa   : > { %2115 = vrot.lane.b32.xlu0 %v11618_v12, %s6645_s11 }
 0x1fb   : > { %v8439_v56 = vpop.permute.xlu1 %1982 }
 0x1fc   : > { %11619 = vst [vmem:[#allocation280_spill] sm:$0xff] %v8439_v56  ;;  %v8441_v26 = vpop.permute.xlu0 %1980 }
 0x1fd   : > { %11620 = vst [vmem:[#allocation281_spill] sm:$0xff] %v8441_v26  ;;  %2121 = vrot.lane.b32.xlu1 %v11621_v49, %s6645_s11  ;;  %v11629_v49 = vld [vmem:[#allocation53_spill] sm:$0xff] }
 0x1fe   : > { %2119 = vrot.lane.b32.xlu0 %v11622_v60, %s6645_s11  ;;  %v11630_v60 = vld [vmem:[#allocation54_spill] sm:$0xff] }
 0x1ff   : > { %v8447_v6 = vpop.permute.xlu1 %1986 }
 0x200   : > { %11623 = vst [vmem:[#allocation282_spill] sm:$0xff] %v8447_v6  ;;  %v8449_v23 = vpop.permute.xlu0 %1984 }
 0x201   : > { %11624 = vst [vmem:[#allocation283_spill] sm:$0xff] %v8449_v23  ;;  %2125 = vrot.lane.b32.xlu1 %v11625_v8, %s6645_s11  ;;  %v11633_v8 = vld [vmem:[#allocation55_spill] sm:$0xff] }
 0x202   : > { %2123 = vrot.lane.b32.xlu0 %v11626_v43, %s6645_s11  ;;  %v11634_v43 = vld [vmem:[#allocation56_spill] sm:$0xff] }
 0x203   : > { %v8455_v56 = vpop.permute.xlu1 %1990 }
 0x204   : > { %11627 = vst [vmem:[#allocation284_spill] sm:$0xff] %v8455_v56  ;;  %v8457_v26 = vpop.permute.xlu0 %1988 }
 0x205   : > { %11628 = vst [vmem:[#allocation285_spill] sm:$0xff] %v8457_v26  ;;  %2129 = vrot.lane.b32.xlu1 %v11629_v49, %s6645_s11  ;;  %v11637_v26 = vld [vmem:[#allocation58_spill] sm:$0xff]  ;;  %v11638_v49 = vld [vmem:[#allocation60_spill] sm:$0xff] }
 0x206   : > { %2127 = vrot.lane.b32.xlu0 %v11630_v60, %s6645_s11 }
 0x207   : > { %v8463_v6 = vpop.permute.xlu1 %1994 }
 0x208   : > { %11631 = vst [vmem:[#allocation286_spill] sm:$0xff] %v8463_v6  ;;  %v8465_v23 = vpop.permute.xlu0 %1992 }
 0x209   : > { %11632 = vst [vmem:[#allocation287_spill] sm:$0xff] %v8465_v23  ;;  %2133 = vrot.lane.b32.xlu1 %v11633_v8, %s6645_s11  ;;  %v11641_v23 = vld [vmem:[#allocation62_spill] sm:$0xff]  ;;  %v6386_v8 = vld [vmem:[%s6739_s7 + $0x290] ss:$0 sps:$4 sm:$0x11]  }
 0x20a   : > { %2131 = vrot.lane.b32.xlu0 %v11634_v43, %s6645_s11  ;;  %v2019_v43 = vshll.u32 %v8248_v51, 16  ;;  %v2027_v50 = vshll.u32 %v6386_v8, 16 }
 0x20b   : > { %v8471_v12 = vpop.permute.xlu1 %1998 }
 0x20c   : > { %11635 = vst [vmem:[#allocation288_spill] sm:$0xff] %v8471_v12  ;;  %v8473_v56 = vpop.permute.xlu0 %1996  ;;  %v11642_v12 = vld [vmem:[#allocation63_spill] sm:$0xff]  ;;  %v2029_v57 = vrot.slane %v2027_v50, 1 }
 0x20d   : > { %11636 = vst [vmem:[#allocation289_spill] sm:$0xff] %v8473_v56  ;;  %2137 = vrot.lane.b32.xlu1 %v11637_v26, %s6645_s11  ;;  %v2014_v26 = vshll.u32 %v8255_v48, 16 }
 0x20e   : > { %2135 = vrot.lane.b32.xlu0 %v11638_v49, %s6645_s11  ;;  %v11645_v49 = vld [vmem:[#allocation64_spill] sm:$0xff] }
 0x20f   : > { %v8479_v60 = vpop.permute.xlu1 %2002  ;;  %v2016_v2 = vrot.slane %v2014_v26, 1 }
 0x210   : > { %11639 = vst [vmem:[#allocation290_spill] sm:$0xff] %v8479_v60  ;;  %v8481_v6 = vpop.permute.xlu0 %2000  ;;  %v2021_v60 = vrot.slane %v2019_v43, 1  ;;  %v11650_v43 = vld [vmem:[#allocation70_spill] sm:$0xff] }
 0x211   : > { %11640 = vst [vmem:[#allocation291_spill] sm:$0xff] %v8481_v6  ;;  %2141 = vrot.lane.b32.xlu1 %v11641_v23, %s6645_s11  ;;  %v2023_v6 = vshrl.u32 %v8248_v51, 16  ;;  %v11646_v23 = vld [vmem:[#allocation66_spill] sm:$0xff] }
 0x212   : > { %2139 = vrot.lane.b32.xlu0 %v11642_v12, %s6645_s11  ;;  %v2012_v12 = vshrl.u32 %v8255_v48, 16  ;;  %v11655_v48 = vld [vmem:[#allocation74_spill] sm:$0xff] }
 0x213   : > { %v8489_v56 = vpop.permute.xlu1 %2006 }
 0x214   : > { %11643 = vst [vmem:[#allocation292_spill] sm:$0xff] %v8489_v56  ;;  %v8492_v19 = vpop.permute.xlu0 %2004  ;;  %v2017_v8 = vor.u32 %v2016_v2, %v2012_v12 }
 0x215   : > { %11644 = vst [vmem:[#allocation293_spill] sm:$0xff] %v8492_v19  ;;  %2145 = vrot.lane.b32.xlu1 %v11645_v49, %s6645_s11  ;;  %v2025_v19 = vor.u32 %v2023_v6, %v2021_v60 }
 0x216   : > { %2143 = vrot.lane.b32.xlu0 %v11646_v23, %s6645_s11  ;;  %v11653_v23 = vld [vmem:[#allocation72_spill] sm:$0xff]  ;;  %v8522_v6 = vsel %vm812_vm0, %v2017_v8, %v2021_v60 }
 0x217   : > { %v8499_v62 = vpop.permute.xlu1 %2033  ;;  %v8515_v26 = vsel %vm812_vm0, %v2025_v19, %v2029_v57  ;;  %11657 = vst [vmem:[#allocation300_spill] sm:$0xff] %v8522_v6  ;;  %v11661_v19 = vld [vmem:[#allocation78_spill] sm:$0xff]  ;;  %v11662_v57 = vld [vmem:[#allocation80_spill] sm:$0xff] }
 0x218   : > { %11647 = vst [vmem:[#allocation294_spill] sm:$0xff] %v8499_v62  ;;  %v8502_v56 = vpop.permute.xlu0 %2031  ;;  %11654 = vst [vmem:[#allocation298_spill] sm:$0xff] %v8515_v26  ;;  %v11686_v62 = vld [vmem:[#allocation111_spill] sm:$0xff] }
 0x219   : > { %11648 = vst [vmem:[#allocation295_spill] sm:$0xff] %v8502_v56  ;;  %2149 = vrot.lane.b32.xlu1 %v11649_v41, %s6645_s11 }
 0x21a   : > { %2147 = vrot.lane.b32.xlu0 %v11650_v43, %s6645_s11  ;;  %v11669_v43 = vld [vmem:[#allocation86_spill] sm:$0xff] }
 0x21b   : > { %v8508_v51 = vpop.permute.xlu1 %2037 }
 0x21c   : > { %11651 = vst [vmem:[#allocation296_spill] sm:$0xff] %v8508_v51  ;;  %v8510_v49 = vpop.permute.xlu0 %2035  ;;  %v11682_v51 = vld [vmem:[#allocation105_spill] sm:$0xff] }
 0x21d   : > { %11652 = vst [vmem:[#allocation297_spill] sm:$0xff] %v8510_v49  ;;  %2153 = vrot.lane.b32.xlu1 %v11653_v23, %s6645_s11 }
 0x21e   : > { %2151 = vrot.lane.b32.xlu0 %v11655_v48, %s6645_s11 }
 0x21f   : > { %v8519_v41 = vpop.permute.xlu1 %2041 }
 0x220   : > { %11656 = vst [vmem:[#allocation299_spill] sm:$0xff] %v8519_v41  ;;  %v8524_v50 = vpop.permute.xlu0 %2039  ;;  %v11678_v41 = vld [vmem:[#allocation99_spill] sm:$0xff] }
 0x221   : > { %11658 = vst [vmem:[#allocation301_spill] sm:$0xff] %v8524_v50  ;;  %2157 = vrot.lane.b32.xlu1 %v8515_v26, %s6645_s11  ;;  %v11665_v26 = vld [vmem:[#allocation82_spill] sm:$0xff] }
 0x222   : > { %2155 = vrot.lane.b32.xlu0 %v8522_v6, %s6645_s11  ;;  %v11666_v6 = vld [vmem:[#allocation84_spill] sm:$0xff]  ;;  %s9916_s11 = scalar_lea.vmem [#allocation2], %s9884_s10 }
 0x223   : > { %v8530_v2 = vpop.permute.xlu1 %2045  ;;  %s5498_s30 = sshll.u32 %s9916_s11, 4  ;;  %s10928_s30 = int_to_ptr.vmem [resolvable:$true] %s5498_s30 }
 0x224   : > { %11659 = vst [vmem:[#allocation302_spill] sm:$0xff] %v8530_v2  ;;  %v8532_v12 = vpop.permute.xlu0 %2043  ;;  %v11674_v2 = vld [vmem:[#allocation93_spill] sm:$0xff]  ;;  %s6562_s10 = scalar_lea.vmem %s10928_s30, 8192 }
 0x225   : > { %11660 = vst [vmem:[#allocation303_spill] sm:$0xff] %v8532_v12  ;;  %2166 = vrot.lane.b32.xlu1 %v11661_v19, %s6646_s12  ;;  %v11670_v19 = vld [vmem:[#allocation88_spill] sm:$0xff]  ;;  %p6563_p12 = scmp.ne.s32.totalorder %s10928_s30, %s6562_s10 }
 0x226   : > { %2164 = vrot.lane.b32.xlu0 %v11662_v57, %s6646_s12 }
 0x227   : > { %v8538_v60 = vpop.permute.xlu1 %2049  ;;  %p6564_p13 = pnand %p6563_p12, %p6719_p4 }
 0x228   : > { %11663 = vst [vmem:[#allocation78_spill] sm:$0xff] %v8538_v60  ;;  %v8540_v8 = vpop.permute.xlu0 %2047 }
 0x229   : > { %11664 = vst [vmem:[#allocation80_spill] sm:$0xff] %v8540_v8  ;;  %2170 = vrot.lane.b32.xlu1 %v11665_v26, %s6646_s12  ;;  %v11673_v8 = vld [vmem:[#allocation90_spill] sm:$0xff]  ;;  %p6565_p0 = pneg %p6564_p13 }
 0x22a   : > { %2168 = vrot.lane.b32.xlu0 %v11666_v6, %s6646_s12 }
 0x22b   : > { %v8546_v23 = vpop.permute.xlu1 %2053 }
 0x22c   : > { %11667 = vst [vmem:[#allocation82_spill] sm:$0xff] %v8546_v23  ;;  %v8548_v48 = vpop.permute.xlu0 %2051 }
 0x22d   : > { %11668 = vst [vmem:[#allocation84_spill] sm:$0xff] %v8548_v48  ;;  %2174 = vrot.lane.b32.xlu1 %v11669_v43, %s6646_s12  ;;  %v11677_v48 = vld [vmem:[#allocation96_spill] sm:$0xff] }
 0x22e   : > { %2172 = vrot.lane.b32.xlu0 %v11670_v19, %s6646_s12 }
 0x22f   : > { %v8554_v57 = vpop.permute.xlu1 %2057 }
 0x230   : > { %11671 = vst [vmem:[#allocation86_spill] sm:$0xff] %v8554_v57  ;;  %v8556_v60 = vpop.permute.xlu0 %2055 }
 0x231   : > { %11672 = vst [vmem:[#allocation88_spill] sm:$0xff] %v8556_v60  ;;  %2178 = vrot.lane.b32.xlu1 %v11673_v8, %s6646_s12  ;;  %v11681_v60 = vld [vmem:[#allocation102_spill] sm:$0xff] }
 0x232   : > { %2176 = vrot.lane.b32.xlu0 %v11674_v2, %s6646_s12 }
 0x233   : > { %v8562_v12 = vpop.permute.xlu1 %2061 }
 0x234   : > { %11675 = vst [vmem:[#allocation90_spill] sm:$0xff] %v8562_v12  ;;  %v8564_v23 = vpop.permute.xlu0 %2059 }
 0x235   : > { %11676 = vst [vmem:[#allocation93_spill] sm:$0xff] %v8564_v23  ;;  %2182 = vrot.lane.b32.xlu1 %v11677_v48, %s6646_s12  ;;  %v11685_v23 = vld [vmem:[#allocation108_spill] sm:$0xff] }
 0x236   : > { %2180 = vrot.lane.b32.xlu0 %v11678_v41, %s6646_s12 }
 0x237   : > { %v8570_v50 = vpop.permute.xlu1 %2065 }
 0x238   : > { %11679 = vst [vmem:[#allocation96_spill] sm:$0xff] %v8570_v50  ;;  %v8572_v57 = vpop.permute.xlu0 %2063 }
 0x239   : > { %11680 = vst [vmem:[#allocation99_spill] sm:$0xff] %v8572_v57  ;;  %2186 = vrot.lane.b32.xlu1 %v11681_v60, %s6646_s12  ;;  %v11689_v57 = vld [vmem:[#allocation114_spill] sm:$0xff]  ;;  %v11690_v60 = vld [vmem:[#allocation117_spill] sm:$0xff] }
 0x23a   : > { %2184 = vrot.lane.b32.xlu0 %v11682_v51, %s6646_s12 }
 0x23b   : > { %v8578_v49 = vpop.permute.xlu1 %2069 }
 0x23c   : > { %11683 = vst [vmem:[#allocation304_spill] sm:$0xff] %v8578_v49  ;;  %v8580_v12 = vpop.permute.xlu0 %2067 }
 0x23d   : > { %11684 = vst [vmem:[#allocation305_spill] sm:$0xff] %v8580_v12  ;;  %2190 = vrot.lane.b32.xlu1 %v11685_v23, %s6646_s12  ;;  %v11693_v12 = vld [vmem:[#allocation120_spill] sm:$0xff]  ;;  %v11694_v23 = vld [vmem:[#allocation123_spill] sm:$0xff] }
 0x23e   : > { %2188 = vrot.lane.b32.xlu0 %v11686_v62, %s6646_s12 }
 0x23f   : > { %v8586_v56 = vpop.permute.xlu1 %2073 }
 0x240   : > { %11687 = vst [vmem:[#allocation306_spill] sm:$0xff] %v8586_v56  ;;  %v8588_v50 = vpop.permute.xlu0 %2071 }
 0x241   : > { %11688 = vst [vmem:[#allocation307_spill] sm:$0xff] %v8588_v50  ;;  %2194 = vrot.lane.b32.xlu1 %v11689_v57, %s6646_s12  ;;  %v11697_v50 = vld [vmem:[#allocation126_spill] sm:$0xff]  ;;  %v11698_v57 = vld [vmem:[#allocation129_spill] sm:$0xff] }
 0x242   : > { %2192 = vrot.lane.b32.xlu0 %v11690_v60, %s6646_s12 }
 0x243   : > { %v8594_v51 = vpop.permute.xlu1 %2077 }
 0x244   : > { %11691 = vst [vmem:[#allocation308_spill] sm:$0xff] %v8594_v51  ;;  %v8596_v49 = vpop.permute.xlu0 %2075 }
 0x245   : > { %11692 = vst [vmem:[#allocation309_spill] sm:$0xff] %v8596_v49  ;;  %2198 = vrot.lane.b32.xlu1 %v11693_v12, %s6646_s12  ;;  %v11701_v49 = vld [vmem:[#allocation132_spill] sm:$0xff]  ;;  %v11702_v12 = vld [vmem:[#allocation135_spill] sm:$0xff] }
 0x246   : > { %2196 = vrot.lane.b32.xlu0 %v11694_v23, %s6646_s12 }
 0x247   : > { %v8602_v62 = vpop.permute.xlu1 %2081 }
 0x248   : > { %11695 = vst [vmem:[#allocation310_spill] sm:$0xff] %v8602_v62  ;;  %v8604_v56 = vpop.permute.xlu0 %2079 }
 0x249   : > { %11696 = vst [vmem:[#allocation311_spill] sm:$0xff] %v8604_v56  ;;  %2202 = vrot.lane.b32.xlu1 %v11697_v50, %s6646_s12  ;;  %v11705_v56 = vld [vmem:[#allocation138_spill] sm:$0xff]  ;;  %v11706_v50 = vld [vmem:[#allocation141_spill] sm:$0xff] }
 0x24a   : > { %2200 = vrot.lane.b32.xlu0 %v11698_v57, %s6646_s12 }
 0x24b   : > { %v8610_v60 = vpop.permute.xlu1 %2085 }
 0x24c   : > { %11699 = vst [vmem:[#allocation312_spill] sm:$0xff] %v8610_v60  ;;  %v8612_v51 = vpop.permute.xlu0 %2083 }
 0x24d   : > { %11700 = vst [vmem:[#allocation313_spill] sm:$0xff] %v8612_v51  ;;  %2206 = vrot.lane.b32.xlu1 %v11701_v49, %s6646_s12  ;;  %v11709_v51 = vld [vmem:[#allocation144_spill] sm:$0xff]  ;;  %v11710_v49 = vld [vmem:[#allocation147_spill] sm:$0xff] }
 0x24e   : > { %2204 = vrot.lane.b32.xlu0 %v11702_v12, %s6646_s12 }
 0x24f   : > { %v8618_v23 = vpop.permute.xlu1 %2089 }
 0x250   : > { %11703 = vst [vmem:[#allocation314_spill] sm:$0xff] %v8618_v23  ;;  %v8620_v62 = vpop.permute.xlu0 %2087 }
 0x251   : > { %11704 = vst [vmem:[#allocation315_spill] sm:$0xff] %v8620_v62  ;;  %2210 = vrot.lane.b32.xlu1 %v11705_v56, %s6646_s12  ;;  %v11711_v62 = vld [vmem:[#allocation150_spill] sm:$0xff]  ;;  %v11712_v56 = vld [vmem:[#allocation153_spill] sm:$0xff] }
 0x252   : > { %2208 = vrot.lane.b32.xlu0 %v11706_v50, %s6646_s12 }
 0x253   : > { %v8626_v57 = vpop.permute.xlu1 %2093 }
 0x254   : > { %11707 = vst [vmem:[#allocation316_spill] sm:$0xff] %v8626_v57  ;;  %v8628_v60 = vpop.permute.xlu0 %2091 }
 0x255   : > { %11708 = vst [vmem:[#allocation317_spill] sm:$0xff] %v8628_v60  ;;  %2214 = vrot.lane.b32.xlu1 %v11709_v51, %s6646_s12 }
 0x256   : > { %2212 = vrot.lane.b32.xlu0 %v11710_v49, %s6646_s12 }
 0x257   : > { %v8634_v12 = vpop.permute.xlu1 %2097 }
 0x258   : > { %v8636_v23 = vpop.permute.xlu0 %2095 }
 0x259   : > { %2218 = vrot.lane.b32.xlu1 %v11711_v62, %s6646_s12 }
 0x25a   : > { %2216 = vrot.lane.b32.xlu0 %v11712_v56, %s6646_s12 }
 0x25b   : > { %v8642_v50 = vpop.permute.xlu1 %2101 }
 0x25c   : > { %v8644_v57 = vpop.permute.xlu0 %2099 }
 0x25d   : > { %2222 = vrot.lane.b32.xlu1 %v7669_v18, %s6646_s12 }
 0x25e   : > { %2220 = vrot.lane.b32.xlu0 %v7681_v15, %s6646_s12 }
 0x25f   : > { %v8650_v60 = vpop.permute.xlu1 %2105 }
 0x260   : > { %v8652_v51 = vpop.permute.xlu0 %2103 }
 0x261   : > { %2226 = vrot.lane.b32.xlu1 %v7692_v58, %s6646_s12 }
 0x262   : > { %2224 = vrot.lane.b32.xlu0 %v7701_v63, %s6646_s12 }
 0x263   : > { %v8658_v62 = vpop.permute.xlu1 %2109 }
 0x264   : > { %v8660_v56 = vpop.permute.xlu0 %2107 }
 0x265   : > { %2230 = vrot.lane.b32.xlu1 %v7709_v30, %s6646_s12 }
 0x266   : > { %2228 = vrot.lane.b32.xlu0 %v7718_v40, %s6646_s12 }
 0x267   : > { %v8666_v18 = vpop.permute.xlu1 %2113 }
 0x268   : > { %11713 = vst [vmem:[#allocation318_spill] sm:$0xff] %v8666_v18  ;;  %v8668_v15 = vpop.permute.xlu0 %2111 }
 0x269   : > { %11714 = vst [vmem:[#allocation319_spill] sm:$0xff] %v8668_v15  ;;  %2234 = vrot.lane.b32.xlu1 %v7726_v3, %s6646_s12 }
 0x26a   : > { %2232 = vrot.lane.b32.xlu0 %v7735_v42, %s6646_s12 }
 0x26b   : > { %v8674_v58 = vpop.permute.xlu1 %2117 }
 0x26c   : > { %11715 = vst [vmem:[#allocation320_spill] sm:$0xff] %v8674_v58  ;;  %v8676_v63 = vpop.permute.xlu0 %2115 }
 0x26d   : > { %11716 = vst [vmem:[#allocation321_spill] sm:$0xff] %v8676_v63  ;;  %2238 = vrot.lane.b32.xlu1 %v7743_v46, %s6646_s12 }
 0x26e   : > { %2236 = vrot.lane.b32.xlu0 %v7752_v44, %s6646_s12 }
 0x26f   : > { %v8682_v30 = vpop.permute.xlu1 %2121 }
 0x270   : > { %11717 = vst [vmem:[#allocation322_spill] sm:$0xff] %v8682_v30  ;;  %v8684_v40 = vpop.permute.xlu0 %2119 }
 0x271   : > { %11718 = vst [vmem:[#allocation323_spill] sm:$0xff] %v8684_v40  ;;  %2242 = vrot.lane.b32.xlu1 %v7760_v9, %s6646_s12 }
 0x272   : > { %2240 = vrot.lane.b32.xlu0 %v7769_v59, %s6646_s12 }
 0x273   : > { %v8690_v49 = vpop.permute.xlu1 %2125 }
 0x274   : > { %11719 = vst [vmem:[#allocation324_spill] sm:$0xff] %v8690_v49  ;;  %v8692_v58 = vpop.permute.xlu0 %2123 }
 0x275   : > { %11720 = vst [vmem:[#allocation325_spill] sm:$0xff] %v8692_v58  ;;  %2246 = vrot.lane.b32.xlu1 %v7777_v39, %s6646_s12 }
 0x276   : > { %2244 = vrot.lane.b32.xlu0 %v7786_v32, %s6646_s12 }
 0x277   : > { %v8698_v63 = vpop.permute.xlu1 %2129 }
 0x278   : > { %11721 = vst [vmem:[#allocation326_spill] sm:$0xff] %v8698_v63  ;;  %v8700_v30 = vpop.permute.xlu0 %2127 }
 0x279   : > { %11722 = vst [vmem:[#allocation327_spill] sm:$0xff] %v8700_v30  ;;  %2250 = vrot.lane.b32.xlu1 %v7794_v17, %s6646_s12 }
 0x27a   : > { %2248 = vrot.lane.b32.xlu0 %v7803_v7, %s6646_s12 }
 0x27b   : > { %v8706_v40 = vpop.permute.xlu1 %2133 }
 0x27c   : > { %11723 = vst [vmem:[#allocation328_spill] sm:$0xff] %v8706_v40  ;;  %v8708_v49 = vpop.permute.xlu0 %2131 }
 0x27d   : > { %11724 = vst [vmem:[#allocation329_spill] sm:$0xff] %v8708_v49  ;;  %2254 = vrot.lane.b32.xlu1 %v7811_v34, %s6646_s12 }
 0x27e   : > { %2252 = vrot.lane.b32.xlu0 %v7820_v10, %s6646_s12 }
 0x27f   : > { %v8714_v63 = vpop.permute.xlu1 %2137 }
 0x280   : > { %11725 = vst [vmem:[#allocation330_spill] sm:$0xff] %v8714_v63  ;;  %v8716_v30 = vpop.permute.xlu0 %2135 }
 0x281   : > { %11726 = vst [vmem:[#allocation331_spill] sm:$0xff] %v8716_v30  ;;  %2258 = vrot.lane.b32.xlu1 %v7828_v14, %s6646_s12 }
 0x282   : > { %2256 = vrot.lane.b32.xlu0 %v7837_v13, %s6646_s12 }
 0x283   : > { %v8722_v40 = vpop.permute.xlu1 %2141 }
 0x284   : > { %11727 = vst [vmem:[#allocation332_spill] sm:$0xff] %v8722_v40  ;;  %v8724_v49 = vpop.permute.xlu0 %2139 }
 0x285   : > { %11728 = vst [vmem:[#allocation333_spill] sm:$0xff] %v8724_v49  ;;  %2262 = vrot.lane.b32.xlu1 %v7845_v22, %s6646_s12  ;;  %v8743_v49 = vld [vmem:[%s6739_s7 + $0x28] sm:$0xff]  }
 0x286   : > { %2260 = vrot.lane.b32.xlu0 %v7854_v20, %s6646_s12 }
 0x287   : > { %v8730_v58 = vpop.permute.xlu1 %2145 }
 0x288   : > { %11729 = vst [vmem:[#allocation334_spill] sm:$0xff] %v8730_v58  ;;  %v8732_v63 = vpop.permute.xlu0 %2143 }
 0x289   : > { %11730 = vst [vmem:[#allocation335_spill] sm:$0xff] %v8732_v63  ;;  %2266 = vrot.lane.b32.xlu1 %v7862_v25, %s6646_s12  ;;  %v6387_v63 = vld [vmem:[%s10987_s1] sm:$0xff]  }
 0x28a   : > { %2264 = vrot.lane.b32.xlu0 %v7871_v53, %s6646_s12  ;;  %6085 = vmatprep.subr.bf16.mxu0 %v6387_v63  ;;  %v8760_v53 = vld [vmem:[%s6739_s7 + $0x30] sm:$0xff]  }
 0x28b   : > { %v8738_v30 = vpop.permute.xlu1 %2149  ;;  %6086 = vmatpush3.bf16.msra.mxu0 %v6387_v63  ;;  %6217 = vmatprep.subr.bf16.mxu1 %v6387_v63 }
 0x28c   : > { %11731 = vst [vmem:[#allocation336_spill] sm:$0xff] %v8738_v30  ;;  %v8740_v40 = vpop.permute.xlu0 %2147  ;;  %v6388_v30 = vld [vmem:[%s10987_s1 + $0x8] sm:$0x3f]   ;;  %6219 = vmatpush3.bf16.msra.mxu1 %v6387_v63 }
 0x28d   : > { %11732 = vst [vmem:[#allocation337_spill] sm:$0xff] %v8740_v40  ;;  %2302 = vrot.lane.b32.xlu1 %v8743_v49, %s6647_s13  ;;  %v6648_v40 = vmov 65535  }
 0x28e   : > { %2268 = vrot.lane.b32.xlu0 %v7888_v36, %s6646_s12  ;;  %v3892_v18 = vsel %vm3890_vm2, 4294967295, %v6648_v40 }
 0x28f   : > { %v8752_v58 = vpop.permute.xlu1 %2153  ;;  %v3893_v15 = vsel %vm3891_vm3, %v3892_v18, 0 }
 0x290   : > { %11733 = vst [vmem:[#allocation338_spill] sm:$0xff] %v8752_v58  ;;  %v8757_v25 = vpop.permute.xlu0 %2151  ;;  %v3895_v36 = vand.u32 %v6388_v30, %v3893_v15 }
 0x291   : > { %11734 = vst [vmem:[#allocation339_spill] sm:$0xff] %v8757_v25  ;;  %2304 = vrot.lane.b32.xlu1 %v8760_v53, %s6647_s13  ;;  %v8857_v25 = vld [vmem:[%s6739_s7 + $0x50] sm:$0xff]  }
 0x292   : > { %2366 = vrot.lane.b32.xlu0 %v8108_v11, %s6647_s13  ;;  %6087 = vmatprep.subr.bf16.mxu0 %v3895_v36 }
 0x293   : > { %v8766_v58 = vpop.permute.xlu1 %2157  ;;  %6088 = vmatpush3.bf16.msra.mxu0 %v3895_v36  ;;  %6218 = vmatprep.subr.bf16.mxu1 %v3895_v36 }
 0x294   : > { %11735 = vst [vmem:[#allocation340_spill] sm:$0xff] %v8766_v58  ;;  %v8768_v40 = vpop.permute.xlu0 %2155  ;;  %6220 = vmatpush3.bf16.msra.mxu1 %v3895_v36 }
 0x295   : > { %11736 = vst [vmem:[#allocation341_spill] sm:$0xff] %v8768_v40  ;;  %2453 = vrot.lane.b32.xlu1 %v11538_v1, %s6649_s26 }
 0x296   : > { %2368 = vrot.lane.b32.xlu0 %v8103_v55, %s6647_s13 }
 0x297   : > { %v8774_v18 = vpop.permute.xlu1 %2166 }
 0x298   : > { %v8776_v15 = vpop.permute.xlu0 %2164 }
 0x299   : > { %2455 = vrot.lane.b32.xlu1 %v11537_v54, %s6649_s26 }
 0x29a   : > { %2517 = vrot.lane.b32.xlu0 %v11602_v33, %s6649_s26  ;;  %v8803_v33 = vld [vmem:[%s6739_s7 + $0x3c] sm:$0xff]  }
 0x29b   : > { %v8782_v63 = vpop.permute.xlu1 %2170 }
 0x29c   : > { %v8784_v30 = vpop.permute.xlu0 %2168 }
 0x29d   : > { %2586 = vrot.lane.b32.xlu1 %v11666_v6, %s6650_s29 }
 0x29e   : > { %2519 = vrot.lane.b32.xlu0 %v11601_v29, %s6649_s26 }
 0x29f   : > { %v8790_v36 = vpop.permute.xlu1 %2174 }
 0x2a0   : > { %v8792_v55 = vpop.permute.xlu0 %2172 }
 0x2a1   : > { %2588 = vrot.lane.b32.xlu1 %v11665_v26, %s6650_s29  ;;  %v8814_v26 = vld [vmem:[%s6739_s7 + $0x44] sm:$0xff]  }
 0x2a2   : > { %2650 = vrot.lane.b32.xlu0 %v7735_v42, %s6650_s29 }
 0x2a3   : > { %v8798_v54 = vpop.permute.xlu1 %2178 }
 0x2a4   : > { %v8800_v1 = vpop.permute.xlu0 %2176 }
 0x2a5   : > { %2306 = vrot.lane.b32.xlu1 %v8803_v33, %s6647_s13 }
 0x2a6   : > { %2652 = vrot.lane.b32.xlu0 %v7726_v3, %s6650_s29 }
 0x2a7   : > { %v8809_v11 = vpop.permute.xlu1 %2182 }
 0x2a8   : > { %v8811_v29 = vpop.permute.xlu0 %2180 }
 0x2a9   : > { %2308 = vrot.lane.b32.xlu1 %v8814_v26, %s6647_s13 }
 0x2aa   : > { %2370 = vrot.lane.b32.xlu0 %v8122_v0, %s6647_s13 }
 0x2ab   : > { %v8820_v42 = vpop.permute.xlu1 %2186 }
 0x2ac   : > { %11737 = vst [vmem:[#allocation342_spill] sm:$0xff] %v8820_v42  ;;  %v8822_v6 = vpop.permute.xlu0 %2184  ;;  %v11796_v42 = vld [vmem:[#allocation269_spill] sm:$0xff] }
 0x2ad   : > { %2457 = vrot.lane.b32.xlu1 %v11542_v47, %s6649_s26 }
 0x2ae   : > { %2372 = vrot.lane.b32.xlu0 %v8117_v4, %s6647_s13 }
 0x2af   : > { %v8828_v3 = vpop.permute.xlu1 %2190 }
 0x2b0   : > { %11738 = vst [vmem:[#allocation343_spill] sm:$0xff] %v8828_v3  ;;  %v8830_v58 = vpop.permute.xlu0 %2188 }
 0x2b1   : > { %11739 = vst [vmem:[#allocation344_spill] sm:$0xff] %v8830_v58  ;;  %2459 = vrot.lane.b32.xlu1 %v11541_v52, %s6649_s26  ;;  %v6480_v58 = vld [vmem:[%s6739_s7 + $0x8] sm:$0xff]  }
 0x2b2   : > { %2521 = vrot.lane.b32.xlu0 %v11606_v31, %s6649_s26 }
 0x2b3   : > { %v8836_v0 = vpop.permute.xlu1 %2194 }
 0x2b4   : > { %11740 = vst [vmem:[#allocation345_spill] sm:$0xff] %v8836_v0  ;;  %v8838_v40 = vpop.permute.xlu0 %2192 }
 0x2b5   : > { %11741 = vst [vmem:[#allocation346_spill] sm:$0xff] %v8838_v40  ;;  %2590 = vrot.lane.b32.xlu1 %v11670_v19, %s6650_s29  ;;  %v11784_v40 = vld [vmem:[#allocation196_spill] sm:$0xff] }
 0x2b6   : > { %2523 = vrot.lane.b32.xlu0 %v11605_v35, %s6649_s26 }
 0x2b7   : > { %v8844_v4 = vpop.permute.xlu1 %2198 }
 0x2b8   : > { %11742 = vst [vmem:[#allocation347_spill] sm:$0xff] %v8844_v4  ;;  %v8846_v47 = vpop.permute.xlu0 %2196 }
 0x2b9   : > { %11743 = vst [vmem:[#allocation348_spill] sm:$0xff] %v8846_v47  ;;  %2592 = vrot.lane.b32.xlu1 %v11669_v43, %s6650_s29  ;;  %v8868_v43 = vld [vmem:[%s6739_s7 + $0x58] sm:$0xff]   ;;  %v11773_v47 = vld [vmem:[#allocation15_spill] sm:$0xff] }
 0x2ba   : > { %2654 = vrot.lane.b32.xlu0 %v7752_v44, %s6650_s29 }
 0x2bb   : > { %v8852_v52 = vpop.permute.xlu1 %2202 }
 0x2bc   : > { %11744 = vst [vmem:[#allocation349_spill] sm:$0xff] %v8852_v52  ;;  %v8854_v31 = vpop.permute.xlu0 %2200 }
 0x2bd   : > { %11745 = vst [vmem:[#allocation350_spill] sm:$0xff] %v8854_v31  ;;  %2310 = vrot.lane.b32.xlu1 %v8857_v25, %s6647_s13 }
 0x2be   : > { %2656 = vrot.lane.b32.xlu0 %v7743_v46, %s6650_s29 }
 0x2bf   : > { %v8863_v35 = vpop.permute.xlu1 %2206 }
 0x2c0   : > { %11746 = vst [vmem:[#allocation351_spill] sm:$0xff] %v8863_v35  ;;  %v8865_v19 = vpop.permute.xlu0 %2204  ;;  %v11769_v35 = vld [vmem:[#allocation16_spill] sm:$0xff] }
 0x2c1   : > { %11747 = vst [vmem:[#allocation352_spill] sm:$0xff] %v8865_v19  ;;  %2312 = vrot.lane.b32.xlu1 %v8868_v43, %s6647_s13 }
 0x2c2   : > { %2374 = vrot.lane.b32.xlu0 %v8136_v21, %s6647_s13 }
 0x2c3   : > { %v8874_v44 = vpop.permute.xlu1 %2210 }
 0x2c4   : > { %11748 = vst [vmem:[#allocation353_spill] sm:$0xff] %v8874_v44  ;;  %v8876_v52 = vpop.permute.xlu0 %2208 }
 0x2c5   : > { %11749 = vst [vmem:[#allocation354_spill] sm:$0xff] %v8876_v52  ;;  %2461 = vrot.lane.b32.xlu1 %v11546_v24, %s6649_s26 }
 0x2c6   : > { %2376 = vrot.lane.b32.xlu0 %v8131_v45, %s6647_s13 }
 0x2c7   : > { %v8882_v46 = vpop.permute.xlu1 %2214 }
 0x2c8   : > { %11750 = vst [vmem:[#allocation355_spill] sm:$0xff] %v8882_v46  ;;  %v8884_v19 = vpop.permute.xlu0 %2212  ;;  %v8965_v46 = vld [vmem:[%s6739_s7 + $0x78] sm:$0xff]  }
 0x2c9   : > { %11751 = vst [vmem:[#allocation356_spill] sm:$0xff] %v8884_v19  ;;  %2463 = vrot.lane.b32.xlu1 %v11545_v5, %s6649_s26  ;;  %11762 = vst [vmem:[#allocation363_spill] sm:$0xff] %v8965_v46 }
 0x2ca   : > { %2525 = vrot.lane.b32.xlu0 %v11610_v27, %s6649_s26 }
 0x2cb   : > { %v8890_v21 = vpop.permute.xlu1 %2218 }
 0x2cc   : > { %11752 = vst [vmem:[#allocation357_spill] sm:$0xff] %v8890_v21  ;;  %v8892_v44 = vpop.permute.xlu0 %2216  ;;  %v8911_v21 = vld [vmem:[%s6739_s7 + $0x64] sm:$0xff]  }
 0x2cd   : > { %11753 = vst [vmem:[#allocation358_spill] sm:$0xff] %v8892_v44  ;;  %2594 = vrot.lane.b32.xlu1 %v11674_v2, %s6650_s29 }
 0x2ce   : > { %2527 = vrot.lane.b32.xlu0 %v11609_v38, %s6649_s26 }
 0x2cf   : > { %v8898_v24 = vpop.permute.xlu1 %2222 }
 0x2d0   : > { %11754 = vst [vmem:[#allocation359_spill] sm:$0xff] %v8898_v24  ;;  %v8900_v45 = vpop.permute.xlu0 %2220 }
 0x2d1   : > { %11755 = vst [vmem:[#allocation360_spill] sm:$0xff] %v8900_v45  ;;  %2596 = vrot.lane.b32.xlu1 %v11673_v8, %s6650_s29  ;;  %v8922_v8 = vld [vmem:[%s6739_s7 + $0x6c] sm:$0xff]  }
 0x2d2   : > { %2658 = vrot.lane.b32.xlu0 %v7769_v59, %s6650_s29 }
 0x2d3   : > { %v8906_v5 = vpop.permute.xlu1 %2226 }
 0x2d4   : > { %11756 = vst [vmem:[#allocation361_spill] sm:$0xff] %v8906_v5  ;;  %v8908_v27 = vpop.permute.xlu0 %2224 }
 0x2d5   : > { %11757 = vst [vmem:[#allocation362_spill] sm:$0xff] %v8908_v27  ;;  %2314 = vrot.lane.b32.xlu1 %v8911_v21, %s6647_s13 }
 0x2d6   : > { %2660 = vrot.lane.b32.xlu0 %v7760_v9, %s6650_s29 }
 0x2d7   : > { %v8917_v38 = vpop.permute.xlu1 %2230 }
 0x2d8   : > { %v8919_v2 = vpop.permute.xlu0 %2228 }
 0x2d9   : > { %2316 = vrot.lane.b32.xlu1 %v8922_v8, %s6647_s13 }
 0x2da   : > { %2378 = vrot.lane.b32.xlu0 %v8150_v28, %s6647_s13  ;;  %v11758_v28 = vld [vmem:[#allocation46_spill] sm:$0xff] }
 0x2db   : > { %v8928_v59 = vpop.permute.xlu1 %2234 }
 0x2dc   : > { %v8930_v5 = vpop.permute.xlu0 %2232 }
 0x2dd   : > { %2465 = vrot.lane.b32.xlu1 %v11550_v37, %s6649_s26 }
 0x2de   : > { %2380 = vrot.lane.b32.xlu0 %v8145_v61, %s6647_s13  ;;  %v11759_v61 = vld [vmem:[#allocation45_spill] sm:$0xff] }
 0x2df   : > { %v8936_v9 = vpop.permute.xlu1 %2238 }
 0x2e0   : > { %v8938_v27 = vpop.permute.xlu0 %2236 }
 0x2e1   : > { %2467 = vrot.lane.b32.xlu1 %v11549_v16, %s6649_s26 }
 0x2e2   : > { %2529 = vrot.lane.b32.xlu0 %v11758_v28, %s6649_s26 }
 0x2e3   : > { %v8944_v24 = vpop.permute.xlu1 %2242 }
 0x2e4   : > { %v8946_v45 = vpop.permute.xlu0 %2240 }
 0x2e5   : > { %2598 = vrot.lane.b32.xlu1 %v11678_v41, %s6650_s29 }
 0x2e6   : > { %2531 = vrot.lane.b32.xlu0 %v11759_v61, %s6649_s26 }
 0x2e7   : > { %v8952_v37 = vpop.permute.xlu1 %2246 }
 0x2e8   : > { %v8954_v44 = vpop.permute.xlu0 %2244 }
 0x2e9   : > { %2600 = vrot.lane.b32.xlu1 %v11677_v48, %s6650_s29  ;;  %v8976_v48 = vld [vmem:[%s6739_s7 + $0x80] sm:$0xff]  }
 0x2ea   : > { %2662 = vrot.lane.b32.xlu0 %v7786_v32, %s6650_s29  ;;  %11765 = vst [vmem:[#allocation366_spill] sm:$0xff] %v8976_v48  ;;  %v11766_v32 = vld [vmem:[#allocation228_spill] sm:$0xff] }
 0x2eb   : > { %v8960_v16 = vpop.permute.xlu1 %2250 }
 0x2ec   : > { %11760 = vst [vmem:[#allocation46_spill] sm:$0xff] %v8960_v16  ;;  %v8962_v28 = vpop.permute.xlu0 %2248 }
 0x2ed   : > { %11761 = vst [vmem:[#allocation45_spill] sm:$0xff] %v8962_v28  ;;  %2318 = vrot.lane.b32.xlu1 %v8965_v46, %s6647_s13  ;;  %v11789_v46 = vld [vmem:[#allocation18_spill] sm:$0xff] }
 0x2ee   : > { %2664 = vrot.lane.b32.xlu0 %v7777_v39, %s6650_s29  ;;  %v11770_v39 = vld [vmem:[#allocation227_spill] sm:$0xff]  ;;  %v11794_v28 = vld [vmem:[#allocation142_spill] sm:$0xff] }
 0x2ef   : > { %v8971_v41 = vpop.permute.xlu1 %2254 }
 0x2f0   : > { %11763 = vst [vmem:[#allocation364_spill] sm:$0xff] %v8971_v41  ;;  %v8973_v61 = vpop.permute.xlu0 %2252  ;;  %v11785_v41 = vld [vmem:[#allocation247_spill] sm:$0xff] }
 0x2f1   : > { %11764 = vst [vmem:[#allocation365_spill] sm:$0xff] %v8973_v61  ;;  %2320 = vrot.lane.b32.xlu1 %v8976_v48, %s6647_s13  ;;  %v11786_v61 = vld [vmem:[#allocation232_spill] sm:$0xff]  ;;  %v11788_v48 = vld [vmem:[#allocation71_spill] sm:$0xff] }
 0x2f2   : > { %2382 = vrot.lane.b32.xlu0 %v11766_v32, %s6647_s13  ;;  %v11774_v32 = vld [vmem:[#allocation48_spill] sm:$0xff] }
 0x2f3   : > { %v8982_v19 = vpop.permute.xlu1 %2258 }
 0x2f4   : > { %11767 = vst [vmem:[#allocation228_spill] sm:$0xff] %v8982_v19  ;;  %v8984_v52 = vpop.permute.xlu0 %2256 }
 0x2f5   : > { %11768 = vst [vmem:[#allocation367_spill] sm:$0xff] %v8984_v52  ;;  %2469 = vrot.lane.b32.xlu1 %v11769_v35, %s6649_s26  ;;  %v11777_v35 = vld [vmem:[#allocation105_spill] sm:$0xff] }
 0x2f6   : > { %2384 = vrot.lane.b32.xlu0 %v11770_v39, %s6647_s13  ;;  %v11778_v39 = vld [vmem:[#allocation47_spill] sm:$0xff] }
 0x2f7   : > { %v8990_v31 = vpop.permute.xlu1 %2262 }
 0x2f8   : > { %11771 = vst [vmem:[#allocation16_spill] sm:$0xff] %v8990_v31  ;;  %v8992_v4 = vpop.permute.xlu0 %2260 }
 0x2f9   : > { %11772 = vst [vmem:[#allocation227_spill] sm:$0xff] %v8992_v4  ;;  %2471 = vrot.lane.b32.xlu1 %v11773_v47, %s6649_s26  ;;  %v11780_v4 = vld [vmem:[#allocation102_spill] sm:$0xff] }
 0x2fa   : > { %2533 = vrot.lane.b32.xlu0 %v11774_v32, %s6649_s26 }
 0x2fb   : > { %v8998_v19 = vpop.permute.xlu1 %2266 }
 0x2fc   : > { %11775 = vst [vmem:[#allocation15_spill] sm:$0xff] %v8998_v19  ;;  %v9000_v52 = vpop.permute.xlu0 %2264  ;;  %v9013_v19 = vld [vmem:[%s6739_s7 + $0x8c] sm:$0xff]  }
 0x2fd   : > { %11776 = vst [vmem:[#allocation48_spill] sm:$0xff] %v9000_v52  ;;  %2602 = vrot.lane.b32.xlu1 %v11777_v35, %s6650_s29  ;;  %11781 = vst [vmem:[#allocation47_spill] sm:$0xff] %v9013_v19  ;;  %v9023_v52 = vld [vmem:[%s6739_s7 + $0x94] sm:$0xff]  }
 0x2fe   : > { %2535 = vrot.lane.b32.xlu0 %v11778_v39, %s6649_s26  ;;  %v6478_v39 = vld [vmem:[%s6739_s7] sm:$0xff]   ;;  %11783 = vst [vmem:[#allocation102_spill] sm:$0xff] %v9023_v52 }
 0x2ff   : > { %v2303_v31 = vpop.permute.xlu1 %2302 }
 0x300   : > { %v9006_v0 = vpop.permute.xlu0 %2268 }
 0x301   : > { %11779 = vst [vmem:[#allocation105_spill] sm:$0xff] %v9006_v0  ;;  %2604 = vrot.lane.b32.xlu1 %v11780_v4, %s6650_s29  ;;  %v11782_v4 = vld [vmem:[#allocation67_spill] sm:$0xff] }
 0x302   : > { %2666 = vrot.lane.b32.xlu0 %v7803_v7, %s6650_s29  ;;  %v2716_v0 = vsel %vm2714_vm4, %v6478_v39, %v11782_v4  ;;  %v11787_v4 = vld [vmem:[#allocation295_spill] sm:$0xff] }
 0x303   : > { %v2305_v47 = vpop.permute.xlu1 %2304 }
 0x304   : > { %v2367_v32 = vpop.permute.xlu0 %2366 }
 0x305   : > { %2322 = vrot.lane.b32.xlu1 %v9013_v19, %s6647_s13  ;;  %v2845_v19 = vsel %vm2843_vm5, %v2716_v0, %v11784_v40 }
 0x306   : > { %2668 = vrot.lane.b32.xlu0 %v7794_v17, %s6650_s29  ;;  %v2974_v17 = vsel %vm2972_vm6, %v2845_v19, %v11785_v41  ;;  %v11790_v19 = vld [vmem:[#allocation59_spill] sm:$0xff] }
 0x307   : > { %v2454_v35 = vpop.permute.xlu1 %2453  ;;  %v3103_v3 = vsel %vm3101_vm7, %v2974_v17, %v11787_v4  ;;  %v6481_v17 = vld [vmem:[%s6739_s7 + $0x140] sm:$0xff]   ;;  %v11791_v4 = vld [vmem:[#allocation149_spill] sm:$0xff] }
 0x308   : > { %v2369_v7 = vpop.permute.xlu0 %2368  ;;  %v3232_v40 = vsel %vm3230_vm8, %v3103_v3, %v8776_v15  ;;  %v2780_v16 = vsel %vm2714_vm4, %v6481_v17, %v11791_v4  ;;  %v11793_v3 = vld [vmem:[#allocation231_spill] sm:$0xff] }
 0x309   : > { %2324 = vrot.lane.b32.xlu1 %v9023_v52, %s6647_s13  ;;  %v2718_v52 = vsel %vm2714_vm4, %v6480_v58, %v11788_v48  ;;  %v11792_v58 = vld [vmem:[#allocation246_spill] sm:$0xff] }
 0x30a   : > { %2386 = vrot.lane.b32.xlu0 %v11786_v61, %s6647_s13  ;;  %v2847_v41 = vsel %vm2843_vm5, %v2718_v52, %v11790_v19  ;;  %v3361_v61 = vsel %vm3359_vm9, %v3232_v40, %v2303_v31  ;;  %v2909_v52 = vsel %vm2843_vm5, %v2780_v16, %v11794_v28  ;;  %v11795_v19 = vld [vmem:[#allocation294_spill] sm:$0xff] }
 0x30b   : > { %v2456_v39 = vpop.permute.xlu1 %2455  ;;  %v2976_v48 = vsel %vm2972_vm6, %v2847_v41, %v11792_v58  ;;  %v3490_v15 = vsel %vm3488_vm10, %v3361_v61, %v2454_v35  ;;  %v3038_v17 = vsel %vm2972_vm6, %v2909_v52, %v11796_v42  ;;  %v11797_v35 = vld [vmem:[#allocation17_spill] sm:$0xff]  ;;  %v6482_v61 = vld [vmem:[%s6739_s7 + $0x148] sm:$0xff]   ;;  %v11798_v58 = vld [vmem:[#allocation146_spill] sm:$0xff] }
 0x30c   : > { %v2518_v0 = vpop.permute.xlu0 %2517  ;;  %v3105_v31 = vsel %vm3101_vm7, %v2976_v48, %v11795_v19  ;;  %v3167_v16 = vsel %vm3101_vm7, %v3038_v17, %v8636_v23  ;;  %v2782_v48 = vsel %vm2714_vm4, %v6482_v61, %v11798_v58  ;;  %v11801_v19 = vld [vmem:[#allocation268_spill] sm:$0xff] }
 0x30d   : > { %2473 = vrot.lane.b32.xlu1 %v11789_v46, %s6649_s26  ;;  %v3234_v41 = vsel %vm3230_vm8, %v3105_v31, %v8774_v18  ;;  %v3296_v42 = vsel %vm3230_vm8, %v3167_v16, %v8919_v2  ;;  %v11802_v2 = vld [vmem:[#allocation111_spill] sm:$0xff] }
 0x30e   : > { %2388 = vrot.lane.b32.xlu0 %v11793_v3, %s6647_s13  ;;  %v3363_v28 = vsel %vm3359_vm9, %v3234_v41, %v2305_v47  ;;  %v3425_v23 = vsel %vm3359_vm9, %v3296_v42, %v2367_v32  ;;  %v9103_v42 = vld [vmem:[%s6739_s7 + $0xa0] sm:$0xff]  }
 0x30f   : > { %v2587_v46 = vpop.permute.xlu1 %2586  ;;  %v3492_v18 = vsel %vm3488_vm10, %v3363_v28, %v2456_v39 }
 0x310   : > { %v3619_v40 = vsel %vm3617_vm11, %v3490_v15, %v2587_v46  ;;  %v2520_v4 = vpop.permute.xlu0 %2519  ;;  %v11799_v15 = vld [vmem:[#allocation50_spill] sm:$0xff]  ;;  %v11800_v46 = vld [vmem:[#allocation139_spill] sm:$0xff] }
 0x311   : > { %2475 = vrot.lane.b32.xlu1 %v11797_v35, %s6649_s26  ;;  %6089 = vmatprep.mubr.msk.bf16.mxu0 %vm3761_vm12, %v3619_v40  ;;  %v2911_v52 = vsel %vm2843_vm5, %v2782_v48, %v11800_v46  ;;  %v3554_v40 = vsel %vm3488_vm10, %v3425_v23, %v2518_v0  ;;  %v11803_v35 = vld [vmem:[#allocation49_spill] sm:$0xff]  ;;  %v11806_v46 = vld [vmem:[#allocation200_spill] sm:$0xff] }
 0x312   : > { %2537 = vrot.lane.b32.xlu0 %v11799_v15, %s6649_s26  ;;  %v3040_v31 = vsel %vm2972_vm6, %v2911_v52, %v11801_v19  ;;  %v11807_v23 = vld [vmem:[#allocation249_spill] sm:$0xff] }
 0x313   : > { %v2589_v3 = vpop.permute.xlu1 %2588  ;;  %v3169_v39 = vsel %vm3101_vm7, %v3040_v31, %v8634_v12  ;;  %v11804_v12 = vld [vmem:[#allocation108_spill] sm:$0xff]  ;;  %v11809_v31 = vld [vmem:[#allocation297_spill] sm:$0xff] }
 0x314   : > { %v3621_v47 = vsel %vm3617_vm11, %v3492_v18, %v2589_v3  ;;  %v2651_v17 = vpop.permute.xlu0 %2650  ;;  %v3298_v32 = vsel %vm3230_vm8, %v3169_v39, %v8917_v38  ;;  %v11805_v18 = vld [vmem:[#allocation65_spill] sm:$0xff]  ;;  %v9113_v3 = vld [vmem:[%s6739_s7 + $0xa8] sm:$0xff]  }
 0x315   : > { %2606 = vrot.lane.b32.xlu1 %v11802_v2, %s6650_s29  ;;  %6090 = vmatmul.mubr.msk.bf16.vlgmr.msra.gmra.mrb[0].mxu0 %vm3761_vm12, %v3621_v47  ;;  %v3683_v41 = vsel %vm3617_vm11, %v3554_v40, %v2651_v17  ;;  %v3427_v16 = vsel %vm3359_vm9, %v3298_v32, %v2369_v7  ;;  %v6486_v17 = vld [vmem:[%s6739_s7 + $0x1c] sm:$0xff]   ;;  %v11810_v2 = vld [vmem:[#allocation69_spill] sm:$0xff] }
 0x316   : > { %2539 = vrot.lane.b32.xlu0 %v11803_v35, %s6649_s26  ;;  %6153 = vmatprep.mubr.msk.bf16.mxu1 %vm3761_vm12, %v3683_v41  ;;  %v3556_v28 = vsel %vm3488_vm10, %v3427_v16, %v2520_v4  ;;  %v6484_v4 = vld [vmem:[%s6739_s7 + $0x14] sm:$0xff]   ;;  %v2722_v39 = vsel %vm2714_vm4, %v6486_v17, %v11810_v2  ;;  %v11811_v35 = vld [vmem:[#allocation20_spill] sm:$0xff] }
 0x317   : > { %v2307_v0 = vpop.permute.xlu1 %2306  ;;  %v2720_v15 = vsel %vm2714_vm4, %v6484_v4, %v11805_v18  ;;  %v11812_v16 = vld [vmem:[#allocation198_spill] sm:$0xff]  ;;  %v11814_v18 = vld [vmem:[#allocation248_spill] sm:$0xff] }
 0x318   : > { %v2653_v61 = vpop.permute.xlu0 %2652  ;;  %v2849_v52 = vsel %vm2843_vm5, %v2720_v15, %v11806_v46 }
 0x319   : > { %2608 = vrot.lane.b32.xlu1 %v11804_v12, %s6650_s29  ;;  %v3685_v58 = vsel %vm3617_vm11, %v3556_v28, %v2653_v61  ;;  %v2978_v47 = vsel %vm2972_vm6, %v2849_v52, %v11807_v23  ;;  %v2851_v28 = vsel %vm2843_vm5, %v2722_v39, %v11812_v16  ;;  %v6487_v12 = vld [vmem:[%s6739_s7 + $0x154] sm:$0xff]   ;;  %v11815_v23 = vld [vmem:[#allocation148_spill] sm:$0xff]  ;;  %v11818_v39 = vld [vmem:[#allocation19_spill] sm:$0xff] }
 0x31a   : > { %2670 = vrot.lane.b32.xlu0 %v7820_v10, %s6650_s29  ;;  %6154 = vmatmul.mubr.msk.bf16.vlgmr.msra.gmra.mrb[0].mxu1 %vm3761_vm12, %v3685_v58  ;;  %v3107_v40 = vsel %vm3101_vm7, %v2978_v47, %v11809_v31  ;;  %v11813_v58 = vld [vmem:[#allocation154_spill] sm:$0xff]  ;;  %v2980_v15 = vsel %vm2972_vm6, %v2851_v28, %v11814_v18  ;;  %v11819_v28 = vld [vmem:[#allocation152_spill] sm:$0xff]  ;;  %v11821_v18 = vld [vmem:[#allocation145_spill] sm:$0xff] }
 0x31b   : > { %v2309_v38 = vpop.permute.xlu1 %2308  ;;  %v3236_v41 = vsel %vm3230_vm8, %v3107_v40, %v8784_v30  ;;  %v2784_v4 = vsel %vm2714_vm4, %v6487_v12, %v11813_v58  ;;  %v9142_v30 = vld [vmem:[%s6739_s7 + $0x1e8] sm:$0xff]   ;;  %v11817_v40 = vld [vmem:[#allocation271_spill] sm:$0xff] }
 0x31c   : > { %v2371_v48 = vpop.permute.xlu0 %2370  ;;  %v3365_v61 = vsel %vm3359_vm9, %v3236_v41, %v2307_v0  ;;  %v2913_v47 = vsel %vm2843_vm5, %v2784_v4, %v11815_v23  ;;  %v11816_v0 = vld [vmem:[#allocation296_spill] sm:$0xff]  ;;  %v6489_v16 = vld [vmem:[%s6739_s7 + $0x15c] sm:$0xff]  }
 0x31d   : > { %2326 = vrot.lane.b32.xlu1 %v9103_v42, %s6647_s13  ;;  %v3042_v17 = vsel %vm2972_vm6, %v2913_v47, %v11817_v40  ;;  %v11820_v58 = vld [vmem:[#allocation52_spill] sm:$0xff] }
 0x31e   : > { %2672 = vrot.lane.b32.xlu0 %v7811_v34, %s6650_s29  ;;  %v11808_v34 = vld [vmem:[#allocation235_spill] sm:$0xff]  ;;  %v3171_v41 = vsel %vm3101_vm7, %v3042_v17, %v8644_v57 }
 0x31f   : > { %v2458_v7 = vpop.permute.xlu1 %2457  ;;  %v3300_v12 = vsel %vm3230_vm8, %v3171_v41, %v8930_v5  ;;  %v11823_v5 = vld [vmem:[#allocation117_spill] sm:$0xff] }
 0x320   : > { %v2373_v10 = vpop.permute.xlu0 %2372  ;;  %v3494_v46 = vsel %vm3488_vm10, %v3365_v61, %v2458_v7  ;;  %v2786_v61 = vsel %vm2714_vm4, %v6489_v16, %v11819_v28  ;;  %v3429_v57 = vsel %vm3359_vm9, %v3300_v12, %v2371_v48  ;;  %v9196_v41 = vld [vmem:[%s6739_s7 + $0xb4] sm:$0xff]   ;;  %v11827_v28 = vld [vmem:[#allocation204_spill] sm:$0xff]  ;;  %v11828_v12 = vld [vmem:[#allocation251_spill] sm:$0xff] }
 0x321   : > { %2328 = vrot.lane.b32.xlu1 %v9113_v3, %s6647_s13 }
 0x322   : > { %2390 = vrot.lane.b32.xlu0 %v11808_v34, %s6647_s13  ;;  %v3109_v34 = vsel %vm3101_vm7, %v2980_v15, %v11816_v0  ;;  %v2915_v15 = vsel %vm2843_vm5, %v2786_v61, %v11821_v18  ;;  %v11830_v18 = vld [vmem:[#allocation73_spill] sm:$0xff] }
 0x323   : > { %v2460_v19 = vpop.permute.xlu1 %2459  ;;  %v3238_v7 = vsel %vm3230_vm8, %v3109_v34, %v8782_v63  ;;  %v11824_v34 = vld [vmem:[#allocation51_spill] sm:$0xff] }
 0x324   : > { %v2522_v32 = vpop.permute.xlu0 %2521 }
 0x325   : > { %2477 = vrot.lane.b32.xlu1 %v11811_v35, %s6649_s26  ;;  %v3367_v35 = vsel %vm3359_vm9, %v3238_v7, %v2309_v38  ;;  %v3558_v23 = vsel %vm3488_vm10, %v3429_v57, %v2522_v32  ;;  %v11825_v7 = vld [vmem:[#allocation114_spill] sm:$0xff] }
 0x326   : > { %2392 = vrot.lane.b32.xlu0 %v9142_v30, %s6647_s13  ;;  %v3496_v63 = vsel %vm3488_vm10, %v3367_v35, %v2460_v19 }
 0x327   : > { %v2591_v52 = vpop.permute.xlu1 %2590 }
 0x328   : > { %v3623_v31 = vsel %vm3617_vm11, %v3494_v46, %v2591_v52  ;;  %v2524_v2 = vpop.permute.xlu0 %2523  ;;  %v11822_v46 = vld [vmem:[#allocation270_spill] sm:$0xff] }
 0x329   : > { %2479 = vrot.lane.b32.xlu1 %v11818_v39, %s6649_s26  ;;  %6093 = vmatprep.mubr.msk.bf16.mxu0 %vm3761_vm12, %v3623_v31  ;;  %v3044_v52 = vsel %vm2972_vm6, %v2915_v15, %v11822_v46  ;;  %v2726_v15 = vsel %vm2714_vm4, %v8760_v53, %v11830_v18  ;;  %v11831_v46 = vld [vmem:[#allocation22_spill] sm:$0xff] }
 0x32a   : > { %2541 = vrot.lane.b32.xlu0 %v11820_v58, %s6649_s26  ;;  %v3173_v19 = vsel %vm3101_vm7, %v3044_v52, %v8642_v50  ;;  %v11829_v58 = vld [vmem:[#allocation301_spill] sm:$0xff]  ;;  %v11832_v52 = vld [vmem:[#allocation202_spill] sm:$0xff] }
 0x32b   : > { %v2593_v4 = vpop.permute.xlu1 %2592  ;;  %v3302_v48 = vsel %vm3230_vm8, %v3173_v19, %v8928_v59  ;;  %v11833_v19 = vld [vmem:[#allocation159_spill] sm:$0xff] }
 0x32c   : > { %v3625_v38 = vsel %vm3617_vm11, %v3496_v63, %v2593_v4  ;;  %v2655_v47 = vpop.permute.xlu0 %2654  ;;  %v3431_v31 = vsel %vm3359_vm9, %v3302_v48, %v2373_v10  ;;  %v11834_v48 = vld [vmem:[#allocation250_spill] sm:$0xff] }
 0x32d   : > { %2610 = vrot.lane.b32.xlu1 %v11823_v5, %s6650_s29  ;;  %6094 = vmatmul.mubr.msk.bf16.gmra.mrb[4].mxu0 %vm3761_vm12, %v3625_v38  ;;  %v3687_v0 = vsel %vm3617_vm11, %v3558_v23, %v2655_v47  ;;  %v3560_v40 = vsel %vm3488_vm10, %v3431_v31, %v2524_v2  ;;  %v11826_v2 = vld [vmem:[#allocation75_spill] sm:$0xff]  ;;  %v2855_v23 = vsel %vm2843_vm5, %v2726_v15, %v11832_v52  ;;  %v6493_v5 = vld [vmem:[%s6739_s7 + $0x168] sm:$0xff]  }
 0x32e   : > { %2543 = vrot.lane.b32.xlu0 %v11824_v34, %s6649_s26  ;;  %6157 = vmatprep.mubr.msk.bf16.mxu1 %vm3761_vm12, %v3687_v0  ;;  %v2724_v35 = vsel %vm2714_vm4, %v8743_v49, %v11826_v2  ;;  %v2788_v0 = vsel %vm2714_vm4, %v6493_v5, %v11833_v19  ;;  %v2984_v53 = vsel %vm2972_vm6, %v2855_v23, %v11834_v48  ;;  %v11837_v2 = vld [vmem:[#allocation273_spill] sm:$0xff]  ;;  %v11841_v52 = vld [vmem:[#allocation151_spill] sm:$0xff] }
 0x32f   : > { %v2311_v32 = vpop.permute.xlu1 %2310  ;;  %v2853_v61 = vsel %vm2843_vm5, %v2724_v35, %v11827_v28 }
 0x330   : > { %v2657_v17 = vpop.permute.xlu0 %2656  ;;  %v2982_v63 = vsel %vm2972_vm6, %v2853_v61, %v11828_v12  ;;  %v11838_v61 = vld [vmem:[#allocation21_spill] sm:$0xff] }
 0x331   : > { %2612 = vrot.lane.b32.xlu1 %v11825_v7, %s6650_s29  ;;  %v3689_v50 = vsel %vm3617_vm11, %v3560_v40, %v2657_v17  ;;  %v3111_v4 = vsel %vm3101_vm7, %v2982_v63, %v11829_v58  ;;  %v11835_v40 = vld [vmem:[#allocation215_spill] sm:$0xff]  ;;  %v6495_v58 = vld [vmem:[%s6739_s7 + $0x170] sm:$0xff]  }
 0x332   : > { %2674 = vrot.lane.b32.xlu0 %v7837_v13, %s6650_s29  ;;  %6158 = vmatmul.mubr.msk.bf16.gmra.mrb[4].mxu1 %vm3761_vm12, %v3689_v50  ;;  %v9206_v13 = vld [vmem:[%s6739_s7 + $0xbc] sm:$0xff]   ;;  %v3240_v57 = vsel %vm3230_vm8, %v3111_v4, %v8792_v55  ;;  %v2917_v17 = vsel %vm2843_vm5, %v2788_v0, %v11835_v40  ;;  %v11839_v4 = vld [vmem:[#allocation157_spill] sm:$0xff] }
 0x333   : > { %v2313_v59 = vpop.permute.xlu1 %2312  ;;  %v3369_v47 = vsel %vm3359_vm9, %v3240_v57, %v2311_v32  ;;  %v9238_v55 = vld [vmem:[%s6739_s7 + $0x1fc] sm:$0xff]   ;;  %v3046_v35 = vsel %vm2972_vm6, %v2917_v17, %v11837_v2  ;;  %v2790_v18 = vsel %vm2714_vm4, %v6495_v58, %v11839_v4  ;;  %v11845_v17 = vld [vmem:[#allocation120_spill] sm:$0xff] }
 0x334   : > { %v2375_v39 = vpop.permute.xlu0 %2374  ;;  %v11836_v32 = vld [vmem:[#allocation299_spill] sm:$0xff]  ;;  %v3175_v12 = vsel %vm3101_vm7, %v3046_v35, %v8652_v51  ;;  %v11840_v57 = vld [vmem:[#allocation54_spill] sm:$0xff]  ;;  %v2919_v23 = vsel %vm2843_vm5, %v2790_v18, %v11841_v52  ;;  %v11850_v4 = vld [vmem:[#allocation76_spill] sm:$0xff] }
 0x335   : > { %2330 = vrot.lane.b32.xlu1 %v9196_v41, %s6647_s13  ;;  %v3113_v7 = vsel %vm3101_vm7, %v2984_v53, %v11836_v32  ;;  %v3304_v15 = vsel %vm3230_vm8, %v3175_v12, %v8938_v27  ;;  %v11843_v27 = vld [vmem:[#allocation123_spill] sm:$0xff]  ;;  %v11844_v53 = vld [vmem:[#allocation53_spill] sm:$0xff]  ;;  %v2730_v18 = vsel %vm2714_vm4, %v8814_v26, %v11850_v4  ;;  %v11862_v4 = vld [vmem:[#allocation274_spill] sm:$0xff] }
 0x336   : > { %2676 = vrot.lane.b32.xlu0 %v7828_v14, %s6650_s29  ;;  %v9215_v14 = vld [vmem:[%s6739_s7 + $0x1f4] sm:$0xff]   ;;  %v3433_v51 = vsel %vm3359_vm9, %v3304_v15, %v2375_v39 }
 0x337   : > { %v2462_v10 = vpop.permute.xlu1 %2461 }
 0x338   : > { %v2377_v16 = vpop.permute.xlu0 %2376  ;;  %v3498_v34 = vsel %vm3488_vm10, %v3369_v47, %v2462_v10  ;;  %v3242_v10 = vsel %vm3230_vm8, %v3113_v7, %v8790_v36  ;;  %v11842_v47 = vld [vmem:[#allocation272_spill] sm:$0xff] }
 0x339   : > { %2332 = vrot.lane.b32.xlu1 %v9206_v13, %s6647_s13  ;;  %v3371_v63 = vsel %vm3359_vm9, %v3242_v10, %v2313_v59  ;;  %v3048_v5 = vsel %vm2972_vm6, %v2919_v23, %v11842_v47  ;;  %v9292_v7 = vld [vmem:[%s6739_s7 + $0xc8] sm:$0xff]   ;;  %v11847_v10 = vld [vmem:[#allocation206_spill] sm:$0xff] }
 0x33a   : > { %2394 = vrot.lane.b32.xlu0 %v9215_v14, %s6647_s13 }
 0x33b   : > { %v2464_v49 = vpop.permute.xlu1 %2463 }
 0x33c   : > { %v2526_v38 = vpop.permute.xlu0 %2525  ;;  %v3500_v36 = vsel %vm3488_vm10, %v3371_v63, %v2464_v49  ;;  %v3177_v49 = vsel %vm3101_vm7, %v3048_v5, %v8650_v60  ;;  %v11849_v63 = vld [vmem:[#allocation303_spill] sm:$0xff]  ;;  %v11854_v5 = vld [vmem:[#allocation252_spill] sm:$0xff] }
 0x33d   : > { %2481 = vrot.lane.b32.xlu1 %v11831_v46, %s6649_s26  ;;  %v3562_v19 = vsel %vm3488_vm10, %v3433_v51, %v2526_v38  ;;  %v3306_v39 = vsel %vm3230_vm8, %v3177_v49, %v8936_v9  ;;  %v6499_v51 = vld [vmem:[%s6739_s7 + $0x17c] sm:$0xff]  }
 0x33e   : > { %2396 = vrot.lane.b32.xlu0 %v9238_v55, %s6647_s13 }
 0x33f   : > { %v2595_v31 = vpop.permute.xlu1 %2594 }
 0x340   : > { %v3627_v50 = vsel %vm3617_vm11, %v3498_v34, %v2595_v31  ;;  %v2528_v28 = vpop.permute.xlu0 %2527  ;;  %v3435_v34 = vsel %vm3359_vm9, %v3306_v39, %v2377_v16 }
 0x341   : > { %2483 = vrot.lane.b32.xlu1 %v11838_v61, %s6649_s26  ;;  %6097 = vmatprep.mubr.msk.bf16.mxu0 %vm3761_vm12, %v3627_v50  ;;  %v3564_v31 = vsel %vm3488_vm10, %v3435_v34, %v2528_v28  ;;  %v11846_v50 = vld [vmem:[#allocation77_spill] sm:$0xff] }
 0x342   : > { %2545 = vrot.lane.b32.xlu0 %v11840_v57, %s6649_s26  ;;  %v2728_v2 = vsel %vm2714_vm4, %v8803_v33, %v11846_v50  ;;  %v11848_v61 = vld [vmem:[#allocation253_spill] sm:$0xff]  ;;  %v11851_v57 = vld [vmem:[#allocation24_spill] sm:$0xff] }
 0x343   : > { %v2597_v46 = vpop.permute.xlu1 %2596  ;;  %v2857_v28 = vsel %vm2843_vm5, %v2728_v2, %v11847_v10  ;;  %v6501_v50 = vld [vmem:[%s6739_s7 + $0x184] sm:$0xff]   ;;  %v11859_v2 = vld [vmem:[#allocation161_spill] sm:$0xff] }
 0x344   : > { %v3629_v59 = vsel %vm3617_vm11, %v3500_v36, %v2597_v46  ;;  %v2659_v0 = vpop.permute.xlu0 %2658  ;;  %v2986_v12 = vsel %vm2972_vm6, %v2857_v28, %v11848_v61  ;;  %v11852_v46 = vld [vmem:[#allocation205_spill] sm:$0xff]  ;;  %v2794_v10 = vsel %vm2714_vm4, %v6501_v50, %v11859_v2  ;;  %v11860_v61 = vld [vmem:[#allocation56_spill] sm:$0xff] }
 0x345   : > { %2614 = vrot.lane.b32.xlu1 %v11843_v27, %s6650_s29  ;;  %6098 = vmatmul.mubr.msk.bf16.gmra.mrb[8].mxu0 %vm3761_vm12, %v3629_v59  ;;  %v3691_v48 = vsel %vm3617_vm11, %v3562_v19, %v2659_v0  ;;  %v3115_v58 = vsel %vm3101_vm7, %v2986_v12, %v11849_v63  ;;  %v2859_v52 = vsel %vm2843_vm5, %v2730_v18, %v11852_v46  ;;  %v11853_v59 = vld [vmem:[#allocation163_spill] sm:$0xff]  ;;  %v11855_v27 = vld [vmem:[#allocation216_spill] sm:$0xff] }
 0x346   : > { %2547 = vrot.lane.b32.xlu0 %v11844_v53, %s6649_s26  ;;  %6161 = vmatprep.mubr.msk.bf16.mxu1 %vm3761_vm12, %v3691_v48  ;;  %v3244_v15 = vsel %vm3230_vm8, %v3115_v58, %v8800_v1  ;;  %v2792_v47 = vsel %vm2714_vm4, %v6499_v51, %v11853_v59  ;;  %v2988_v26 = vsel %vm2972_vm6, %v2859_v52, %v11854_v5  ;;  %v9334_v1 = vld [vmem:[%s6739_s7 + $0x210] sm:$0xff]   ;;  %v11856_v48 = vld [vmem:[#allocation302_spill] sm:$0xff]  ;;  %v11861_v63 = vld [vmem:[#allocation156_spill] sm:$0xff] }
 0x347   : > { %v2315_v38 = vpop.permute.xlu1 %2314  ;;  %v2921_v49 = vsel %vm2843_vm5, %v2792_v47, %v11855_v27  ;;  %v3117_v39 = vsel %vm3101_vm7, %v2988_v26, %v11856_v48  ;;  %v2923_v58 = vsel %vm2843_vm5, %v2794_v10, %v11861_v63  ;;  %v11864_v52 = vld [vmem:[#allocation55_spill] sm:$0xff]  ;;  %v11865_v47 = vld [vmem:[#allocation126_spill] sm:$0xff]  ;;  %v11868_v27 = vld [vmem:[#allocation81_spill] sm:$0xff] }
 0x348   : > { %v2661_v40 = vpop.permute.xlu0 %2660  ;;  %v3373_v23 = vsel %vm3359_vm9, %v3244_v15, %v2315_v38  ;;  %v11857_v38 = vld [vmem:[#allocation275_spill] sm:$0xff]  ;;  %v3052_v18 = vsel %vm2972_vm6, %v2923_v58, %v11862_v4  ;;  %v6505_v63 = vld [vmem:[%s6739_s7 + $0x190] sm:$0xff]  }
 0x349   : > { %2616 = vrot.lane.b32.xlu1 %v11845_v17, %s6650_s29  ;;  %v3693_v60 = vsel %vm3617_vm11, %v3564_v31, %v2661_v40  ;;  %v3050_v34 = vsel %vm2972_vm6, %v2921_v49, %v11857_v38  ;;  %v3246_v31 = vsel %vm3230_vm8, %v3117_v39, %v8798_v54  ;;  %v11858_v17 = vld [vmem:[#allocation23_spill] sm:$0xff]  ;;  %v2732_v49 = vsel %vm2714_vm4, %v8857_v25, %v11868_v27  ;;  %v11883_v27 = vld [vmem:[#allocation60_spill] sm:$0xff] }
 0x34a   : > { %2678 = vrot.lane.b32.xlu0 %v7854_v20, %s6650_s29  ;;  %6162 = vmatmul.mubr.msk.bf16.gmra.mrb[8].mxu1 %vm3761_vm12, %v3693_v60  ;;  %v9302_v20 = vld [vmem:[%s6739_s7 + $0xd0] sm:$0xff]   ;;  %v3179_v60 = vsel %vm3101_vm7, %v3050_v34, %v8660_v56  ;;  %v6503_v39 = vld [vmem:[%s6739_s7 + $0xe4] sm:$0xff]  }
 0x34b   : > { %v2317_v9 = vpop.permute.xlu1 %2316  ;;  %v3308_v28 = vsel %vm3230_vm8, %v3179_v60, %v8946_v45  ;;  %v11863_v45 = vld [vmem:[#allocation129_spill] sm:$0xff]  ;;  %v11871_v60 = vld [vmem:[#allocation80_spill] sm:$0xff]  ;;  %v11872_v25 = vld [vmem:[#allocation79_spill] sm:$0xff] }
 0x34c   : > { %v2379_v32 = vpop.permute.xlu0 %2378  ;;  %v11870_v34 = vld [vmem:[#allocation5_spill] sm:$0xff]  ;;  %v2734_v50 = vsel %vm2714_vm4, %v8868_v43, %v11872_v25  ;;  %v11875_v58 = vld [vmem:[#allocation167_spill] sm:$0xff] }
 0x34d   : > { %2334 = vrot.lane.b32.xlu1 %v9292_v7, %s6647_s13  ;;  %v3437_v56 = vsel %vm3359_vm9, %v3308_v28, %v2379_v32  ;;  %v11873_v28 = vld [vmem:[#allocation26_spill] sm:$0xff] }
 0x34e   : > { %2680 = vrot.lane.b32.xlu0 %v7845_v22, %s6650_s29  ;;  %v9311_v22 = vld [vmem:[%s6739_s7 + $0x208] sm:$0xff]  }
 0x34f   : > { %v2466_v16 = vpop.permute.xlu1 %2465 }
 0x350   : > { %v2381_v35 = vpop.permute.xlu0 %2380  ;;  %v3502_v19 = vsel %vm3488_vm10, %v3373_v23, %v2466_v16  ;;  %v3375_v16 = vsel %vm3359_vm9, %v3246_v31, %v2317_v9 }
 0x351   : > { %2336 = vrot.lane.b32.xlu1 %v9302_v20, %s6647_s13 }
 0x352   : > { %2398 = vrot.lane.b32.xlu0 %v9311_v22, %s6647_s13 }
 0x353   : > { %v2468_v33 = vpop.permute.xlu1 %2467 }
 0x354   : > { %v2530_v36 = vpop.permute.xlu0 %2529  ;;  %v3504_v54 = vsel %vm3488_vm10, %v3375_v16, %v2468_v33  ;;  %v3181_v33 = vsel %vm3101_vm7, %v3052_v18, %v8658_v62 }
 0x355   : > { %2485 = vrot.lane.b32.xlu1 %v11851_v57, %s6649_s26  ;;  %v3566_v15 = vsel %vm3488_vm10, %v3437_v56, %v2530_v36  ;;  %v3310_v32 = vsel %vm3230_vm8, %v3181_v33, %v8944_v24  ;;  %v11866_v24 = vld [vmem:[#allocation186_spill] sm:$0xff]  ;;  %v2796_v56 = vsel %vm2714_vm4, %v6505_v63, %v11875_v58 }
 0x356   : > { %2400 = vrot.lane.b32.xlu0 %v9334_v1, %s6647_s13  ;;  %v3439_v23 = vsel %vm3359_vm9, %v3310_v32, %v2381_v35  ;;  %v11867_v35 = vld [vmem:[#allocation184_spill] sm:$0xff]  ;;  %v11879_v32 = vld [vmem:[#allocation277_spill] sm:$0xff] }
 0x357   : > { %v2599_v0 = vpop.permute.xlu1 %2598 }
 0x358   : > { %v3631_v53 = vsel %vm3617_vm11, %v3502_v19, %v2599_v0  ;;  %v2532_v40 = vpop.permute.xlu0 %2531  ;;  %v6502_v19 = vld [vmem:[%s6739_s7 + $0xdc] sm:$0xff]  }
 0x359   : > { %2487 = vrot.lane.b32.xlu1 %v11858_v17, %s6649_s26  ;;  %6101 = vmatprep.mubr.msk.bf16.mxu0 %vm3761_vm12, %v3631_v53  ;;  %v3568_v51 = vsel %vm3488_vm10, %v3439_v23, %v2532_v40  ;;  %v11869_v53 = vld [vmem:[#allocation208_spill] sm:$0xff]  ;;  %v6504_v40 = vld [vmem:[%s6739_s7 + $0x21c] sm:$0xff]  }
 0x35a   : > { %2549 = vrot.lane.b32.xlu0 %v11860_v61, %s6649_s26  ;;  %v2861_v38 = vsel %vm2843_vm5, %v2732_v49, %v11869_v53 }
 0x35b   : > { %v2601_v12 = vpop.permute.xlu1 %2600  ;;  %v2990_v31 = vsel %vm2972_vm6, %v2861_v38, %v11870_v34  ;;  %v11885_v34 = vld [vmem:[#allocation276_spill] sm:$0xff] }
 0x35c   : > { %v3633_v9 = vsel %vm3617_vm11, %v3504_v54, %v2601_v12  ;;  %v2663_v57 = vpop.permute.xlu0 %2662  ;;  %v3119_v16 = vsel %vm3101_vm7, %v2990_v31, %v11871_v60  ;;  %v11874_v54 = vld [vmem:[#allocation207_spill] sm:$0xff] }
 0x35d   : > { %2618 = vrot.lane.b32.xlu1 %v11863_v45, %s6650_s29  ;;  %6102 = vmatmul.mubr.msk.bf16.gmra.mrb[12].mxu0 %vm3761_vm12, %v3633_v9  ;;  %v3695_v46 = vsel %vm3617_vm11, %v3566_v15, %v2663_v57  ;;  %v3248_v2 = vsel %vm3230_vm8, %v3119_v16, %v8811_v29  ;;  %v2863_v61 = vsel %vm2843_vm5, %v2734_v50, %v11874_v54  ;;  %v11876_v9 = vld [vmem:[#allocation6_spill] sm:$0xff]  ;;  %v6506_v29 = vld [vmem:[%s6739_s7 + $0x224] sm:$0xff]  }
 0x35e   : > { %2551 = vrot.lane.b32.xlu0 %v11864_v52, %s6649_s26  ;;  %6165 = vmatprep.mubr.msk.bf16.mxu1 %vm3761_vm12, %v3695_v46  ;;  %v2992_v43 = vsel %vm2972_vm6, %v2863_v61, %v11876_v9  ;;  %v11877_v15 = vld [vmem:[#allocation218_spill] sm:$0xff]  ;;  %v11889_v61 = vld [vmem:[#allocation132_spill] sm:$0xff]  ;;  %v11892_v9 = vld [vmem:[#allocation85_spill] sm:$0xff] }
 0x35f   : > { %v2319_v36 = vpop.permute.xlu1 %2318  ;;  %v2925_v57 = vsel %vm2843_vm5, %v2796_v56, %v11877_v15  ;;  %v11878_v45 = vld [vmem:[#allocation78_spill] sm:$0xff]  ;;  %v11891_v56 = vld [vmem:[#allocation188_spill] sm:$0xff] }
 0x360   : > { %v2665_v59 = vpop.permute.xlu0 %2664  ;;  %v3377_v12 = vsel %vm3359_vm9, %v3248_v2, %v2319_v36  ;;  %v3121_v33 = vsel %vm3101_vm7, %v2992_v43, %v11878_v45  ;;  %v3054_v52 = vsel %vm2972_vm6, %v2925_v57, %v11879_v32  ;;  %v11888_v50 = vld [vmem:[#allocation58_spill] sm:$0xff]  ;;  %v2736_v43 = vsel %vm2714_vm4, %v8911_v21, %v11892_v9  ;;  %v11894_v57 = vld [vmem:[#allocation8_spill] sm:$0xff]  ;;  %v11896_v21 = vld [vmem:[#allocation83_spill] sm:$0xff] }
 0x361   : > { %2620 = vrot.lane.b32.xlu1 %v11865_v47, %s6650_s29  ;;  %v3697_v62 = vsel %vm3617_vm11, %v3568_v51, %v2665_v59  ;;  %v3250_v36 = vsel %vm3230_vm8, %v3121_v33, %v8809_v11  ;;  %v11880_v51 = vld [vmem:[#allocation25_spill] sm:$0xff]  ;;  %v11881_v59 = vld [vmem:[#allocation319_spill] sm:$0xff]  ;;  %v11895_v32 = vld [vmem:[#allocation84_spill] sm:$0xff] }
 0x362   : > { %2682 = vrot.lane.b32.xlu0 %v11866_v24, %s6650_s29  ;;  %6166 = vmatmul.mubr.msk.bf16.gmra.mrb[12].mxu1 %vm3761_vm12, %v3697_v62  ;;  %v3183_v47 = vsel %vm3101_vm7, %v3054_v52, %v11881_v59  ;;  %v6507_v24 = vld [vmem:[%s6739_s7 + $0x198] sm:$0xff]   ;;  %v6509_v33 = vld [vmem:[%s6739_s7 + $0xf0] sm:$0xff]  }
 0x363   : > { %v2321_v5 = vpop.permute.xlu1 %2320  ;;  %v6510_v59 = vld [vmem:[%s6739_s7 + $0x238] sm:$0xff]  }
 0x364   : > { %v2383_v26 = vpop.permute.xlu0 %2382  ;;  %v3379_v62 = vsel %vm3359_vm9, %v3250_v36, %v2321_v5  ;;  %v2738_v36 = vsel %vm2714_vm4, %v8922_v8, %v11896_v21  ;;  %v11914_v21 = vld [vmem:[#allocation27_spill] sm:$0xff] }
 0x365   : > { %2338 = vrot.lane.b32.xlu1 %v6502_v19, %s6647_s13  ;;  %v11882_v19 = vld [vmem:[#allocation165_spill] sm:$0xff] }
 0x366   : > { %2684 = vrot.lane.b32.xlu0 %v11867_v35, %s6650_s29  ;;  %v2798_v35 = vsel %vm2714_vm4, %v6507_v24, %v11882_v19  ;;  %v6511_v19 = vld [vmem:[%s6739_s7 + $0x1a4] sm:$0xff]  }
 0x367   : > { %v2470_v0 = vpop.permute.xlu1 %2469 }
 0x368   : > { %v2385_v48 = vpop.permute.xlu0 %2384  ;;  %v3506_v4 = vsel %vm3488_vm10, %v3377_v12, %v2470_v0  ;;  %v3312_v0 = vsel %vm3230_vm8, %v3183_v47, %v8954_v44  ;;  %v11886_v44 = vld [vmem:[#allocation135_spill] sm:$0xff]  ;;  %v11897_v47 = vld [vmem:[#allocation209_spill] sm:$0xff] }
 0x369   : > { %2340 = vrot.lane.b32.xlu1 %v6503_v39, %s6647_s13  ;;  %v11884_v39 = vld [vmem:[#allocation217_spill] sm:$0xff]  ;;  %v3441_v38 = vsel %vm3359_vm9, %v3312_v0, %v2383_v26 }
 0x36a   : > { %2402 = vrot.lane.b32.xlu0 %v6504_v40, %s6647_s13  ;;  %v2927_v53 = vsel %vm2843_vm5, %v2798_v35, %v11884_v39  ;;  %v11898_v35 = vld [vmem:[#allocation169_spill] sm:$0xff]  ;;  %v11900_v39 = vld [vmem:[#allocation220_spill] sm:$0xff] }
 0x36b   : > { %v2472_v17 = vpop.permute.xlu1 %2471  ;;  %v3056_v31 = vsel %vm2972_vm6, %v2927_v53, %v11885_v34  ;;  %v2800_v0 = vsel %vm2714_vm4, %v6511_v19, %v11898_v35 }
 0x36c   : > { %v2534_v10 = vpop.permute.xlu0 %2533  ;;  %v3508_v11 = vsel %vm3488_vm10, %v3379_v62, %v2472_v17  ;;  %v11887_v17 = vld [vmem:[#allocation318_spill] sm:$0xff]  ;;  %v2867_v62 = vsel %vm2843_vm5, %v2738_v36, %v11897_v47  ;;  %v2929_v53 = vsel %vm2843_vm5, %v2800_v0, %v11900_v39  ;;  %v11917_v0 = vld [vmem:[#allocation192_spill] sm:$0xff] }
 0x36d   : > { %2489 = vrot.lane.b32.xlu1 %v11873_v28, %s6649_s26  ;;  %v3570_v40 = vsel %vm3488_vm10, %v3441_v38, %v2534_v10  ;;  %v3185_v16 = vsel %vm3101_vm7, %v3056_v31, %v11887_v17  ;;  %v11901_v38 = vld [vmem:[#allocation82_spill] sm:$0xff]  ;;  %v11902_v31 = vld [vmem:[#allocation40_spill] sm:$0xff] }
 0x36e   : > { %2404 = vrot.lane.b32.xlu0 %v6506_v29, %s6647_s13  ;;  %v3314_v26 = vsel %vm3230_vm8, %v3185_v16, %v8952_v37  ;;  %v11890_v37 = vld [vmem:[#allocation190_spill] sm:$0xff]  ;;  %v6508_v29 = vld [vmem:[%s6739_s7 + $0x230] sm:$0xff]   ;;  %v11904_v16 = vld [vmem:[#allocation63_spill] sm:$0xff] }
 0x36f   : > { %v2603_v18 = vpop.permute.xlu1 %2602  ;;  %v3443_v10 = vsel %vm3359_vm9, %v3314_v26, %v2385_v48  ;;  %v11915_v47 = vld [vmem:[#allocation194_spill] sm:$0xff]  ;;  %v11921_v39 = vld [vmem:[#allocation212_spill] sm:$0xff] }
 0x370   : > { %v3635_v46 = vsel %vm3617_vm11, %v3506_v4, %v2603_v18  ;;  %v2536_v23 = vpop.permute.xlu0 %2535  ;;  %v11893_v18 = vld [vmem:[#allocation210_spill] sm:$0xff] }
 0x371   : > { %2491 = vrot.lane.b32.xlu1 %v11880_v51, %s6649_s26  ;;  %6105 = vmatprep.mubr.msk.bf16.mxu0 %vm3761_vm12, %v3635_v46  ;;  %v3572_v28 = vsel %vm3488_vm10, %v3443_v10, %v2536_v23  ;;  %v2865_v15 = vsel %vm2843_vm5, %v2736_v43, %v11893_v18  ;;  %v11906_v10 = vld [vmem:[#allocation168_spill] sm:$0xff] }
 0x372   : > { %2553 = vrot.lane.b32.xlu0 %v11883_v27, %s6649_s26  ;;  %v2994_v45 = vsel %vm2972_vm6, %v2865_v15, %v11894_v57 }
 0x373   : > { %v2605_v49 = vpop.permute.xlu1 %2604  ;;  %v3123_v52 = vsel %vm3101_vm7, %v2994_v45, %v11895_v32  ;;  %v11911_v45 = vld [vmem:[#allocation62_spill] sm:$0xff] }
 0x374   : > { %v3637_v5 = vsel %vm3617_vm11, %v3508_v11, %v2605_v49  ;;  %v2667_v60 = vpop.permute.xlu0 %2666  ;;  %v3252_v23 = vsel %vm3230_vm8, %v3123_v52, %v8822_v6  ;;  %v11899_v11 = vld [vmem:[#allocation7_spill] sm:$0xff]  ;;  %v6512_v6 = vld [vmem:[%s6739_s7 + $0xf8] sm:$0xff]  }
 0x375   : > { %2622 = vrot.lane.b32.xlu1 %v11886_v44, %s6650_s29  ;;  %6106 = vmatmul.mubr.msk.bf16.gmra.mrb[16].mxu0 %vm3761_vm12, %v3637_v5  ;;  %v3699_v25 = vsel %vm3617_vm11, %v3570_v40, %v2667_v60  ;;  %v2996_v8 = vsel %vm2972_vm6, %v2867_v62, %v11899_v11  ;;  %v3058_v40 = vsel %vm2972_vm6, %v2929_v53, %v11902_v31  ;;  %v11903_v60 = vld [vmem:[#allocation342_spill] sm:$0xff]  ;;  %v11923_v31 = vld [vmem:[#allocation88_spill] sm:$0xff] }
 0x376   : > { %2555 = vrot.lane.b32.xlu0 %v11888_v50, %s6649_s26  ;;  %6169 = vmatprep.mubr.msk.bf16.mxu1 %vm3761_vm12, %v3699_v25  ;;  %v3125_v5 = vsel %vm3101_vm7, %v2996_v8, %v11901_v38  ;;  %v11905_v25 = vld [vmem:[#allocation321_spill] sm:$0xff]  ;;  %v11913_v52 = vld [vmem:[#allocation46_spill] sm:$0xff] }
 0x377   : > { %v2323_v2 = vpop.permute.xlu1 %2322  ;;  %v3254_v44 = vsel %vm3230_vm8, %v3125_v5, %v11903_v60  ;;  %v3187_v26 = vsel %vm3101_vm7, %v3058_v40, %v11905_v25  ;;  %v11919_v8 = vld [vmem:[#allocation89_spill] sm:$0xff]  ;;  %v11922_v38 = vld [vmem:[#allocation10_spill] sm:$0xff]  ;;  %v11924_v60 = vld [vmem:[#allocation87_spill] sm:$0xff] }
 0x378   : > { %v2669_v54 = vpop.permute.xlu0 %2668  ;;  %v3381_v24 = vsel %vm3359_vm9, %v3252_v23, %v2323_v2  ;;  %v6513_v2 = vld [vmem:[%s6739_s7 + $0x1ac] sm:$0xff]  }
 0x379   : > { %2624 = vrot.lane.b32.xlu1 %v11889_v61, %s6650_s29  ;;  %v3701_v12 = vsel %vm3617_vm11, %v3572_v28, %v2669_v54  ;;  %v2802_v28 = vsel %vm2714_vm4, %v6513_v2, %v11906_v10  ;;  %v11907_v54 = vld [vmem:[#allocation45_spill] sm:$0xff]  ;;  %v11927_v2 = vld [vmem:[#allocation211_spill] sm:$0xff] }
 0x37a   : > { %2686 = vrot.lane.b32.xlu0 %v11890_v37, %s6650_s29  ;;  %6170 = vmatmul.mubr.msk.bf16.gmra.mrb[16].mxu1 %vm3761_vm12, %v3701_v12  ;;  %v3316_v61 = vsel %vm3230_vm8, %v3187_v26, %v11907_v54  ;;  %v11908_v37 = vld [vmem:[#allocation28_spill] sm:$0xff]  ;;  %v6515_v54 = vld [vmem:[%s6739_s7 + $0x1b8] sm:$0xff]  }
 0x37b   : > { %v2325_v63 = vpop.permute.xlu1 %2324 }
 0x37c   : > { %v2387_v58 = vpop.permute.xlu0 %2386  ;;  %v3383_v50 = vsel %vm3359_vm9, %v3254_v44, %v2325_v63  ;;  %v11925_v44 = vld [vmem:[#allocation366_spill] sm:$0xff] }
 0x37d   : > { %2270 = vrot.lane.b32.xlu1 %v11891_v56, %s6646_s12  ;;  %v3445_v43 = vsel %vm3359_vm9, %v3316_v61, %v2387_v58  ;;  %v11928_v61 = vld [vmem:[#allocation171_spill] sm:$0xff] }
 0x37e   : > { %2688 = vrot.lane.b32.xlu0 %v11891_v56, %s6650_s29 }
 0x37f   : > { %v2474_v48 = vpop.permute.xlu1 %2473 }
 0x380   : > { %v2389_v4 = vpop.permute.xlu0 %2388  ;;  %v3510_v27 = vsel %vm3488_vm10, %v3381_v24, %v2474_v48  ;;  %v11909_v48 = vld [vmem:[#allocation219_spill] sm:$0xff]  ;;  %v11916_v24 = vld [vmem:[#allocation141_spill] sm:$0xff] }
 0x381   : > { %2406 = vrot.lane.b32.xlu1 %v6508_v29, %s6647_s13  ;;  %v2931_v9 = vsel %vm2843_vm5, %v2802_v28, %v11909_v48  ;;  %v11910_v29 = vld [vmem:[#allocation39_spill] sm:$0xff] }
 0x382   : > { %2342 = vrot.lane.b32.xlu0 %v6509_v33, %s6647_s13  ;;  %v3060_v18 = vsel %vm2972_vm6, %v2931_v9, %v11910_v29  ;;  %v11912_v33 = vld [vmem:[#allocation320_spill] sm:$0xff] }
 0x383   : > { %v2476_v46 = vpop.permute.xlu1 %2475  ;;  %v6516_v9 = vld [vmem:[%s6739_s7 + $0x104] sm:$0xff]  }
 0x384   : > { %v2538_v51 = vpop.permute.xlu0 %2537  ;;  %v3512_v12 = vsel %vm3488_vm10, %v3383_v50, %v2476_v46  ;;  %v3189_v46 = vsel %vm3101_vm7, %v3060_v18, %v11912_v33  ;;  %v6514_v50 = vld [vmem:[%s6739_s7 + $0x244] sm:$0xff]   ;;  %v11931_v18 = vld [vmem:[#allocation86_spill] sm:$0xff] }
 0x385   : > { %2408 = vrot.lane.b32.xlu1 %v6510_v59, %s6647_s13  ;;  %v3574_v15 = vsel %vm3488_vm10, %v3445_v43, %v2538_v51  ;;  %v3318_v58 = vsel %vm3230_vm8, %v3189_v46, %v11913_v52  ;;  %v11933_v46 = vld [vmem:[#allocation343_spill] sm:$0xff] }
 0x386   : > { %2344 = vrot.lane.b32.xlu0 %v6512_v6, %s6647_s13  ;;  %v3447_v23 = vsel %vm3359_vm9, %v3318_v58, %v2389_v4  ;;  %v11918_v4 = vld [vmem:[#allocation138_spill] sm:$0xff]  ;;  %v6517_v58 = vld [vmem:[%s6739_s7 + $0x24c] sm:$0xff]  }
 0x387   : > { %v2607_v49 = vpop.permute.xlu1 %2606 }
 0x388   : > { %v3639_v34 = vsel %vm3617_vm11, %v3510_v27, %v2607_v49  ;;  %v2540_v17 = vpop.permute.xlu0 %2539  ;;  %v11920_v27 = vld [vmem:[#allocation363_spill] sm:$0xff] }
 0x389   : > { %2557 = vrot.lane.b32.xlu1 %v11904_v16, %s6649_s26  ;;  %6109 = vmatprep.mubr.msk.bf16.mxu0 %vm3761_vm12, %v3639_v34  ;;  %v3576_v51 = vsel %vm3488_vm10, %v3447_v23, %v2540_v17  ;;  %v2740_v6 = vsel %vm2714_vm4, %v11920_v27, %v11919_v8  ;;  %v2742_v17 = vsel %vm2714_vm4, %v11925_v44, %v11924_v60  ;;  %v11926_v16 = vld [vmem:[#allocation344_spill] sm:$0xff]  ;;  %v11937_v8 = vld [vmem:[#allocation221_spill] sm:$0xff] }
 0x38a   : > { %2493 = vrot.lane.b32.xlu0 %v11908_v37, %s6649_s26  ;;  %v2869_v53 = vsel %vm2843_vm5, %v2740_v6, %v11921_v39  ;;  %v2871_v10 = vsel %vm2843_vm5, %v2742_v17, %v11927_v2  ;;  %v11929_v37 = vld [vmem:[#allocation9_spill] sm:$0xff]  ;;  %v11941_v44 = vld [vmem:[#allocation364_spill] sm:$0xff]  ;;  %v11942_v17 = vld [vmem:[#allocation30_spill] sm:$0xff] }
 0x38b   : > { %v2609_v56 = vpop.permute.xlu1 %2608  ;;  %v2998_v5 = vsel %vm2972_vm6, %v2869_v53, %v11922_v38  ;;  %v11938_v39 = vld [vmem:[#allocation41_spill] sm:$0xff]  ;;  %v11943_v2 = vld [vmem:[#allocation64_spill] sm:$0xff] }
 0x38c   : > { %v3641_v63 = vsel %vm3617_vm11, %v3512_v12, %v2609_v56  ;;  %v2671_v57 = vpop.permute.xlu0 %2670  ;;  %v3127_v40 = vsel %vm3101_vm7, %v2998_v5, %v11923_v31  ;;  %v2804_v12 = vsel %vm2714_vm4, %v6515_v54, %v11928_v61  ;;  %v3000_v56 = vsel %vm2972_vm6, %v2871_v10, %v11929_v37  ;;  %v11939_v31 = vld [vmem:[#allocation66_spill] sm:$0xff] }
 0x38d   : > { %2559 = vrot.lane.b32.xlu1 %v11911_v45, %s6649_s26  ;;  %6110 = vmatmul.mubr.msk.bf16.gmra.mrb[20].mxu0 %vm3761_vm12, %v3641_v63  ;;  %v3703_v32 = vsel %vm3617_vm11, %v3574_v15, %v2671_v57  ;;  %v3256_v25 = vsel %vm3230_vm8, %v3127_v40, %v11926_v16  ;;  %v11930_v63 = vld [vmem:[#allocation222_spill] sm:$0xff]  ;;  %v3129_v15 = vsel %vm3101_vm7, %v3000_v56, %v11931_v18  ;;  %v11947_v56 = vld [vmem:[#allocation95_spill] sm:$0xff] }
 0x38e   : > { %2495 = vrot.lane.b32.xlu0 %v11914_v21, %s6649_s26  ;;  %6173 = vmatprep.mubr.msk.bf16.mxu1 %vm3761_vm12, %v3703_v32  ;;  %v2933_v29 = vsel %vm2843_vm5, %v2804_v12, %v11930_v63  ;;  %v11932_v45 = vld [vmem:[#allocation42_spill] sm:$0xff]  ;;  %v3258_v32 = vsel %vm3230_vm8, %v3129_v15, %v11933_v46  ;;  %v11934_v21 = vld [vmem:[#allocation323_spill] sm:$0xff]  ;;  %v11945_v12 = vld [vmem:[#allocation61_spill] sm:$0xff] }
 0x38f   : > { %v2327_v36 = vpop.permute.xlu1 %2326  ;;  %v3062_v33 = vsel %vm2972_vm6, %v2933_v29, %v11932_v45  ;;  %v11949_v63 = vld [vmem:[#allocation195_spill] sm:$0xff]  ;;  %v11950_v29 = vld [vmem:[#allocation214_spill] sm:$0xff]  ;;  %v11951_v15 = vld [vmem:[#allocation12_spill] sm:$0xff] }
 0x390   : > { %v2673_v59 = vpop.permute.xlu0 %2672  ;;  %v3385_v28 = vsel %vm3359_vm9, %v3256_v25, %v2327_v36  ;;  %v3191_v36 = vsel %vm3101_vm7, %v3062_v33, %v11934_v21  ;;  %v11952_v45 = vld [vmem:[#allocation144_spill] sm:$0xff]  ;;  %v11953_v46 = vld [vmem:[#allocation93_spill] sm:$0xff] }
 0x391   : > { %2690 = vrot.lane.b32.xlu1 %v11915_v47, %s6650_s29  ;;  %v3705_v62 = vsel %vm3617_vm11, %v3576_v51, %v2673_v59  ;;  %v6518_v51 = vld [vmem:[%s6739_s7 + $0x1c0] sm:$0xff]   ;;  %v11935_v59 = vld [vmem:[#allocation170_spill] sm:$0xff] }
 0x392   : > { %2626 = vrot.lane.b32.xlu0 %v11916_v24, %s6650_s29  ;;  %6174 = vmatmul.mubr.msk.bf16.gmra.mrb[20].mxu1 %vm3761_vm12, %v3705_v62  ;;  %v11936_v62 = vld [vmem:[#allocation365_spill] sm:$0xff] }
 0x393   : > { %v2329_v19 = vpop.permute.xlu1 %2328  ;;  %v3320_v24 = vsel %vm3230_vm8, %v3191_v36, %v11936_v62  ;;  %v11956_v36 = vld [vmem:[#allocation346_spill] sm:$0xff] }
 0x394   : > { %v2391_v35 = vpop.permute.xlu0 %2390  ;;  %v3387_v23 = vsel %vm3359_vm9, %v3258_v32, %v2329_v19 }
 0x395   : > { %2692 = vrot.lane.b32.xlu1 %v11917_v0, %s6650_s29  ;;  %v3449_v6 = vsel %vm3359_vm9, %v3320_v24, %v2391_v35  ;;  %v6520_v24 = vld [vmem:[%s6739_s7 + $0x1cc] sm:$0xff]  }
 0x396   : > { %2628 = vrot.lane.b32.xlu0 %v11918_v4, %s6650_s29  ;;  %v6519_v4 = vld [vmem:[%s6739_s7 + $0x10c] sm:$0xff]  }
 0x397   : > { %v2478_v11 = vpop.permute.xlu1 %2477 }
 0x398   : > { %v2393_v49 = vpop.permute.xlu0 %2392  ;;  %v3514_v48 = vsel %vm3488_vm10, %v3385_v28, %v2478_v11  ;;  %v11944_v28 = vld [vmem:[#allocation29_spill] sm:$0xff] }
 0x399   : > { %2274 = vrot.lane.b32.xlu1 %v11917_v0, %s6646_s12 }
 0x39a   : > { %2272 = vrot.lane.b32.xlu0 %v11915_v47, %s6646_s12  ;;  %v2806_v47 = vsel %vm2714_vm4, %v6518_v51, %v11935_v59  ;;  %v11957_v59 = vld [vmem:[#allocation213_spill] sm:$0xff] }
 0x39b   : > { %v2480_v34 = vpop.permute.xlu1 %2479  ;;  %v2935_v27 = vsel %vm2843_vm5, %v2806_v47, %v11937_v8 }
 0x39c   : > { %v2542_v26 = vpop.permute.xlu0 %2541  ;;  %v3516_v0 = vsel %vm3488_vm10, %v3387_v23, %v2480_v34  ;;  %v3064_v53 = vsel %vm2972_vm6, %v2935_v27, %v11938_v39  ;;  %v11940_v34 = vld [vmem:[#allocation322_spill] sm:$0xff] }
 0x39d   : > { %2410 = vrot.lane.b32.xlu1 %v6514_v50, %s6647_s13  ;;  %v3578_v38 = vsel %vm3488_vm10, %v3449_v6, %v2542_v26  ;;  %v3193_v40 = vsel %vm3101_vm7, %v3064_v53, %v11940_v34  ;;  %v11961_v53 = vld [vmem:[#allocation90_spill] sm:$0xff] }
 0x39e   : > { %2346 = vrot.lane.b32.xlu0 %v6516_v9, %s6647_s13  ;;  %v3322_v35 = vsel %vm3230_vm8, %v3193_v40, %v11941_v44  ;;  %v11963_v40 = vld [vmem:[#allocation345_spill] sm:$0xff] }
 0x39f   : > { %v2611_v43 = vpop.permute.xlu1 %2610  ;;  %v3451_v25 = vsel %vm3359_vm9, %v3322_v35, %v2393_v49  ;;  %v11946_v49 = vld [vmem:[#allocation147_spill] sm:$0xff]  ;;  %v6521_v35 = vld [vmem:[%s6739_s7 + $0x258] sm:$0xff]  }
 0x3a0   : > { %v3643_v57 = vsel %vm3617_vm11, %v3514_v48, %v2611_v43  ;;  %v2544_v52 = vpop.permute.xlu0 %2543  ;;  %v11948_v48 = vld [vmem:[#allocation47_spill] sm:$0xff] }
 0x3a1   : > { %2412 = vrot.lane.b32.xlu1 %v6517_v58, %s6647_s13  ;;  %6113 = vmatprep.mubr.msk.bf16.mxu0 %vm3761_vm12, %v3643_v57  ;;  %v3580_v26 = vsel %vm3488_vm10, %v3451_v25, %v2544_v52  ;;  %v2744_v9 = vsel %vm2714_vm4, %v11948_v48, %v11947_v56  ;;  %v11954_v52 = vld [vmem:[#allocation92_spill] sm:$0xff]  ;;  %v11955_v58 = vld [vmem:[#allocation102_spill] sm:$0xff]  ;;  %v11967_v56 = vld [vmem:[#allocation223_spill] sm:$0xff] }
 0x3a2   : > { %2348 = vrot.lane.b32.xlu0 %v6519_v4, %s6647_s13  ;;  %v2873_v18 = vsel %vm2843_vm5, %v2744_v9, %v11950_v29  ;;  %v2746_v21 = vsel %vm2714_vm4, %v11955_v58, %v11954_v52  ;;  %v6525_v52 = vld [vmem:[%s6739_s7 + $0x120] sm:$0xff]  }
 0x3a3   : > { %v2613_v11 = vpop.permute.xlu1 %2612  ;;  %v3002_v57 = vsel %vm2972_vm6, %v2873_v18, %v11951_v15  ;;  %v2875_v47 = vsel %vm2843_vm5, %v2746_v21, %v11957_v59 }
 0x3a4   : > { %v3645_v19 = vsel %vm3617_vm11, %v3516_v0, %v2613_v11  ;;  %v2675_v5 = vpop.permute.xlu0 %2674  ;;  %v3131_v32 = vsel %vm3101_vm7, %v3002_v57, %v11953_v46  ;;  %v11958_v0 = vld [vmem:[#allocation173_spill] sm:$0xff]  ;;  %v11959_v11 = vld [vmem:[#allocation11_spill] sm:$0xff] }
 0x3a5   : > { %2561 = vrot.lane.b32.xlu1 %v11939_v31, %s6649_s26  ;;  %6114 = vmatmul.mubr.msk.bf16.gmra.mrb[24].mxu0 %vm3761_vm12, %v3645_v19  ;;  %v3707_v60 = vsel %vm3617_vm11, %v3578_v38, %v2675_v5  ;;  %v3260_v23 = vsel %vm3230_vm8, %v3131_v32, %v11956_v36  ;;  %v2808_v4 = vsel %vm2714_vm4, %v6520_v24, %v11958_v0  ;;  %v11960_v19 = vld [vmem:[#allocation224_spill] sm:$0xff]  ;;  %v6524_v57 = vld [vmem:[%s6739_s7 + $0x260] sm:$0xff]  }
 0x3a6   : > { %2497 = vrot.lane.b32.xlu0 %v11942_v17, %s6649_s26  ;;  %6177 = vmatprep.mubr.msk.bf16.mxu1 %vm3761_vm12, %v3707_v60  ;;  %v3004_v8 = vsel %vm2972_vm6, %v2875_v47, %v11959_v11  ;;  %v2937_v39 = vsel %vm2843_vm5, %v2808_v4, %v11960_v19  ;;  %v11962_v31 = vld [vmem:[#allocation44_spill] sm:$0xff]  ;;  %v11964_v17 = vld [vmem:[#allocation325_spill] sm:$0xff]  ;;  %v11977_v19 = vld [vmem:[#allocation94_spill] sm:$0xff] }
 0x3a7   : > { %v2331_v16 = vpop.permute.xlu1 %2330  ;;  %v3133_v38 = vsel %vm3101_vm7, %v3004_v8, %v11961_v53  ;;  %v3066_v34 = vsel %vm2972_vm6, %v2937_v39, %v11962_v31  ;;  %v11970_v32 = vld [vmem:[#allocation228_spill] sm:$0xff]  ;;  %v11975_v11 = vld [vmem:[#allocation101_spill] sm:$0xff]  ;;  %v11978_v53 = vld [vmem:[#allocation14_spill] sm:$0xff] }
 0x3a8   : > { %v2677_v50 = vpop.permute.xlu0 %2676  ;;  %v3389_v62 = vsel %vm3359_vm9, %v3260_v23, %v2331_v16  ;;  %v3262_v60 = vsel %vm3230_vm8, %v3133_v38, %v11963_v40  ;;  %v3195_v16 = vsel %vm3101_vm7, %v3066_v34, %v11964_v17  ;;  %v11972_v47 = vld [vmem:[#allocation32_spill] sm:$0xff]  ;;  %v2748_v8 = vsel %vm2714_vm4, %v9103_v42, %v11975_v11  ;;  %v11980_v34 = vld [vmem:[#allocation99_spill] sm:$0xff] }
 0x3a9   : > { %2563 = vrot.lane.b32.xlu1 %v11943_v2, %s6649_s26  ;;  %v3709_v10 = vsel %vm3617_vm11, %v3580_v26, %v2677_v50  ;;  %v6522_v26 = vld [vmem:[%s6739_s7 + $0x1d4] sm:$0xff]   ;;  %v11965_v50 = vld [vmem:[#allocation172_spill] sm:$0xff]  ;;  %v2877_v39 = vsel %vm2843_vm5, %v2748_v8, %v11977_v19 }
 0x3aa   : > { %2499 = vrot.lane.b32.xlu0 %v11944_v28, %s6649_s26  ;;  %6178 = vmatmul.mubr.msk.bf16.gmra.mrb[24].mxu1 %vm3761_vm12, %v3709_v10  ;;  %v2810_v2 = vsel %vm2714_vm4, %v6522_v26, %v11965_v50  ;;  %v11966_v10 = vld [vmem:[#allocation367_spill] sm:$0xff]  ;;  %v11973_v0 = vld [vmem:[#allocation68_spill] sm:$0xff]  ;;  %v3006_v38 = vsel %vm2972_vm6, %v2877_v39, %v11978_v53 }
 0x3ab   : > { %v2333_v54 = vpop.permute.xlu1 %2332  ;;  %v3324_v28 = vsel %vm3230_vm8, %v3195_v16, %v11966_v10  ;;  %v2939_v48 = vsel %vm2843_vm5, %v2810_v2, %v11967_v56  ;;  %v3135_v40 = vsel %vm3101_vm7, %v3006_v38, %v11980_v34  ;;  %v11983_v16 = vld [vmem:[#allocation197_spill] sm:$0xff]  ;;  %v6526_v2 = vld [vmem:[%s6739_s7 + $0x1e0] sm:$0xff]   ;;  %v11998_v39 = vld [vmem:[#allocation16_spill] sm:$0xff] }
 0x3ac   : > { %v2395_v61 = vpop.permute.xlu0 %2394  ;;  %v3391_v25 = vsel %vm3359_vm9, %v3262_v60, %v2333_v54  ;;  %v11981_v60 = vld [vmem:[#allocation98_spill] sm:$0xff]  ;;  %v11985_v10 = vld [vmem:[#allocation175_spill] sm:$0xff]  ;;  %v6527_v8 = vld [vmem:[%s6739_s7 + $0x26c] sm:$0xff]  }
 0x3ad   : > { %2694 = vrot.lane.b32.xlu1 %v11945_v12, %s6650_s29  ;;  %v3453_v9 = vsel %vm3359_vm9, %v3324_v28, %v2395_v61  ;;  %v2750_v42 = vsel %vm2714_vm4, %v9113_v3, %v11981_v60  ;;  %v2812_v28 = vsel %vm2714_vm4, %v6526_v2, %v11985_v10  ;;  %v6528_v38 = vld [vmem:[%s6739_s7 + $0x12c] sm:$0xff]   ;;  %v6529_v60 = vld [vmem:[%s6739_s7 + $0x274] sm:$0xff]  }
 0x3ae   : > { %2630 = vrot.lane.b32.xlu0 %v11946_v49, %s6650_s29  ;;  %v6523_v49 = vld [vmem:[%s6739_s7 + $0x118] sm:$0xff]   ;;  %v12002_v10 = vld [vmem:[#allocation72_spill] sm:$0xff] }
 0x3af   : > { %v2482_v37 = vpop.permute.xlu1 %2481 }
 0x3b0   : > { %v2397_v43 = vpop.permute.xlu0 %2396  ;;  %v3518_v27 = vsel %vm3488_vm10, %v3389_v62, %v2482_v37 }
 0x3b1   : > { %2696 = vrot.lane.b32.xlu1 %v11949_v63, %s6650_s29 }
 0x3b2   : > { %2632 = vrot.lane.b32.xlu0 %v11952_v45, %s6650_s29  ;;  %v11969_v45 = vld [vmem:[#allocation324_spill] sm:$0xff] }
 0x3b3   : > { %v2484_v33 = vpop.permute.xlu1 %2483 }
 0x3b4   : > { %v2546_v51 = vpop.permute.xlu0 %2545 }
 0x3b5   : > { %2278 = vrot.lane.b32.xlu1 %v11949_v63, %s6646_s12  ;;  %v11968_v63 = vld [vmem:[#allocation43_spill] sm:$0xff]  ;;  %v3582_v18 = vsel %vm3488_vm10, %v3453_v9, %v2546_v51  ;;  %v11971_v51 = vld [vmem:[#allocation70_spill] sm:$0xff] }
 0x3b6   : > { %2276 = vrot.lane.b32.xlu0 %v11945_v12, %s6646_s12  ;;  %v3520_v12 = vsel %vm3488_vm10, %v3391_v25, %v2484_v33  ;;  %v3068_v29 = vsel %vm2972_vm6, %v2939_v48, %v11968_v63  ;;  %v11984_v25 = vld [vmem:[#allocation91_spill] sm:$0xff]  ;;  %v11988_v48 = vld [vmem:[#allocation226_spill] sm:$0xff] }
 0x3b7   : > { %v2615_v6 = vpop.permute.xlu1 %2614  ;;  %v3197_v33 = vsel %vm3101_vm7, %v3068_v29, %v11969_v45  ;;  %v2879_v26 = vsel %vm2843_vm5, %v2750_v42, %v11984_v25  ;;  %v2941_v9 = vsel %vm2843_vm5, %v2812_v28, %v11988_v48  ;;  %v12003_v28 = vld [vmem:[#allocation100_spill] sm:$0xff]  ;;  %v12006_v48 = vld [vmem:[#allocation305_spill] sm:$0xff] }
 0x3b8   : > { %v3647_v5 = vsel %vm3617_vm11, %v3518_v27, %v2615_v6  ;;  %v2548_v44 = vpop.permute.xlu0 %2547  ;;  %v3326_v61 = vsel %vm3230_vm8, %v3197_v33, %v11970_v32  ;;  %v11976_v6 = vld [vmem:[#allocation199_spill] sm:$0xff] }
 0x3b9   : > { %2414 = vrot.lane.b32.xlu1 %v6521_v35, %s6647_s13  ;;  %6117 = vmatprep.mubr.msk.bf16.mxu0 %vm3761_vm12, %v3647_v5  ;;  %v3455_v21 = vsel %vm3359_vm9, %v3326_v61, %v2397_v43  ;;  %v11974_v43 = vld [vmem:[#allocation31_spill] sm:$0xff]  ;;  %v11979_v5 = vld [vmem:[#allocation153_spill] sm:$0xff] }
 0x3ba   : > { %2350 = vrot.lane.b32.xlu0 %v6523_v49, %s6647_s13  ;;  %v3584_v36 = vsel %vm3488_vm10, %v3455_v21, %v2548_v44  ;;  %v11982_v44 = vld [vmem:[#allocation348_spill] sm:$0xff]  ;;  %v11994_v21 = vld [vmem:[#allocation227_spill] sm:$0xff] }
 0x3bb   : > { %v2617_v37 = vpop.permute.xlu1 %2616  ;;  %v3264_v35 = vsel %vm3230_vm8, %v3135_v40, %v11982_v44  ;;  %v6530_v44 = vld [vmem:[%s6739_s7 + $0x134] sm:$0xff]  }
 0x3bc   : > { %v3649_v54 = vsel %vm3617_vm11, %v3520_v12, %v2617_v37  ;;  %v2679_v15 = vpop.permute.xlu0 %2678  ;;  %v11986_v12 = vld [vmem:[#allocation13_spill] sm:$0xff]  ;;  %v11987_v37 = vld [vmem:[#allocation150_spill] sm:$0xff] }
 0x3bd   : > { %2416 = vrot.lane.b32.xlu1 %v6524_v57, %s6647_s13  ;;  %6118 = vmatmul.mubr.msk.bf16.gmra.mrb[28].mxu0 %vm3761_vm12, %v3649_v54  ;;  %v3711_v46 = vsel %vm3617_vm11, %v3582_v18, %v2679_v15  ;;  %v3008_v49 = vsel %vm2972_vm6, %v2879_v26, %v11986_v12  ;;  %v11989_v54 = vld [vmem:[#allocation96_spill] sm:$0xff]  ;;  %v11990_v18 = vld [vmem:[#allocation279_spill] sm:$0xff] }
 0x3be   : > { %2352 = vrot.lane.b32.xlu0 %v6525_v52, %s6647_s13  ;;  %6181 = vmatprep.mubr.msk.bf16.mxu1 %vm3761_vm12, %v3711_v46  ;;  %v3137_v63 = vsel %vm3101_vm7, %v3008_v49, %v11989_v54  ;;  %v3070_v15 = vsel %vm2972_vm6, %v2941_v9, %v11990_v18  ;;  %v11991_v57 = vld [vmem:[#allocation347_spill] sm:$0xff]  ;;  %v11993_v52 = vld [vmem:[#allocation174_spill] sm:$0xff]  ;;  %v12007_v54 = vld [vmem:[#allocation104_spill] sm:$0xff] }
 0x3bf   : > { %v2335_v58 = vpop.permute.xlu1 %2334  ;;  %v3266_v45 = vsel %vm3230_vm8, %v3137_v63, %v11991_v57  ;;  %v11992_v46 = vld [vmem:[#allocation327_spill] sm:$0xff]  ;;  %v12008_v63 = vld [vmem:[#allocation350_spill] sm:$0xff]  ;;  %v12010_v57 = vld [vmem:[#allocation97_spill] sm:$0xff] }
 0x3c0   : > { %v2681_v23 = vpop.permute.xlu0 %2680  ;;  %v3393_v50 = vsel %vm3359_vm9, %v3264_v35, %v2335_v58  ;;  %v3199_v32 = vsel %vm3101_vm7, %v3070_v15, %v11992_v46  ;;  %v2814_v58 = vsel %vm2714_vm4, %v9142_v30, %v11993_v52  ;;  %v12001_v26 = vld [vmem:[#allocation107_spill] sm:$0xff] }
 0x3c1   : > { %2565 = vrot.lane.b32.xlu1 %v11971_v51, %s6649_s26  ;;  %v3713_v59 = vsel %vm3617_vm11, %v3584_v36, %v2681_v23  ;;  %v3328_v36 = vsel %vm3230_vm8, %v3199_v32, %v11994_v21  ;;  %v12004_v49 = vld [vmem:[#allocation255_spill] sm:$0xff]  ;;  %v12011_v32 = vld [vmem:[#allocation176_spill] sm:$0xff] }
 0x3c2   : > { %2501 = vrot.lane.b32.xlu0 %v11972_v47, %s6649_s26  ;;  %6182 = vmatmul.mubr.msk.bf16.gmra.mrb[28].mxu1 %vm3761_vm12, %v3713_v59  ;;  %v11995_v59 = vld [vmem:[#allocation225_spill] sm:$0xff]  ;;  %v12009_v15 = vld [vmem:[#allocation203_spill] sm:$0xff] }
 0x3c3   : > { %v2337_v62 = vpop.permute.xlu1 %2336  ;;  %v2943_v47 = vsel %vm2843_vm5, %v2814_v58, %v11995_v59  ;;  %v9839_v46 = vld [vmem:[%s10988_s2] ss:$0 sm:$0xff]  ;;  %v12013_v58 = vld [vmem:[#allocation254_spill] sm:$0xff]  ;;  %v12015_v59 = vld [vmem:[#allocation229_spill] sm:$0xff] }
 0x3c4   : > { %v2399_v24 = vpop.permute.xlu0 %2398  ;;  %v3395_v61 = vsel %vm3359_vm9, %v3266_v45, %v2337_v62 }
 0x3c5   : > { %2567 = vrot.lane.b32.xlu1 %v11973_v0, %s6649_s26  ;;  %v3457_v0 = vsel %vm3359_vm9, %v3328_v36, %v2399_v24 }
 0x3c6   : > { %2503 = vrot.lane.b32.xlu0 %v11974_v43, %s6649_s26  ;;  %v11996_v43 = vld [vmem:[#allocation278_spill] sm:$0xff] }
 0x3c7   : > { %v2486_v4 = vpop.permute.xlu1 %2485  ;;  %v3072_v30 = vsel %vm2972_vm6, %v2943_v47, %v11996_v43 }
 0x3c8   : > { %v2401_v27 = vpop.permute.xlu0 %2400  ;;  %v3522_v3 = vsel %vm3488_vm10, %v3393_v50, %v2486_v4  ;;  %v2752_v50 = vsel %vm2714_vm4, %v9196_v41, %v12001_v26  ;;  %v2754_v41 = vsel %vm2714_vm4, %v9206_v13, %v12007_v54  ;;  %v2818_v13 = vsel %vm2714_vm4, %v9238_v55, %v12011_v32  ;;  %v12017_v55 = vld [vmem:[#allocation304_spill] sm:$0xff] }
 0x3c9   : > { %2698 = vrot.lane.b32.xlu1 %v11976_v6, %s6650_s29  ;;  %v2881_v12 = vsel %vm2843_vm5, %v2752_v50, %v12003_v28  ;;  %v2883_v45 = vsel %vm2843_vm5, %v2754_v41, %v12010_v57  ;;  %v2947_v47 = vsel %vm2843_vm5, %v2818_v13, %v12015_v59  ;;  %v12024_v50 = vld [vmem:[#allocation155_spill] sm:$0xff] }
 0x3ca   : > { %2634 = vrot.lane.b32.xlu0 %v11979_v5, %s6650_s29  ;;  %v3012_v21 = vsel %vm2972_vm6, %v2883_v45, %v12013_v58 }
 0x3cb   : > { %v2488_v31 = vpop.permute.xlu1 %2487  ;;  %v3141_v43 = vsel %vm3101_vm7, %v3012_v21, %v12017_v55 }
 0x3cc   : > { %v2550_v17 = vpop.permute.xlu0 %2549  ;;  %v3524_v23 = vsel %vm3488_vm10, %v3395_v61, %v2488_v31  ;;  %v12012_v61 = vld [vmem:[#allocation177_spill] sm:$0xff] }
 0x3cd   : > { %2700 = vrot.lane.b32.xlu1 %v11983_v16, %s6650_s29  ;;  %v3586_v4 = vsel %vm3488_vm10, %v3457_v0, %v2550_v17  ;;  %v2816_v52 = vsel %vm2714_vm4, %v9215_v14, %v12012_v61  ;;  %v12016_v0 = vld [vmem:[#allocation230_spill] sm:$0xff] }
 0x3ce   : > { %2636 = vrot.lane.b32.xlu0 %v11987_v37, %s6650_s29  ;;  %v12005_v37 = vld [vmem:[#allocation33_spill] sm:$0xff] }
 0x3cf   : > { %v2619_v56 = vpop.permute.xlu1 %2618 }
 0x3d0   : > { %v3651_v29 = vsel %vm3617_vm11, %v3522_v3, %v2619_v56  ;;  %v2552_v33 = vpop.permute.xlu0 %2551  ;;  %v3010_v3 = vsel %vm2972_vm6, %v2881_v12, %v12004_v49 }
 0x3d1   : > { %2282 = vrot.lane.b32.xlu1 %v11983_v16, %s6646_s12  ;;  %6121 = vmatprep.mubr.msk.bf16.mxu0 %vm3761_vm12, %v3651_v29  ;;  %v11999_v16 = vld [vmem:[#allocation74_spill] sm:$0xff]  ;;  %v3139_v9 = vsel %vm3101_vm7, %v3010_v3, %v12006_v48 }
 0x3d2   : > { %2280 = vrot.lane.b32.xlu0 %v11976_v6, %s6646_s12  ;;  %v11997_v6 = vld [vmem:[#allocation326_spill] sm:$0xff]  ;;  %v3268_v29 = vsel %vm3230_vm8, %v3139_v9, %v12008_v63 }
 0x3d3   : > { %v2621_v51 = vpop.permute.xlu1 %2620  ;;  %v3201_v19 = vsel %vm3101_vm7, %v3072_v30, %v11997_v6  ;;  %v12019_v6 = vld [vmem:[#allocation349_spill] sm:$0xff] }
 0x3d4   : > { %v3653_v62 = vsel %vm3617_vm11, %v3524_v23, %v2621_v51  ;;  %v2683_v11 = vpop.permute.xlu0 %2682  ;;  %v3330_v53 = vsel %vm3230_vm8, %v3201_v19, %v11998_v39  ;;  %v12014_v23 = vld [vmem:[#allocation158_spill] sm:$0xff]  ;;  %v3270_v19 = vsel %vm3230_vm8, %v3141_v43, %v12019_v6  ;;  %v6531_v43 = vld [vmem:[%s6739_s7 + $0x280] sm:$0xff]  }
 0x3d5   : > { %2418 = vrot.lane.b32.xlu1 %v6527_v8, %s6647_s13  ;;  %6122 = vmatmul.mubr.msk.bf16.gmra.mrb[32].mxu0 %vm3761_vm12, %v3653_v62  ;;  %v3715_v24 = vsel %vm3617_vm11, %v3586_v4, %v2683_v11  ;;  %v3459_v31 = vsel %vm3359_vm9, %v3330_v53, %v2401_v27  ;;  %v12000_v27 = vld [vmem:[#allocation34_spill] sm:$0xff]  ;;  %v2945_v62 = vsel %vm2843_vm5, %v2816_v52, %v12016_v0  ;;  %v9863_v4 = vld [vmem:[%s10989_s3] ss:$0 sm:$0xff]  ;;  %v12018_v11 = vld [vmem:[#allocation281_spill] sm:$0xff] }
 0x3d6   : > { %2354 = vrot.lane.b32.xlu0 %v6528_v38, %s6647_s13  ;;  %6185 = vmatprep.mubr.msk.bf16.mxu1 %vm3761_vm12, %v3715_v24  ;;  %v3588_v34 = vsel %vm3488_vm10, %v3459_v31, %v2552_v33  ;;  %v3074_v8 = vsel %vm2972_vm6, %v2945_v62, %v12018_v11  ;;  %v12020_v53 = vld [vmem:[#allocation201_spill] sm:$0xff] }
 0x3d7   : > { %v2339_v5 = vpop.permute.xlu1 %2338 }
 0x3d8   : > { %v2685_v40 = vpop.permute.xlu0 %2684  ;;  %v3397_v33 = vsel %vm3359_vm9, %v3268_v29, %v2339_v5  ;;  %v12021_v5 = vld [vmem:[#allocation280_spill] sm:$0xff] }
 0x3d9   : > { %2420 = vrot.lane.b32.xlu1 %v6529_v60, %s6647_s13  ;;  %v3717_v42 = vsel %vm3617_vm11, %v3588_v34, %v2685_v40  ;;  %v3076_v31 = vsel %vm2972_vm6, %v2947_v47, %v12021_v5  ;;  %v12022_v34 = vld [vmem:[#allocation329_spill] sm:$0xff] }
 0x3da   : > { %2356 = vrot.lane.b32.xlu0 %v6530_v44, %s6647_s13  ;;  %6186 = vmatmul.mubr.msk.bf16.gmra.mrb[32].mxu1 %vm3761_vm12, %v3717_v42  ;;  %v3203_v40 = vsel %vm3101_vm7, %v3074_v8, %v12022_v34 }
 0x3db   : > { %v2341_v35 = vpop.permute.xlu1 %2340 }
 0x3dc   : > { %v2403_v17 = vpop.permute.xlu0 %2402  ;;  %v3399_v60 = vsel %vm3359_vm9, %v3270_v19, %v2341_v35 }
 0x3dd   : > { %2569 = vrot.lane.b32.xlu1 %v11999_v16, %s6649_s26  ;;  %v12023_v16 = vld [vmem:[#allocation48_spill] sm:$0xff] }
 0x3de   : > { %2505 = vrot.lane.b32.xlu0 %v12000_v27, %s6649_s26  ;;  %v3332_v27 = vsel %vm3230_vm8, %v3203_v40, %v12023_v16  ;;  %v6533_v40 = vld [vmem:[%s6739_s7 + $0x288] sm:$0xff]  }
 0x3df   : > { %v2490_v25 = vpop.permute.xlu1 %2489  ;;  %v3461_v12 = vsel %vm3359_vm9, %v3332_v27, %v2403_v17  ;;  %v6534_v16 = vld [vmem:[%s6739_s7 + $0x148] sm:$0xff]  }
 0x3e0   : > { %v9814_v2 = vpop.permute.xlu0 %2404  ;;  %v3526_v36 = vsel %vm3488_vm10, %v3397_v33, %v2490_v25  ;;  %v12026_v33 = vld [vmem:[#allocation15_spill] sm:$0xff] }
 0x3e1   : > { %2571 = vrot.lane.b32.xlu1 %v12002_v10, %s6649_s26 }
 0x3e2   : > { %2507 = vrot.lane.b32.xlu0 %v12005_v37, %s6649_s26 }
 0x3e3   : > { %v2492_v56 = vpop.permute.xlu1 %2491 }
 0x3e4   : > { %v2554_v18 = vpop.permute.xlu0 %2553  ;;  %v3528_v25 = vsel %vm3488_vm10, %v3399_v60, %v2492_v56  ;;  %v12025_v56 = vld [vmem:[#allocation328_spill] sm:$0xff] }
 0x3e5   : > { %2702 = vrot.lane.b32.xlu1 %v12009_v15, %s6650_s29  ;;  %v3205_v48 = vsel %vm3101_vm7, %v3076_v31, %v12025_v56  ;;  %v3590_v9 = vsel %vm3488_vm10, %v3461_v12, %v2554_v18  ;;  %v12028_v12 = vld [vmem:[#allocation110_spill] sm:$0xff]  ;;  %v12030_v56 = vld [vmem:[#allocation113_spill] sm:$0xff] }
 0x3e6   : > { %2638 = vrot.lane.b32.xlu0 %v12014_v23, %s6650_s29  ;;  %v3334_v18 = vsel %vm3230_vm8, %v3205_v48, %v12026_v33  ;;  %v2756_v48 = vsel %vm2714_vm4, %v9292_v7, %v12030_v56 }
 0x3e7   : > { %v2623_v51 = vpop.permute.xlu1 %2622  ;;  %v3463_v21 = vsel %vm3359_vm9, %v3334_v18, %v9814_v2  ;;  %v12036_v18 = vld [vmem:[#allocation234_spill] sm:$0xff] }
 0x3e8   : > { %v3655_v14 = vsel %vm3617_vm11, %v3526_v36, %v2623_v51  ;;  %v6091_v30 = vpop.f32.mrb[0].mxu0  ;;  %v2556_v24 = vpop.permute.xlu0 %2555 }
 0x3e9   : > { %v4451_v39 = vmul.f32 %v6091_v30, %v9839_v46  ;;  %2704 = vrot.lane.b32.xlu1 %v12020_v53, %s6650_s29  ;;  %v3931_v38 = vpop.f32.mrb[1].mxu0  ;;  %6125 = vmatprep.mubr.msk.bf16.mxu0 %vm3761_vm12, %v3655_v14  ;;  %v3592_v47 = vsel %vm3488_vm10, %v3463_v21, %v2556_v24  ;;  %v6532_v24 = vld [vmem:[%s6739_s7 + $0x140] sm:$0xff]   ;;  %v12039_v21 = vld [vmem:[#allocation257_spill] sm:$0xff] }
 0x3ea   : > { %v4449_v42 = vmul.f32 %v9839_v46, %v3931_v38  ;;  %v6092_v44 = vpop.f32.mrb[2].mxu0  ;;  %2640 = vrot.lane.b32.xlu0 %v12024_v50, %s6650_s29  ;;  %v12027_v50 = vld [vmem:[#allocation300_spill] sm:$0xff] }
 0x3eb   : > { %v4586_v26 = vadd.f32 %v9863_v4, %v4451_v39  ;;  %v4452_v10 = vmul.f32 %v6092_v44, %v9839_v46  ;;  %v2625_v28 = vpop.permute.xlu1 %2624  ;;  %v3934_v35 = vpop.f32.mrb[3].mxu0 }
 0x3ec   : > { %v4584_v49 = vadd.f32 %v9863_v4, %v4449_v42  ;;  %v3657_v3 = vsel %vm3617_vm11, %v3528_v25, %v2625_v28  ;;  %v4450_v37 = vmul.f32 %v9839_v46, %v3934_v35  ;;  %v2687_v63 = vpop.permute.xlu0 %2686  ;;  %v2160_v28 = vrot.slane %v6533_v40, 1  ;;  %v9955_v35 = vld [vmem:[%s6739_s7 + $0x294] sm:$0xff]  }
 0x3ed   : > { %v4714_v54 = vmax.f32 %v4586_v26, 0.0  ;;  %v4587_v41 = vadd.f32 %v9863_v4, %v4452_v10  ;;  %2286 = vrot.lane.b32.xlu1 %v12020_v53, %s6646_s12  ;;  %6126 = vmatmul.mubr.msk.bf16.gmra.mrb[36].mxu0 %vm3761_vm12, %v3657_v3  ;;  %v3719_v57 = vsel %vm3617_vm11, %v3590_v9, %v2687_v63  ;;  %v6155_v45 = vpop.f32.mrb[0].mxu1  ;;  %v2159_v10 = vrot.slane %v6531_v43, 1  ;;  %v12029_v3 = vld [vmem:[#allocation36_spill] sm:$0xff]  ;;  %v12031_v9 = vld [vmem:[#allocation178_spill] sm:$0xff] }
 0x3ee   : > { %v4712_v17 = vmax.f32 %v4584_v49, 0.0  ;;  %v4585_v29 = vadd.f32 %v9863_v4, %v4450_v37  ;;  %v4515_v61 = vmul.f32 %v6155_v45, %v9839_v46  ;;  %v4187_v52 = vpop.f32.mrb[1].mxu1  ;;  %2284 = vrot.lane.b32.xlu0 %v12009_v15, %s6646_s12  ;;  %6189 = vmatprep.mubr.msk.bf16.mxu1 %vm3761_vm12, %v3719_v57  ;;  %v2758_v49 = vsel %vm2714_vm4, %v9302_v20, %v12028_v12  ;;  %v12034_v20 = vld [vmem:[#allocation106_spill] sm:$0xff]  ;;  %v12035_v45 = vld [vmem:[#allocation233_spill] sm:$0xff] }
 0x3ef   : > { %v5892_v32 = vpack.c.bf16 %v4714_v54, %v4714_v54  ;;  %v4715_v13 = vmax.f32 %v4587_v41, 0.0  ;;  %v9909_v58 = vpop.permute.xlu1 %2270  ;;  %v4513_v51 = vmul.f32 %v9839_v46, %v4187_v52  ;;  %v6156_v59 = vpop.f32.mrb[2].mxu1  ;;  %v2822_v54 = vsel %vm2714_vm4, %v9334_v1, %v12031_v9  ;;  %v12032_v41 = vld [vmem:[#allocation179_spill] sm:$0xff]  ;;  %v6535_v1 = vld [vmem:[%s6739_s7 + $0x290] ss:$0 sps:$4 sm:$0x11]  }
 0x3f0   : > { %v5890_v36 = vpack.c.bf16 %v4712_v17, %v4712_v17  ;;  %v4713_v23 = vmax.f32 %v4585_v29, 0.0  ;;  %v4650_v0 = vadd.f32 %v9863_v4, %v4515_v61  ;;  %v4516_v2 = vmul.f32 %v6156_v59, %v9839_v46  ;;  %v4190_v62 = vpop.f32.mrb[3].mxu1  ;;  %v2689_v55 = vpop.permute.xlu0 %2688  ;;  %v12033_v17 = vld [vmem:[#allocation103_spill] sm:$0xff]  ;;  %v12038_v52 = vld [vmem:[#allocation256_spill] sm:$0xff]  ;;  %v12040_v59 = vld [vmem:[#allocation282_spill] sm:$0xff] }
 0x3f1   : > { %5355 = vst.msk [vmem:[%s9916_s11 + $0x8] sm:$0xf] %vm5352_vm13, %v5892_v32  ;;  %v5893_v15 = vpack.c.bf16 %v4715_v13, %v4715_v13  ;;  %2422 = vrot.lane.b32.xlu1 %v6531_v43, %s6647_s13  ;;  %v4648_v30 = vadd.f32 %v9863_v4, %v4513_v51  ;;  %v4514_v11 = vmul.f32 %v9839_v46, %v4190_v62  ;;  %v12037_v13 = vld [vmem:[#allocation298_spill] sm:$0xff]  ;;  %v2162_v61 = vrot.slane %v6535_v1, 1 }
 0x3f2   : > { %5353 = vst.msk [vmem:[%s9916_s11] sm:$0xf] %vm5352_vm13, %v5890_v36  ;;  %v5891_v14 = vpack.c.bf16 %v4713_v23, %v4713_v23  ;;  %v3721_v8 = vsel %vm3617_vm11, %v3592_v47, %v2689_v55  ;;  %v4778_v6 = vmax.f32 %v4650_v0, 0.0  ;;  %v4651_v19 = vadd.f32 %v9863_v4, %v4516_v2  ;;  %2358 = vrot.lane.b32.xlu0 %v6532_v24, %s6647_s13  ;;  %v12042_v2 = vld [vmem:[#allocation306_spill] sm:$0xff]  ;;  %v12043_v55 = vld [vmem:[#allocation307_spill] sm:$0xff] }
 0x3f3   : > { %5356 = vst.msk [vmem:[%s9916_s11 + $0xc] sm:$0xf] %vm5352_vm13, %v5893_v15  ;;  %6190 = vmatmul.mubr.msk.bf16.gmra.mrb[36].mxu1 %vm3761_vm12, %v3721_v8  ;;  %v9935_v39 = vpop.permute.xlu1 %2406  ;;  %v4776_v53 = vmax.f32 %v4648_v30, 0.0  ;;  %v4649_v38 = vadd.f32 %v9863_v4, %v4514_v11  ;;  %v2820_v63 = vsel %vm2714_vm4, %v9311_v22, %v12032_v41  ;;  %v2887_v29 = vsel %vm2843_vm5, %v2758_v49, %v12033_v17  ;;  %v12041_v15 = vld [vmem:[#allocation283_spill] sm:$0xff]  ;;  %v12045_v11 = vld [vmem:[#allocation330_spill] sm:$0xff] }
 0x3f4   : > { %5354 = vst.msk [vmem:[%s9916_s11 + $0x4] sm:$0xf] %vm5352_vm13, %v5891_v14  ;;  %v5956_v5 = vpack.c.bf16 %v4778_v6, %v4778_v6  ;;  %v4779_v31 = vmax.f32 %v4651_v19, 0.0  ;;  %v2343_v34 = vpop.permute.xlu0 %2342  ;;  %v2885_v57 = vsel %vm2843_vm5, %v2756_v48, %v12034_v20  ;;  %v2951_v33 = vsel %vm2843_vm5, %v2822_v54, %v12035_v45  ;;  %v12044_v14 = vld [vmem:[#allocation35_spill] sm:$0xff] }
 0x3f5   : > { %2424 = vrot.lane.b32.xlu1 %v6533_v40, %s6647_s13  ;;  %v5954_v60 = vpack.c.bf16 %v4776_v53, %v4776_v53  ;;  %v4777_v42 = vmax.f32 %v4649_v38, 0.0  ;;  %v2949_v7 = vsel %vm2843_vm5, %v2820_v63, %v12036_v18  ;;  %v3016_v22 = vsel %vm2972_vm6, %v2887_v29, %v12038_v52  ;;  %v12046_v6 = vld [vmem:[#allocation331_spill] sm:$0xff]  ;;  %v12048_v38 = vld [vmem:[#allocation352_spill] sm:$0xff]  ;;  %v12049_v40 = vld [vmem:[#allocation105_spill] sm:$0xff] }
 0x3f6   : > { %5419 = vst.msk [vmem:[%s9916_s11 + $0x108] sm:$0xf] %vm5352_vm13, %v5956_v5  ;;  %v5957_v44 = vpack.c.bf16 %v4779_v31, %v4779_v31  ;;  %2360 = vrot.lane.b32.xlu0 %v6534_v16, %s6647_s13  ;;  %v3014_v36 = vsel %vm2972_vm6, %v2885_v57, %v12039_v21  ;;  %v9987_v23 = vsel %vm1581_vm1, %v2159_v10, %v2160_v28  ;;  %v2436_v51 = vshll.u32 %v9955_v35, 16  ;;  %v12047_v24 = vld [vmem:[#allocation351_spill] sm:$0xff] }
 0x3f7   : > { %v2409_v27 = vpop.permute.xlu1 %2408  ;;  %5417 = vst.msk [vmem:[%s9916_s11 + $0x100] sm:$0xf] %vm5352_vm13, %v5954_v60  ;;  %v5955_v25 = vpack.c.bf16 %v4777_v42, %v4777_v42  ;;  %v3080_v47 = vsel %vm2972_vm6, %v2951_v33, %v12040_v59  ;;  %v3078_v0 = vsel %vm2972_vm6, %v2949_v7, %v12041_v15  ;;  %v3145_v62 = vsel %vm3101_vm7, %v3016_v22, %v12042_v2  ;;  %v10038_v18 = vld [vmem:[%s6739_s7 + $0x29c] sm:$0xff]  }
 0x3f8   : > { %5420 = vst.msk [vmem:[%s9916_s11 + $0x10c] sm:$0xf] %vm5352_vm13, %v5957_v44  ;;  %v2345_v26 = vpop.permute.xlu0 %2344  ;;  %v3143_v43 = vsel %vm3101_vm7, %v3014_v36, %v12043_v55  ;;  %v3209_v8 = vsel %vm3101_vm7, %v3080_v47, %v12045_v11  ;;  %v3207_v19 = vsel %vm3101_vm7, %v3078_v0, %v12046_v6  ;;  %v3274_v53 = vsel %vm3230_vm8, %v3145_v62, %v12047_v24  ;;  %v12051_v36 = vld [vmem:[#allocation160_spill] sm:$0xff] }
 0x3f9   : > { %2573 = vrot.lane.b32.xlu1 %v12027_v50, %s6649_s26  ;;  %5418 = vst.msk [vmem:[%s9916_s11 + $0x104] sm:$0xf] %vm5352_vm13, %v5955_v25  ;;  %v3272_v5 = vsel %vm3230_vm8, %v3143_v43, %v12048_v38  ;;  %v3336_v60 = vsel %vm3230_vm8, %v3207_v19, %v12049_v40  ;;  %v2163_v25 = vsel %vm1581_vm1, %v2160_v28, %v2162_v61  ;;  %v2434_v50 = vshrl.u32 %v9955_v35, 16  ;;  %v12050_v28 = vld [vmem:[#allocation162_spill] sm:$0xff] }
 0x3fa   : > { %2509 = vrot.lane.b32.xlu0 %v12029_v3, %s6649_s26  ;;  %v3338_v10 = vsel %vm3230_vm8, %v3209_v8, %v9909_v58  ;;  %v3465_v12 = vsel %vm3359_vm9, %v3336_v60, %v9935_v39  ;;  %v10020_v56 = vrot.slane %v2436_v51, 1  ;;  %v3401_v48 = vsel %vm3359_vm9, %v3272_v5, %v2343_v34 }
 0x3fb   : > { %v2558_v37 = vpop.permute.xlu1 %2557  ;;  %v3467_v39 = vsel %vm3359_vm9, %v3338_v10, %v2409_v27  ;;  %v2441_v11 = vshll.u32 %v10038_v18, 16 }
 0x3fc   : > { %v2494_v32 = vpop.permute.xlu0 %2493  ;;  %v3594_v9 = vsel %vm3488_vm10, %v3465_v12, %v2558_v37  ;;  %v3403_v37 = vsel %vm3359_vm9, %v3274_v53, %v2345_v26  ;;  %v10063_v53 = vld [vmem:[%s6739_s7 + $0x2a4] ss:$0 sps:$4 sm:$0x11]  }
 0x3fd   : > { %2575 = vrot.lane.b32.xlu1 %v12037_v13, %s6649_s26  ;;  %v3530_v20 = vsel %vm3488_vm10, %v3401_v48, %v2494_v32 }
 0x3fe   : > { %2511 = vrot.lane.b32.xlu0 %v12044_v14, %s6649_s26 }
 0x3ff   : > { %v2560_v30 = vpop.permute.xlu1 %2559 }
 0x400   : > { %v6095_v31 = vpop.f32.mrb[4].mxu0  ;;  %v2496_v42 = vpop.permute.xlu0 %2495  ;;  %v3596_v27 = vsel %vm3488_vm10, %v3467_v39, %v2560_v30 }
 0x401   : > { %v4455_v44 = vmul.f32 %v6095_v31, %v9839_v46  ;;  %2706 = vrot.lane.b32.xlu1 %v9987_v23, %s6650_s29  ;;  %v3947_v16 = vpop.f32.mrb[5].mxu0  ;;  %v3532_v32 = vsel %vm3488_vm10, %v3403_v37, %v2496_v42  ;;  %v6539_v37 = vld [vmem:[%s6739_s7 + $0xdc] sm:$0xff]  }
 0x402   : > { %v4453_v49 = vmul.f32 %v9839_v46, %v3947_v16  ;;  %v6096_v3 = vpop.f32.mrb[6].mxu0  ;;  %2642 = vrot.lane.b32.xlu0 %v12050_v28, %s6650_s29 }
 0x403   : > { %v4590_v54 = vadd.f32 %v9863_v4, %v4455_v44  ;;  %v4456_v58 = vmul.f32 %v6096_v3, %v9839_v46  ;;  %v2691_v41 = vpop.permute.xlu1 %2690  ;;  %v3950_v63 = vpop.f32.mrb[7].mxu0  ;;  %v2449_v3 = vshll.u32 %v10063_v53, 16 }
 0x404   : > { %v4588_v17 = vadd.f32 %v9863_v4, %v4453_v49  ;;  %v3723_v29 = vsel %vm3617_vm11, %v3594_v9, %v2691_v41  ;;  %v4454_v34 = vmul.f32 %v9839_v46, %v3950_v63  ;;  %v2627_v33 = vpop.permute.xlu0 %2626  ;;  %v2445_v49 = vshrl.u32 %v10038_v18, 16  ;;  %v6536_v9 = vld [vmem:[%s6739_s7 + $0x154] sm:$0xff]   ;;  %v6537_v63 = vld [vmem:[%s6739_s7 + $0x15c] sm:$0xff]  }
 0x405   : > { %v4718_v57 = vmax.f32 %v4590_v54, 0.0  ;;  %v4591_v45 = vadd.f32 %v9863_v4, %v4456_v58  ;;  %2708 = vrot.lane.b32.xlu1 %v2163_v25, %s6650_s29  ;;  %6193 = vmatprep.mubr.msk.bf16.mxu1 %vm3761_vm12, %v3723_v29  ;;  %v3659_v26 = vsel %vm3617_vm11, %v3530_v20, %v2627_v33  ;;  %v6159_v1 = vpop.f32.mrb[4].mxu1  ;;  %v2451_v41 = vrot.slane %v2449_v3, 1  ;;  %v12052_v29 = vld [vmem:[#allocation116_spill] sm:$0xff]  ;;  %v12053_v20 = vld [vmem:[#allocation119_spill] sm:$0xff] }
 0x406   : > { %v4716_v7 = vmax.f32 %v4588_v17, 0.0  ;;  %v4589_v13 = vadd.f32 %v9863_v4, %v4454_v34  ;;  %v4519_v22 = vmul.f32 %v6159_v1, %v9839_v46  ;;  %v4203_v21 = vpop.f32.mrb[5].mxu1  ;;  %2644 = vrot.lane.b32.xlu0 %v12051_v36, %s6650_s29  ;;  %6129 = vmatprep.mubr.msk.bf16.mxu0 %vm3761_vm12, %v3659_v26  ;;  %v6538_v17 = vld [vmem:[%s6739_s7 + $0xe4] sm:$0xff]   ;;  %v12055_v26 = vld [vmem:[#allocation181_spill] sm:$0xff] }
 0x407   : > { %v5896_v61 = vpack.c.bf16 %v4718_v57, %v4718_v57  ;;  %v4719_v52 = vmax.f32 %v4591_v45, 0.0  ;;  %v2693_v51 = vpop.permute.xlu1 %2692  ;;  %v4517_v15 = vmul.f32 %v9839_v46, %v4203_v21  ;;  %v6160_v0 = vpop.f32.mrb[6].mxu1  ;;  %v2762_v34 = vsel %vm2714_vm4, %v6538_v17, %v12052_v29  ;;  %v6540_v45 = vld [vmem:[%s6739_s7 + $0x224] sm:$0xff]  }
 0x408   : > { %v5894_v59 = vpack.c.bf16 %v4716_v7, %v4716_v7  ;;  %v4717_v47 = vmax.f32 %v4589_v13, 0.0  ;;  %v3725_v2 = vsel %vm3617_vm11, %v3596_v27, %v2693_v51  ;;  %v4654_v55 = vadd.f32 %v9863_v4, %v4519_v22  ;;  %v4206_v14 = vpop.f32.mrb[7].mxu1  ;;  %v2629_v30 = vpop.permute.xlu0 %2628  ;;  %v12054_v33 = vld [vmem:[#allocation180_spill] sm:$0xff]  ;;  %v6541_v13 = vld [vmem:[%s6739_s7 + $0x21c] sm:$0xff]   ;;  %v12056_v22 = vld [vmem:[#allocation109_spill] sm:$0xff] }
 0x409   : > { %5359 = vst.msk [vmem:[%s9916_s11 + $0x18] sm:$0xf] %vm5352_vm13, %v5896_v61  ;;  %v5897_v62 = vpack.c.bf16 %v4719_v52, %v4719_v52  ;;  %v4520_v43 = vmul.f32 %v6160_v0, %v9839_v46  ;;  %2290 = vrot.lane.b32.xlu1 %v2163_v25, %s6646_s12  ;;  %6194 = vmatmul.mubr.msk.bf16.gmra.mrb[40].mxu1 %vm3761_vm12, %v3725_v2  ;;  %v2443_v25 = vrot.slane %v2441_v11, 1  ;;  %v2581_v61 = vrot.slane %v9955_v35, 1  ;;  %v12057_v36 = vld [vmem:[#allocation112_spill] sm:$0xff] }
 0x40a   : > { %5357 = vst.msk [vmem:[%s9916_s11 + $0x10] sm:$0xf] %vm5352_vm13, %v5894_v59  ;;  %v5895_v8 = vpack.c.bf16 %v4717_v47, %v4717_v47  ;;  %v4652_v6 = vadd.f32 %v9863_v4, %v4517_v15  ;;  %v4518_v19 = vmul.f32 %v9839_v46, %v4206_v14  ;;  %v3661_v24 = vsel %vm3617_vm11, %v3532_v32, %v2629_v30  ;;  %v12058_v59 = vld [vmem:[#allocation236_spill] sm:$0xff]  ;;  %v12059_v15 = vld [vmem:[#allocation38_spill] sm:$0xff] }
 0x40b   : > { %5360 = vst.msk [vmem:[%s9916_s11 + $0x1c] sm:$0xf] %vm5352_vm13, %v5897_v62  ;;  %v4782_v38 = vmax.f32 %v4654_v55, 0.0  ;;  %v4655_v5 = vadd.f32 %v9863_v4, %v4520_v43  ;;  %2288 = vrot.lane.b32.xlu0 %v9987_v23, %s6646_s12  ;;  %6130 = vmatmul.mubr.msk.bf16.gmra.mrb[40].mxu0 %vm3761_vm12, %v3661_v24  ;;  %v10071_v31 = vpop.permute.xlu1 %2274  ;;  %v2439_v23 = vor.u32 %v10020_v56, %v2434_v50  ;;  %v2582_v52 = vrot.slane %v10038_v18, 1  ;;  %v12060_v62 = vld [vmem:[#allocation237_spill] sm:$0xff]  ;;  %v12061_v55 = vld [vmem:[#allocation258_spill] sm:$0xff] }
 0x40c   : > { %5358 = vst.msk [vmem:[%s9916_s11 + $0x14] sm:$0xf] %vm5352_vm13, %v5895_v8  ;;  %v4780_v40 = vmax.f32 %v4652_v6, 0.0  ;;  %v4653_v60 = vadd.f32 %v9863_v4, %v4518_v19  ;;  %v10076_v16 = vpop.permute.xlu0 %2272  ;;  %v2447_v58 = vor.u32 %v2445_v49, %v2443_v25  ;;  %v2760_v57 = vsel %vm2714_vm4, %v6539_v37, %v12053_v20  ;;  %v12062_v43 = vld [vmem:[#allocation259_spill] sm:$0xff]  ;;  %v12063_v30 = vld [vmem:[#allocation284_spill] sm:$0xff]  ;;  %v12064_v6 = vld [vmem:[#allocation285_spill] sm:$0xff] }
 0x40d   : > { %v5960_v42 = vpack.c.bf16 %v4782_v38, %v4782_v38  ;;  %v4783_v44 = vmax.f32 %v4655_v5, 0.0  ;;  %2426 = vrot.lane.b32.xlu1 %v9955_v35, %s6647_s13  ;;  %v2444_v28 = vsel %vm812_vm0, %v2439_v23, %v2443_v25  ;;  %v2826_v27 = vsel %vm2714_vm4, %v6540_v45, %v12054_v33  ;;  %v12065_v24 = vld [vmem:[#allocation308_spill] sm:$0xff]  ;;  %v12068_v25 = vld [vmem:[#allocation333_spill] sm:$0xff]  ;;  %s6651_s12 = smov [#allocation2]  }
 0x40e   : > { %v5958_v10 = vpack.c.bf16 %v4780_v40, %v4780_v40  ;;  %v4781_v12 = vmax.f32 %v4653_v60, 0.0  ;;  %v2824_v1 = vsel %vm2714_vm4, %v6541_v13, %v12055_v26  ;;  %v2452_v32 = vsel %vm812_vm0, %v2447_v58, %v2451_v41 }
 0x40f   : > { %5423 = vst.msk [vmem:[%s9916_s11 + $0x118] sm:$0xf] %vm5352_vm13, %v5960_v42  ;;  %v5961_v48 = vpack.c.bf16 %v4783_v44, %v4783_v44  ;;  %2362 = vrot.lane.b32.xlu0 %v6536_v9, %s6647_s13  ;;  %v2411_v54 = vpop.permute.xlu1 %2410  ;;  %v2891_v21 = vsel %vm2843_vm5, %v2762_v34, %v12056_v22  ;;  %v2889_v51 = vsel %vm2843_vm5, %v2760_v57, %v12057_v36  ;;  %v2584_v2 = vrot.slane %v10063_v53, 1  ;;  %v12066_v53 = vld [vmem:[#allocation309_spill] sm:$0xff]  ;;  %v12067_v44 = vld [vmem:[#allocation332_spill] sm:$0xff] }
 0x410   : > { %5421 = vst.msk [vmem:[%s9916_s11 + $0x110] sm:$0xf] %vm5352_vm13, %v5958_v10  ;;  %v5959_v50 = vpack.c.bf16 %v4781_v12, %v4781_v12  ;;  %v2347_v56 = vpop.permute.xlu0 %2346  ;;  %v2955_v47 = vsel %vm2843_vm5, %v2826_v27, %v12058_v59  ;;  %v2953_v35 = vsel %vm2843_vm5, %v2824_v1, %v12060_v62  ;;  %v3018_v14 = vsel %vm2972_vm6, %v2889_v51, %v12062_v43 }
 0x411   : > { %5424 = vst.msk [vmem:[%s9916_s11 + $0x11c] sm:$0xf] %vm5352_vm13, %v5961_v48  ;;  %2428 = vrot.lane.b32.xlu1 %v10038_v18, %s6647_s13  ;;  %v3020_v18 = vsel %vm2972_vm6, %v2891_v21, %v12061_v55  ;;  %v3084_v11 = vsel %vm2972_vm6, %v2955_v47, %v12063_v30  ;;  %v3082_v19 = vsel %vm2972_vm6, %v2953_v35, %v12064_v6  ;;  %v12069_v48 = vld [vmem:[#allocation354_spill] sm:$0xff] }
 0x412   : > { %5422 = vst.msk [vmem:[%s9916_s11 + $0x114] sm:$0xf] %vm5352_vm13, %v5959_v50  ;;  %v3149_v38 = vsel %vm3101_vm7, %v3020_v18, %v12065_v24  ;;  %v3147_v5 = vsel %vm3101_vm7, %v3018_v14, %v12066_v53  ;;  %v3213_v23 = vsel %vm3101_vm7, %v3084_v11, %v12067_v44  ;;  %v3211_v10 = vsel %vm3101_vm7, %v3082_v19, %v12068_v25  ;;  %v12071_v21 = vld [vmem:[#allocation166_spill] sm:$0xff]  ;;  %v12072_v11 = vld [vmem:[#allocation353_spill] sm:$0xff]  ;;  %v12073_v53 = vld [vmem:[#allocation164_spill] sm:$0xff] }
 0x413   : > { %2364 = vrot.lane.b32.xlu0 %v6537_v63, %s6647_s13  ;;  %v2413_v39 = vpop.permute.xlu1 %2412  ;;  %v2583_v3 = vsel %vm1581_vm1, %v2581_v61, %v2582_v52  ;;  %v3276_v9 = vsel %vm3230_vm8, %v3147_v5, %v12069_v48  ;;  %v2585_v17 = vsel %vm1581_vm1, %v2582_v52, %v2584_v2  ;;  %v3342_v29 = vsel %vm3230_vm8, %v3213_v23, %v10071_v31  ;;  %s6566_s13 = sshll.u32 %s6651_s12, 4  ;;  %s6567_s13 = int_to_ptr.vmem [resolvable:$false] %s6566_s13 }
 0x414   : > { %v10109_v7 = vpop.permute.xlu0 %2348  ;;  %v3340_v34 = vsel %vm3230_vm8, %v3211_v10, %v10076_v16  ;;  %v3405_v45 = vsel %vm3359_vm9, %v3276_v9, %v2347_v56  ;;  %v3471_v26 = vsel %vm3359_vm9, %v3342_v29, %v2413_v39  ;;  %v12074_v29 = vld [vmem:[#allocation122_spill] sm:$0xff]  ;;  %s6568_s14 = scalar_lea.vmem %s6567_s13, 16384  ;;  %p6569_p1 = scmp.lt.s32.totalorder %s10928_s30, %s6567_s13 }
 0x415   : > { %2577 = vrot.lane.b32.xlu1 %v2444_v28, %s6649_s26  ;;  %v12070_v28 = vld [vmem:[#allocation37_spill] sm:$0xff]  ;;  %v3469_v57 = vsel %vm3359_vm9, %v3340_v34, %v2411_v54  ;;  %p6570_p2 = scmp.lt.s32.totalorder %s6568_s14, %s6562_s10 }
 0x417   : > { %2513 = vrot.lane.b32.xlu0 %v12059_v15, %s6649_s26  ;;  %v2562_v0 = vpop.permute.xlu1 %2561  ;;  %p6571_p3 = por %p6570_p2, %p6569_p1 }
 0x418   : > { %v6099_v8 = vpop.f32.mrb[8].mxu0  ;;  %v2498_v40 = vpop.permute.xlu0 %2497  ;;  %v3598_v31 = vsel %vm3488_vm10, %v3469_v57, %v2562_v0 }
 0x419   : > { %v4459_v60 = vmul.f32 %v6099_v8, %v9839_v46  ;;  %2579 = vrot.lane.b32.xlu1 %v2452_v32, %s6649_s26  ;;  %v3963_v42 = vpop.f32.mrb[9].mxu0  ;;  %v3534_v61 = vsel %vm3488_vm10, %v3405_v45, %v2498_v40  ;;  %v3278_v8 = vsel %vm3230_vm8, %v3149_v38, %v12072_v11  ;;  %v6544_v45 = vld [vmem:[%s6739_s7 + $0x238] sm:$0xff]   ;;  %p6572_p5 = pnand %p6571_p3, %p6565_p0 }
 0x41a   : > { %v4457_v12 = vmul.f32 %v9839_v46, %v3963_v42  ;;  %v6100_v49 = vpop.f32.mrb[10].mxu0  ;;  %v3407_v40 = vsel %vm3359_vm9, %v3278_v8, %v10109_v7  ;;  %v12085_v8 = vld [vmem:[#allocation287_spill] sm:$0xff] }
 0x41b   : > { %v4594_v50 = vadd.f32 %v9863_v4, %v4459_v60  ;;  %2515 = vrot.lane.b32.xlu0 %v12070_v28, %s6649_s26  ;;  %v4460_v58 = vmul.f32 %v6100_v49, %v9839_v46  ;;  %v2564_v41 = vpop.permute.xlu1 %2563  ;;  %v3966_v63 = vpop.f32.mrb[11].mxu0 }
 0x41c   : > { %v4592_v37 = vadd.f32 %v9863_v4, %v4457_v12  ;;  %v4458_v20 = vmul.f32 %v9839_v46, %v3966_v63  ;;  %v2500_v13 = vpop.permute.xlu0 %2499  ;;  %v3600_v6 = vsel %vm3488_vm10, %v3471_v26, %v2564_v41 }
 0x41d   : > { %v4722_v33 = vmax.f32 %v4594_v50, 0.0  ;;  %v4595_v27 = vadd.f32 %v9863_v4, %v4460_v58  ;;  %2710 = vrot.lane.b32.xlu1 %v2583_v3, %s6650_s29  ;;  %v6163_v32 = vpop.f32.mrb[8].mxu1  ;;  %v3536_v44 = vsel %vm3488_vm10, %v3407_v40, %v2500_v13 }
 0x41e   : > { %v4720_v16 = vmax.f32 %v4592_v37, 0.0  ;;  %v4593_v1 = vadd.f32 %v9863_v4, %v4458_v20  ;;  %v4523_v56 = vmul.f32 %v6163_v32, %v9839_v46  ;;  %v4219_v22 = vpop.f32.mrb[9].mxu1  ;;  %v6543_v37 = vld [vmem:[%s6739_s7 + $0xf0] sm:$0xff]  }
 0x41f   : > { %v5900_v54 = vpack.c.bf16 %v4722_v33, %v4722_v33  ;;  %v4723_v52 = vmax.f32 %v4595_v27, 0.0  ;;  %2646 = vrot.lane.b32.xlu0 %v12071_v21, %s6650_s29  ;;  %v2695_v36 = vpop.permute.xlu1 %2694  ;;  %v4521_v59 = vmul.f32 %v9839_v46, %v4219_v22  ;;  %v6164_v47 = vpop.f32.mrb[10].mxu1  ;;  %v12075_v20 = vld [vmem:[#allocation125_spill] sm:$0xff]  ;;  %v12076_v33 = vld [vmem:[#allocation182_spill] sm:$0xff] }
 0x420   : > { %v5898_v39 = vpack.c.bf16 %v4720_v16, %v4720_v16  ;;  %v4721_v51 = vmax.f32 %v4593_v1, 0.0  ;;  %v3727_v15 = vsel %vm3617_vm11, %v3598_v31, %v2695_v36  ;;  %v4658_v2 = vadd.f32 %v9863_v4, %v4523_v56  ;;  %v4222_v35 = vpop.f32.mrb[11].mxu1  ;;  %v2631_v55 = vpop.permute.xlu0 %2630  ;;  %v6545_v16 = vld [vmem:[%s6739_s7 + $0x230] sm:$0xff]   ;;  %v12077_v1 = vld [vmem:[#allocation183_spill] sm:$0xff]  ;;  %v12080_v36 = vld [vmem:[#allocation238_spill] sm:$0xff] }
 0x421   : > { %5363 = vst.msk [vmem:[%s9916_s11 + $0x28] sm:$0xf] %vm5352_vm13, %v5900_v54  ;;  %v5901_v0 = vpack.c.bf16 %v4723_v52, %v4723_v52  ;;  %v4524_v62 = vmul.f32 %v6164_v47, %v9839_v46  ;;  %2712 = vrot.lane.b32.xlu1 %v2585_v17, %s6650_s29  ;;  %6197 = vmatprep.mubr.msk.bf16.mxu1 %vm3761_vm12, %v3727_v15  ;;  %v6542_v17 = vld [vmem:[%s6739_s7 + $0xf8] sm:$0xff]  }
 0x422   : > { %5361 = vst.msk [vmem:[%s9916_s11 + $0x20] sm:$0xf] %vm5352_vm13, %v5898_v39  ;;  %v5899_v18 = vpack.c.bf16 %v4721_v51, %v4721_v51  ;;  %v4656_v43 = vadd.f32 %v9863_v4, %v4521_v59  ;;  %v4522_v14 = vmul.f32 %v9839_v46, %v4222_v35  ;;  %v3663_v30 = vsel %vm3617_vm11, %v3534_v61, %v2631_v55  ;;  %v12078_v61 = vld [vmem:[#allocation115_spill] sm:$0xff]  ;;  %v12079_v52 = vld [vmem:[#allocation118_spill] sm:$0xff]  ;;  %v12083_v55 = vld [vmem:[#allocation261_spill] sm:$0xff] }
 0x423   : > { %5364 = vst.msk [vmem:[%s9916_s11 + $0x2c] sm:$0xf] %vm5352_vm13, %v5901_v0  ;;  %v4786_v19 = vmax.f32 %v4658_v2, 0.0  ;;  %v4659_v24 = vadd.f32 %v9863_v4, %v4524_v62  ;;  %2648 = vrot.lane.b32.xlu0 %v12073_v53, %s6650_s29  ;;  %6133 = vmatprep.mubr.msk.bf16.mxu0 %vm3761_vm12, %v3663_v30  ;;  %v2697_v5 = vpop.permute.xlu1 %2696  ;;  %v2766_v34 = vsel %vm2714_vm4, %v6542_v17, %v12074_v29  ;;  %v12081_v51 = vld [vmem:[#allocation239_spill] sm:$0xff]  ;;  %v12082_v62 = vld [vmem:[#allocation260_spill] sm:$0xff]  ;;  %v12084_v30 = vld [vmem:[#allocation286_spill] sm:$0xff] }
 0x424   : > { %5362 = vst.msk [vmem:[%s9916_s11 + $0x24] sm:$0xf] %vm5352_vm13, %v5899_v18  ;;  %v4784_v38 = vmax.f32 %v4656_v43, 0.0  ;;  %v4657_v60 = vadd.f32 %v9863_v4, %v4522_v14  ;;  %v3729_v42 = vsel %vm3617_vm11, %v3600_v6, %v2697_v5  ;;  %v2633_v10 = vpop.permute.xlu0 %2632  ;;  %v2764_v57 = vsel %vm2714_vm4, %v6543_v37, %v12075_v20  ;;  %v12086_v5 = vld [vmem:[#allocation310_spill] sm:$0xff]  ;;  %s6018_s29 = sshll.u32 %s6632_s18, 13 }
 0x425   : > { %v5964_v23 = vpack.c.bf16 %v4786_v19, %v4786_v19  ;;  %v4787_v25 = vmax.f32 %v4659_v24, 0.0  ;;  %6198 = vmatmul.mubr.msk.bf16.gmra.mrb[44].mxu1 %vm3761_vm12, %v3729_v42  ;;  %v3665_v49 = vsel %vm3617_vm11, %v3536_v44, %v2633_v10  ;;  %v2830_v27 = vsel %vm2714_vm4, %v6544_v45, %v12076_v33  ;;  %s10926_s8 = scalar_lea.hbm %s10990_s4, %s6018_s29 }
 0x426   : > { %v5962_v12 = vpack.c.bf16 %v4784_v38, %v4784_v38  ;;  %v4785_v7 = vmax.f32 %v4657_v60, 0.0  ;;  %6134 = vmatmul.mubr.msk.bf16.gmra.mrb[44].mxu0 %vm3761_vm12, %v3665_v49  ;;  %v2828_v32 = vsel %vm2714_vm4, %v6545_v16, %v12077_v1  ;;  %v2895_v54 = vsel %vm2843_vm5, %v2766_v34, %v12078_v61  ;;  %v12087_v38 = vld [vmem:[#allocation311_spill] sm:$0xff] }
 0x427   : > { %5427 = vst.msk [vmem:[%s9916_s11 + $0x128] sm:$0xf] %vm5352_vm13, %v5964_v23  ;;  %v5965_v3 = vpack.c.bf16 %v4787_v25, %v4787_v25  ;;  %v10207_v48 = vpop.permute.xlu1 %2278  ;;  %v2893_v56 = vsel %vm2843_vm5, %v2764_v57, %v12079_v52  ;;  %v2959_v39 = vsel %vm2843_vm5, %v2830_v27, %v12080_v36  ;;  %v2957_v59 = vsel %vm2843_vm5, %v2828_v32, %v12081_v51  ;;  %v12088_v25 = vld [vmem:[#allocation334_spill] sm:$0xff] }
 0x428   : > { %5425 = vst.msk [vmem:[%s9916_s11 + $0x120] sm:$0xf] %vm5352_vm13, %v5962_v12  ;;  %v5963_v9 = vpack.c.bf16 %v4785_v7, %v4785_v7  ;;  %v2277_v50 = vpop.permute.xlu0 %2276  ;;  %v3024_v35 = vsel %vm2972_vm6, %v2895_v54, %v12082_v62  ;;  %v3022_v18 = vsel %vm2972_vm6, %v2893_v56, %v12083_v55  ;;  %v3088_v11 = vsel %vm2972_vm6, %v2959_v39, %v12084_v30 }
 0x429   : > { %5428 = vst.msk [vmem:[%s9916_s11 + $0x12c] sm:$0xf] %vm5352_vm13, %v5965_v3  ;;  %v3086_v6 = vsel %vm2972_vm6, %v2957_v59, %v12085_v8  ;;  %v3153_v40 = vsel %vm3101_vm7, %v3024_v35, %v12086_v5  ;;  %v3151_v60 = vsel %vm3101_vm7, %v3022_v18, %v12087_v38  ;;  %v3217_v10 = vsel %vm3101_vm7, %v3088_v11, %v12088_v25  ;;  %v12091_v18 = vld [vmem:[#allocation355_spill] sm:$0xff] }
 0x42a   : > { %5426 = vst.msk [vmem:[%s9916_s11 + $0x124] sm:$0xf] %vm5352_vm13, %v5963_v9  ;;  %v3346_v59 = vsel %vm3230_vm8, %v3217_v10, %v10207_v48  ;;  %v3282_v48 = vsel %vm3230_vm8, %v3153_v40, %v12091_v18 }
 0x42b   : > { %v2415_v28 = vpop.permute.xlu1 %2414 }
 0x42c   : > { %v10215_v58 = vpop.permute.xlu0 %2350 }
 0x42f   : > { %v10217_v41 = vpop.permute.xlu1 %2416 }
 0x430   : > { %v6103_v63 = vpop.f32.mrb[12].mxu0  ;;  %v10228_v13 = vpop.permute.xlu0 %2352 }
 0x431   : > { %v4463_v26 = vmul.f32 %v6103_v63, %v9839_v46  ;;  %v3979_v31 = vpop.f32.mrb[13].mxu0  ;;  %v12089_v63 = vld [vmem:[#allocation335_spill] sm:$0xff]  ;;  %v3411_v11 = vsel %vm3359_vm9, %v3282_v48, %v10228_v13 }
 0x432   : > { %v4461_v22 = vmul.f32 %v9839_v46, %v3979_v31  ;;  %v6104_v21 = vpop.f32.mrb[14].mxu0  ;;  %v3215_v17 = vsel %vm3101_vm7, %v3086_v6, %v12089_v63 }
 0x433   : > { %v4598_v47 = vadd.f32 %v9863_v4, %v4463_v26  ;;  %v4464_v15 = vmul.f32 %v6104_v21, %v9839_v46  ;;  %v2566_v0 = vpop.permute.xlu1 %2565  ;;  %v3982_v2 = vpop.f32.mrb[15].mxu0  ;;  %v3344_v57 = vsel %vm3230_vm8, %v3215_v17, %v2277_v50  ;;  %v12090_v50 = vld [vmem:[#allocation356_spill] sm:$0xff] }
 0x434   : > { %v4596_v43 = vadd.f32 %v9863_v4, %v4461_v22  ;;  %v4462_v14 = vmul.f32 %v9839_v46, %v3982_v2  ;;  %v2502_v53 = vpop.permute.xlu0 %2501  ;;  %v3473_v16 = vsel %vm3359_vm9, %v3344_v57, %v2415_v28  ;;  %v3280_v54 = vsel %vm3230_vm8, %v3151_v60, %v12090_v50  ;;  %v12093_v57 = vld [vmem:[#allocation131_spill] sm:$0xff] }
 0x435   : > { %v4726_v19 = vmax.f32 %v4598_v47, 0.0  ;;  %v4599_v24 = vadd.f32 %v9863_v4, %v4464_v15  ;;  %v6167_v23 = vpop.f32.mrb[12].mxu1  ;;  %v3602_v52 = vsel %vm3488_vm10, %v3473_v16, %v2566_v0  ;;  %v3409_v28 = vsel %vm3359_vm9, %v3280_v54, %v10215_v58  ;;  %v12094_v16 = vld [vmem:[#allocation185_spill] sm:$0xff] }
 0x436   : > { %v4724_v42 = vmax.f32 %v4596_v43, 0.0  ;;  %v4597_v44 = vadd.f32 %v9863_v4, %v4462_v14  ;;  %v4527_v49 = vmul.f32 %v6167_v23, %v9839_v46  ;;  %v4235_v3 = vpop.f32.mrb[13].mxu1  ;;  %v3538_v47 = vsel %vm3488_vm10, %v3409_v28, %v2502_v53 }
 0x437   : > { %v5904_v12 = vpack.c.bf16 %v4726_v19, %v4726_v19  ;;  %v4727_v7 = vmax.f32 %v4599_v24, 0.0  ;;  %v2568_v9 = vpop.permute.xlu1 %2567  ;;  %v4525_v37 = vmul.f32 %v9839_v46, %v4235_v3  ;;  %v6168_v20 = vpop.f32.mrb[14].mxu1  ;;  %v3475_v58 = vsel %vm3359_vm9, %v3346_v59, %v10217_v41  ;;  %v12096_v59 = vld [vmem:[#allocation121_spill] sm:$0xff] }
 0x438   : > { %v5902_v29 = vpack.c.bf16 %v4724_v42, %v4724_v42  ;;  %v4725_v34 = vmax.f32 %v4597_v44, 0.0  ;;  %v4662_v33 = vadd.f32 %v9863_v4, %v4527_v49  ;;  %v4528_v27 = vmul.f32 %v6168_v20, %v9839_v46  ;;  %v4238_v26 = vpop.f32.mrb[15].mxu1  ;;  %v2504_v31 = vpop.permute.xlu0 %2503  ;;  %v6547_v20 = vld [vmem:[%s6739_s7 + $0x104] sm:$0xff]  }
 0x439   : > { %5367 = vst.msk [vmem:[%s9916_s11 + $0x38] sm:$0xf] %vm5352_vm13, %v5904_v12  ;;  %v5905_v45 = vpack.c.bf16 %v4727_v7, %v4727_v7  ;;  %v4660_v32 = vadd.f32 %v9863_v4, %v4525_v37  ;;  %v4526_v61 = vmul.f32 %v9839_v46, %v4238_v26  ;;  %v3604_v14 = vsel %vm3488_vm10, %v3475_v58, %v2568_v9 }
 0x43a   : > { %5365 = vst.msk [vmem:[%s9916_s11 + $0x30] sm:$0xf] %vm5352_vm13, %v5902_v29  ;;  %v5903_v1 = vpack.c.bf16 %v4725_v34, %v4725_v34  ;;  %v4790_v56 = vmax.f32 %v4662_v33, 0.0  ;;  %v4663_v22 = vadd.f32 %v9863_v4, %v4528_v27  ;;  %v3540_v6 = vsel %vm3488_vm10, %v3411_v11, %v2504_v31  ;;  %v6546_v29 = vld [vmem:[%s6739_s7 + $0x10c] sm:$0xff]  }
 0x43b   : > { %5368 = vst.msk [vmem:[%s9916_s11 + $0x3c] sm:$0xf] %vm5352_vm13, %v5905_v45  ;;  %v2699_v21 = vpop.permute.xlu1 %2698  ;;  %v4788_v36 = vmax.f32 %v4660_v32, 0.0  ;;  %v4661_v39 = vadd.f32 %v9863_v4, %v4526_v61  ;;  %v12092_v34 = vld [vmem:[#allocation128_spill] sm:$0xff]  ;;  %v2768_v45 = vsel %vm2714_vm4, %v6547_v20, %v12093_v57  ;;  %v12099_v11 = vld [vmem:[#allocation289_spill] sm:$0xff]  ;;  %v12105_v57 = vld [vmem:[#allocation358_spill] sm:$0xff] }
 0x43c   : > { %5366 = vst.msk [vmem:[%s9916_s11 + $0x34] sm:$0xf] %vm5352_vm13, %v5903_v1  ;;  %v3731_v51 = vsel %vm3617_vm11, %v3602_v52, %v2699_v21  ;;  %v5968_v15 = vpack.c.bf16 %v4790_v56, %v4790_v56  ;;  %v4791_v0 = vmax.f32 %v4663_v22, 0.0  ;;  %v2635_v2 = vpop.permute.xlu0 %2634  ;;  %v2770_v37 = vsel %vm2714_vm4, %v6546_v29, %v12092_v34  ;;  %v6548_v31 = vld [vmem:[%s6739_s7 + $0x24c] sm:$0xff]   ;;  %v6549_v56 = vld [vmem:[%s6739_s7 + $0x244] sm:$0xff]  }
 0x43d   : > { %6201 = vmatprep.mubr.msk.bf16.mxu1 %vm3761_vm12, %v3731_v51  ;;  %v5966_v62 = vpack.c.bf16 %v4788_v36, %v4788_v36  ;;  %v4789_v35 = vmax.f32 %v4661_v39, 0.0  ;;  %v3667_v55 = vsel %vm3617_vm11, %v3538_v47, %v2635_v2  ;;  %v2834_v1 = vsel %vm2714_vm4, %v6548_v31, %v12094_v16  ;;  %v12095_v22 = vld [vmem:[#allocation187_spill] sm:$0xff]  ;;  %v12104_v20 = vld [vmem:[#allocation288_spill] sm:$0xff] }
 0x43e   : > { %5431 = vst.msk [vmem:[%s9916_s11 + $0x138] sm:$0xf] %vm5352_vm13, %v5968_v15  ;;  %v5969_v43 = vpack.c.bf16 %v4791_v0, %v4791_v0  ;;  %6137 = vmatprep.mubr.msk.bf16.mxu0 %vm3761_vm12, %v3667_v55  ;;  %v2832_v21 = vsel %vm2714_vm4, %v6549_v56, %v12095_v22  ;;  %v2899_v47 = vsel %vm2843_vm5, %v2770_v37, %v12096_v59  ;;  %v12108_v56 = vld [vmem:[#allocation312_spill] sm:$0xff] }
 0x43f   : > { %v2701_v30 = vpop.permute.xlu1 %2700  ;;  %5429 = vst.msk [vmem:[%s9916_s11 + $0x130] sm:$0xf] %vm5352_vm13, %v5966_v62  ;;  %v5967_v41 = vpack.c.bf16 %v4789_v35, %v4789_v35  ;;  %v12097_v35 = vld [vmem:[#allocation241_spill] sm:$0xff] }
 0x440   : > { %v3733_v8 = vsel %vm3617_vm11, %v3604_v14, %v2701_v30  ;;  %5432 = vst.msk [vmem:[%s9916_s11 + $0x13c] sm:$0xf] %vm5352_vm13, %v5969_v43  ;;  %v2637_v19 = vpop.permute.xlu0 %2636  ;;  %v2961_v55 = vsel %vm2843_vm5, %v2832_v21, %v12097_v35  ;;  %v12098_v14 = vld [vmem:[#allocation124_spill] sm:$0xff] }
 0x441   : > { %6202 = vmatmul.mubr.msk.bf16.gmra.mrb[48].mxu1 %vm3761_vm12, %v3733_v8  ;;  %5430 = vst.msk [vmem:[%s9916_s11 + $0x134] sm:$0xf] %vm5352_vm13, %v5967_v41  ;;  %v3669_v24 = vsel %vm3617_vm11, %v3540_v6, %v2637_v19  ;;  %v2897_v30 = vsel %vm2843_vm5, %v2768_v45, %v12098_v14  ;;  %v3090_v41 = vsel %vm2972_vm6, %v2961_v55, %v12099_v11 }
 0x442   : > { %6138 = vmatmul.mubr.msk.bf16.gmra.mrb[48].mxu0 %vm3761_vm12, %v3669_v24  ;;  %v12100_v24 = vld [vmem:[#allocation240_spill] sm:$0xff] }
 0x443   : > { %v10315_v53 = vpop.permute.xlu1 %2282 }
 0x444   : > { %v2281_v13 = vpop.permute.xlu0 %2280 }
 0x447   : > { %v10317_v5 = vpop.permute.xlu1 %2418 }
 0x448   : > { %v6107_v40 = vpop.f32.mrb[16].mxu0  ;;  %v10319_v38 = vpop.permute.xlu0 %2354 }
 0x449   : > { %v4467_v60 = vmul.f32 %v6107_v40, %v9839_v46  ;;  %v3995_v42 = vpop.f32.mrb[17].mxu0  ;;  %v2963_v40 = vsel %vm2843_vm5, %v2834_v1, %v12100_v24 }
 0x44a   : > { %v4465_v44 = vmul.f32 %v9839_v46, %v3995_v42  ;;  %v6108_v23 = vpop.f32.mrb[18].mxu0 }
 0x44b   : > { %v4602_v25 = vadd.f32 %v9863_v4, %v4467_v60  ;;  %v4468_v10 = vmul.f32 %v6108_v23, %v9839_v46  ;;  %v10325_v12 = vpop.permute.xlu1 %2420  ;;  %v3998_v7 = vpop.f32.mrb[19].mxu0  ;;  %v12101_v60 = vld [vmem:[#allocation337_spill] sm:$0xff]  ;;  %v12102_v23 = vld [vmem:[#allocation263_spill] sm:$0xff] }
 0x44c   : > { %v4600_v49 = vadd.f32 %v9863_v4, %v4465_v44  ;;  %v4466_v3 = vmul.f32 %v9839_v46, %v3998_v7  ;;  %v10330_v17 = vpop.permute.xlu0 %2356  ;;  %v3219_v42 = vsel %vm3101_vm7, %v3090_v41, %v12101_v60 }
 0x44d   : > { %v4730_v9 = vmax.f32 %v4602_v25, 0.0  ;;  %v4603_v63 = vadd.f32 %v9863_v4, %v4468_v10  ;;  %v6171_v26 = vpop.f32.mrb[16].mxu1  ;;  %v3026_v25 = vsel %vm2972_vm6, %v2897_v30, %v12102_v23  ;;  %v3348_v10 = vsel %vm3230_vm8, %v3219_v42, %v2281_v13 }
 0x44e   : > { %v4728_v33 = vmax.f32 %v4600_v49, 0.0  ;;  %v4601_v27 = vadd.f32 %v9863_v4, %v4466_v3  ;;  %v4531_v50 = vmul.f32 %v6171_v26, %v9839_v46  ;;  %v4251_v54 = vpop.f32.mrb[17].mxu1  ;;  %v3477_v29 = vsel %vm3359_vm9, %v3348_v10, %v10317_v5  ;;  %v12106_v26 = vld [vmem:[#allocation336_spill] sm:$0xff] }
 0x44f   : > { %v5908_v32 = vpack.c.bf16 %v4730_v9, %v4730_v9  ;;  %v4731_v61 = vmax.f32 %v4603_v63, 0.0  ;;  %v2570_v52 = vpop.permute.xlu1 %2569  ;;  %v4529_v39 = vmul.f32 %v9839_v46, %v4251_v54  ;;  %v6172_v51 = vpop.f32.mrb[18].mxu1  ;;  %v12103_v9 = vld [vmem:[#allocation313_spill] sm:$0xff] }
 0x450   : > { %v5906_v28 = vpack.c.bf16 %v4728_v33, %v4728_v33  ;;  %v4729_v36 = vmax.f32 %v4601_v27, 0.0  ;;  %v4666_v0 = vadd.f32 %v9863_v4, %v4531_v50  ;;  %v4532_v2 = vmul.f32 %v6172_v51, %v9839_v46  ;;  %v4254_v58 = vpop.f32.mrb[19].mxu1  ;;  %v2506_v62 = vpop.permute.xlu0 %2505 }
 0x451   : > { %5371 = vst.msk [vmem:[%s9916_s11 + $0x48] sm:$0xf] %vm5352_vm13, %v5908_v32  ;;  %v5909_v15 = vpack.c.bf16 %v4731_v61, %v4731_v61  ;;  %v4664_v48 = vadd.f32 %v9863_v4, %v4529_v39  ;;  %v4530_v43 = vmul.f32 %v9839_v46, %v4254_v58  ;;  %v3155_v63 = vsel %vm3101_vm7, %v3026_v25, %v12103_v9  ;;  %v12107_v32 = vld [vmem:[#allocation262_spill] sm:$0xff] }
 0x452   : > { %5369 = vst.msk [vmem:[%s9916_s11 + $0x40] sm:$0xf] %vm5352_vm13, %v5906_v28  ;;  %v5907_v18 = vpack.c.bf16 %v4729_v36, %v4729_v36  ;;  %v4794_v8 = vmax.f32 %v4666_v0, 0.0  ;;  %v4667_v6 = vadd.f32 %v9863_v4, %v4532_v2  ;;  %v3284_v45 = vsel %vm3230_vm8, %v3155_v63, %v12105_v57  ;;  %v12109_v28 = vld [vmem:[#allocation357_spill] sm:$0xff] }
 0x453   : > { %5372 = vst.msk [vmem:[%s9916_s11 + $0x4c] sm:$0xf] %vm5352_vm13, %v5909_v15  ;;  %v2572_v19 = vpop.permute.xlu1 %2571  ;;  %v4792_v46 = vmax.f32 %v4664_v48, 0.0  ;;  %v4665_v44 = vadd.f32 %v9863_v4, %v4530_v43  ;;  %v3092_v4 = vsel %vm2972_vm6, %v2963_v40, %v12104_v20  ;;  %v3606_v33 = vsel %vm3488_vm10, %v3477_v29, %v2570_v52  ;;  %v10434_v48 = vld [vmem:[%s10989_s3] ss:$0 sm:$0xff] }
 0x454   : > { %5370 = vst.msk [vmem:[%s9916_s11 + $0x44] sm:$0xf] %vm5352_vm13, %v5907_v18  ;;  %v5972_v7 = vpack.c.bf16 %v4794_v8, %v4794_v8  ;;  %v4795_v49 = vmax.f32 %v4667_v6, 0.0  ;;  %v2508_v3 = vpop.permute.xlu0 %2507  ;;  %v3221_v31 = vsel %vm3101_vm7, %v3092_v4, %v12106_v26  ;;  %v3413_v5 = vsel %vm3359_vm9, %v3284_v45, %v10319_v38 }
 0x455   : > { %v5970_v34 = vpack.c.bf16 %v4792_v46, %v4792_v46  ;;  %v4793_v37 = vmax.f32 %v4665_v44, 0.0  ;;  %v3028_v61 = vsel %vm2972_vm6, %v2899_v47, %v12107_v32  ;;  %v3350_v50 = vsel %vm3230_vm8, %v3221_v31, %v10315_v53 }
 0x456   : > { %5435 = vst.msk [vmem:[%s9916_s11 + $0x148] sm:$0xf] %vm5352_vm13, %v5972_v7  ;;  %v5973_v13 = vpack.c.bf16 %v4795_v49, %v4795_v49  ;;  %v3542_v54 = vsel %vm3488_vm10, %v3413_v5, %v2506_v62  ;;  %v3157_v38 = vsel %vm3101_vm7, %v3028_v61, %v12108_v56  ;;  %v3479_v22 = vsel %vm3359_vm9, %v3350_v50, %v10325_v12  ;;  %v6552_v5 = vld [vmem:[%s6739_s7 + $0x258] sm:$0xff]  }
 0x457   : > { %v2703_v27 = vpop.permute.xlu1 %2702  ;;  %5433 = vst.msk [vmem:[%s9916_s11 + $0x140] sm:$0xf] %vm5352_vm13, %v5970_v34  ;;  %v5971_v16 = vpack.c.bf16 %v4793_v37, %v4793_v37  ;;  %v3286_v53 = vsel %vm3230_vm8, %v3157_v38, %v12109_v28  ;;  %v3608_v36 = vsel %vm3488_vm10, %v3479_v22, %v2572_v19  ;;  %v6553_v22 = vld [vmem:[%s6739_s7 + $0x118] sm:$0xff]  }
 0x458   : > { %v3735_v1 = vsel %vm3617_vm11, %v3606_v33, %v2703_v27  ;;  %5436 = vst.msk [vmem:[%s9916_s11 + $0x14c] sm:$0xf] %vm5352_vm13, %v5973_v13  ;;  %v2639_v52 = vpop.permute.xlu0 %2638  ;;  %v3415_v51 = vsel %vm3359_vm9, %v3286_v53, %v10330_v17  ;;  %v10427_v17 = vld [vmem:[%s10988_s2] ss:$0 sm:$0xff] }
 0x459   : > { %6205 = vmatprep.mubr.msk.bf16.mxu1 %vm3761_vm12, %v3735_v1  ;;  %5434 = vst.msk [vmem:[%s9916_s11 + $0x144] sm:$0xf] %vm5352_vm13, %v5971_v16  ;;  %v3671_v21 = vsel %vm3617_vm11, %v3542_v54, %v2639_v52  ;;  %v3544_v47 = vsel %vm3488_vm10, %v3415_v51, %v2508_v3  ;;  %v12110_v16 = vld [vmem:[#allocation191_spill] sm:$0xff] }
 0x45a   : > { %6141 = vmatprep.mubr.msk.bf16.mxu0 %vm3761_vm12, %v3671_v21  ;;  %v2836_v1 = vsel %vm2714_vm4, %v6552_v5, %v12110_v16  ;;  %v12111_v54 = vld [vmem:[#allocation243_spill] sm:$0xff]  ;;  %v12112_v21 = vld [vmem:[#allocation137_spill] sm:$0xff] }
 0x45b   : > { %v2705_v39 = vpop.permute.xlu1 %2704  ;;  %v2965_v52 = vsel %vm2843_vm5, %v2836_v1, %v12111_v54  ;;  %v2772_v28 = vsel %vm2714_vm4, %v6553_v22, %v12112_v21  ;;  %v12113_v53 = vld [vmem:[#allocation291_spill] sm:$0xff] }
 0x45c   : > { %v3737_v59 = vsel %vm3617_vm11, %v3608_v36, %v2705_v39  ;;  %v2641_v12 = vpop.permute.xlu0 %2640  ;;  %v3094_v36 = vsel %vm2972_vm6, %v2965_v52, %v12113_v53 }
 0x45d   : > { %6206 = vmatmul.mubr.msk.bf16.gmra.mrb[52].mxu1 %vm3761_vm12, %v3737_v59  ;;  %v3673_v15 = vsel %vm3617_vm11, %v3544_v47, %v2641_v12  ;;  %v12114_v59 = vld [vmem:[#allocation130_spill] sm:$0xff]  ;;  %v12115_v12 = vld [vmem:[#allocation339_spill] sm:$0xff] }
 0x45e   : > { %6142 = vmatmul.mubr.msk.bf16.gmra.mrb[52].mxu0 %vm3761_vm12, %v3673_v15  ;;  %v2901_v47 = vsel %vm2843_vm5, %v2772_v28, %v12114_v59  ;;  %v3223_v15 = vsel %vm3101_vm7, %v3094_v36, %v12115_v12 }
 0x45f   : > { %v10420_v0 = vpop.permute.xlu1 %2286 }
 0x460   : > { %v6111_v2 = vpop.f32.mrb[20].mxu0  ;;  %v10422_v58 = vpop.permute.xlu0 %2284 }
 0x461   : > { %v4471_v62 = vmul.f32 %v10427_v17, %v6111_v2  ;;  %v4011_v35 = vpop.f32.mrb[21].mxu0 }
 0x462   : > { %v4469_v55 = vmul.f32 %v10427_v17, %v4011_v35  ;;  %v6112_v18 = vpop.f32.mrb[22].mxu0  ;;  %v12116_v35 = vld [vmem:[#allocation189_spill] sm:$0xff] }
 0x463   : > { %v4606_v43 = vadd.f32 %v10434_v48, %v4471_v62  ;;  %v4472_v14 = vmul.f32 %v10427_v17, %v6112_v18  ;;  %v10438_v30 = vpop.permute.xlu1 %2422  ;;  %v4014_v11 = vpop.f32.mrb[23].mxu0  ;;  %v6554_v62 = vld [vmem:[%s6739_s7 + $0x260] sm:$0xff]   ;;  %v12117_v18 = vld [vmem:[#allocation265_spill] sm:$0xff] }
 0x464   : > { %v4604_v41 = vadd.f32 %v10434_v48, %v4469_v55  ;;  %v4470_v8 = vmul.f32 %v10427_v17, %v4014_v11  ;;  %v10443_v24 = vpop.permute.xlu0 %2358  ;;  %v2838_v55 = vsel %vm2714_vm4, %v6554_v62, %v12116_v35 }
 0x465   : > { %v4734_v6 = vmax.f32 %v4606_v43, 0.0  ;;  %v4607_v19 = vadd.f32 %v10434_v48, %v4472_v14  ;;  %v6175_v42 = vpop.f32.mrb[20].mxu1  ;;  %v3030_v43 = vsel %vm2972_vm6, %v2901_v47, %v12117_v18  ;;  %v3352_v14 = vsel %vm3230_vm8, %v3223_v15, %v10422_v58 }
 0x466   : > { %v4732_v40 = vmax.f32 %v4604_v41, 0.0  ;;  %v4605_v60 = vadd.f32 %v10434_v48, %v4470_v8  ;;  %v4535_v23 = vmul.f32 %v10427_v17, %v6175_v42  ;;  %v4267_v25 = vpop.f32.mrb[21].mxu1  ;;  %v12118_v41 = vld [vmem:[#allocation242_spill] sm:$0xff] }
 0x467   : > { %v5912_v46 = vpack.c.bf16 %v4734_v6, %v4734_v6  ;;  %v4735_v44 = vmax.f32 %v4607_v19, 0.0  ;;  %v10447_v10 = vpop.permute.xlu1 %2424  ;;  %v4533_v3 = vmul.f32 %v10427_v17, %v4267_v25  ;;  %v6176_v9 = vpop.f32.mrb[22].mxu1  ;;  %v2967_v8 = vsel %vm2843_vm5, %v2838_v55, %v12118_v41  ;;  %v12119_v6 = vld [vmem:[#allocation315_spill] sm:$0xff]  ;;  %v12120_v42 = vld [vmem:[#allocation134_spill] sm:$0xff] }
 0x468   : > { %v5910_v7 = vpack.c.bf16 %v4732_v40, %v4732_v40  ;;  %v4733_v49 = vmax.f32 %v4605_v60, 0.0  ;;  %v4670_v29 = vadd.f32 %v10434_v48, %v4535_v23  ;;  %v4536_v34 = vmul.f32 %v10427_v17, %v6176_v9  ;;  %v4270_v37 = vpop.f32.mrb[23].mxu1  ;;  %v10454_v20 = vpop.permute.xlu0 %2360  ;;  %v6555_v60 = vld [vmem:[%s6739_s7 + $0x120] sm:$0xff]   ;;  %v12122_v23 = vld [vmem:[#allocation360_spill] sm:$0xff] }
 0x469   : > { %5375 = vst.msk [vmem:[%s9916_s11 + $0x58] sm:$0xf] %vm5352_vm13, %v5912_v46  ;;  %v5913_v63 = vpack.c.bf16 %v4735_v44, %v4735_v44  ;;  %v4668_v57 = vadd.f32 %v10434_v48, %v4533_v3  ;;  %v4534_v45 = vmul.f32 %v10427_v17, %v4270_v37  ;;  %v3159_v19 = vsel %vm3101_vm7, %v3030_v43, %v12119_v6  ;;  %v12121_v44 = vld [vmem:[#allocation290_spill] sm:$0xff]  ;;  %v12123_v3 = vld [vmem:[#allocation127_spill] sm:$0xff]  ;;  %v12125_v37 = vld [vmem:[#allocation264_spill] sm:$0xff] }
 0x46a   : > { %5373 = vst.msk [vmem:[%s9916_s11 + $0x50] sm:$0xf] %vm5352_vm13, %v5910_v7  ;;  %v5911_v4 = vpack.c.bf16 %v4733_v49, %v4733_v49  ;;  %v4798_v13 = vmax.f32 %v4670_v29, 0.0  ;;  %v4671_v33 = vadd.f32 %v10434_v48, %v4536_v34  ;;  %v3481_v40 = vsel %vm3359_vm9, %v3352_v14, %v10438_v30 }
 0x46b   : > { %5376 = vst.msk [vmem:[%s9916_s11 + $0x5c] sm:$0xf] %vm5352_vm13, %v5913_v63  ;;  %v2574_v27 = vpop.permute.xlu1 %2573  ;;  %v4796_v26 = vmax.f32 %v4668_v57, 0.0  ;;  %v4669_v31 = vadd.f32 %v10434_v48, %v4534_v45  ;;  %v2774_v46 = vsel %vm2714_vm4, %v6555_v60, %v12120_v42  ;;  %v3096_v58 = vsel %vm2972_vm6, %v2967_v8, %v12121_v44  ;;  %v12124_v63 = vld [vmem:[#allocation338_spill] sm:$0xff] }
 0x46c   : > { %5374 = vst.msk [vmem:[%s9916_s11 + $0x54] sm:$0xf] %vm5352_vm13, %v5911_v4  ;;  %v5976_v32 = vpack.c.bf16 %v4798_v13, %v4798_v13  ;;  %v4799_v61 = vmax.f32 %v4671_v33, 0.0  ;;  %v2510_v50 = vpop.permute.xlu0 %2509  ;;  %v3288_v25 = vsel %vm3230_vm8, %v3159_v19, %v12122_v23  ;;  %v3610_v7 = vsel %vm3488_vm10, %v3481_v40, %v2574_v27  ;;  %v12126_v33 = vld [vmem:[#allocation314_spill] sm:$0xff] }
 0x46d   : > { %v5974_v56 = vpack.c.bf16 %v4796_v26, %v4796_v26  ;;  %v4797_v38 = vmax.f32 %v4669_v31, 0.0  ;;  %v2903_v9 = vsel %vm2843_vm5, %v2774_v46, %v12123_v3  ;;  %v3225_v30 = vsel %vm3101_vm7, %v3096_v58, %v12124_v63  ;;  %v12127_v31 = vld [vmem:[#allocation359_spill] sm:$0xff] }
 0x46e   : > { %5439 = vst.msk [vmem:[%s9916_s11 + $0x158] sm:$0xf] %vm5352_vm13, %v5976_v32  ;;  %v5977_v39 = vpack.c.bf16 %v4799_v61, %v4799_v61  ;;  %v3417_v29 = vsel %vm3359_vm9, %v3288_v25, %v10443_v24  ;;  %v3032_v4 = vsel %vm2972_vm6, %v2903_v9, %v12125_v37  ;;  %v3354_v57 = vsel %vm3230_vm8, %v3225_v30, %v10420_v0 }
 0x46f   : > { %v2576_v51 = vpop.permute.xlu1 %2575  ;;  %5437 = vst.msk [vmem:[%s9916_s11 + $0x150] sm:$0xf] %vm5352_vm13, %v5974_v56  ;;  %v5975_v2 = vpack.c.bf16 %v4797_v38, %v4797_v38  ;;  %v3546_v45 = vsel %vm3488_vm10, %v3417_v29, %v2510_v50  ;;  %v3161_v27 = vsel %vm3101_vm7, %v3032_v4, %v12126_v33  ;;  %v3483_v26 = vsel %vm3359_vm9, %v3354_v57, %v10447_v10 }
 0x470   : > { %5440 = vst.msk [vmem:[%s9916_s11 + $0x15c] sm:$0xf] %vm5352_vm13, %v5977_v39  ;;  %v2512_v11 = vpop.permute.xlu0 %2511  ;;  %v3290_v5 = vsel %vm3230_vm8, %v3161_v27, %v12127_v31  ;;  %v3612_v16 = vsel %vm3488_vm10, %v3483_v26, %v2576_v51  ;;  %v12129_v26 = vld [vmem:[#allocation245_spill] sm:$0xff] }
 0x471   : > { %5438 = vst.msk [vmem:[%s9916_s11 + $0x154] sm:$0xf] %vm5352_vm13, %v5975_v2  ;;  %v3419_v1 = vsel %vm3359_vm9, %v3290_v5, %v10454_v20  ;;  %v6557_v31 = vld [vmem:[%s6739_s7 + $0x12c] sm:$0xff]   ;;  %v12130_v5 = vld [vmem:[#allocation143_spill] sm:$0xff] }
 0x472   : > { %v3548_v50 = vsel %vm3488_vm10, %v3419_v1, %v2512_v11 }
 0x473   : > { %v2707_v49 = vpop.permute.xlu1 %2706 }
 0x474   : > { %v3739_v34 = vsel %vm3617_vm11, %v3610_v7, %v2707_v49  ;;  %v2643_v13 = vpop.permute.xlu0 %2642 }
 0x475   : > { %6209 = vmatprep.mubr.msk.bf16.mxu1 %vm3761_vm12, %v3739_v34  ;;  %v3675_v24 = vsel %vm3617_vm11, %v3546_v45, %v2643_v13  ;;  %v6556_v45 = vld [vmem:[%s6739_s7 + $0x26c] sm:$0xff]  }
 0x476   : > { %6145 = vmatprep.mubr.msk.bf16.mxu0 %vm3761_vm12, %v3675_v24  ;;  %v12128_v13 = vld [vmem:[#allocation57_spill] sm:$0xff] }
 0x477   : > { %v2709_v0 = vpop.permute.xlu1 %2708  ;;  %v2840_v33 = vsel %vm2714_vm4, %v6556_v45, %v12128_v13 }
 0x478   : > { %v3741_v32 = vsel %vm3617_vm11, %v3612_v16, %v2709_v0  ;;  %v6115_v61 = vpop.f32.mrb[24].mxu0  ;;  %v2645_v54 = vpop.permute.xlu0 %2644  ;;  %v2969_v24 = vsel %vm2843_vm5, %v2840_v33, %v12129_v26  ;;  %v2776_v16 = vsel %vm2714_vm4, %v6557_v31, %v12130_v5  ;;  %v12131_v0 = vld [vmem:[#allocation293_spill] sm:$0xff] }
 0x479   : > { %v4475_v10 = vmul.f32 %v10427_v17, %v6115_v61  ;;  %v4027_v52 = vpop.f32.mrb[25].mxu0  ;;  %6210 = vmatmul.mubr.msk.bf16.gmra.mrb[56].mxu1 %vm3761_vm12, %v3741_v32  ;;  %v3677_v56 = vsel %vm3617_vm11, %v3548_v50, %v2645_v54  ;;  %v3098_v1 = vsel %vm2972_vm6, %v2969_v24, %v12131_v0  ;;  %v12132_v61 = vld [vmem:[#allocation136_spill] sm:$0xff]  ;;  %v12133_v54 = vld [vmem:[#allocation341_spill] sm:$0xff] }
 0x47a   : > { %v4473_v38 = vmul.f32 %v10427_v17, %v4027_v52  ;;  %v6116_v22 = vpop.f32.mrb[26].mxu0  ;;  %6146 = vmatmul.mubr.msk.bf16.gmra.mrb[56].mxu0 %vm3761_vm12, %v3677_v56  ;;  %v2905_v50 = vsel %vm2843_vm5, %v2776_v16, %v12132_v61  ;;  %v6558_v52 = vld [vmem:[%s6739_s7 + $0x274] sm:$0xff]  }
 0x47b   : > { %v4610_v21 = vadd.f32 %v10434_v48, %v4475_v10  ;;  %v4476_v20 = vmul.f32 %v10427_v17, %v6116_v22  ;;  %v10542_v28 = vpop.permute.xlu1 %2290  ;;  %v4030_v53 = vpop.f32.mrb[27].mxu0  ;;  %v3227_v10 = vsel %vm3101_vm7, %v3098_v1, %v12133_v54  ;;  %v12134_v56 = vld [vmem:[#allocation193_spill] sm:$0xff]  ;;  %v12135_v22 = vld [vmem:[#allocation267_spill] sm:$0xff] }
 0x47c   : > { %v4608_v36 = vadd.f32 %v10434_v48, %v4473_v38  ;;  %v4474_v39 = vmul.f32 %v10427_v17, %v4030_v53  ;;  %v2842_v38 = vsel %vm2714_vm4, %v6558_v52, %v12134_v56 }
 0x47d   : > { %v4738_v51 = vmax.f32 %v4610_v21, 0.0  ;;  %v4611_v59 = vadd.f32 %v10434_v48, %v4476_v20  ;;  %v2289_v47 = vpop.permute.xlu0 %2288  ;;  %v6179_v2 = vpop.f32.mrb[24].mxu1  ;;  %v3034_v21 = vsel %vm2972_vm6, %v2905_v50, %v12135_v22 }
 0x47e   : > { %v4736_v12 = vmax.f32 %v4608_v36, 0.0  ;;  %v4609_v15 = vadd.f32 %v10434_v48, %v4474_v39  ;;  %v4539_v55 = vmul.f32 %v10427_v17, %v6179_v2  ;;  %v4283_v18 = vpop.f32.mrb[25].mxu1  ;;  %v3356_v20 = vsel %vm3230_vm8, %v3227_v10, %v2289_v47  ;;  %v12136_v36 = vld [vmem:[#allocation244_spill] sm:$0xff] }
 0x47f   : > { %v5916_v62 = vpack.c.bf16 %v4738_v51, %v4738_v51  ;;  %v4739_v35 = vmax.f32 %v4611_v59, 0.0  ;;  %v2427_v43 = vpop.permute.xlu1 %2426  ;;  %v4537_v41 = vmul.f32 %v10427_v17, %v4283_v18  ;;  %v6180_v8 = vpop.f32.mrb[26].mxu1  ;;  %v2971_v39 = vsel %vm2843_vm5, %v2842_v38, %v12136_v36  ;;  %v12137_v51 = vld [vmem:[#allocation317_spill] sm:$0xff]  ;;  %v12138_v2 = vld [vmem:[#allocation140_spill] sm:$0xff]  ;;  %v12140_v18 = vld [vmem:[#allocation362_spill] sm:$0xff] }
 0x480   : > { %v5914_v14 = vpack.c.bf16 %v4736_v12, %v4736_v12  ;;  %v4737_v11 = vmax.f32 %v4609_v15, 0.0  ;;  %v4674_v19 = vadd.f32 %v10434_v48, %v4539_v55  ;;  %v4540_v40 = vmul.f32 %v10427_v17, %v6180_v8  ;;  %v4286_v60 = vpop.f32.mrb[27].mxu1  ;;  %v6559_v15 = vld [vmem:[%s6739_s7 + $0x134] sm:$0xff]  }
 0x481   : > { %5379 = vst.msk [vmem:[%s9916_s11 + $0x68] sm:$0xf] %vm5352_vm13, %v5916_v62  ;;  %v5917_v6 = vpack.c.bf16 %v4739_v35, %v4739_v35  ;;  %v2363_v42 = vpop.permute.xlu0 %2362  ;;  %v4672_v44 = vadd.f32 %v10434_v48, %v4537_v41  ;;  %v4538_v58 = vmul.f32 %v10427_v17, %v4286_v60  ;;  %v3163_v59 = vsel %vm3101_vm7, %v3034_v21, %v12137_v51  ;;  %v12139_v35 = vld [vmem:[#allocation292_spill] sm:$0xff]  ;;  %v12141_v41 = vld [vmem:[#allocation133_spill] sm:$0xff] }
 0x482   : > { %5377 = vst.msk [vmem:[%s9916_s11 + $0x60] sm:$0xf] %vm5352_vm13, %v5914_v14  ;;  %v5915_v46 = vpack.c.bf16 %v4737_v11, %v4737_v11  ;;  %v4802_v23 = vmax.f32 %v4674_v19, 0.0  ;;  %v4675_v25 = vadd.f32 %v10434_v48, %v4540_v40  ;;  %v3485_v12 = vsel %vm3359_vm9, %v3356_v20, %v2427_v43 }
 0x483   : > { %5380 = vst.msk [vmem:[%s9916_s11 + $0x6c] sm:$0xf] %vm5352_vm13, %v5917_v6  ;;  %v2429_v7 = vpop.permute.xlu1 %2428  ;;  %v4800_v49 = vmax.f32 %v4672_v44, 0.0  ;;  %v4673_v3 = vadd.f32 %v10434_v48, %v4538_v58  ;;  %v2778_v62 = vsel %vm2714_vm4, %v6559_v15, %v12138_v2  ;;  %v3100_v55 = vsel %vm2972_vm6, %v2971_v39, %v12139_v35  ;;  %v12142_v6 = vld [vmem:[#allocation340_spill] sm:$0xff] }
 0x484   : > { %5378 = vst.msk [vmem:[%s9916_s11 + $0x64] sm:$0xf] %vm5352_vm13, %v5915_v46  ;;  %v5980_v9 = vpack.c.bf16 %v4802_v23, %v4802_v23  ;;  %v4803_v63 = vmax.f32 %v4675_v25, 0.0  ;;  %v3292_v14 = vsel %vm3230_vm8, %v3163_v59, %v12140_v18  ;;  %v2907_v8 = vsel %vm2843_vm5, %v2778_v62, %v12141_v41  ;;  %v12143_v46 = vld [vmem:[#allocation266_spill] sm:$0xff] }
 0x485   : > { %v2365_v30 = vpop.permute.xlu0 %2364  ;;  %v5978_v29 = vpack.c.bf16 %v4800_v49, %v4800_v49  ;;  %v4801_v34 = vmax.f32 %v4673_v3, 0.0  ;;  %v3229_v19 = vsel %vm3101_vm7, %v3100_v55, %v12142_v6  ;;  %v3421_v43 = vsel %vm3359_vm9, %v3292_v14, %v2363_v42 }
 0x486   : > { %5443 = vst.msk [vmem:[%s9916_s11 + $0x168] sm:$0xf] %vm5352_vm13, %v5980_v9  ;;  %v5981_v37 = vpack.c.bf16 %v4803_v63, %v4803_v63  ;;  %v3036_v44 = vsel %vm2972_vm6, %v2907_v8, %v12143_v46  ;;  %v3358_v58 = vsel %vm3230_vm8, %v3229_v19, %v10542_v28  ;;  %v12144_v9 = vld [vmem:[#allocation316_spill] sm:$0xff] }
 0x487   : > { %v2578_v4 = vpop.permute.xlu1 %2577  ;;  %5441 = vst.msk [vmem:[%s9916_s11 + $0x160] sm:$0xf] %vm5352_vm13, %v5978_v29  ;;  %v5979_v57 = vpack.c.bf16 %v4801_v34, %v4801_v34  ;;  %v3165_v42 = vsel %vm3101_vm7, %v3036_v44, %v12144_v9  ;;  %v3487_v63 = vsel %vm3359_vm9, %v3358_v58, %v2429_v7 }
 0x488   : > { %5444 = vst.msk [vmem:[%s9916_s11 + $0x16c] sm:$0xf] %vm5352_vm13, %v5981_v37  ;;  %v3614_v47 = vsel %vm3488_vm10, %v3485_v12, %v2578_v4  ;;  %v12145_v4 = vld [vmem:[#allocation361_spill] sm:$0xff] }
 0x489   : > { %v2514_v27 = vpop.permute.xlu0 %2513  ;;  %5442 = vst.msk [vmem:[%s9916_s11 + $0x164] sm:$0xf] %vm5352_vm13, %v5979_v57  ;;  %v3294_v28 = vsel %vm3230_vm8, %v3165_v42, %v12145_v4 }
 0x48a   : > { %v3550_v23 = vsel %vm3488_vm10, %v3421_v43, %v2514_v27  ;;  %v3423_v7 = vsel %vm3359_vm9, %v3294_v28, %v2365_v30 }
 0x48b   : > { %v2580_v32 = vpop.permute.xlu1 %2579 }
 0x48c   : > { %v3616_v57 = vsel %vm3488_vm10, %v3487_v63, %v2580_v32 }
 0x48d   : > { %v2516_v53 = vpop.permute.xlu0 %2515 }
 0x48e   : > { %v3552_v5 = vsel %vm3488_vm10, %v3423_v7, %v2516_v53 }
 0x48f   : > { %v2711_v11 = vpop.permute.xlu1 %2710 }
 0x490   : > { %v3743_v40 = vsel %vm3617_vm11, %v3614_v47, %v2711_v11  ;;  %v6119_v60 = vpop.f32.mrb[28].mxu0 }
 0x491   : > { %v2647_v25 = vpop.permute.xlu0 %2646  ;;  %v4479_v49 = vmul.f32 %v10427_v17, %v6119_v60  ;;  %v4043_v3 = vpop.f32.mrb[29].mxu0  ;;  %6213 = vmatprep.mubr.msk.bf16.mxu1 %vm3761_vm12, %v3743_v40 }
 0x492   : > { %v3679_v29 = vsel %vm3617_vm11, %v3550_v23, %v2647_v25  ;;  %v4477_v34 = vmul.f32 %v10427_v17, %v4043_v3  ;;  %v6120_v37 = vpop.f32.mrb[30].mxu0 }
 0x493   : > { %v4614_v45 = vadd.f32 %v10434_v48, %v4479_v49  ;;  %6149 = vmatprep.mubr.msk.bf16.mxu0 %vm3761_vm12, %v3679_v29  ;;  %v4480_v13 = vmul.f32 %v10427_v17, %v6120_v37  ;;  %v2713_v33 = vpop.permute.xlu1 %2712  ;;  %v4046_v27 = vpop.f32.mrb[31].mxu0 }
 0x494   : > { %v4612_v26 = vadd.f32 %v10434_v48, %v4477_v34  ;;  %v3745_v24 = vsel %vm3617_vm11, %v3616_v57, %v2713_v33  ;;  %v4478_v31 = vmul.f32 %v10427_v17, %v4046_v27 }
 0x495   : > { %v4742_v16 = vmax.f32 %v4614_v45, 0.0  ;;  %v4615_v0 = vadd.f32 %v10434_v48, %v4480_v13  ;;  %v2649_v1 = vpop.permute.xlu0 %2648  ;;  %6214 = vmatmul.mubr.msk.bf16.gmra.mrb[60].mxu1 %vm3761_vm12, %v3745_v24  ;;  %v6183_v50 = vpop.f32.mrb[28].mxu1 }
 0x496   : > { %v4740_v32 = vmax.f32 %v4612_v26, 0.0  ;;  %v4613_v61 = vadd.f32 %v10434_v48, %v4478_v31  ;;  %v3681_v30 = vsel %vm3617_vm11, %v3552_v5, %v2649_v1  ;;  %v4543_v52 = vmul.f32 %v10427_v17, %v6183_v50  ;;  %v4299_v56 = vpop.f32.mrb[29].mxu1 }
 0x497   : > { %v5920_v54 = vpack.c.bf16 %v4742_v16, %v4742_v16  ;;  %v4743_v10 = vmax.f32 %v4615_v0, 0.0  ;;  %6150 = vmatmul.mubr.msk.bf16.gmra.mrb[60].mxu0 %vm3761_vm12, %v3681_v30  ;;  %v4541_v21 = vmul.f32 %v10427_v17, %v4299_v56  ;;  %v6184_v20 = vpop.f32.mrb[30].mxu1 }
 0x498   : > { %v5918_v38 = vpack.c.bf16 %v4740_v32, %v4740_v32  ;;  %v4741_v22 = vmax.f32 %v4613_v61, 0.0  ;;  %v4678_v36 = vadd.f32 %v10434_v48, %v4543_v52  ;;  %v4544_v39 = vmul.f32 %v10427_v17, %v6184_v20  ;;  %v4302_v51 = vpop.f32.mrb[31].mxu1 }
 0x499   : > { %5383 = vst.msk [vmem:[%s9916_s11 + $0x78] sm:$0xf] %vm5352_vm13, %v5920_v54  ;;  %v5921_v53 = vpack.c.bf16 %v4743_v10, %v4743_v10  ;;  %v4676_v12 = vadd.f32 %v10434_v48, %v4541_v21  ;;  %v4542_v15 = vmul.f32 %v10427_v17, %v4302_v51 }
 0x49a   : > { %5381 = vst.msk [vmem:[%s9916_s11 + $0x70] sm:$0xf] %vm5352_vm13, %v5918_v38  ;;  %v5919_v59 = vpack.c.bf16 %v4741_v22, %v4741_v22  ;;  %v4806_v2 = vmax.f32 %v4678_v36, 0.0  ;;  %v4679_v62 = vadd.f32 %v10434_v48, %v4544_v39 }
 0x49b   : > { %5384 = vst.msk [vmem:[%s9916_s11 + $0x7c] sm:$0xf] %vm5352_vm13, %v5921_v53  ;;  %v4804_v35 = vmax.f32 %v4676_v12, 0.0  ;;  %v4677_v55 = vadd.f32 %v10434_v48, %v4542_v15 }
 0x49c   : > { %5382 = vst.msk [vmem:[%s9916_s11 + $0x74] sm:$0xf] %vm5352_vm13, %v5919_v59  ;;  %v5984_v18 = vpack.c.bf16 %v4806_v2, %v4806_v2  ;;  %v4807_v14 = vmax.f32 %v4679_v62, 0.0 }
 0x49d   : > { %v5982_v47 = vpack.c.bf16 %v4804_v35, %v4804_v35  ;;  %v4805_v11 = vmax.f32 %v4677_v55, 0.0 }
 0x49e   : > { %5447 = vst.msk [vmem:[%s9916_s11 + $0x178] sm:$0xf] %vm5352_vm13, %v5984_v18  ;;  %v5985_v41 = vpack.c.bf16 %v4807_v14, %v4807_v14 }
 0x49f   : > { %5445 = vst.msk [vmem:[%s9916_s11 + $0x170] sm:$0xf] %vm5352_vm13, %v5982_v47  ;;  %v5983_v8 = vpack.c.bf16 %v4805_v11, %v4805_v11 }
 0x4a0   : > { %5448 = vst.msk [vmem:[%s9916_s11 + $0x17c] sm:$0xf] %vm5352_vm13, %v5985_v41 }
 0x4a1   : > { %5446 = vst.msk [vmem:[%s9916_s11 + $0x174] sm:$0xf] %vm5352_vm13, %v5983_v8 }
 0x4a8   : > { %v6123_v6 = vpop.f32.mrb[32].mxu0 }
 0x4a9   : > { %v4483_v19 = vmul.f32 %v10427_v17, %v6123_v6  ;;  %v4059_v43 = vpop.f32.mrb[33].mxu0 }
 0x4aa   : > { %v4481_v40 = vmul.f32 %v10427_v17, %v4059_v43  ;;  %v6124_v60 = vpop.f32.mrb[34].mxu0 }
 0x4ab   : > { %v4618_v46 = vadd.f32 %v10434_v48, %v4483_v19  ;;  %v4484_v44 = vmul.f32 %v10427_v17, %v6124_v60  ;;  %v4062_v58 = vpop.f32.mrb[35].mxu0 }
 0x4ac   : > { %v4616_v23 = vadd.f32 %v10434_v48, %v4481_v40  ;;  %v4482_v25 = vmul.f32 %v10427_v17, %v4062_v58 }
 0x4ad   : > { %v4746_v49 = vmax.f32 %v4618_v46, 0.0  ;;  %v4619_v3 = vadd.f32 %v10434_v48, %v4484_v44  ;;  %v6187_v63 = vpop.f32.mrb[32].mxu1 }
 0x4ae   : > { %v4744_v9 = vmax.f32 %v4616_v23, 0.0  ;;  %v4617_v42 = vadd.f32 %v10434_v48, %v4482_v25  ;;  %v4547_v37 = vmul.f32 %v10427_v17, %v6187_v63  ;;  %v4315_v4 = vpop.f32.mrb[33].mxu1 }
 0x4af   : > { %v5924_v29 = vpack.c.bf16 %v4746_v49, %v4746_v49  ;;  %v4747_v34 = vmax.f32 %v4619_v3, 0.0  ;;  %v4545_v45 = vmul.f32 %v10427_v17, %v4315_v4  ;;  %v6188_v13 = vpop.f32.mrb[34].mxu1 }
 0x4b0   : > { %v5922_v28 = vpack.c.bf16 %v4744_v9, %v4744_v9  ;;  %v4745_v57 = vmax.f32 %v4617_v42, 0.0  ;;  %v4682_v27 = vadd.f32 %v10434_v48, %v4547_v37  ;;  %v4548_v7 = vmul.f32 %v10427_v17, %v6188_v13  ;;  %v4318_v26 = vpop.f32.mrb[35].mxu1 }
 0x4b1   : > { %5387 = vst.msk [vmem:[%s9916_s11 + $0x88] sm:$0xf] %vm5352_vm13, %v5924_v29  ;;  %v5925_v33 = vpack.c.bf16 %v4747_v34, %v4747_v34  ;;  %v4680_v31 = vadd.f32 %v10434_v48, %v4545_v45  ;;  %v4546_v5 = vmul.f32 %v10427_v17, %v4318_v26 }
 0x4b2   : > { %5385 = vst.msk [vmem:[%s9916_s11 + $0x80] sm:$0xf] %vm5352_vm13, %v5922_v28  ;;  %v5923_v24 = vpack.c.bf16 %v4745_v57, %v4745_v57  ;;  %v4810_v16 = vmax.f32 %v4682_v27, 0.0  ;;  %v4683_v0 = vadd.f32 %v10434_v48, %v4548_v7 }
 0x4b3   : > { %5388 = vst.msk [vmem:[%s9916_s11 + $0x8c] sm:$0xf] %vm5352_vm13, %v5925_v33  ;;  %v4808_v1 = vmax.f32 %v4680_v31, 0.0  ;;  %v4681_v32 = vadd.f32 %v10434_v48, %v4546_v5 }
 0x4b4   : > { %5386 = vst.msk [vmem:[%s9916_s11 + $0x84] sm:$0xf] %vm5352_vm13, %v5923_v24  ;;  %v5988_v61 = vpack.c.bf16 %v4810_v16, %v4810_v16  ;;  %v4811_v30 = vmax.f32 %v4683_v0, 0.0 }
 0x4b5   : > { %v5986_v50 = vpack.c.bf16 %v4808_v1, %v4808_v1  ;;  %v4809_v54 = vmax.f32 %v4681_v32, 0.0 }
 0x4b6   : > { %5451 = vst.msk [vmem:[%s9916_s11 + $0x188] sm:$0xf] %vm5352_vm13, %v5988_v61  ;;  %v5989_v10 = vpack.c.bf16 %v4811_v30, %v4811_v30 }
 0x4b7   : > { %5449 = vst.msk [vmem:[%s9916_s11 + $0x180] sm:$0xf] %vm5352_vm13, %v5986_v50  ;;  %v5987_v52 = vpack.c.bf16 %v4809_v54, %v4809_v54 }
 0x4b8   : > { %5452 = vst.msk [vmem:[%s9916_s11 + $0x18c] sm:$0xf] %vm5352_vm13, %v5989_v10 }
 0x4b9   : > { %5450 = vst.msk [vmem:[%s9916_s11 + $0x184] sm:$0xf] %vm5352_vm13, %v5987_v52 }
 0x4c0   : > { %v6127_v56 = vpop.f32.mrb[36].mxu0 }
 0x4c1   : > { %v4487_v38 = vmul.f32 %v10427_v17, %v6127_v56  ;;  %v4075_v22 = vpop.f32.mrb[37].mxu0 }
 0x4c2   : > { %v4485_v21 = vmul.f32 %v10427_v17, %v4075_v22  ;;  %v6128_v20 = vpop.f32.mrb[38].mxu0 }
 0x4c3   : > { %v4622_v53 = vadd.f32 %v10434_v48, %v4487_v38  ;;  %v4488_v36 = vmul.f32 %v10427_v17, %v6128_v20  ;;  %v4078_v39 = vpop.f32.mrb[39].mxu0 }
 0x4c4   : > { %v4620_v51 = vadd.f32 %v10434_v48, %v4485_v21  ;;  %v4486_v59 = vmul.f32 %v10427_v17, %v4078_v39 }
 0x4c5   : > { %v4750_v12 = vmax.f32 %v4622_v53, 0.0  ;;  %v4623_v15 = vadd.f32 %v10434_v48, %v4488_v36 }
 0x4c6   : > { %v4748_v2 = vmax.f32 %v4620_v51, 0.0  ;;  %v4621_v62 = vadd.f32 %v10434_v48, %v4486_v59  ;;  %v6191_v35 = vpop.f32.mrb[36].mxu1 }
 0x4c7   : > { %v5928_v55 = vpack.c.bf16 %v4750_v12, %v4750_v12  ;;  %v4751_v18 = vmax.f32 %v4623_v15, 0.0  ;;  %v4551_v14 = vmul.f32 %v10427_v17, %v6191_v35  ;;  %v4331_v47 = vpop.f32.mrb[37].mxu1 }
 0x4c8   : > { %v5926_v11 = vpack.c.bf16 %v4748_v2, %v4748_v2  ;;  %v4749_v41 = vmax.f32 %v4621_v62, 0.0  ;;  %v4549_v8 = vmul.f32 %v10427_v17, %v4331_v47  ;;  %v6192_v6 = vpop.f32.mrb[38].mxu1 }
 0x4c9   : > { %5391 = vst.msk [vmem:[%s9916_s11 + $0x98] sm:$0xf] %vm5352_vm13, %v5928_v55  ;;  %v5929_v19 = vpack.c.bf16 %v4751_v18, %v4751_v18  ;;  %v4686_v43 = vadd.f32 %v10434_v48, %v4551_v14  ;;  %v4552_v40 = vmul.f32 %v10427_v17, %v6192_v6  ;;  %v4334_v60 = vpop.f32.mrb[39].mxu1 }
 0x4ca   : > { %5389 = vst.msk [vmem:[%s9916_s11 + $0x90] sm:$0xf] %vm5352_vm13, %v5926_v11  ;;  %v5927_v46 = vpack.c.bf16 %v4749_v41, %v4749_v41  ;;  %v4684_v44 = vadd.f32 %v10434_v48, %v4549_v8  ;;  %v4550_v58 = vmul.f32 %v10427_v17, %v4334_v60 }
 0x4cb   : > { %5392 = vst.msk [vmem:[%s9916_s11 + $0x9c] sm:$0xf] %vm5352_vm13, %v5929_v19  ;;  %v4814_v23 = vmax.f32 %v4686_v43, 0.0  ;;  %v4687_v25 = vadd.f32 %v10434_v48, %v4552_v40 }
 0x4cc   : > { %5390 = vst.msk [vmem:[%s9916_s11 + $0x94] sm:$0xf] %vm5352_vm13, %v5927_v46  ;;  %v4812_v49 = vmax.f32 %v4684_v44, 0.0  ;;  %v4685_v3 = vadd.f32 %v10434_v48, %v4550_v58 }
 0x4cd   : > { %v5992_v9 = vpack.c.bf16 %v4814_v23, %v4814_v23  ;;  %v4815_v42 = vmax.f32 %v4687_v25, 0.0 }
 0x4ce   : > { %v5990_v63 = vpack.c.bf16 %v4812_v49, %v4812_v49  ;;  %v4813_v29 = vmax.f32 %v4685_v3, 0.0 }
 0x4cf   : > { %5455 = vst.msk [vmem:[%s9916_s11 + $0x198] sm:$0xf] %vm5352_vm13, %v5992_v9  ;;  %v5993_v34 = vpack.c.bf16 %v4815_v42, %v4815_v42 }
 0x4d0   : > { %5453 = vst.msk [vmem:[%s9916_s11 + $0x190] sm:$0xf] %vm5352_vm13, %v5990_v63  ;;  %v5991_v37 = vpack.c.bf16 %v4813_v29, %v4813_v29 }
 0x4d1   : > { %5456 = vst.msk [vmem:[%s9916_s11 + $0x19c] sm:$0xf] %vm5352_vm13, %v5993_v34 }
 0x4d2   : > { %5454 = vst.msk [vmem:[%s9916_s11 + $0x194] sm:$0xf] %vm5352_vm13, %v5991_v37 }
 0x4dc   : > { %v6195_v4 = vpop.f32.mrb[40].mxu1 }
 0x4dd   : > { %v4555_v28 = vmul.f32 %v10427_v17, %v6195_v4  ;;  %v4347_v57 = vpop.f32.mrb[41].mxu1 }
 0x4de   : > { %v6131_v45 = vpop.f32.mrb[40].mxu0  ;;  %v4553_v13 = vmul.f32 %v10427_v17, %v4347_v57  ;;  %v6196_v33 = vpop.f32.mrb[42].mxu1 }
 0x4df   : > { %v4491_v27 = vmul.f32 %v10427_v17, %v6131_v45  ;;  %v4690_v7 = vadd.f32 %v10434_v48, %v4555_v28  ;;  %v4091_v26 = vpop.f32.mrb[41].mxu0  ;;  %v4556_v24 = vmul.f32 %v10427_v17, %v6196_v33  ;;  %v4350_v31 = vpop.f32.mrb[43].mxu1 }
 0x4e0   : > { %v4489_v5 = vmul.f32 %v10427_v17, %v4091_v26  ;;  %v4688_v16 = vadd.f32 %v10434_v48, %v4553_v13  ;;  %v6132_v0 = vpop.f32.mrb[42].mxu0  ;;  %v4554_v1 = vmul.f32 %v10427_v17, %v4350_v31 }
 0x4e1   : > { %v4626_v32 = vadd.f32 %v10434_v48, %v4491_v27  ;;  %v4818_v61 = vmax.f32 %v4690_v7, 0.0  ;;  %v4492_v30 = vmul.f32 %v10427_v17, %v6132_v0  ;;  %v4691_v50 = vadd.f32 %v10434_v48, %v4556_v24  ;;  %v4094_v54 = vpop.f32.mrb[43].mxu0 }
 0x4e2   : > { %v4624_v10 = vadd.f32 %v10434_v48, %v4489_v5  ;;  %v4816_v52 = vmax.f32 %v4688_v16, 0.0  ;;  %v4490_v56 = vmul.f32 %v10427_v17, %v4094_v54  ;;  %v4689_v38 = vadd.f32 %v10434_v48, %v4554_v1 }
 0x4e3   : > { %v4754_v22 = vmax.f32 %v4626_v32, 0.0  ;;  %v5996_v21 = vpack.c.bf16 %v4818_v61, %v4818_v61  ;;  %v4627_v20 = vadd.f32 %v10434_v48, %v4492_v30  ;;  %v4819_v53 = vmax.f32 %v4691_v50, 0.0 }
 0x4e4   : > { %v4752_v36 = vmax.f32 %v4624_v10, 0.0  ;;  %v5994_v39 = vpack.c.bf16 %v4816_v52, %v4816_v52  ;;  %v4625_v51 = vadd.f32 %v10434_v48, %v4490_v56  ;;  %v4817_v59 = vmax.f32 %v4689_v38, 0.0 }
 0x4e5   : > { %v5932_v12 = vpack.c.bf16 %v4754_v22, %v4754_v22  ;;  %5459 = vst.msk [vmem:[%s9916_s11 + $0x1a8] sm:$0xf] %vm5352_vm13, %v5996_v21  ;;  %v4755_v15 = vmax.f32 %v4627_v20, 0.0  ;;  %v5997_v2 = vpack.c.bf16 %v4819_v53, %v4819_v53 }
 0x4e6   : > { %v5930_v62 = vpack.c.bf16 %v4752_v36, %v4752_v36  ;;  %5457 = vst.msk [vmem:[%s9916_s11 + $0x1a0] sm:$0xf] %vm5352_vm13, %v5994_v39  ;;  %v4753_v35 = vmax.f32 %v4625_v51, 0.0  ;;  %v5995_v55 = vpack.c.bf16 %v4817_v59, %v4817_v59 }
 0x4e7   : > { %5395 = vst.msk [vmem:[%s9916_s11 + $0xa8] sm:$0xf] %vm5352_vm13, %v5932_v12  ;;  %v5933_v18 = vpack.c.bf16 %v4755_v15, %v4755_v15  ;;  %5460 = vst.msk [vmem:[%s9916_s11 + $0x1ac] sm:$0xf] %vm5352_vm13, %v5997_v2 }
 0x4e8   : > { %5393 = vst.msk [vmem:[%s9916_s11 + $0xa0] sm:$0xf] %vm5352_vm13, %v5930_v62  ;;  %v5931_v14 = vpack.c.bf16 %v4753_v35, %v4753_v35  ;;  %5458 = vst.msk [vmem:[%s9916_s11 + $0x1a4] sm:$0xf] %vm5352_vm13, %v5995_v55 }
 0x4e9   : > { %5396 = vst.msk [vmem:[%s9916_s11 + $0xac] sm:$0xf] %vm5352_vm13, %v5933_v18 }
 0x4ea   : > { %5394 = vst.msk [vmem:[%s9916_s11 + $0xa4] sm:$0xf] %vm5352_vm13, %v5931_v14 }
 0x4f8   : > { %v6199_v47 = vpop.f32.mrb[44].mxu1 }
 0x4f9   : > { %v4559_v11 = vmul.f32 %v10427_v17, %v6199_v47  ;;  %v4363_v41 = vpop.f32.mrb[45].mxu1  ;;  %v6135_v8 = vpop.f32.mrb[44].mxu0 }
 0x4fa   : > { %v4557_v6 = vmul.f32 %v10427_v17, %v4363_v41  ;;  %v6200_v19 = vpop.f32.mrb[46].mxu1  ;;  %v4495_v43 = vmul.f32 %v10427_v17, %v6135_v8  ;;  %v4107_v60 = vpop.f32.mrb[45].mxu0 }
 0x4fb   : > { %v4694_v40 = vadd.f32 %v10434_v48, %v4559_v11  ;;  %v4560_v46 = vmul.f32 %v10427_v17, %v6200_v19  ;;  %v4366_v44 = vpop.f32.mrb[47].mxu1  ;;  %v4493_v58 = vmul.f32 %v10427_v17, %v4107_v60  ;;  %v6136_v25 = vpop.f32.mrb[46].mxu0 }
 0x4fc   : > { %v4692_v23 = vadd.f32 %v10434_v48, %v4557_v6  ;;  %v4558_v49 = vmul.f32 %v10427_v17, %v4366_v44  ;;  %v4630_v3 = vadd.f32 %v10434_v48, %v4495_v43  ;;  %v4496_v42 = vmul.f32 %v10427_v17, %v6136_v25  ;;  %v4110_v29 = vpop.f32.mrb[47].mxu0 }
 0x4fd   : > { %v4822_v9 = vmax.f32 %v4694_v40, 0.0  ;;  %v4695_v63 = vadd.f32 %v10434_v48, %v4560_v46  ;;  %v4628_v34 = vadd.f32 %v10434_v48, %v4493_v58  ;;  %v4494_v4 = vmul.f32 %v10427_v17, %v4110_v29 }
 0x4fe   : > { %v4820_v37 = vmax.f32 %v4692_v23, 0.0  ;;  %v4693_v28 = vadd.f32 %v10434_v48, %v4558_v49  ;;  %v4758_v57 = vmax.f32 %v4630_v3, 0.0  ;;  %v4631_v13 = vadd.f32 %v10434_v48, %v4496_v42 }
 0x4ff   : > { %v6000_v45 = vpack.c.bf16 %v4822_v9, %v4822_v9  ;;  %v4823_v33 = vmax.f32 %v4695_v63, 0.0  ;;  %v4756_v27 = vmax.f32 %v4628_v34, 0.0  ;;  %v4629_v26 = vadd.f32 %v10434_v48, %v4494_v4 }
 0x500   : > { %v5998_v7 = vpack.c.bf16 %v4820_v37, %v4820_v37  ;;  %v4821_v24 = vmax.f32 %v4693_v28, 0.0  ;;  %v5936_v31 = vpack.c.bf16 %v4758_v57, %v4758_v57  ;;  %v4759_v5 = vmax.f32 %v4631_v13, 0.0 }
 0x501   : > { %5463 = vst.msk [vmem:[%s9916_s11 + $0x1b8] sm:$0xf] %vm5352_vm13, %v6000_v45  ;;  %v6001_v16 = vpack.c.bf16 %v4823_v33, %v4823_v33  ;;  %v5934_v0 = vpack.c.bf16 %v4756_v27, %v4756_v27  ;;  %v4757_v1 = vmax.f32 %v4629_v26, 0.0 }
 0x502   : > { %5461 = vst.msk [vmem:[%s9916_s11 + $0x1b0] sm:$0xf] %vm5352_vm13, %v5998_v7  ;;  %v5999_v32 = vpack.c.bf16 %v4821_v24, %v4821_v24  ;;  %5399 = vst.msk [vmem:[%s9916_s11 + $0xb8] sm:$0xf] %vm5352_vm13, %v5936_v31  ;;  %v5937_v61 = vpack.c.bf16 %v4759_v5, %v4759_v5 }
 0x503   : > { %5464 = vst.msk [vmem:[%s9916_s11 + $0x1bc] sm:$0xf] %vm5352_vm13, %v6001_v16  ;;  %5397 = vst.msk [vmem:[%s9916_s11 + $0xb0] sm:$0xf] %vm5352_vm13, %v5934_v0  ;;  %v5935_v30 = vpack.c.bf16 %v4757_v1, %v4757_v1 }
 0x504   : > { %5462 = vst.msk [vmem:[%s9916_s11 + $0x1b4] sm:$0xf] %vm5352_vm13, %v5999_v32  ;;  %5400 = vst.msk [vmem:[%s9916_s11 + $0xbc] sm:$0xf] %vm5352_vm13, %v5937_v61 }
 0x505   : > { %5398 = vst.msk [vmem:[%s9916_s11 + $0xb4] sm:$0xf] %vm5352_vm13, %v5935_v30 }
 0x514   : > { %v6203_v50 = vpop.f32.mrb[48].mxu1 }
 0x515   : > { %v4563_v54 = vmul.f32 %v10427_v17, %v6203_v50  ;;  %v4379_v10 = vpop.f32.mrb[49].mxu1  ;;  %v6139_v52 = vpop.f32.mrb[48].mxu0 }
 0x516   : > { %v4561_v56 = vmul.f32 %v10427_v17, %v4379_v10  ;;  %v6204_v38 = vpop.f32.mrb[50].mxu1  ;;  %v4499_v22 = vmul.f32 %v10427_v17, %v6139_v52  ;;  %v4123_v20 = vpop.f32.mrb[49].mxu0 }
 0x517   : > { %v4698_v21 = vadd.f32 %v10434_v48, %v4563_v54  ;;  %v4564_v53 = vmul.f32 %v10427_v17, %v6204_v38  ;;  %v4382_v36 = vpop.f32.mrb[51].mxu1  ;;  %v4497_v39 = vmul.f32 %v10427_v17, %v4123_v20  ;;  %v6140_v59 = vpop.f32.mrb[50].mxu0 }
 0x518   : > { %v4696_v51 = vadd.f32 %v10434_v48, %v4561_v56  ;;  %v4562_v12 = vmul.f32 %v10427_v17, %v4382_v36  ;;  %v4634_v15 = vadd.f32 %v10434_v48, %v4499_v22  ;;  %v4500_v62 = vmul.f32 %v10427_v17, %v6140_v59  ;;  %v4126_v55 = vpop.f32.mrb[51].mxu0 }
 0x519   : > { %v4826_v2 = vmax.f32 %v4698_v21, 0.0  ;;  %v4699_v35 = vadd.f32 %v10434_v48, %v4564_v53  ;;  %v4632_v18 = vadd.f32 %v10434_v48, %v4497_v39  ;;  %v4498_v47 = vmul.f32 %v10427_v17, %v4126_v55 }
 0x51a   : > { %v4824_v14 = vmax.f32 %v4696_v51, 0.0  ;;  %v4697_v11 = vadd.f32 %v10434_v48, %v4562_v12  ;;  %v4762_v41 = vmax.f32 %v4634_v15, 0.0  ;;  %v4635_v6 = vadd.f32 %v10434_v48, %v4500_v62  ;;  %v10858_v62 = vld [vmem:[%s10988_s2] ss:$0 sm:$0xff] }
 0x51b   : > { %v6004_v8 = vpack.c.bf16 %v4826_v2, %v4826_v2  ;;  %v4827_v19 = vmax.f32 %v4699_v35, 0.0  ;;  %v4760_v43 = vmax.f32 %v4632_v18, 0.0  ;;  %v4633_v60 = vadd.f32 %v10434_v48, %v4498_v47 }
 0x51c   : > { %v6002_v40 = vpack.c.bf16 %v4824_v14, %v4824_v14  ;;  %v4825_v46 = vmax.f32 %v4697_v11, 0.0  ;;  %v5940_v44 = vpack.c.bf16 %v4762_v41, %v4762_v41  ;;  %v4763_v58 = vmax.f32 %v4635_v6, 0.0  ;;  %v10866_v41 = vld [vmem:[%s10989_s3] ss:$0 sm:$0xff] }
 0x51d   : > { %5467 = vst.msk [vmem:[%s9916_s11 + $0x1c8] sm:$0xf] %vm5352_vm13, %v6004_v8  ;;  %v6005_v23 = vpack.c.bf16 %v4827_v19, %v4827_v19  ;;  %v5938_v25 = vpack.c.bf16 %v4760_v43, %v4760_v43  ;;  %v4761_v49 = vmax.f32 %v4633_v60, 0.0 }
 0x51e   : > { %5465 = vst.msk [vmem:[%s9916_s11 + $0x1c0] sm:$0xf] %vm5352_vm13, %v6002_v40  ;;  %v6003_v3 = vpack.c.bf16 %v4825_v46, %v4825_v46  ;;  %5403 = vst.msk [vmem:[%s9916_s11 + $0xc8] sm:$0xf] %vm5352_vm13, %v5940_v44  ;;  %v5941_v9 = vpack.c.bf16 %v4763_v58, %v4763_v58 }
 0x51f   : > { %5468 = vst.msk [vmem:[%s9916_s11 + $0x1cc] sm:$0xf] %vm5352_vm13, %v6005_v23  ;;  %5401 = vst.msk [vmem:[%s9916_s11 + $0xc0] sm:$0xf] %vm5352_vm13, %v5938_v25  ;;  %v5939_v42 = vpack.c.bf16 %v4761_v49, %v4761_v49 }
 0x520   : > { %5466 = vst.msk [vmem:[%s9916_s11 + $0x1c4] sm:$0xf] %vm5352_vm13, %v6003_v3  ;;  %5404 = vst.msk [vmem:[%s9916_s11 + $0xcc] sm:$0xf] %vm5352_vm13, %v5941_v9 }
 0x521   : > { %5402 = vst.msk [vmem:[%s9916_s11 + $0xc4] sm:$0xf] %vm5352_vm13, %v5939_v42 }
 0x530   : > { %v6207_v63 = vpop.f32.mrb[52].mxu1 }
 0x531   : > { %v4567_v29 = vmul.f32 %v10427_v17, %v6207_v63  ;;  %v4395_v34 = vpop.f32.mrb[53].mxu1  ;;  %v6143_v37 = vpop.f32.mrb[52].mxu0 }
 0x532   : > { %v4565_v4 = vmul.f32 %v10427_v17, %v4395_v34  ;;  %v6208_v28 = vpop.f32.mrb[54].mxu1  ;;  %v4503_v57 = vmul.f32 %v10427_v17, %v6143_v37  ;;  %v4139_v13 = vpop.f32.mrb[53].mxu0 }
 0x533   : > { %v4702_v45 = vadd.f32 %v10434_v48, %v4567_v29  ;;  %v4568_v33 = vmul.f32 %v10427_v17, %v6208_v28  ;;  %v4398_v27 = vpop.f32.mrb[55].mxu1  ;;  %v4501_v7 = vmul.f32 %v10427_v17, %v4139_v13  ;;  %v6144_v24 = vpop.f32.mrb[54].mxu0 }
 0x534   : > { %v4700_v26 = vadd.f32 %v10434_v48, %v4565_v4  ;;  %v4566_v31 = vmul.f32 %v10427_v17, %v4398_v27  ;;  %v4638_v5 = vadd.f32 %v10434_v48, %v4503_v57  ;;  %v4504_v0 = vmul.f32 %v10427_v17, %v6144_v24  ;;  %v4142_v32 = vpop.f32.mrb[55].mxu0 }
 0x535   : > { %v4830_v16 = vmax.f32 %v4702_v45, 0.0  ;;  %v4703_v1 = vadd.f32 %v10434_v48, %v4568_v33  ;;  %v4636_v61 = vadd.f32 %v10434_v48, %v4501_v7  ;;  %v4502_v50 = vmul.f32 %v10427_v17, %v4142_v32 }
 0x536   : > { %v4828_v30 = vmax.f32 %v4700_v26, 0.0  ;;  %v4701_v54 = vadd.f32 %v10434_v48, %v4566_v31  ;;  %v4766_v10 = vmax.f32 %v4638_v5, 0.0  ;;  %v4639_v56 = vadd.f32 %v10434_v48, %v4504_v0 }
 0x537   : > { %v6008_v52 = vpack.c.bf16 %v4830_v16, %v4830_v16  ;;  %v4831_v38 = vmax.f32 %v4703_v1, 0.0  ;;  %v4764_v22 = vmax.f32 %v4636_v61, 0.0  ;;  %v4637_v20 = vadd.f32 %v10434_v48, %v4502_v50 }
 0x538   : > { %v6006_v21 = vpack.c.bf16 %v4828_v30, %v4828_v30  ;;  %v4829_v53 = vmax.f32 %v4701_v54, 0.0  ;;  %v5944_v36 = vpack.c.bf16 %v4766_v10, %v4766_v10  ;;  %v4767_v17 = vmax.f32 %v4639_v56, 0.0 }
 0x539   : > { %5471 = vst.msk [vmem:[%s9916_s11 + $0x1d8] sm:$0xf] %vm5352_vm13, %v6008_v52  ;;  %v6009_v39 = vpack.c.bf16 %v4831_v38, %v4831_v38  ;;  %v5942_v51 = vpack.c.bf16 %v4764_v22, %v4764_v22  ;;  %v4765_v59 = vmax.f32 %v4637_v20, 0.0 }
 0x53a   : > { %5469 = vst.msk [vmem:[%s9916_s11 + $0x1d0] sm:$0xf] %vm5352_vm13, %v6006_v21  ;;  %v6007_v12 = vpack.c.bf16 %v4829_v53, %v4829_v53  ;;  %5407 = vst.msk [vmem:[%s9916_s11 + $0xd8] sm:$0xf] %vm5352_vm13, %v5944_v36  ;;  %v5945_v15 = vpack.c.bf16 %v4767_v17, %v4767_v17 }
 0x53b   : > { %5472 = vst.msk [vmem:[%s9916_s11 + $0x1dc] sm:$0xf] %vm5352_vm13, %v6009_v39  ;;  %5405 = vst.msk [vmem:[%s9916_s11 + $0xd0] sm:$0xf] %vm5352_vm13, %v5942_v51  ;;  %v5943_v48 = vpack.c.bf16 %v4765_v59, %v4765_v59 }
 0x53c   : > { %5470 = vst.msk [vmem:[%s9916_s11 + $0x1d4] sm:$0xf] %vm5352_vm13, %v6007_v12  ;;  %5408 = vst.msk [vmem:[%s9916_s11 + $0xdc] sm:$0xf] %vm5352_vm13, %v5945_v15 }
 0x53d   : > { %5406 = vst.msk [vmem:[%s9916_s11 + $0xd4] sm:$0xf] %vm5352_vm13, %v5943_v48 }
 0x54c   : > { %v6211_v2 = vpop.f32.mrb[56].mxu1 }
 0x54d   : > { %v4571_v35 = vmul.f32 %v10858_v62, %v6211_v2  ;;  %v4411_v55 = vpop.f32.mrb[57].mxu1  ;;  %v6147_v18 = vpop.f32.mrb[56].mxu0 }
 0x54e   : > { %v4569_v14 = vmul.f32 %v10858_v62, %v4411_v55  ;;  %v6212_v47 = vpop.f32.mrb[58].mxu1  ;;  %v4507_v11 = vmul.f32 %v10858_v62, %v6147_v18  ;;  %v4155_v6 = vpop.f32.mrb[57].mxu0 }
 0x54f   : > { %v4706_v8 = vadd.f32 %v10866_v41, %v4571_v35  ;;  %v4572_v19 = vmul.f32 %v10858_v62, %v6212_v47  ;;  %v4414_v43 = vpop.f32.mrb[59].mxu1  ;;  %v4505_v40 = vmul.f32 %v10858_v62, %v4155_v6  ;;  %v6148_v46 = vpop.f32.mrb[58].mxu0 }
 0x550   : > { %v4704_v60 = vadd.f32 %v10866_v41, %v4569_v14  ;;  %v4570_v44 = vmul.f32 %v10858_v62, %v4414_v43  ;;  %v4642_v58 = vadd.f32 %v10866_v41, %v4507_v11  ;;  %v4508_v25 = vmul.f32 %v10858_v62, %v6148_v46  ;;  %v4158_v3 = vpop.f32.mrb[59].mxu0 }
 0x551   : > { %v4834_v23 = vmax.f32 %v4706_v8, 0.0  ;;  %v4707_v49 = vadd.f32 %v10866_v41, %v4572_v19  ;;  %v4640_v9 = vadd.f32 %v10866_v41, %v4505_v40  ;;  %v4506_v63 = vmul.f32 %v10858_v62, %v4158_v3 }
 0x552   : > { %v4832_v42 = vmax.f32 %v4704_v60, 0.0  ;;  %v4705_v29 = vadd.f32 %v10866_v41, %v4570_v44  ;;  %v4770_v34 = vmax.f32 %v4642_v58, 0.0  ;;  %v4643_v4 = vadd.f32 %v10866_v41, %v4508_v25 }
 0x553   : > { %v6012_v37 = vpack.c.bf16 %v4834_v23, %v4834_v23  ;;  %v4835_v28 = vmax.f32 %v4707_v49, 0.0  ;;  %v4768_v57 = vmax.f32 %v4640_v9, 0.0  ;;  %v4641_v13 = vadd.f32 %v10866_v41, %v4506_v63 }
 0x554   : > { %v6010_v45 = vpack.c.bf16 %v4832_v42, %v4832_v42  ;;  %v4833_v33 = vmax.f32 %v4705_v29, 0.0  ;;  %v5948_v27 = vpack.c.bf16 %v4770_v34, %v4770_v34  ;;  %v4771_v7 = vmax.f32 %v4643_v4, 0.0 }
 0x555   : > { %5475 = vst.msk [vmem:[%s9916_s11 + $0x1e8] sm:$0xf] %vm5352_vm13, %v6012_v37  ;;  %v6013_v26 = vpack.c.bf16 %v4835_v28, %v4835_v28  ;;  %v5946_v24 = vpack.c.bf16 %v4768_v57, %v4768_v57  ;;  %v4769_v31 = vmax.f32 %v4641_v13, 0.0 }
 0x556   : > { %5473 = vst.msk [vmem:[%s9916_s11 + $0x1e0] sm:$0xf] %vm5352_vm13, %v6010_v45  ;;  %v6011_v5 = vpack.c.bf16 %v4833_v33, %v4833_v33  ;;  %5411 = vst.msk [vmem:[%s9916_s11 + $0xe8] sm:$0xf] %vm5352_vm13, %v5948_v27  ;;  %v5949_v16 = vpack.c.bf16 %v4771_v7, %v4771_v7 }
 0x557   : > { %5476 = vst.msk [vmem:[%s9916_s11 + $0x1ec] sm:$0xf] %vm5352_vm13, %v6013_v26  ;;  %5409 = vst.msk [vmem:[%s9916_s11 + $0xe0] sm:$0xf] %vm5352_vm13, %v5946_v24  ;;  %v5947_v0 = vpack.c.bf16 %v4769_v31, %v4769_v31 }
 0x558   : > { %5474 = vst.msk [vmem:[%s9916_s11 + $0x1e4] sm:$0xf] %vm5352_vm13, %v6011_v5  ;;  %5412 = vst.msk [vmem:[%s9916_s11 + $0xec] sm:$0xf] %vm5352_vm13, %v5949_v16 }
 0x559   : > { %5410 = vst.msk [vmem:[%s9916_s11 + $0xe4] sm:$0xf] %vm5352_vm13, %v5947_v0 }
 0x568   : > { %v6215_v1 = vpop.f32.mrb[60].mxu1 }
 0x569   : > { %v4575_v32 = vmul.f32 %v10858_v62, %v6215_v1  ;;  %v4427_v61 = vpop.f32.mrb[61].mxu1 }
 0x56a   : > { %v6151_v30 = vpop.f32.mrb[60].mxu0  ;;  %v4573_v50 = vmul.f32 %v10858_v62, %v4427_v61  ;;  %v6216_v54 = vpop.f32.mrb[62].mxu1 }
 0x56b   : > { %v4511_v10 = vmul.f32 %v10858_v62, %v6151_v30  ;;  %v4710_v52 = vadd.f32 %v10866_v41, %v4575_v32  ;;  %v4171_v56 = vpop.f32.mrb[61].mxu0  ;;  %v4576_v38 = vmul.f32 %v10858_v62, %v6216_v54  ;;  %v4430_v22 = vpop.f32.mrb[63].mxu1 }
 0x56c   : > { %v4509_v21 = vmul.f32 %v10858_v62, %v4171_v56  ;;  %v4708_v20 = vadd.f32 %v10866_v41, %v4573_v50  ;;  %v6152_v53 = vpop.f32.mrb[62].mxu0  ;;  %v4574_v36 = vmul.f32 %v10858_v62, %v4430_v22 }
 0x56d   : > { %v4646_v17 = vadd.f32 %v10866_v41, %v4511_v10  ;;  %v4838_v39 = vmax.f32 %v4710_v52, 0.0  ;;  %v4512_v51 = vmul.f32 %v10858_v62, %v6152_v53  ;;  %v4711_v59 = vadd.f32 %v10866_v41, %v4576_v38  ;;  %v4174_v12 = vpop.f32.mrb[63].mxu0 }
 0x56e   : > { %v4644_v15 = vadd.f32 %v10866_v41, %v4509_v21  ;;  %v4836_v48 = vmax.f32 %v4708_v20, 0.0  ;;  %v4510_v2 = vmul.f32 %v10858_v62, %v4174_v12  ;;  %v4709_v35 = vadd.f32 %v10866_v41, %v4574_v36 }
 0x56f   : > { %v4774_v55 = vmax.f32 %v4646_v17, 0.0  ;;  %v6016_v18 = vpack.c.bf16 %v4838_v39, %v4838_v39  ;;  %v4647_v14 = vadd.f32 %v10866_v41, %v4512_v51  ;;  %v4839_v47 = vmax.f32 %v4711_v59, 0.0 }
 0x570   : > { %v4772_v11 = vmax.f32 %v4644_v15, 0.0  ;;  %v6014_v8 = vpack.c.bf16 %v4836_v48, %v4836_v48  ;;  %v4645_v6 = vadd.f32 %v10866_v41, %v4510_v2  ;;  %v4837_v19 = vmax.f32 %v4709_v35, 0.0 }
 0x571   : > { %v5952_v62 = vpack.c.bf16 %v4774_v55, %v4774_v55  ;;  %5479 = vst.msk [vmem:[%s9916_s11 + $0x1f8] sm:$0xf] %vm5352_vm13, %v6016_v18  ;;  %v4775_v43 = vmax.f32 %v4647_v14, 0.0  ;;  %v6017_v40 = vpack.c.bf16 %v4839_v47, %v4839_v47 }
 0x572   : > { %v5950_v60 = vpack.c.bf16 %v4772_v11, %v4772_v11  ;;  %5477 = vst.msk [vmem:[%s9916_s11 + $0x1f0] sm:$0xf] %vm5352_vm13, %v6014_v8  ;;  %v4773_v46 = vmax.f32 %v4645_v6, 0.0  ;;  %v6015_v44 = vpack.c.bf16 %v4837_v19, %v4837_v19 }
 0x573   : > { %5415 = vst.msk [vmem:[%s9916_s11 + $0xf8] sm:$0xf] %vm5352_vm13, %v5952_v62  ;;  %v5953_v41 = vpack.c.bf16 %v4775_v43, %v4775_v43  ;;  %5480 = vst.msk [vmem:[%s9916_s11 + $0x1fc] sm:$0xf] %vm5352_vm13, %v6017_v40 }
 0x574   : > { %5413 = vst.msk [vmem:[%s9916_s11 + $0xf0] sm:$0xf] %vm5352_vm13, %v5950_v60  ;;  %v5951_v58 = vpack.c.bf16 %v4773_v46, %v4773_v46  ;;  %5478 = vst.msk [vmem:[%s9916_s11 + $0x1f4] sm:$0xf] %vm5352_vm13, %v6015_v44 }
 0x575   : > { %5416 = vst.msk [vmem:[%s9916_s11 + $0xfc] sm:$0xf] %vm5352_vm13, %v5953_v41 }
 0x576   : > { %5414 = vst.msk [vmem:[%s9916_s11 + $0xf4] sm:$0xf] %vm5352_vm13, %v5951_v58 }
 0x577   : > { %6575 = shalt.err (!%p6572_p5)
}
 0x578   : > { %s6576_s6 = scalar_lea.hbm %s10926_s8, 8192  ;;  %s6580_s7 = scalar_lea.hbm %s10990_s4, 16384 }
 0x579   : > { %p6577_p6 = scmp.ne.s32.totalorder %s10926_s8, %s6576_s6  ;;  %p6581_p10 = scmp.lt.u32.totalorder %s10926_s8, %s10990_s4 }
 0x57a   : > { %p6582_p11 = scmp.lt.u32.totalorder %s6580_s7, %s6576_s6  ;;  %p6584_p13 = scmp.lt.u32.totalorder %s6576_s6, %s10926_s8 }
 0x57b   : > { %p6578_p7 = pnand %p6577_p6, %p6719_p4 }
 0x57c   : > { %p6583_p12 = por %p6582_p11, %p6581_p10 }
 0x57d   : > { %p6579_p9 = pneg %p6578_p7 }
 0x57e   : > { %p6585_p0 = por %p6584_p13, %p6583_p12 }
 0x580   : > { %p6586_p1 = pnand %p6585_p0, %p6579_p9 }
 0x582   : > { %6589 = shalt.err (!%p6586_p1)
}
 0x583   : > { %s6652_s26 = smov 64   ;;  %s6653_s29 = smov 4  }
 0x584   : > { %6222 = dma.vmem_to_hbm [thread:$0]  (%p6719_p4), %s10928_s30, 8192, %s10926_s8, %s10940_s9, %s6652_s26, %s6652_s26, %s6653_s29  }
 0x585 PF: > { %p6228_p2 = scmp.ge.s32.totalorder %s6640_s20, 2  ;;  %s5513_s18 = sand.u32 1, %s6620_s15  }
 0x586   : > { %s5514_s5 = scalar_lea.sflag [#allocation3], %s5513_s18 }
 0x587   : > { %p6225_p3 = pnand %p6228_p2, %p6726_p8 }
 0x589   : > { %6615 = dma.done.wait (!%p6225_p3), %s5514_s5, 8192  }
 0x58a   : > { %6617 = vsyncadd (!%p6225_p3), %s5514_s5, 4294959104  ;;  %s17_s20 = sadd.s32 1, %s6640_s20   ;;  %s12146_s15 = smov %s6624_s16 }
 0x58b   : > { %p14_p5 = scmp.ge.s32.totalorder %s17_s20, 4   ;;  %s12147_s16 = smov %s6628_s17 }
 0x58c   : > { %s12148_s17 = smov %s6732_s28  ;;  %s12149_s18 = smov %s6636_s19 }
 0x58d   : > { %s12150_s19 = smov %s12152_s23  ;;  %16 = sbr.rel (!%p14_p5) target bundleno = 4 (0x4), region = 71 }
 0x594   :  { %5519 = vsyncpa [#allocation3], 1 }
 0x595   :  { %5521 = vsyncpa [#allocation3 + $0x1], 1 }

</bundles_post_ra>
